<compile_context>
chip_gen: v7x
topology: tpu7x:2x2x1
jax: 0.10.0
libtpu: 0.0.40
codegen_flags: <defaults>
</compile_context>

<pallas_src>
import math
import functools

import jax
import jax.numpy as jnp
from jax.experimental import pallas as pl
from jax.experimental.pallas import tpu as pltpu

# ----- model hyper-parameters (hard-coded in the PyTorch source) -----
d_k = d_v = 64
d_model = 512
n_heads = 8
d_ff = 2048
n_layers = 6
LN_EPS = 1e-5  # nn.LayerNorm default

# vocab size is dataset dependent in the original; pick a small synthetic one
SRC_VOCAB_SIZE = 16


# =====================================================================
# Pallas kernel: full encoder stack (grid over layers)
# =====================================================================
def _layernorm(y):
    # fresh nn.LayerNorm(d_model) is created in forward() -> weight=1, bias=0
    mu = jnp.mean(y, axis=-1, keepdims=True)
    var = jnp.mean((y - mu) ** 2, axis=-1, keepdims=True)
    return (y - mu) * jax.lax.rsqrt(var + jnp.float32(LN_EPS))


def _encoder_stack_kernel(x_in_ref, mask_ref, wqkv_ref, wo_ref, w1_ref, w2_ref,
                          x_ref, attn_ref):
    l = pl.program_id(0)
    B, S, _ = mask_ref.shape
    M = B * S
    hk = n_heads * d_k

    # layer-0: seed the carried activation (x_ref is resident across the layer axis)
    @pl.when(l == 0)
    def _():
        x_ref[...] = x_in_ref[...]

    x = x_ref[...]                      # [M, d_model] f32 (carried across layers)
    mask = mask_ref[...]                # [B, S, S] f32 (0 => masked)

    # ---- fused Q/K/V projection: one MXU pass, N = 3*H*d_k = 1536 ----
    qkv = jnp.dot(x.astype(jnp.bfloat16), wqkv_ref[...],
                  preferred_element_type=jnp.float32)        # [M, 3*H*d_k] f32

    scale = jnp.float32(1.0 / math.sqrt(d_k))
    neg_big = jnp.float32(-1.0e9)

    ctx_heads = []
    attn_heads = []
    for h in range(n_heads):
        qh = qkv[:, h * d_k:(h + 1) * d_k].reshape(B, S, d_k).astype(jnp.bfloat16)
        kh = qkv[:, hk + h * d_k: hk + (h + 1) * d_k].reshape(B, S, d_k).astype(jnp.bfloat16)
        vh = qkv[:, 2 * hk + h * d_v: 2 * hk + (h + 1) * d_v].reshape(B, S, d_v).astype(jnp.bfloat16)

        # scores = Q @ K^T / sqrt(d_k), masked_fill(mask==0, -1e9), softmax(dim=-1)
        s = jnp.einsum('bqd,bkd->bqk', qh, kh,
                       preferred_element_type=jnp.float32) * scale      # [B,S,S] f32
        s = jnp.where(mask == 0.0, neg_big, s)
        s = s - jnp.max(s, axis=-1, keepdims=True)
        e = jnp.exp(s)
        p = e / jnp.sum(e, axis=-1, keepdims=True)                      # f32 softmax
        attn_heads.append(p)

        ctx_h = jnp.einsum('bqk,bkd->bqd', p.astype(jnp.bfloat16), vh,
                           preferred_element_type=jnp.float32)          # [B,S,d_v]
        ctx_heads.append(ctx_h.reshape(M, d_v))

    # attention probabilities output for this layer, head-major: [H*B, S, S]
    attn_ref[...] = jnp.concatenate(attn_heads, axis=0)

    ctx = jnp.concatenate(ctx_heads, axis=1)                            # [M, H*d_v]

    # ---- attention output projection + residual + LayerNorm ----
    y = jnp.dot(ctx.astype(jnp.bfloat16), wo_ref[...],
                preferred_element_type=jnp.float32) + x
    y = _layernorm(y)

    # ---- position-wise FFN: Linear -> ReLU -> Linear, + residual + LayerNorm ----
    h1 = jnp.maximum(jnp.dot(y.astype(jnp.bfloat16), w1_ref[...],
                             preferred_element_type=jnp.float32), 0.0)
    z = jnp.dot(h1.astype(jnp.bfloat16), w2_ref[...],
                preferred_element_type=jnp.float32) + y
    x_ref[...] = _layernorm(z)


def encoder_stack(x2d, mask, w_qkv, w_o, w_ff1, w_ff2):
    """Runs all n_layers encoder layers in one pallas_call.

    x2d:   [B*S, d_model] f32
    mask:  [B, S, S] f32
    w_qkv: [n_layers, d_model, 3*H*d_k] bf16
    w_o:   [n_layers, H*d_v, d_model]   bf16
    w_ff1: [n_layers, d_model, d_ff]    bf16
    w_ff2: [n_layers, d_ff, d_model]    bf16
    """
    M, _ = x2d.shape
    B, S, _ = mask.shape
    hk = n_heads * d_k

    x_out, attn_out = pl.pallas_call(
        _encoder_stack_kernel,
        grid=(n_layers,),
        in_specs=[
            pl.BlockSpec((M, d_model), lambda l: (0, 0)),                 # activations (seed)
            pl.BlockSpec((B, S, S), lambda l: (0, 0, 0)),                 # shared mask (1 DMA)
            pl.BlockSpec((None, d_model, 3 * hk), lambda l: (l, 0, 0)),   # fused QKV weight
            pl.BlockSpec((None, n_heads * d_v, d_model), lambda l: (l, 0, 0)),
            pl.BlockSpec((None, d_model, d_ff), lambda l: (l, 0, 0)),
            pl.BlockSpec((None, d_ff, d_model), lambda l: (l, 0, 0)),
        ],
        out_specs=(
            pl.BlockSpec((M, d_model), lambda l: (0, 0)),                 # carried activation
            pl.BlockSpec((None, n_heads * B, S, S), lambda l: (l, 0, 0, 0)),
        ),
        out_shape=(
            jax.ShapeDtypeStruct((M, d_model), jnp.float32),
            jax.ShapeDtypeStruct((n_layers, n_heads * B, S, S), jnp.float32),
        ),
        compiler_params=pltpu.CompilerParams(
            dimension_semantics=("arbitrary",),      # layer axis is sequential (carry)
            vmem_limit_bytes=32 << 20,               # ~12 MiB double-buffered bf16 weights + slack
        ),
    )(x2d, mask, w_qkv, w_o, w_ff1, w_ff2)
    return x_out, attn_out


# =====================================================================
# Mask & positional encoding (glue, plain JAX)
# =====================================================================
def creat_self_mask(from_tensor, to_tensor):
    # mask[b, i_to, j_from] = (from_tensor[b, j_from] != 0)
    to_mask = (from_tensor != 0).astype(jnp.float32)[:, None, :]             # [b, 1, l_from]
    broadcast_ones = jnp.ones_like(to_tensor, dtype=jnp.float32)[:, :, None]  # [b, l_to, 1]
    return broadcast_ones * to_mask                                          # [b, l_to, l_from]


def make_positional_encoding(max_len, dm):
    position = jnp.arange(max_len, dtype=jnp.float32)[:, None]
    div_term = jnp.exp(
        jnp.arange(0, dm, 2, dtype=jnp.float32) * (-math.log(10000.0) / dm)
    )
    pe = jnp.zeros((max_len, dm), jnp.float32)
    pe = pe.at[:, 0::2].set(jnp.sin(position * div_term))
    pe = pe.at[:, 1::2].set(jnp.cos(position * div_term))
    return pe  # [max_len, d_model]


# =====================================================================
# Encoder forward (orchestrates the fused Pallas kernel)
# =====================================================================
def encoder_forward(params, enc_inputs, pe):
    B, S = enc_inputs.shape
    x = params["src_emb"][enc_inputs]                 # [B, S, d_model]
    x = x + pe[:S][None, :, :]
    # TODO(synk): nn.Dropout(p=0.1) in PositionalEncoding treated as identity (eval mode)
    self_mask = creat_self_mask(enc_inputs, enc_inputs)          # [B, S, S] f32

    x2d = x.reshape(B * S, d_model).astype(jnp.float32)
    x_out, attn_out = encoder_stack(
        x2d, self_mask,
        params["w_qkv"], params["w_o"], params["w_ff1"], params["w_ff2"],
    )

    enc_outputs = x_out.reshape(B, S, d_model)
    # attn_out: [n_layers, H*B, S, S] head-major -> per-layer [B, H, S, S]
    attn_stack = attn_out.reshape(n_layers, n_heads, B, S, S).transpose(0, 2, 1, 3, 4)
    enc_self_attns = [attn_stack[l] for l in range(n_layers)]
    return enc_outputs, enc_self_attns


# =====================================================================
# Deterministic parameter init (fresh-init model; all Linears are bias=False
# in the PyTorch source, LayerNorm is freshly created -> gamma=1, beta=0)
# =====================================================================
def _init(key, shape, scale=0.02, dtype=jnp.bfloat16):
    return (scale * jax.random.normal(key, shape, jnp.float32)).astype(dtype)


def init_params(key):
    k_emb, k_qkv, k_o, k_f1, k_f2 = jax.random.split(key, 5)
    return {
        "src_emb": _init(k_emb, (SRC_VOCAB_SIZE, d_model), scale=1.0, dtype=jnp.float32),
        # fused W_Q|W_K|W_V per layer, stacked over layers
        "w_qkv": _init(k_qkv, (n_layers, d_model, 3 * n_heads * d_k)),
        "w_o": _init(k_o, (n_layers, n_heads * d_v, d_model)),
        "w_ff1": _init(k_f1, (n_layers, d_model, d_ff)),
        "w_ff2": _init(k_f2, (n_layers, d_ff, d_model)),
    }


# =====================================================================
if __name__ == "__main__":
    key = jax.random.PRNGKey(0)
    kp, ke = jax.random.split(key)

    batch = 2
    src_len = 8

    params = init_params(kp)
    pe = make_positional_encoding(64, d_model)

    # synthetic token ids; zero-pad the tail positions so the padding mask is non-trivial
    enc_inputs = jax.random.randint(ke, (batch, src_len), 1, SRC_VOCAB_SIZE, jnp.int32)
    enc_inputs = enc_inputs.at[:, -2:].set(0)

    fwd = jax.jit(functools.partial(encoder_forward, pe=pe))
    enc_outputs, enc_self_attns = fwd(params, enc_inputs)
    jax.block_until_ready(enc_outputs)
    jax.block_until_ready(enc_self_attns[-1])

    assert enc_outputs.shape == (batch, src_len, d_model)
    assert len(enc_self_attns) == n_layers
    assert enc_self_attns[0].shape == (batch, n_heads, src_len, src_len)
    assert bool(jnp.all(jnp.isfinite(enc_outputs)))
    # softmax rows must sum to 1
    assert bool(jnp.allclose(jnp.sum(enc_self_attns[0], axis=-1), 1.0, atol=1e-3))
    # padded key positions (last 2 tokens) must get ~zero attention
    assert bool(jnp.all(enc_self_attns[-1][:, :, :, -2:] < 1e-6))
    print("KERNEL_OK")
</pallas_src>

<mosaic_0001>
module attributes {stable_mosaic.version = 11 : i64} {
  func.func @_encoder_stack_kernel(%arg0: i32, %arg1: memref<16x512xf32, #tpu.memory_space<vmem>>, %arg2: memref<2x8x8xf32, #tpu.memory_space<vmem>>, %arg3: memref<1x512x1536xbf16, #tpu.memory_space<vmem>>, %arg4: memref<1x512x512xbf16, #tpu.memory_space<vmem>>, %arg5: memref<1x512x2048xbf16, #tpu.memory_space<vmem>>, %arg6: memref<1x2048x512xbf16, #tpu.memory_space<vmem>>, %arg7: memref<16x512xf32, #tpu.memory_space<vmem>>, %arg8: memref<1x16x8x8xf32, #tpu.memory_space<vmem>>) attributes {dimension_semantics = [#tpu.dimension_semantics<arbitrary>], iteration_bounds = array<i64: 6>, scalar_prefetch = 0 : i64, scratch_operands = 0 : i64, tpu.core_type = #tpu.core_type<tc>, window_params = [{pipeline_mode = #tpu.pipeline_mode<synchronous>, transform_indices = @transform_0, window_bounds = array<i64: 16, 512>}, {pipeline_mode = #tpu.pipeline_mode<synchronous>, transform_indices = @transform_1, window_bounds = array<i64: 2, 8, 8>}, {transform_indices = @transform_2, window_bounds = array<i64: 1, 512, 1536>}, {transform_indices = @transform_3, window_bounds = array<i64: 1, 512, 512>}, {transform_indices = @transform_4, window_bounds = array<i64: 1, 512, 2048>}, {transform_indices = @transform_5, window_bounds = array<i64: 1, 2048, 512>}, {pipeline_mode = #tpu.pipeline_mode<synchronous>, transform_indices = @transform_6, window_bounds = array<i64: 16, 512>}, {transform_indices = @transform_7, window_bounds = array<i64: 1, 16, 8, 8>}]} {
    %c0_i32 = arith.constant 0 : i32
    %0 = arith.cmpi eq, %arg0, %c0_i32 : i32
    %1 = arith.extui %0 : i1 to i32
    %c0_i32_0 = arith.constant 0 : i32
    %2 = arith.cmpi ne, %1, %c0_i32_0 : i32
    scf.if %2 {
      %c0_93 = arith.constant 0 : index
      %c0_94 = arith.constant 0 : index
      %291 = vector.load %arg1[%c0_93, %c0_94] : memref<16x512xf32, #tpu.memory_space<vmem>>, vector<16x512xf32>
      %c0_95 = arith.constant 0 : index
      %c0_96 = arith.constant 0 : index
      %292 = vector.load %arg7[%c0_95, %c0_96] : memref<16x512xf32, #tpu.memory_space<vmem>>, vector<16x512xf32>
      tpu.vector_store %arg7[%c0_95, %c0_96], %291 {strides = array<i32>} : memref<16x512xf32, #tpu.memory_space<vmem>>, vector<16x512xf32>,
    } else {
    }
    %c0 = arith.constant 0 : index
    %c0_1 = arith.constant 0 : index
    %3 = vector.load %arg7[%c0, %c0_1] : memref<16x512xf32, #tpu.memory_space<vmem>>, vector<16x512xf32>
    %c0_2 = arith.constant 0 : index
    %c0_3 = arith.constant 0 : index
    %c0_4 = arith.constant 0 : index
    %4 = vector.load %arg2[%c0_2, %c0_3, %c0_4] : memref<2x8x8xf32, #tpu.memory_space<vmem>>, vector<2x8x8xf32>
    %5 = arith.truncf %3 : vector<16x512xf32> to vector<16x512xbf16>
    %c0_5 = arith.constant 0 : index
    %c0_6 = arith.constant 0 : index
    %c0_7 = arith.constant 0 : index
    %6 = vector.load %arg3[%c0_5, %c0_6, %c0_7] : memref<1x512x1536xbf16, #tpu.memory_space<vmem>>, vector<1x512x1536xbf16>
    %7 = vector.shape_cast %6 : vector<1x512x1536xbf16> to vector<512x1536xbf16>
    %cst = arith.constant dense<0.000000e+00> : vector<16x1536xf32>
    %8 = tpu.matmul %5, %7, %cst {dimension_numbers = #tpu.dot_dimension_numbers<[1], [0], [0], [1], [0, 0, 1, 1], [], []>} : vector<16x512xbf16>, vector<512x1536xbf16>, vector<16x1536xf32> -> vector<16x1536xf32>
    %9 = vector.extract_strided_slice %8 {offsets = [0, 0], sizes = [16, 64], strides = [1, 1]} : vector<16x1536xf32> to vector<16x64xf32>
    %10 = vector.shape_cast %9 : vector<16x64xf32> to vector<2x8x64xf32>
    %11 = arith.truncf %10 : vector<2x8x64xf32> to vector<2x8x64xbf16>
    %12 = vector.extract_strided_slice %8 {offsets = [0, 512], sizes = [16, 64], strides = [1, 1]} : vector<16x1536xf32> to vector<16x64xf32>
    %13 = vector.shape_cast %12 : vector<16x64xf32> to vector<2x8x64xf32>
    %14 = arith.truncf %13 : vector<2x8x64xf32> to vector<2x8x64xbf16>
    %15 = vector.extract_strided_slice %8 {offsets = [0, 1024], sizes = [16, 64], strides = [1, 1]} : vector<16x1536xf32> to vector<16x64xf32>
    %16 = vector.shape_cast %15 : vector<16x64xf32> to vector<2x8x64xf32>
    %17 = arith.truncf %16 : vector<2x8x64xf32> to vector<2x8x64xbf16>
    "tpu.trace_start"() <{level = 10 : i32, message = "bqd,bkd->bqk"}> : () -> ()
    %cst_8 = arith.constant dense<0.000000e+00> : vector<2x8x8xf32>
    %18 = tpu.matmul %11, %14, %cst_8 {dimension_numbers = #tpu.dot_dimension_numbers<[2], [2], [1], [1], [0, 0, 0, 1, 1, 1], [0], [0]>} : vector<2x8x64xbf16>, vector<2x8x64xbf16>, vector<2x8x8xf32> -> vector<2x8x8xf32>
    "tpu.trace_stop"() : () -> ()
    %cst_9 = arith.constant 1.250000e-01 : f32
    %19 = vector.broadcast %cst_9 : f32 to vector<2x8x8xf32>
    %20 = arith.mulf %18, %19 : vector<2x8x8xf32>
    %cst_10 = arith.constant 0.000000e+00 : f32
    %21 = vector.broadcast %cst_10 : f32 to vector<2x8x8xf32>
    %22 = arith.cmpf oeq, %4, %21 : vector<2x8x8xf32>
    %cst_11 = arith.constant -1.000000e+09 : f32
    %23 = vector.broadcast %cst_11 : f32 to vector<2x8x8xf32>
    %24 = arith.select %22, %23, %20 : vector<2x8x8xi1>, vector<2x8x8xf32>
    %cst_12 = arith.constant dense<0xFF800000> : vector<2x8xf32>
    %25 = vector.multi_reduction <maximumf>, %24, %cst_12 [2] : vector<2x8x8xf32> to vector<2x8xf32>
    %26 = vector.shape_cast %25 : vector<2x8xf32> to vector<2x8x1xf32>
    %27 = vector.broadcast %26 : vector<2x8x1xf32> to vector<2x8x8xf32>
    %28 = arith.subf %24, %27 : vector<2x8x8xf32>
    %29 = math.exp %28 : vector<2x8x8xf32>
    %cst_13 = arith.constant dense<0.000000e+00> : vector<2x8xf32>
    %30 = vector.multi_reduction <add>, %29, %cst_13 [2] : vector<2x8x8xf32> to vector<2x8xf32>
    %31 = vector.shape_cast %30 : vector<2x8xf32> to vector<2x8x1xf32>
    %32 = vector.broadcast %31 : vector<2x8x1xf32> to vector<2x8x8xf32>
    %33 = arith.divf %29, %32 : vector<2x8x8xf32>
    %34 = arith.truncf %33 : vector<2x8x8xf32> to vector<2x8x8xbf16>
    "tpu.trace_start"() <{level = 10 : i32, message = "bqk,bkd->bqd"}> : () -> ()
    %cst_14 = arith.constant dense<0.000000e+00> : vector<2x8x64xf32>
    %35 = tpu.matmul %34, %17, %cst_14 {dimension_numbers = #tpu.dot_dimension_numbers<[2], [1], [1], [2], [0, 0, 0, 1, 1, 2], [0], [0]>} : vector<2x8x8xbf16>, vector<2x8x64xbf16>, vector<2x8x64xf32> -> vector<2x8x64xf32>
    "tpu.trace_stop"() : () -> ()
    %36 = vector.shape_cast %35 : vector<2x8x64xf32> to vector<16x64xf32>
    %37 = vector.extract_strided_slice %8 {offsets = [0, 64], sizes = [16, 64], strides = [1, 1]} : vector<16x1536xf32> to vector<16x64xf32>
    %38 = vector.shape_cast %37 : vector<16x64xf32> to vector<2x8x64xf32>
    %39 = arith.truncf %38 : vector<2x8x64xf32> to vector<2x8x64xbf16>
    %40 = vector.extract_strided_slice %8 {offsets = [0, 576], sizes = [16, 64], strides = [1, 1]} : vector<16x1536xf32> to vector<16x64xf32>
    %41 = vector.shape_cast %40 : vector<16x64xf32> to vector<2x8x64xf32>
    %42 = arith.truncf %41 : vector<2x8x64xf32> to vector<2x8x64xbf16>
    %43 = vector.extract_strided_slice %8 {offsets = [0, 1088], sizes = [16, 64], strides = [1, 1]} : vector<16x1536xf32> to vector<16x64xf32>
    %44 = vector.shape_cast %43 : vector<16x64xf32> to vector<2x8x64xf32>
    %45 = arith.truncf %44 : vector<2x8x64xf32> to vector<2x8x64xbf16>
    "tpu.trace_start"() <{level = 10 : i32, message = "bqd,bkd->bqk"}> : () -> ()
    %cst_15 = arith.constant dense<0.000000e+00> : vector<2x8x8xf32>
    %46 = tpu.matmul %39, %42, %cst_15 {dimension_numbers = #tpu.dot_dimension_numbers<[2], [2], [1], [1], [0, 0, 0, 1, 1, 1], [0], [0]>} : vector<2x8x64xbf16>, vector<2x8x64xbf16>, vector<2x8x8xf32> -> vector<2x8x8xf32>
    "tpu.trace_stop"() : () -> ()
    %cst_16 = arith.constant 1.250000e-01 : f32
    %47 = vector.broadcast %cst_16 : f32 to vector<2x8x8xf32>
    %48 = arith.mulf %46, %47 : vector<2x8x8xf32>
    %cst_17 = arith.constant 0.000000e+00 : f32
    %49 = vector.broadcast %cst_17 : f32 to vector<2x8x8xf32>
    %50 = arith.cmpf oeq, %4, %49 : vector<2x8x8xf32>
    %cst_18 = arith.constant -1.000000e+09 : f32
    %51 = vector.broadcast %cst_18 : f32 to vector<2x8x8xf32>
    %52 = arith.select %50, %51, %48 : vector<2x8x8xi1>, vector<2x8x8xf32>
    %cst_19 = arith.constant dense<0xFF800000> : vector<2x8xf32>
    %53 = vector.multi_reduction <maximumf>, %52, %cst_19 [2] : vector<2x8x8xf32> to vector<2x8xf32>
    %54 = vector.shape_cast %53 : vector<2x8xf32> to vector<2x8x1xf32>
    %55 = vector.broadcast %54 : vector<2x8x1xf32> to vector<2x8x8xf32>
    %56 = arith.subf %52, %55 : vector<2x8x8xf32>
    %57 = math.exp %56 : vector<2x8x8xf32>
    %cst_20 = arith.constant dense<0.000000e+00> : vector<2x8xf32>
    %58 = vector.multi_reduction <add>, %57, %cst_20 [2] : vector<2x8x8xf32> to vector<2x8xf32>
    %59 = vector.shape_cast %58 : vector<2x8xf32> to vector<2x8x1xf32>
    %60 = vector.broadcast %59 : vector<2x8x1xf32> to vector<2x8x8xf32>
    %61 = arith.divf %57, %60 : vector<2x8x8xf32>
    %62 = arith.truncf %61 : vector<2x8x8xf32> to vector<2x8x8xbf16>
    "tpu.trace_start"() <{level = 10 : i32, message = "bqk,bkd->bqd"}> : () -> ()
    %cst_21 = arith.constant dense<0.000000e+00> : vector<2x8x64xf32>
    %63 = tpu.matmul %62, %45, %cst_21 {dimension_numbers = #tpu.dot_dimension_numbers<[2], [1], [1], [2], [0, 0, 0, 1, 1, 2], [0], [0]>} : vector<2x8x8xbf16>, vector<2x8x64xbf16>, vector<2x8x64xf32> -> vector<2x8x64xf32>
    "tpu.trace_stop"() : () -> ()
    %64 = vector.shape_cast %63 : vector<2x8x64xf32> to vector<16x64xf32>
    %65 = vector.extract_strided_slice %8 {offsets = [0, 128], sizes = [16, 64], strides = [1, 1]} : vector<16x1536xf32> to vector<16x64xf32>
    %66 = vector.shape_cast %65 : vector<16x64xf32> to vector<2x8x64xf32>
    %67 = arith.truncf %66 : vector<2x8x64xf32> to vector<2x8x64xbf16>
    %68 = vector.extract_strided_slice %8 {offsets = [0, 640], sizes = [16, 64], strides = [1, 1]} : vector<16x1536xf32> to vector<16x64xf32>
    %69 = vector.shape_cast %68 : vector<16x64xf32> to vector<2x8x64xf32>
    %70 = arith.truncf %69 : vector<2x8x64xf32> to vector<2x8x64xbf16>
    %71 = vector.extract_strided_slice %8 {offsets = [0, 1152], sizes = [16, 64], strides = [1, 1]} : vector<16x1536xf32> to vector<16x64xf32>
    %72 = vector.shape_cast %71 : vector<16x64xf32> to vector<2x8x64xf32>
    %73 = arith.truncf %72 : vector<2x8x64xf32> to vector<2x8x64xbf16>
    "tpu.trace_start"() <{level = 10 : i32, message = "bqd,bkd->bqk"}> : () -> ()
    %cst_22 = arith.constant dense<0.000000e+00> : vector<2x8x8xf32>
    %74 = tpu.matmul %67, %70, %cst_22 {dimension_numbers = #tpu.dot_dimension_numbers<[2], [2], [1], [1], [0, 0, 0, 1, 1, 1], [0], [0]>} : vector<2x8x64xbf16>, vector<2x8x64xbf16>, vector<2x8x8xf32> -> vector<2x8x8xf32>
    "tpu.trace_stop"() : () -> ()
    %cst_23 = arith.constant 1.250000e-01 : f32
    %75 = vector.broadcast %cst_23 : f32 to vector<2x8x8xf32>
    %76 = arith.mulf %74, %75 : vector<2x8x8xf32>
    %cst_24 = arith.constant 0.000000e+00 : f32
    %77 = vector.broadcast %cst_24 : f32 to vector<2x8x8xf32>
    %78 = arith.cmpf oeq, %4, %77 : vector<2x8x8xf32>
    %cst_25 = arith.constant -1.000000e+09 : f32
    %79 = vector.broadcast %cst_25 : f32 to vector<2x8x8xf32>
    %80 = arith.select %78, %79, %76 : vector<2x8x8xi1>, vector<2x8x8xf32>
    %cst_26 = arith.constant dense<0xFF800000> : vector<2x8xf32>
    %81 = vector.multi_reduction <maximumf>, %80, %cst_26 [2] : vector<2x8x8xf32> to vector<2x8xf32>
    %82 = vector.shape_cast %81 : vector<2x8xf32> to vector<2x8x1xf32>
    %83 = vector.broadcast %82 : vector<2x8x1xf32> to vector<2x8x8xf32>
    %84 = arith.subf %80, %83 : vector<2x8x8xf32>
    %85 = math.exp %84 : vector<2x8x8xf32>
    %cst_27 = arith.constant dense<0.000000e+00> : vector<2x8xf32>
    %86 = vector.multi_reduction <add>, %85, %cst_27 [2] : vector<2x8x8xf32> to vector<2x8xf32>
    %87 = vector.shape_cast %86 : vector<2x8xf32> to vector<2x8x1xf32>
    %88 = vector.broadcast %87 : vector<2x8x1xf32> to vector<2x8x8xf32>
    %89 = arith.divf %85, %88 : vector<2x8x8xf32>
    %90 = arith.truncf %89 : vector<2x8x8xf32> to vector<2x8x8xbf16>
    "tpu.trace_start"() <{level = 10 : i32, message = "bqk,bkd->bqd"}> : () -> ()
    %cst_28 = arith.constant dense<0.000000e+00> : vector<2x8x64xf32>
    %91 = tpu.matmul %90, %73, %cst_28 {dimension_numbers = #tpu.dot_dimension_numbers<[2], [1], [1], [2], [0, 0, 0, 1, 1, 2], [0], [0]>} : vector<2x8x8xbf16>, vector<2x8x64xbf16>, vector<2x8x64xf32> -> vector<2x8x64xf32>
    "tpu.trace_stop"() : () -> ()
    %92 = vector.shape_cast %91 : vector<2x8x64xf32> to vector<16x64xf32>
    %93 = vector.extract_strided_slice %8 {offsets = [0, 192], sizes = [16, 64], strides = [1, 1]} : vector<16x1536xf32> to vector<16x64xf32>
    %94 = vector.shape_cast %93 : vector<16x64xf32> to vector<2x8x64xf32>
    %95 = arith.truncf %94 : vector<2x8x64xf32> to vector<2x8x64xbf16>
    %96 = vector.extract_strided_slice %8 {offsets = [0, 704], sizes = [16, 64], strides = [1, 1]} : vector<16x1536xf32> to vector<16x64xf32>
    %97 = vector.shape_cast %96 : vector<16x64xf32> to vector<2x8x64xf32>
    %98 = arith.truncf %97 : vector<2x8x64xf32> to vector<2x8x64xbf16>
    %99 = vector.extract_strided_slice %8 {offsets = [0, 1216], sizes = [16, 64], strides = [1, 1]} : vector<16x1536xf32> to vector<16x64xf32>
    %100 = vector.shape_cast %99 : vector<16x64xf32> to vector<2x8x64xf32>
    %101 = arith.truncf %100 : vector<2x8x64xf32> to vector<2x8x64xbf16>
    "tpu.trace_start"() <{level = 10 : i32, message = "bqd,bkd->bqk"}> : () -> ()
    %cst_29 = arith.constant dense<0.000000e+00> : vector<2x8x8xf32>
    %102 = tpu.matmul %95, %98, %cst_29 {dimension_numbers = #tpu.dot_dimension_numbers<[2], [2], [1], [1], [0, 0, 0, 1, 1, 1], [0], [0]>} : vector<2x8x64xbf16>, vector<2x8x64xbf16>, vector<2x8x8xf32> -> vector<2x8x8xf32>
    "tpu.trace_stop"() : () -> ()
    %cst_30 = arith.constant 1.250000e-01 : f32
    %103 = vector.broadcast %cst_30 : f32 to vector<2x8x8xf32>
    %104 = arith.mulf %102, %103 : vector<2x8x8xf32>
    %cst_31 = arith.constant 0.000000e+00 : f32
    %105 = vector.broadcast %cst_31 : f32 to vector<2x8x8xf32>
    %106 = arith.cmpf oeq, %4, %105 : vector<2x8x8xf32>
    %cst_32 = arith.constant -1.000000e+09 : f32
    %107 = vector.broadcast %cst_32 : f32 to vector<2x8x8xf32>
    %108 = arith.select %106, %107, %104 : vector<2x8x8xi1>, vector<2x8x8xf32>
    %cst_33 = arith.constant dense<0xFF800000> : vector<2x8xf32>
    %109 = vector.multi_reduction <maximumf>, %108, %cst_33 [2] : vector<2x8x8xf32> to vector<2x8xf32>
    %110 = vector.shape_cast %109 : vector<2x8xf32> to vector<2x8x1xf32>
    %111 = vector.broadcast %110 : vector<2x8x1xf32> to vector<2x8x8xf32>
    %112 = arith.subf %108, %111 : vector<2x8x8xf32>
    %113 = math.exp %112 : vector<2x8x8xf32>
    %cst_34 = arith.constant dense<0.000000e+00> : vector<2x8xf32>
    %114 = vector.multi_reduction <add>, %113, %cst_34 [2] : vector<2x8x8xf32> to vector<2x8xf32>
    %115 = vector.shape_cast %114 : vector<2x8xf32> to vector<2x8x1xf32>
    %116 = vector.broadcast %115 : vector<2x8x1xf32> to vector<2x8x8xf32>
    %117 = arith.divf %113, %116 : vector<2x8x8xf32>
    %118 = arith.truncf %117 : vector<2x8x8xf32> to vector<2x8x8xbf16>
    "tpu.trace_start"() <{level = 10 : i32, message = "bqk,bkd->bqd"}> : () -> ()
    %cst_35 = arith.constant dense<0.000000e+00> : vector<2x8x64xf32>
    %119 = tpu.matmul %118, %101, %cst_35 {dimension_numbers = #tpu.dot_dimension_numbers<[2], [1], [1], [2], [0, 0, 0, 1, 1, 2], [0], [0]>} : vector<2x8x8xbf16>, vector<2x8x64xbf16>, vector<2x8x64xf32> -> vector<2x8x64xf32>
    "tpu.trace_stop"() : () -> ()
    %120 = vector.shape_cast %119 : vector<2x8x64xf32> to vector<16x64xf32>
    %121 = vector.extract_strided_slice %8 {offsets = [0, 256], sizes = [16, 64], strides = [1, 1]} : vector<16x1536xf32> to vector<16x64xf32>
    %122 = vector.shape_cast %121 : vector<16x64xf32> to vector<2x8x64xf32>
    %123 = arith.truncf %122 : vector<2x8x64xf32> to vector<2x8x64xbf16>
    %124 = vector.extract_strided_slice %8 {offsets = [0, 768], sizes = [16, 64], strides = [1, 1]} : vector<16x1536xf32> to vector<16x64xf32>
    %125 = vector.shape_cast %124 : vector<16x64xf32> to vector<2x8x64xf32>
    %126 = arith.truncf %125 : vector<2x8x64xf32> to vector<2x8x64xbf16>
    %127 = vector.extract_strided_slice %8 {offsets = [0, 1280], sizes = [16, 64], strides = [1, 1]} : vector<16x1536xf32> to vector<16x64xf32>
    %128 = vector.shape_cast %127 : vector<16x64xf32> to vector<2x8x64xf32>
    %129 = arith.truncf %128 : vector<2x8x64xf32> to vector<2x8x64xbf16>
    "tpu.trace_start"() <{level = 10 : i32, message = "bqd,bkd->bqk"}> : () -> ()
    %cst_36 = arith.constant dense<0.000000e+00> : vector<2x8x8xf32>
    %130 = tpu.matmul %123, %126, %cst_36 {dimension_numbers = #tpu.dot_dimension_numbers<[2], [2], [1], [1], [0, 0, 0, 1, 1, 1], [0], [0]>} : vector<2x8x64xbf16>, vector<2x8x64xbf16>, vector<2x8x8xf32> -> vector<2x8x8xf32>
    "tpu.trace_stop"() : () -> ()
    %cst_37 = arith.constant 1.250000e-01 : f32
    %131 = vector.broadcast %cst_37 : f32 to vector<2x8x8xf32>
    %132 = arith.mulf %130, %131 : vector<2x8x8xf32>
    %cst_38 = arith.constant 0.000000e+00 : f32
    %133 = vector.broadcast %cst_38 : f32 to vector<2x8x8xf32>
    %134 = arith.cmpf oeq, %4, %133 : vector<2x8x8xf32>
    %cst_39 = arith.constant -1.000000e+09 : f32
    %135 = vector.broadcast %cst_39 : f32 to vector<2x8x8xf32>
    %136 = arith.select %134, %135, %132 : vector<2x8x8xi1>, vector<2x8x8xf32>
    %cst_40 = arith.constant dense<0xFF800000> : vector<2x8xf32>
    %137 = vector.multi_reduction <maximumf>, %136, %cst_40 [2] : vector<2x8x8xf32> to vector<2x8xf32>
    %138 = vector.shape_cast %137 : vector<2x8xf32> to vector<2x8x1xf32>
    %139 = vector.broadcast %138 : vector<2x8x1xf32> to vector<2x8x8xf32>
    %140 = arith.subf %136, %139 : vector<2x8x8xf32>
    %141 = math.exp %140 : vector<2x8x8xf32>
    %cst_41 = arith.constant dense<0.000000e+00> : vector<2x8xf32>
    %142 = vector.multi_reduction <add>, %141, %cst_41 [2] : vector<2x8x8xf32> to vector<2x8xf32>
    %143 = vector.shape_cast %142 : vector<2x8xf32> to vector<2x8x1xf32>
    %144 = vector.broadcast %143 : vector<2x8x1xf32> to vector<2x8x8xf32>
    %145 = arith.divf %141, %144 : vector<2x8x8xf32>
    %146 = arith.truncf %145 : vector<2x8x8xf32> to vector<2x8x8xbf16>
    "tpu.trace_start"() <{level = 10 : i32, message = "bqk,bkd->bqd"}> : () -> ()
    %cst_42 = arith.constant dense<0.000000e+00> : vector<2x8x64xf32>
    %147 = tpu.matmul %146, %129, %cst_42 {dimension_numbers = #tpu.dot_dimension_numbers<[2], [1], [1], [2], [0, 0, 0, 1, 1, 2], [0], [0]>} : vector<2x8x8xbf16>, vector<2x8x64xbf16>, vector<2x8x64xf32> -> vector<2x8x64xf32>
    "tpu.trace_stop"() : () -> ()
    %148 = vector.shape_cast %147 : vector<2x8x64xf32> to vector<16x64xf32>
    %149 = vector.extract_strided_slice %8 {offsets = [0, 320], sizes = [16, 64], strides = [1, 1]} : vector<16x1536xf32> to vector<16x64xf32>
    %150 = vector.shape_cast %149 : vector<16x64xf32> to vector<2x8x64xf32>
    %151 = arith.truncf %150 : vector<2x8x64xf32> to vector<2x8x64xbf16>
    %152 = vector.extract_strided_slice %8 {offsets = [0, 832], sizes = [16, 64], strides = [1, 1]} : vector<16x1536xf32> to vector<16x64xf32>
    %153 = vector.shape_cast %152 : vector<16x64xf32> to vector<2x8x64xf32>
    %154 = arith.truncf %153 : vector<2x8x64xf32> to vector<2x8x64xbf16>
    %155 = vector.extract_strided_slice %8 {offsets = [0, 1344], sizes = [16, 64], strides = [1, 1]} : vector<16x1536xf32> to vector<16x64xf32>
    %156 = vector.shape_cast %155 : vector<16x64xf32> to vector<2x8x64xf32>
    %157 = arith.truncf %156 : vector<2x8x64xf32> to vector<2x8x64xbf16>
    "tpu.trace_start"() <{level = 10 : i32, message = "bqd,bkd->bqk"}> : () -> ()
    %cst_43 = arith.constant dense<0.000000e+00> : vector<2x8x8xf32>
    %158 = tpu.matmul %151, %154, %cst_43 {dimension_numbers = #tpu.dot_dimension_numbers<[2], [2], [1], [1], [0, 0, 0, 1, 1, 1], [0], [0]>} : vector<2x8x64xbf16>, vector<2x8x64xbf16>, vector<2x8x8xf32> -> vector<2x8x8xf32>
    "tpu.trace_stop"() : () -> ()
    %cst_44 = arith.constant 1.250000e-01 : f32
    %159 = vector.broadcast %cst_44 : f32 to vector<2x8x8xf32>
    %160 = arith.mulf %158, %159 : vector<2x8x8xf32>
    %cst_45 = arith.constant 0.000000e+00 : f32
    %161 = vector.broadcast %cst_45 : f32 to vector<2x8x8xf32>
    %162 = arith.cmpf oeq, %4, %161 : vector<2x8x8xf32>
    %cst_46 = arith.constant -1.000000e+09 : f32
    %163 = vector.broadcast %cst_46 : f32 to vector<2x8x8xf32>
    %164 = arith.select %162, %163, %160 : vector<2x8x8xi1>, vector<2x8x8xf32>
    %cst_47 = arith.constant dense<0xFF800000> : vector<2x8xf32>
    %165 = vector.multi_reduction <maximumf>, %164, %cst_47 [2] : vector<2x8x8xf32> to vector<2x8xf32>
    %166 = vector.shape_cast %165 : vector<2x8xf32> to vector<2x8x1xf32>
    %167 = vector.broadcast %166 : vector<2x8x1xf32> to vector<2x8x8xf32>
    %168 = arith.subf %164, %167 : vector<2x8x8xf32>
    %169 = math.exp %168 : vector<2x8x8xf32>
    %cst_48 = arith.constant dense<0.000000e+00> : vector<2x8xf32>
    %170 = vector.multi_reduction <add>, %169, %cst_48 [2] : vector<2x8x8xf32> to vector<2x8xf32>
    %171 = vector.shape_cast %170 : vector<2x8xf32> to vector<2x8x1xf32>
    %172 = vector.broadcast %171 : vector<2x8x1xf32> to vector<2x8x8xf32>
    %173 = arith.divf %169, %172 : vector<2x8x8xf32>
    %174 = arith.truncf %173 : vector<2x8x8xf32> to vector<2x8x8xbf16>
    "tpu.trace_start"() <{level = 10 : i32, message = "bqk,bkd->bqd"}> : () -> ()
    %cst_49 = arith.constant dense<0.000000e+00> : vector<2x8x64xf32>
    %175 = tpu.matmul %174, %157, %cst_49 {dimension_numbers = #tpu.dot_dimension_numbers<[2], [1], [1], [2], [0, 0, 0, 1, 1, 2], [0], [0]>} : vector<2x8x8xbf16>, vector<2x8x64xbf16>, vector<2x8x64xf32> -> vector<2x8x64xf32>
    "tpu.trace_stop"() : () -> ()
    %176 = vector.shape_cast %175 : vector<2x8x64xf32> to vector<16x64xf32>
    %177 = vector.extract_strided_slice %8 {offsets = [0, 384], sizes = [16, 64], strides = [1, 1]} : vector<16x1536xf32> to vector<16x64xf32>
    %178 = vector.shape_cast %177 : vector<16x64xf32> to vector<2x8x64xf32>
    %179 = arith.truncf %178 : vector<2x8x64xf32> to vector<2x8x64xbf16>
    %180 = vector.extract_strided_slice %8 {offsets = [0, 896], sizes = [16, 64], strides = [1, 1]} : vector<16x1536xf32> to vector<16x64xf32>
    %181 = vector.shape_cast %180 : vector<16x64xf32> to vector<2x8x64xf32>
    %182 = arith.truncf %181 : vector<2x8x64xf32> to vector<2x8x64xbf16>
    %183 = vector.extract_strided_slice %8 {offsets = [0, 1408], sizes = [16, 64], strides = [1, 1]} : vector<16x1536xf32> to vector<16x64xf32>
    %184 = vector.shape_cast %183 : vector<16x64xf32> to vector<2x8x64xf32>
    %185 = arith.truncf %184 : vector<2x8x64xf32> to vector<2x8x64xbf16>
    "tpu.trace_start"() <{level = 10 : i32, message = "bqd,bkd->bqk"}> : () -> ()
    %cst_50 = arith.constant dense<0.000000e+00> : vector<2x8x8xf32>
    %186 = tpu.matmul %179, %182, %cst_50 {dimension_numbers = #tpu.dot_dimension_numbers<[2], [2], [1], [1], [0, 0, 0, 1, 1, 1], [0], [0]>} : vector<2x8x64xbf16>, vector<2x8x64xbf16>, vector<2x8x8xf32> -> vector<2x8x8xf32>
    "tpu.trace_stop"() : () -> ()
    %cst_51 = arith.constant 1.250000e-01 : f32
    %187 = vector.broadcast %cst_51 : f32 to vector<2x8x8xf32>
    %188 = arith.mulf %186, %187 : vector<2x8x8xf32>
    %cst_52 = arith.constant 0.000000e+00 : f32
    %189 = vector.broadcast %cst_52 : f32 to vector<2x8x8xf32>
    %190 = arith.cmpf oeq, %4, %189 : vector<2x8x8xf32>
    %cst_53 = arith.constant -1.000000e+09 : f32
    %191 = vector.broadcast %cst_53 : f32 to vector<2x8x8xf32>
    %192 = arith.select %190, %191, %188 : vector<2x8x8xi1>, vector<2x8x8xf32>
    %cst_54 = arith.constant dense<0xFF800000> : vector<2x8xf32>
    %193 = vector.multi_reduction <maximumf>, %192, %cst_54 [2] : vector<2x8x8xf32> to vector<2x8xf32>
    %194 = vector.shape_cast %193 : vector<2x8xf32> to vector<2x8x1xf32>
    %195 = vector.broadcast %194 : vector<2x8x1xf32> to vector<2x8x8xf32>
    %196 = arith.subf %192, %195 : vector<2x8x8xf32>
    %197 = math.exp %196 : vector<2x8x8xf32>
    %cst_55 = arith.constant dense<0.000000e+00> : vector<2x8xf32>
    %198 = vector.multi_reduction <add>, %197, %cst_55 [2] : vector<2x8x8xf32> to vector<2x8xf32>
    %199 = vector.shape_cast %198 : vector<2x8xf32> to vector<2x8x1xf32>
    %200 = vector.broadcast %199 : vector<2x8x1xf32> to vector<2x8x8xf32>
    %201 = arith.divf %197, %200 : vector<2x8x8xf32>
    %202 = arith.truncf %201 : vector<2x8x8xf32> to vector<2x8x8xbf16>
    "tpu.trace_start"() <{level = 10 : i32, message = "bqk,bkd->bqd"}> : () -> ()
    %cst_56 = arith.constant dense<0.000000e+00> : vector<2x8x64xf32>
    %203 = tpu.matmul %202, %185, %cst_56 {dimension_numbers = #tpu.dot_dimension_numbers<[2], [1], [1], [2], [0, 0, 0, 1, 1, 2], [0], [0]>} : vector<2x8x8xbf16>, vector<2x8x64xbf16>, vector<2x8x64xf32> -> vector<2x8x64xf32>
    "tpu.trace_stop"() : () -> ()
    %204 = vector.shape_cast %203 : vector<2x8x64xf32> to vector<16x64xf32>
    %205 = vector.extract_strided_slice %8 {offsets = [0, 448], sizes = [16, 64], strides = [1, 1]} : vector<16x1536xf32> to vector<16x64xf32>
    %206 = vector.shape_cast %205 : vector<16x64xf32> to vector<2x8x64xf32>
    %207 = arith.truncf %206 : vector<2x8x64xf32> to vector<2x8x64xbf16>
    %208 = vector.extract_strided_slice %8 {offsets = [0, 960], sizes = [16, 64], strides = [1, 1]} : vector<16x1536xf32> to vector<16x64xf32>
    %209 = vector.shape_cast %208 : vector<16x64xf32> to vector<2x8x64xf32>
    %210 = arith.truncf %209 : vector<2x8x64xf32> to vector<2x8x64xbf16>
    %211 = vector.extract_strided_slice %8 {offsets = [0, 1472], sizes = [16, 64], strides = [1, 1]} : vector<16x1536xf32> to vector<16x64xf32>
    %212 = vector.shape_cast %211 : vector<16x64xf32> to vector<2x8x64xf32>
    %213 = arith.truncf %212 : vector<2x8x64xf32> to vector<2x8x64xbf16>
    "tpu.trace_start"() <{level = 10 : i32, message = "bqd,bkd->bqk"}> : () -> ()
    %cst_57 = arith.constant dense<0.000000e+00> : vector<2x8x8xf32>
    %214 = tpu.matmul %207, %210, %cst_57 {dimension_numbers = #tpu.dot_dimension_numbers<[2], [2], [1], [1], [0, 0, 0, 1, 1, 1], [0], [0]>} : vector<2x8x64xbf16>, vector<2x8x64xbf16>, vector<2x8x8xf32> -> vector<2x8x8xf32>
    "tpu.trace_stop"() : () -> ()
    %cst_58 = arith.constant 1.250000e-01 : f32
    %215 = vector.broadcast %cst_58 : f32 to vector<2x8x8xf32>
    %216 = arith.mulf %214, %215 : vector<2x8x8xf32>
    %cst_59 = arith.constant 0.000000e+00 : f32
    %217 = vector.broadcast %cst_59 : f32 to vector<2x8x8xf32>
    %218 = arith.cmpf oeq, %4, %217 : vector<2x8x8xf32>
    %cst_60 = arith.constant -1.000000e+09 : f32
    %219 = vector.broadcast %cst_60 : f32 to vector<2x8x8xf32>
    %220 = arith.select %218, %219, %216 : vector<2x8x8xi1>, vector<2x8x8xf32>
    %cst_61 = arith.constant dense<0xFF800000> : vector<2x8xf32>
    %221 = vector.multi_reduction <maximumf>, %220, %cst_61 [2] : vector<2x8x8xf32> to vector<2x8xf32>
    %222 = vector.shape_cast %221 : vector<2x8xf32> to vector<2x8x1xf32>
    %223 = vector.broadcast %222 : vector<2x8x1xf32> to vector<2x8x8xf32>
    %224 = arith.subf %220, %223 : vector<2x8x8xf32>
    %225 = math.exp %224 : vector<2x8x8xf32>
    %cst_62 = arith.constant dense<0.000000e+00> : vector<2x8xf32>
    %226 = vector.multi_reduction <add>, %225, %cst_62 [2] : vector<2x8x8xf32> to vector<2x8xf32>
    %227 = vector.shape_cast %226 : vector<2x8xf32> to vector<2x8x1xf32>
    %228 = vector.broadcast %227 : vector<2x8x1xf32> to vector<2x8x8xf32>
    %229 = arith.divf %225, %228 : vector<2x8x8xf32>
    %230 = arith.truncf %229 : vector<2x8x8xf32> to vector<2x8x8xbf16>
    "tpu.trace_start"() <{level = 10 : i32, message = "bqk,bkd->bqd"}> : () -> ()
    %cst_63 = arith.constant dense<0.000000e+00> : vector<2x8x64xf32>
    %231 = tpu.matmul %230, %213, %cst_63 {dimension_numbers = #tpu.dot_dimension_numbers<[2], [1], [1], [2], [0, 0, 0, 1, 1, 2], [0], [0]>} : vector<2x8x8xbf16>, vector<2x8x64xbf16>, vector<2x8x64xf32> -> vector<2x8x64xf32>
    "tpu.trace_stop"() : () -> ()
    %232 = vector.shape_cast %231 : vector<2x8x64xf32> to vector<16x64xf32>
    %233 = tpu.concatenate %33, %61, %89, %117, %145, %173, %201, %229 in 0 : vector<2x8x8xf32>, vector<2x8x8xf32>, vector<2x8x8xf32>, vector<2x8x8xf32>, vector<2x8x8xf32>, vector<2x8x8xf32>, vector<2x8x8xf32>, vector<2x8x8xf32> -> vector<16x8x8xf32>
    %c0_64 = arith.constant 0 : index
    %c0_65 = arith.constant 0 : index
    %c0_66 = arith.constant 0 : index
    %c0_67 = arith.constant 0 : index
    %234 = vector.load %arg8[%c0_64, %c0_65, %c0_66, %c0_67] : memref<1x16x8x8xf32, #tpu.memory_space<vmem>>, vector<1x16x8x8xf32>
    %235 = vector.shape_cast %234 : vector<1x16x8x8xf32> to vector<16x8x8xf32>
    %236 = vector.shape_cast %233 : vector<16x8x8xf32> to vector<1x16x8x8xf32>
    tpu.vector_store %arg8[%c0_64, %c0_65, %c0_66, %c0_67], %236 {strides = array<i32>} : memref<1x16x8x8xf32, #tpu.memory_space<vmem>>, vector<1x16x8x8xf32>,
    %237 = tpu.concatenate %36, %64, %92, %120, %148, %176, %204, %232 in 1 : vector<16x64xf32>, vector<16x64xf32>, vector<16x64xf32>, vector<16x64xf32>, vector<16x64xf32>, vector<16x64xf32>, vector<16x64xf32>, vector<16x64xf32> -> vector<16x512xf32>
    %238 = arith.truncf %237 : vector<16x512xf32> to vector<16x512xbf16>
    %c0_68 = arith.constant 0 : index
    %c0_69 = arith.constant 0 : index
    %c0_70 = arith.constant 0 : index
    %239 = vector.load %arg4[%c0_68, %c0_69, %c0_70] : memref<1x512x512xbf16, #tpu.memory_space<vmem>>, vector<1x512x512xbf16>
    %240 = vector.shape_cast %239 : vector<1x512x512xbf16> to vector<512x512xbf16>
    %cst_71 = arith.constant dense<0.000000e+00> : vector<16x512xf32>
    %241 = tpu.matmul %238, %240, %cst_71 {dimension_numbers = #tpu.dot_dimension_numbers<[1], [0], [0], [1], [0, 0, 1, 1], [], []>} : vector<16x512xbf16>, vector<512x512xbf16>, vector<16x512xf32> -> vector<16x512xf32>
    %242 = arith.addf %241, %3 : vector<16x512xf32>
    %cst_72 = arith.constant dense<0.000000e+00> : vector<16xf32>
    %243 = vector.multi_reduction <add>, %242, %cst_72 [1] : vector<16x512xf32> to vector<16xf32>
    %244 = vector.shape_cast %243 : vector<16xf32> to vector<16x1xf32>
    %cst_73 = arith.constant 5.120000e+02 : f32
    %245 = vector.broadcast %cst_73 : f32 to vector<16x1xf32>
    %246 = arith.divf %244, %245 : vector<16x1xf32>
    %247 = vector.broadcast %246 : vector<16x1xf32> to vector<16x512xf32>
    %248 = arith.subf %242, %247 : vector<16x512xf32>
    %249 = arith.mulf %248, %248 : vector<16x512xf32>
    %cst_74 = arith.constant dense<0.000000e+00> : vector<16xf32>
    %250 = vector.multi_reduction <add>, %249, %cst_74 [1] : vector<16x512xf32> to vector<16xf32>
    %251 = vector.shape_cast %250 : vector<16xf32> to vector<16x1xf32>
    %cst_75 = arith.constant 5.120000e+02 : f32
    %252 = vector.broadcast %cst_75 : f32 to vector<16x1xf32>
    %253 = arith.divf %251, %252 : vector<16x1xf32>
    %254 = vector.broadcast %246 : vector<16x1xf32> to vector<16x512xf32>
    %255 = arith.subf %242, %254 : vector<16x512xf32>
    %cst_76 = arith.constant 9.99999974E-6 : f32
    %256 = vector.broadcast %cst_76 : f32 to vector<16x1xf32>
    %257 = arith.addf %253, %256 : vector<16x1xf32>
    %258 = math.rsqrt %257 : vector<16x1xf32>
    %259 = vector.broadcast %258 : vector<16x1xf32> to vector<16x512xf32>
    %260 = arith.mulf %255, %259 : vector<16x512xf32>
    %261 = arith.truncf %260 : vector<16x512xf32> to vector<16x512xbf16>
    %c0_77 = arith.constant 0 : index
    %c0_78 = arith.constant 0 : index
    %c0_79 = arith.constant 0 : index
    %262 = vector.load %arg5[%c0_77, %c0_78, %c0_79] : memref<1x512x2048xbf16, #tpu.memory_space<vmem>>, vector<1x512x2048xbf16>
    %263 = vector.shape_cast %262 : vector<1x512x2048xbf16> to vector<512x2048xbf16>
    %cst_80 = arith.constant dense<0.000000e+00> : vector<16x2048xf32>
    %264 = tpu.matmul %261, %263, %cst_80 {dimension_numbers = #tpu.dot_dimension_numbers<[1], [0], [0], [1], [0, 0, 1, 1], [], []>} : vector<16x512xbf16>, vector<512x2048xbf16>, vector<16x2048xf32> -> vector<16x2048xf32>
    %cst_81 = arith.constant 0.000000e+00 : f32
    %265 = vector.broadcast %cst_81 : f32 to vector<16x2048xf32>
    %266 = arith.maximumf %264, %265 : vector<16x2048xf32>
    %267 = arith.truncf %266 : vector<16x2048xf32> to vector<16x2048xbf16>
    %c0_82 = arith.constant 0 : index
    %c0_83 = arith.constant 0 : index
    %c0_84 = arith.constant 0 : index
    %268 = vector.load %arg6[%c0_82, %c0_83, %c0_84] : memref<1x2048x512xbf16, #tpu.memory_space<vmem>>, vector<1x2048x512xbf16>
    %269 = vector.shape_cast %268 : vector<1x2048x512xbf16> to vector<2048x512xbf16>
    %cst_85 = arith.constant dense<0.000000e+00> : vector<16x512xf32>
    %270 = tpu.matmul %267, %269, %cst_85 {dimension_numbers = #tpu.dot_dimension_numbers<[1], [0], [0], [1], [0, 0, 1, 1], [], []>} : vector<16x2048xbf16>, vector<2048x512xbf16>, vector<16x512xf32> -> vector<16x512xf32>
    %271 = arith.addf %270, %260 : vector<16x512xf32>
    %cst_86 = arith.constant dense<0.000000e+00> : vector<16xf32>
    %272 = vector.multi_reduction <add>, %271, %cst_86 [1] : vector<16x512xf32> to vector<16xf32>
    %273 = vector.shape_cast %272 : vector<16xf32> to vector<16x1xf32>
    %cst_87 = arith.constant 5.120000e+02 : f32
    %274 = vector.broadcast %cst_87 : f32 to vector<16x1xf32>
    %275 = arith.divf %273, %274 : vector<16x1xf32>
    %276 = vector.broadcast %275 : vector<16x1xf32> to vector<16x512xf32>
    %277 = arith.subf %271, %276 : vector<16x512xf32>
    %278 = arith.mulf %277, %277 : vector<16x512xf32>
    %cst_88 = arith.constant dense<0.000000e+00> : vector<16xf32>
    %279 = vector.multi_reduction <add>, %278, %cst_88 [1] : vector<16x512xf32> to vector<16xf32>
    %280 = vector.shape_cast %279 : vector<16xf32> to vector<16x1xf32>
    %cst_89 = arith.constant 5.120000e+02 : f32
    %281 = vector.broadcast %cst_89 : f32 to vector<16x1xf32>
    %282 = arith.divf %280, %281 : vector<16x1xf32>
    %283 = vector.broadcast %275 : vector<16x1xf32> to vector<16x512xf32>
    %284 = arith.subf %271, %283 : vector<16x512xf32>
    %cst_90 = arith.constant 9.99999974E-6 : f32
    %285 = vector.broadcast %cst_90 : f32 to vector<16x1xf32>
    %286 = arith.addf %282, %285 : vector<16x1xf32>
    %287 = math.rsqrt %286 : vector<16x1xf32>
    %288 = vector.broadcast %287 : vector<16x1xf32> to vector<16x512xf32>
    %289 = arith.mulf %284, %288 : vector<16x512xf32>
    %c0_91 = arith.constant 0 : index
    %c0_92 = arith.constant 0 : index
    %290 = vector.load %arg7[%c0_91, %c0_92] : memref<16x512xf32, #tpu.memory_space<vmem>>, vector<16x512xf32>
    tpu.vector_store %arg7[%c0_91, %c0_92], %289 {strides = array<i32>} : memref<16x512xf32, #tpu.memory_space<vmem>>, vector<16x512xf32>,
    return
  }
  func.func @transform_0(%arg0: i32) -> (i32, i32) {
    %c0_i32 = arith.constant 0 : i32
    %c0_i32_0 = arith.constant 0 : i32
    %c0_i32_1 = arith.constant 0 : i32
    return %c0_i32, %c0_i32_0 : i32, i32
  }
  func.func @transform_1(%arg0: i32) -> (i32, i32, i32) {
    %c0_i32 = arith.constant 0 : i32
    %c0_i32_0 = arith.constant 0 : i32
    %c0_i32_1 = arith.constant 0 : i32
    %c0_i32_2 = arith.constant 0 : i32
    return %c0_i32, %c0_i32_0, %c0_i32_1 : i32, i32, i32
  }
  func.func @transform_2(%arg0: i32) -> (i32, i32, i32) {
    %c0_i32 = arith.constant 0 : i32
    %c0_i32_0 = arith.constant 0 : i32
    %c0_i32_1 = arith.constant 0 : i32
    return %arg0, %c0_i32, %c0_i32_0 : i32, i32, i32
  }
  func.func @transform_3(%arg0: i32) -> (i32, i32, i32) {
    %c0_i32 = arith.constant 0 : i32
    %c0_i32_0 = arith.constant 0 : i32
    %c0_i32_1 = arith.constant 0 : i32
    return %arg0, %c0_i32, %c0_i32_0 : i32, i32, i32
  }
  func.func @transform_4(%arg0: i32) -> (i32, i32, i32) {
    %c0_i32 = arith.constant 0 : i32
    %c0_i32_0 = arith.constant 0 : i32
    %c0_i32_1 = arith.constant 0 : i32
    return %arg0, %c0_i32, %c0_i32_0 : i32, i32, i32
  }
  func.func @transform_5(%arg0: i32) -> (i32, i32, i32) {
    %c0_i32 = arith.constant 0 : i32
    %c0_i32_0 = arith.constant 0 : i32
    %c0_i32_1 = arith.constant 0 : i32
    return %arg0, %c0_i32, %c0_i32_0 : i32, i32, i32
  }
  func.func @transform_6(%arg0: i32) -> (i32, i32) {
    %c0_i32 = arith.constant 0 : i32
    %c0_i32_0 = arith.constant 0 : i32
    %c0_i32_1 = arith.constant 0 : i32
    return %c0_i32, %c0_i32_0 : i32, i32
  }
  func.func @transform_7(%arg0: i32) -> (i32, i32, i32, i32) {
    %c0_i32 = arith.constant 0 : i32
    %c0_i32_0 = arith.constant 0 : i32
    %c0_i32_1 = arith.constant 0 : i32
    %c0_i32_2 = arith.constant 0 : i32
    return %arg0, %c0_i32, %c0_i32_0, %c0_i32_1 : i32, i32, i32, i32
  }
}

</mosaic_0001>

<bundles_post_ra>
// kernel: mul.5
= control target key start
LH: loop header
LB: loop body
LE: loop exit
PB: predicated region body
PF: predicated region fallthrough
CT: control target
= control target key end

     0   :  { %s34_s0 = inlined_call_operand.vmem [shape: f32[2,8], index: 0, kind: input, shape index: {}]   ;;  %s35_s1 = inlined_call_operand.vmem [shape: f32[2,8,8], index: 1, kind: output, shape index: {}]  }
   0x1   :  { %v4_v0 = vld [vmem:[%s34_s0] ss:$0 sm:$0xff]  ;;  %v10_v1 = vld [vmem:[%s34_s0 + $0x1] ss:$0 sm:$0xff] }
   0x2   :  { %5 = vst [vmem:[%s35_s1] sm:$0xff] %v4_v0  ;;  %11 = vst [vmem:[%s35_s1 + $0x8] sm:$0xff] %v10_v1 }

// kernel: encoder_forward.1
= control target key start
LH: loop header
LB: loop body
LE: loop exit
PB: predicated region body
PF: predicated region fallthrough
CT: control target
= control target key end

     0   :  { %s20429_s0 = inlined_call_operand.vmem [shape: f32[16,512], index: 0, kind: input, shape index: {}]   ;;  %s20430_s1 = inlined_call_operand.vmem [shape: f32[2,8,8], index: 1, kind: input, shape index: {}]   ;;  %s20431_s2 = inlined_call_operand.hbm [shape: bf16[6,512,1536], index: 2, kind: input, shape index: {}]   ;;  %s20432_s3 = inlined_call_operand.hbm [shape: bf16[6,512,512], index: 3, kind: input, shape index: {}]   ;;  %s20433_s4 = inlined_call_operand.hbm [shape: bf16[6,512,2048], index: 4, kind: input, shape index: {}]   ;;  %s20434_s5 = inlined_call_operand.hbm [shape: bf16[6,2048,512], index: 5, kind: input, shape index: {}]   ;;  %s20435_s6 = inlined_call_operand.hbm [shape: f32[16,512], index: 6, kind: output, shape index: {0}]   ;;  %s20436_s7 = inlined_call_operand.vmem [shape: f32[6,16,8,8], index: 7, kind: output, shape index: {1}]  }
   0x1   :  { %20440 = sst [smem:[#allocation15_spill]] %s20431_s2 }
   0x2   :  { %20441 = sst [smem:[#allocation16_spill]] %s20432_s3 }
   0x3   :  { %13 = vsyncpa [#allocation3], 0 }
   0x4   :  { %15 = vsyncpa [#allocation3 + $0x1], 0 }
   0x5   :  { %16 = vsyncpa [#allocation6], 0 }
   0x6   :  { %18 = vsyncpa [#allocation6 + $0x1], 0 }
   0x7   :  { %19 = vsyncpa [#allocation9], 0 }
   0x8   :  { %21 = vsyncpa [#allocation9 + $0x1], 0 }
   0x9   :  { %22 = vsyncpa [#allocation4], 0  ;;  %s17860_s24 = smov 0   ;;  %s17862_s25 = smov 0  }
   0xa   :  { %s17864_s26 = smov 0   ;;  %s17866_s27 = smov 0  }
   0xb LB: > { %s17879_s28 = sadd.s32 4294967295, %s17802_s27   ;;  %s17882_s29 = sadd.s32 1, %s17802_s27   ;;  %s17802_s27 = sphi %s17866_s27, %s20455_s27   ;;  %s17798_s26 = sphi %s17864_s26, %s20454_s26   ;;  %s17794_s25 = sphi %s17862_s25, %s20453_s25   ;;  %s17790_s24 = sphi %s17860_s24, %s20452_s24  }
   0xc   : > { %s74_s30 = ssub.s32 %s17802_s27, %s17882_s29  ;;  %s77_s8 = sadd.s32 1, %s17798_s26 }
   0xd   : > { %p75_p0 = scmp.eq.s32.totalorder %s74_s30, 0  ;;  %p84_p1 = scmp.ne.s32.totalorder %s17798_s26, %s17794_s25 }
   0xe   : > { %p85_p2 = scmp.eq.s32.totalorder %s17802_s27, 0  ;;  %p90_p3 = scmp.ne.s32.totalorder %s17794_s25, %s17790_s24 }
   0xf   : > { %s17892_s9 = scalar_select %p75_p0, %s17798_s26, %s77_s8  }
  0x10   : > { %p86_p4 = por %p85_p2, %p84_p1  ;;  %p91_p5 = scmp.eq.s32.totalorder %s17879_s28, 0 }
  0x11   : > { %p15927_p6 = scmp.lt.s32.totalorder %s17802_s27, 6  ;;  %s17901_s11 = sand.u32 1, %s17798_s26  }
  0x12   : > { %p17896_p7 = por %p91_p5, %p90_p3  ;;  %s266_s13 = sand.u32 1, %s17802_s27  }
  0x13   : > { %p17903_p8 = pnand %p15927_p6, %p86_p4  ;;  %s13915_s14 = sshll.u32 %s17901_s11, 10 }
  0x14   : > { %s20442_s10 = scalar_select %p17896_p7, 1, 0 }
  0x15   : > { %s15503_s15 = sshll.u32 %s17802_s27, 14  ;;  %s270_s16 = scalar_lea.vmem [#allocation5], %s13915_s14 }
  0x16   : > { %s277_s17 = sshll.u32 %s270_s16, 4  ;;  %s20444_s3 = sld [smem:[#allocation16_spill]]  ;;  %s17915_s17 = int_to_ptr.vmem [resolvable:$true] %s277_s17 }
  0x17   : > { %s17917_s21 = scalar_lea.sflag [#allocation6], %s266_s13  ;;  %p17923_p10 = pneg %p17903_p8 }
  0x1c   : > { %s17913_s20 = scalar_lea.hbm %s20444_s3, %s15503_s15  ;;  %s17615_s8 = scalar_lea.hbm %s20444_s3, 98304 }
  0x1d   : > { %s17610_s22 = scalar_lea.hbm %s17913_s20, 16384  ;;  %p17616_p13 = scmp.lt.u32.totalorder %s17913_s20, %s20444_s3 }
  0x1e   : > { %p17611_p9 = scmp.ne.s32.totalorder %s17913_s20, %s17610_s22  ;;  %p17617_p0 = scmp.lt.u32.totalorder %s17615_s8, %s17610_s22 }
  0x1f   : > { %p17619_p2 = scmp.lt.u32.totalorder %s17610_s22, %s17913_s20 }
  0x20   : > { %p17613_p11 = pnand %p17923_p10, %p17611_p9  ;;  %p17618_p1 = por %p17617_p0, %p17616_p13 }
  0x22   : > { %p17614_p12 = pneg %p17613_p11  ;;  %p17620_p3 = por %p17619_p2, %p17618_p1 }
  0x24   : > { %p17621_p4 = pnand %p17620_p3, %p17614_p12 }
  0x26   : > { %17624 = shalt.err (!%p17621_p4)
}
  0x27   : > { %s17625_s13 = scalar_lea.vmem %s17915_s17, 16384  ;;  %s17804_s16 = smov [#allocation5]  }
  0x28   : > { %p17626_p5 = scmp.ne.s32.totalorder %s17915_s17, %s17625_s13  ;;  %s17630_s18 = sshll.u32 %s17804_s16, 4  ;;  %s17631_s18 = int_to_ptr.vmem [resolvable:$false] %s17630_s18 }
  0x29   : > { %s17632_s19 = scalar_lea.vmem %s17631_s18, 32768  ;;  %p17633_p11 = scmp.lt.s32.totalorder %s17915_s17, %s17631_s18 }
  0x2a   : > { %p17628_p6 = pnand %p17626_p5, %p17923_p10  ;;  %p17634_p7 = scmp.lt.s32.totalorder %s17632_s19, %s17625_s13 }
  0x2c   : > { %p17629_p9 = pneg %p17628_p6  ;;  %p17635_p13 = por %p17634_p7, %p17633_p11 }
  0x2e   : > { %p17636_p0 = pnand %p17635_p13, %p17629_p9 }
  0x30   : > { %17639 = shalt.err (!%p17636_p0)
}
  0x31   : > { %s20438_s22 = smov 256   ;;  %s20439_s24 = smov 16  }
  0x32   : > { %15920 = dma.hbm_to_vmem [thread:$0]  (!%p17903_p8), %s17913_s20, 16384, %s17915_s17, %s17917_s21, %s20438_s22, %s20438_s22, %s20439_s24  }
  0x33   : > { %p13924_p7 = scmp.ge.s32.totalorder %s17802_s27, 1  ;;  %p327_p12 = scmp.lt.s32.totalorder %s17802_s27, 7 }
  0x34   : > { %s15899_s30 = smul.u32 3072, %s17901_s11  ;;  %s20447_s2 = sld [smem:[#allocation15_spill]] }
  0x35   : > { %p17953_p1 = pnand %p13924_p7, %p327_p12  ;;  %s15900_s14 = smul.u32 49152, %s17802_s27 }
  0x36   : > { %s249_s18 = scalar_lea.vmem [#allocation2], %s15899_s30  ;;  %s246_s17 = scalar_lea.sflag [#allocation3], %s17901_s11 }
  0x37   : > { %s20446_s8 = scalar_select %p17953_p1, 1, 0 }
  0x38   : > { %s256_s19 = sshll.u32 %s249_s18, 4  ;;  %s17963_s19 = int_to_ptr.vmem [resolvable:$true] %s256_s19 }
  0x3a   : > { %s17961_s16 = scalar_lea.hbm %s20447_s2, %s15900_s14  ;;  %s17645_s15 = scalar_lea.hbm %s20447_s2, 294912 }
  0x3b   : > { %s17640_s20 = scalar_lea.hbm %s17961_s16, 49152  ;;  %p17646_p5 = scmp.lt.u32.totalorder %s17961_s16, %s20447_s2 }
  0x3c   : > { %p17641_p2 = scmp.ne.s32.totalorder %s17961_s16, %s17640_s20  ;;  %p17647_p6 = scmp.lt.u32.totalorder %s17645_s15, %s17640_s20 }
  0x3d   : > { %p17649_p11 = scmp.lt.u32.totalorder %s17640_s20, %s17961_s16 }
  0x3e   : > { %p17643_p3 = pnand %p17641_p2, %p17923_p10  ;;  %p17648_p9 = por %p17647_p6, %p17646_p5 }
  0x40   : > { %p17644_p4 = pneg %p17643_p3  ;;  %p17650_p13 = por %p17649_p11, %p17648_p9 }
  0x42   : > { %p17651_p0 = pnand %p17650_p13, %p17644_p4 }
  0x44   : > { %17654 = shalt.err (!%p17651_p0)
}
  0x45   : > { %s17655_s30 = scalar_lea.vmem %s17963_s19, 49152  ;;  %s17807_s22 = smov [#allocation2]  }
  0x46   : > { %p17656_p7 = scmp.ne.s32.totalorder %s17963_s19, %s17655_s30  ;;  %s17660_s24 = sshll.u32 %s17807_s22, 4  ;;  %s17661_s24 = int_to_ptr.vmem [resolvable:$false] %s17660_s24 }
  0x47   : > { %s17662_s18 = scalar_lea.vmem %s17661_s24, 98304  ;;  %p17663_p3 = scmp.lt.s32.totalorder %s17963_s19, %s17661_s24 }
  0x48   : > { %p17658_p12 = pnand %p17656_p7, %p17923_p10  ;;  %p17664_p1 = scmp.lt.s32.totalorder %s17662_s18, %s17655_s30 }
  0x4a   : > { %p17659_p2 = pneg %p17658_p12  ;;  %p17665_p5 = por %p17664_p1, %p17663_p3 }
  0x4c   : > { %p17666_p6 = pnand %p17665_p5, %p17659_p2 }
  0x4e   : > { %17669 = shalt.err (!%p17666_p6)
}
  0x4f   : > { %s17808_s20 = smov 768   ;;  %s17809_s15 = smov 48  }
  0x50   : > { %15917 = dma.hbm_to_vmem [thread:$0]  (!%p17903_p8), %s17961_s16, 49152, %s17963_s19, %s246_s17, %s17808_s20, %s17808_s20, %s17809_s15  }
  0x51   : > { %s13918_s14 = sshll.u32 %s17901_s11, 12  ;;  %s15504_s13 = sshll.u32 %s17802_s27, 16 }
  0x52   : > { %s17996_s24 = scalar_lea.hbm %s20433_s4, %s15504_s13  ;;  %s291_s18 = scalar_lea.vmem [#allocation7], %s13918_s14 }
  0x53   : > { %s298_s2 = sshll.u32 %s291_s18, 4  ;;  %s17670_s3 = scalar_lea.hbm %s17996_s24, 65536  ;;  %s18000_s2 = int_to_ptr.vmem [resolvable:$true] %s298_s2 }
  0x54   : > { %p17671_p1 = scmp.ne.s32.totalorder %s17996_s24, %s17670_s3  ;;  %s17675_s17 = scalar_lea.hbm %s20433_s4, 393216 }
  0x55   : > { %p17676_p11 = scmp.lt.u32.totalorder %s17996_s24, %s20433_s4  ;;  %p17677_p13 = scmp.lt.u32.totalorder %s17675_s17, %s17670_s3 }
  0x56   : > { %p17673_p4 = pnand %p17671_p1, %p17923_p10  ;;  %p17679_p7 = scmp.lt.u32.totalorder %s17670_s3, %s17996_s24 }
  0x57   : > { %p17678_p0 = por %p17677_p13, %p17676_p11 }
  0x58   : > { %p17674_p9 = pneg %p17673_p4 }
  0x59   : > { %p17680_p12 = por %p17679_p7, %p17678_p0 }
  0x5b   : > { %p17681_p2 = pnand %p17680_p12, %p17674_p9 }
  0x5d   : > { %17684 = shalt.err (!%p17681_p2)
}
  0x5e   : > { %s17685_s30 = scalar_lea.vmem %s18000_s2, 65536  ;;  %s17810_s22 = smov [#allocation7]  }
  0x5f   : > { %p17686_p3 = scmp.ne.s32.totalorder %s18000_s2, %s17685_s30  ;;  %s17690_s18 = sshll.u32 %s17810_s22, 4  ;;  %s17691_s18 = int_to_ptr.vmem [resolvable:$false] %s17690_s18 }
  0x60   : > { %s17692_s16 = scalar_lea.vmem %s17691_s18, 131072  ;;  %p17693_p1 = scmp.lt.s32.totalorder %s18000_s2, %s17691_s18 }
  0x61   : > { %p17688_p5 = pnand %p17686_p3, %p17923_p10  ;;  %p17694_p4 = scmp.lt.s32.totalorder %s17692_s16, %s17685_s30 }
  0x63   : > { %p17689_p6 = pneg %p17688_p5  ;;  %p17695_p11 = por %p17694_p4, %p17693_p1 }
  0x65   : > { %p17696_p13 = pnand %p17695_p11, %p17689_p6 }
  0x67   : > { %17699 = shalt.err (!%p17696_p13)
}
  0x68   : > { %s17811_s3 = smov 1024   ;;  %s17812_s19 = smov 64  }
  0x69   : > { %15923 = dma.hbm_to_vmem [thread:$0]  (!%p17903_p8), %s17996_s24, 65536, %s18000_s2, %s17917_s21, %s17811_s3, %s17811_s3, %s17812_s19  }
  0x6a   : > { %s18029_s15 = scalar_lea.hbm %s20434_s5, %s15504_s13  ;;  %s312_s30 = scalar_lea.vmem [#allocation8], %s13918_s14 }
  0x6b   : > { %s319_s22 = sshll.u32 %s312_s30, 4  ;;  %s309_s18 = scalar_lea.sflag [#allocation9], %s17901_s11  ;;  %s18033_s22 = int_to_ptr.vmem [resolvable:$true] %s319_s22 }
  0x6c   : > { %s17700_s16 = scalar_lea.hbm %s18029_s15, 65536  ;;  %s17705_s21 = scalar_lea.hbm %s20434_s5, 393216 }
  0x6d   : > { %p17701_p9 = scmp.ne.s32.totalorder %s18029_s15, %s17700_s16  ;;  %p17706_p12 = scmp.lt.u32.totalorder %s18029_s15, %s20434_s5 }
  0x6e   : > { %p17707_p2 = scmp.lt.u32.totalorder %s17705_s21, %s17700_s16  ;;  %p17709_p5 = scmp.lt.u32.totalorder %s17700_s16, %s18029_s15 }
  0x6f   : > { %p17703_p0 = pnand %p17701_p9, %p17923_p10 }
  0x70   : > { %p17708_p3 = por %p17707_p2, %p17706_p12 }
  0x71   : > { %p17704_p7 = pneg %p17703_p0 }
  0x72   : > { %p17710_p6 = por %p17709_p5, %p17708_p3 }
  0x74   : > { %p17711_p1 = pnand %p17710_p6, %p17704_p7 }
  0x76   : > { %17714 = shalt.err (!%p17711_p1)
}
  0x77   : > { %s17715_s14 = scalar_lea.vmem %s18033_s22, 65536  ;;  %s17813_s3 = smov [#allocation8]  }
  0x78   : > { %p17716_p4 = scmp.ne.s32.totalorder %s18033_s22, %s17715_s14  ;;  %s17720_s19 = sshll.u32 %s17813_s3, 4  ;;  %s17721_s19 = int_to_ptr.vmem [resolvable:$false] %s17720_s19 }
  0x79   : > { %s17722_s17 = scalar_lea.vmem %s17721_s19, 131072  ;;  %p17723_p9 = scmp.lt.s32.totalorder %s18033_s22, %s17721_s19 }
  0x7a   : > { %p17718_p11 = pnand %p17716_p4, %p17923_p10  ;;  %p17724_p0 = scmp.lt.s32.totalorder %s17722_s17, %s17715_s14 }
  0x7c   : > { %p17719_p13 = pneg %p17718_p11  ;;  %p17725_p12 = por %p17724_p0, %p17723_p9 }
  0x7e   : > { %p17726_p2 = pnand %p17725_p12, %p17719_p13 }
  0x80   : > { %17729 = shalt.err (!%p17726_p2)
}
  0x81   : > { %s20448_s20 = smov 16   ;;  %s20449_s30 = smov 256  }
  0x82   : > { %15926 = dma.hbm_to_vmem [thread:$0]  (!%p17903_p8), %s18029_s15, 65536, %s18033_s22, %s309_s18, %s20449_s30, %s20449_s30, %s20448_s20  }
  0x83   : > { %p20450_p10 = scmp.ne.s32.totalorder %s20446_s8, 0 }
  0x84   : > { %s333_s23 = sand.u32 (!%p20450_p10), 1, %s17794_s25   ;;  %p20451_p7 = scmp.ne.s32.totalorder (!%p20450_p10), %s20442_s10, 0 }
  0x85   : > { %331 = sbr.rel (%p20450_p10) target bundleno = 7340 (0x1cac), region = 44  ;;  %s334_s2 = scalar_lea.sflag (!%p20450_p10), [#allocation3], %s333_s23 }
  0x86   : > { %s15901_s16 = smul.u32 (!%p20450_p10), 3072, %s333_s23 }
  0x88   : > { %s18065_s27 = scalar_lea.vmem (!%p20450_p10), [#allocation2], %s15901_s16 }
  0x8c   : > { %17773 = dma.done.wait (%p20451_p7), %s334_s2, 49152  }
  0x8d   : > { %17775 = vsyncadd (%p20451_p7), %s334_s2, 4294918144  ;;  %s342_s11 = sand.u32 1, %s17879_s28   ;;  %s13925_s12 = sshll.u32 %s333_s23, 10 }
  0x8e   : > { %s343_s15 = scalar_lea.sflag [#allocation6], %s342_s11  ;;  %s18072_s22 = scalar_lea.vmem [#allocation5], %s13925_s12 }
  0x8f   : > { %17777 = dma.done.wait (%p20451_p7), %s343_s15, 81920  }
  0x90   : > { %17779 = vsyncadd (%p20451_p7), %s343_s15, 4294885376  ;;  %s13926_s8 = sshll.u32 %s333_s23, 12  ;;  %s361_s21 = scalar_lea.sflag [#allocation9], %s333_s23 }
  0x91   : > { %s18078_s18 = scalar_lea.vmem [#allocation7], %s13926_s8  ;;  %s18080_s13 = scalar_lea.vmem [#allocation8], %s13926_s8 }
  0x92   : > { %17781 = dma.done.wait (%p20451_p7), %s361_s21, 65536  }
  0x93   : > { %17783 = vsyncadd (%p20451_p7), %s361_s21, 4294901760  ;;  %p410_p8 = scmp.lt.s32.totalorder %s17879_s28, 5  ;;  %p13930_p3 = scmp.ne.s32.totalorder %s17879_s28, 0 }
  0x94   : > { %v420_v0 = vld [vmem:[%s20429_s0] sm:$0xff] (!%p13930_p3)  ;;  %v421_v1 = vld [vmem:[%s20429_s0 + $0x8] sm:$0xff] (!%p13930_p3)  ;;  %v422_v2 = vld [vmem:[%s20429_s0 + $0x10] sm:$0xff] (!%p13930_p3) }
  0x95   : > { %s411_s24 = scalar_select %p410_p8, %s17879_s28, 5 }
  0x96   : > { %419 = sbr.rel (%p13930_p3) target bundleno = 157 (0x9d), region = 64  ;;  %428 = vst [vmem:[#allocation10] sm:$0xff] (!%p13930_p3), %v420_v0  ;;  %429 = vst [vmem:[#allocation10 + $0x8] sm:$0xff] (!%p13930_p3), %v421_v1  ;;  %v423_v3 = vld [vmem:[%s20429_s0 + $0x18] sm:$0xff] (!%p13930_p3)  ;;  %v424_v4 = vld [vmem:[%s20429_s0 + $0x20] sm:$0xff] (!%p13930_p3) }
  0x97   : > { %s15506_s14 = sshll.u32 %s411_s24, 7  ;;  %430 = vst [vmem:[#allocation10 + $0x10] sm:$0xff] (!%p13930_p3), %v422_v2  ;;  %v425_v5 = vld [vmem:[%s20429_s0 + $0x28] sm:$0xff] (!%p13930_p3)  ;;  %431 = vst [vmem:[#allocation10 + $0x18] sm:$0xff] (!%p13930_p3), %v423_v3  ;;  %v426_v6 = vld [vmem:[%s20429_s0 + $0x30] sm:$0xff] (!%p13930_p3) }
  0x98   : > { %s18091_s17 = scalar_lea.vmem %s20436_s7, %s15506_s14  ;;  %432 = vst [vmem:[#allocation10 + $0x20] sm:$0xff] (!%p13930_p3), %v424_v4  ;;  %433 = vst [vmem:[#allocation10 + $0x28] sm:$0xff] (!%p13930_p3), %v425_v5  ;;  %v427_v7 = vld [vmem:[%s20429_s0 + $0x38] sm:$0xff] (!%p13930_p3) }
  0x99   : > { %434 = vst [vmem:[#allocation10 + $0x30] sm:$0xff] (!%p13930_p3), %v426_v6  ;;  %435 = vst [vmem:[#allocation10 + $0x38] sm:$0xff] (!%p13930_p3), %v427_v7 }
  0x9d PF: > { %v15994_v8 = vld [vmem:[%s18065_s27 + $0x4] ss:$48 sps:$4 sm:$0xff]   ;;  %v15996_v9 = vld [vmem:[%s18065_s27] ss:$48 sps:$4 sm:$0xff]   ;;  %v16009_v14 = vld [vmem:[%s18065_s27 + $0xc] ss:$48 sps:$4 sm:$0xff]  }
  0x9e   : > { %2754 = vmatprep.subr.bf16.mxu0 %v15994_v8  ;;  %v15997_v10 = vld [vmem:[%s18065_s27 + $0x64] ss:$48 sps:$4 sm:$0xff]   ;;  %v15999_v11 = vld [vmem:[%s18065_s27 + $0x60] ss:$48 sps:$4 sm:$0xff]   ;;  %v16013_v16 = vld [vmem:[%s18065_s27 + $0x8] ss:$48 sps:$4 sm:$0xff]   ;;  %2840 = vmatprep.subr.bf16.mxu1 %v16009_v14 }
  0x9f   : > { %2755 = vmatpush1.bf16.msra.mxu0 %v15996_v9  ;;  %v16000_v12 = vld [vmem:[%s18065_s27 + $0xc4] ss:$48 sps:$4 sm:$0xff]   ;;  %v16002_v13 = vld [vmem:[%s18065_s27 + $0xc0] ss:$48 sps:$4 sm:$0xff]   ;;  %2841 = vmatpush1.bf16.msra.mxu1 %v16013_v16  ;;  %v16015_v17 = vld [vmem:[%s18065_s27 + $0x6c] ss:$48 sps:$4 sm:$0xff]  }
  0xa0   : > { %2756 = vmatprep.subr.bf16.mxu0 %v15997_v10  ;;  %v16003_v15 = vld [vmem:[%s18065_s27 + $0x124] ss:$48 sps:$4 sm:$0xff]   ;;  %v16005_v18 = vld [vmem:[%s18065_s27 + $0x120] ss:$48 sps:$4 sm:$0xff]   ;;  %v16019_v20 = vld [vmem:[%s18065_s27 + $0x68] ss:$48 sps:$4 sm:$0xff]   ;;  %2842 = vmatprep.subr.bf16.mxu1 %v16015_v17 }
  0xa1   : > { %v16006_v19 = vld [vmem:[%s18065_s27 + $0x184] ss:$48 sps:$4 sm:$0xff]   ;;  %v16021_v21 = vld [vmem:[%s18065_s27 + $0xcc] ss:$48 sps:$4 sm:$0xff]   ;;  %v16008_v22 = vld [vmem:[%s18065_s27 + $0x180] ss:$48 sps:$4 sm:$0xff]  }
  0xa2   : > { %v16025_v23 = vld [vmem:[%s18065_s27 + $0xc8] ss:$48 sps:$4 sm:$0xff]   ;;  %v16027_v24 = vld [vmem:[%s18065_s27 + $0x12c] ss:$48 sps:$4 sm:$0xff]   ;;  %v16011_v25 = vld [vmem:[%s18065_s27 + $0x1e4] ss:$48 sps:$4 sm:$0xff]  }
  0xa3   : > { %2757 = vmatpush1.bf16.msra.mxu0 %v15999_v11  ;;  %2843 = vmatpush1.bf16.msra.mxu1 %v16019_v20  ;;  %v16031_v26 = vld [vmem:[%s18065_s27 + $0x128] ss:$48 sps:$4 sm:$0xff]   ;;  %v16014_v27 = vld [vmem:[%s18065_s27 + $0x1e0] ss:$48 sps:$4 sm:$0xff]   ;;  %v16033_v28 = vld [vmem:[%s18065_s27 + $0x18c] ss:$48 sps:$4 sm:$0xff]  }
  0xa4   : > { %2758 = vmatprep.subr.bf16.mxu0 %v16000_v12  ;;  %2844 = vmatprep.subr.bf16.mxu1 %v16021_v21  ;;  %v16017_v29 = vld [vmem:[%s18065_s27 + $0x244] ss:$48 sps:$4 sm:$0xff]   ;;  %v16020_v30 = vld [vmem:[%s18065_s27 + $0x240] ss:$48 sps:$4 sm:$0xff]   ;;  %v16037_v31 = vld [vmem:[%s18065_s27 + $0x188] ss:$48 sps:$4 sm:$0xff]  }
  0xa5   : > { %v16039_v32 = vld [vmem:[%s18065_s27 + $0x1ec] ss:$48 sps:$4 sm:$0xff]   ;;  %v16023_v33 = vld [vmem:[%s18065_s27 + $0x2a4] ss:$48 sps:$4 sm:$0xff]   ;;  %v16043_v34 = vld [vmem:[%s18065_s27 + $0x1e8] ss:$48 sps:$4 sm:$0xff]  }
  0xa6   : > { %v16026_v35 = vld [vmem:[%s18065_s27 + $0x2a0] ss:$48 sps:$4 sm:$0xff]   ;;  %v16045_v36 = vld [vmem:[%s18065_s27 + $0x24c] ss:$48 sps:$4 sm:$0xff]   ;;  %v16029_v37 = vld [vmem:[%s18065_s27 + $0x304] ss:$48 sps:$4 sm:$0xff]  }
  0xa7   : > { %2759 = vmatpush1.bf16.msra.mxu0 %v16002_v13  ;;  %2845 = vmatpush1.bf16.msra.mxu1 %v16025_v23  ;;  %v16032_v38 = vld [vmem:[%s18065_s27 + $0x300] ss:$48 sps:$4 sm:$0xff]   ;;  %v16049_v39 = vld [vmem:[%s18065_s27 + $0x248] ss:$48 sps:$4 sm:$0xff]   ;;  %v16051_v40 = vld [vmem:[%s18065_s27 + $0x2ac] ss:$48 sps:$4 sm:$0xff]  }
  0xa8   : > { %2760 = vmatprep.subr.bf16.mxu0 %v16003_v15  ;;  %2846 = vmatprep.subr.bf16.mxu1 %v16027_v24  ;;  %v16035_v41 = vld [vmem:[%s18065_s27 + $0x364] ss:$48 sps:$4 sm:$0xff]   ;;  %v16055_v42 = vld [vmem:[%s18065_s27 + $0x2a8] ss:$48 sps:$4 sm:$0xff]   ;;  %v16038_v43 = vld [vmem:[%s18065_s27 + $0x360] ss:$48 sps:$4 sm:$0xff]  }
  0xa9   : > { %v16057_v44 = vld [vmem:[%s18065_s27 + $0x30c] ss:$48 sps:$4 sm:$0xff]   ;;  %v16041_v45 = vld [vmem:[%s18065_s27 + $0x3c4] ss:$48 sps:$4 sm:$0xff]   ;;  %v16061_v48 = vld [vmem:[%s18065_s27 + $0x308] ss:$48 sps:$4 sm:$0xff]  }
  0xaa   : > { %v437_v46 = vld [vmem:[#allocation10 + $0x8] sm:$0xff]  ;;  %v16044_v50 = vld [vmem:[%s18065_s27 + $0x3c0] ss:$48 sps:$4 sm:$0xff]   ;;  %v16047_v52 = vld [vmem:[%s18065_s27 + $0x424] ss:$48 sps:$4 sm:$0xff]   ;;  %vm17815_vm0 = vmmov 0  }
  0xab   : > { %2761 = vmatpush1.bf16.msra.mxu0 %v16005_v18  ;;  %2847 = vmatpush1.bf16.msra.mxu1 %v16031_v26  ;;  %v441_v47 = vld [vmem:[#allocation10 + $0x28] sm:$0xff]  ;;  %v16050_v53 = vld [vmem:[%s18065_s27 + $0x420] ss:$48 sps:$4 sm:$0xff]   ;;  %v16053_v56 = vld [vmem:[%s18065_s27 + $0x484] ss:$48 sps:$4 sm:$0xff]   ;;  %vm3276_vm1 = vcmask 523264  }
  0xac   : > { %2762 = vmatprep.subr.bf16.mxu0 %v16006_v19  ;;  %2848 = vmatprep.subr.bf16.mxu1 %v16033_v28  ;;  %v18157_v49 = vpack.c.bf16 %v441_v47, %v437_v46  ;;  %v16063_v51 = vld [vmem:[%s18065_s27 + $0x36c] ss:$48 sps:$4 sm:$0xff]   ;;  %v16067_v54 = vld [vmem:[%s18065_s27 + $0x368] ss:$48 sps:$4 sm:$0xff]   ;;  %v16056_v58 = vld [vmem:[%s18065_s27 + $0x480] ss:$48 sps:$4 sm:$0xff]  }
  0xad   : > { %v16069_v55 = vld [vmem:[%s18065_s27 + $0x3cc] ss:$48 sps:$4 sm:$0xff]   ;;  %v16073_v57 = vld [vmem:[%s18065_s27 + $0x3c8] ss:$48 sps:$4 sm:$0xff]   ;;  %v16059_v60 = vld [vmem:[%s18065_s27 + $0x4e4] ss:$48 sps:$4 sm:$0xff]  }
  0xae   : > { %2786 = vmatprep.mubr.bf16.mxu0 %v18157_v49  ;;  %2872 = vmatprep.mubr.bf16.mxu1 %v18157_v49  ;;  %v16075_v59 = vld [vmem:[%s18065_s27 + $0x42c] ss:$48 sps:$4 sm:$0xff]   ;;  %v16080_v61 = vld [vmem:[%s18065_s27 + $0x428] ss:$48 sps:$4 sm:$0xff]   ;;  %v16062_v62 = vld [vmem:[%s18065_s27 + $0x4e0] ss:$48 sps:$4 sm:$0xff]  }
  0xaf   : > { %2763 = vmatpush1.bf16.msra.mxu0 %v16008_v22  ;;  %2849 = vmatpush1.bf16.msra.mxu1 %v16037_v31  ;;  %v16081_v63 = vld [vmem:[%s18065_s27 + $0x48c] ss:$48 sps:$4 sm:$0xff]   ;;  %v16065_v0 = vld [vmem:[%s18065_s27 + $0x544] ss:$48 sps:$4 sm:$0xff]   ;;  %v16086_v1 = vld [vmem:[%s18065_s27 + $0x488] ss:$48 sps:$4 sm:$0xff]  }
  0xb0   : > { %2764 = vmatprep.subr.bf16.mxu0 %v16011_v25  ;;  %2850 = vmatprep.subr.bf16.mxu1 %v16039_v32  ;;  %v16068_v2 = vld [vmem:[%s18065_s27 + $0x540] ss:$48 sps:$4 sm:$0xff]   ;;  %v16087_v3 = vld [vmem:[%s18065_s27 + $0x4ec] ss:$48 sps:$4 sm:$0xff]   ;;  %v16071_v4 = vld [vmem:[%s18065_s27 + $0x5a4] ss:$48 sps:$4 sm:$0xff]  }
  0xb1   : > { %v16074_v5 = vld [vmem:[%s18065_s27 + $0x5a0] ss:$48 sps:$4 sm:$0xff]   ;;  %v16092_v7 = vld [vmem:[%s18065_s27 + $0x4e8] ss:$48 sps:$4 sm:$0xff]   ;;  %v16093_v9 = vld [vmem:[%s18065_s27 + $0x54c] ss:$48 sps:$4 sm:$0xff]  }
  0xb2   : > { %v436_v6 = vld [vmem:[#allocation10] sm:$0xff]  ;;  %v16098_v12 = vld [vmem:[%s18065_s27 + $0x548] ss:$48 sps:$4 sm:$0xff]   ;;  %v16099_v14 = vld [vmem:[%s18065_s27 + $0x5ac] ss:$48 sps:$4 sm:$0xff]   ;;  %vm3403_vm2 = vcmask 1043456  }
  0xb3   : > { %2765 = vmatpush1.bf16.msra.mxu0 %v16014_v27  ;;  %2851 = vmatpush1.bf16.msra.mxu1 %v16043_v34  ;;  %v440_v8 = vld [vmem:[#allocation10 + $0x20] sm:$0xff]  ;;  %v16104_v16 = vld [vmem:[%s18065_s27 + $0x5a8] ss:$48 sps:$4 sm:$0xff]   ;;  %v16107_v18 = vld [vmem:[%s18065_s27 + $0x60c] ss:$48 sps:$4 sm:$0xff]   ;;  %vm3375_vm4 = vcmask 64512  }
  0xb4   : > { %2766 = vmatprep.subr.bf16.mxu0 %v16017_v29  ;;  %2852 = vmatprep.subr.bf16.mxu1 %v16045_v36  ;;  %v16079_v10 = vld [vmem:[%s18065_s27 + $0x604] ss:$48 sps:$4 sm:$0xff]   ;;  %v18184_v11 = vpack.c.bf16 %v440_v8, %v436_v6  ;;  %v16077_v13 = vld [vmem:[%s18065_s27 + $0x600] ss:$48 sps:$4 sm:$0xff]   ;;  %v16105_v20 = vld [vmem:[%s18065_s27 + $0x608] ss:$48 sps:$4 sm:$0xff]  }
  0xb5   : > { %v16085_v15 = vld [vmem:[%s18065_s27 + $0x664] ss:$48 sps:$4 sm:$0xff]   ;;  %v16083_v17 = vld [vmem:[%s18065_s27 + $0x660] ss:$48 sps:$4 sm:$0xff]   ;;  %v16113_v22 = vld [vmem:[%s18065_s27 + $0x66c] ss:$48 sps:$4 sm:$0xff]  }
  0xb6   : > { %v16091_v19 = vld [vmem:[%s18065_s27 + $0x6c4] ss:$48 sps:$4 sm:$0xff]   ;;  %v16089_v21 = vld [vmem:[%s18065_s27 + $0x6c0] ss:$48 sps:$4 sm:$0xff]   ;;  %v16111_v24 = vld [vmem:[%s18065_s27 + $0x668] ss:$48 sps:$4 sm:$0xff]  }
  0xb7   : > { %2767 = vmatpush1.bf16.msra.mxu0 %v16020_v30  ;;  %2853 = vmatpush1.bf16.msra.mxu1 %v16049_v39  ;;  %v16097_v23 = vld [vmem:[%s18065_s27 + $0x724] ss:$48 sps:$4 sm:$0xff]   ;;  %v16095_v25 = vld [vmem:[%s18065_s27 + $0x720] ss:$48 sps:$4 sm:$0xff]   ;;  %v16119_v26 = vld [vmem:[%s18065_s27 + $0x6cc] ss:$48 sps:$4 sm:$0xff]  }
  0xb8   : > { %2768 = vmatprep.subr.bf16.mxu0 %v16023_v33  ;;  %2854 = vmatprep.subr.bf16.mxu1 %v16051_v40  ;;  %v16103_v27 = vld [vmem:[%s18065_s27 + $0x784] ss:$48 sps:$4 sm:$0xff]   ;;  %v16101_v28 = vld [vmem:[%s18065_s27 + $0x780] ss:$48 sps:$4 sm:$0xff]   ;;  %v16117_v29 = vld [vmem:[%s18065_s27 + $0x6c8] ss:$48 sps:$4 sm:$0xff]  }
  0xb9   : > { %v16110_v30 = vld [vmem:[%s18065_s27 + $0x7e4] ss:$48 sps:$4 sm:$0xff]   ;;  %v16125_v31 = vld [vmem:[%s18065_s27 + $0x72c] ss:$48 sps:$4 sm:$0xff]   ;;  %v16108_v36 = vld [vmem:[%s18065_s27 + $0x7e0] ss:$48 sps:$4 sm:$0xff]  }
  0xba   : > { %v439_v32 = vld [vmem:[#allocation10 + $0x18] sm:$0xff]  ;;  %v16114_v40 = vld [vmem:[%s18065_s27 + $0x840] ss:$48 sps:$4 sm:$0xff]   ;;  %v16128_v46 = vld [vmem:[%s18065_s27 + $0x904] ss:$48 sps:$4 sm:$0xff]   ;;  %p15928_p5 = scmp.eq.s32.totalorder %s17879_s28, 5 }
  0xbb   : > { %2769 = vmatpush1.bf16.msra.mxu0 %v16026_v35  ;;  %2855 = vmatpush1.bf16.msra.mxu1 %v16055_v42  ;;  %v443_v33 = vld [vmem:[#allocation10 + $0x38] sm:$0xff]  ;;  %v16122_v42 = vld [vmem:[%s18065_s27 + $0x8a4] ss:$48 sps:$4 sm:$0xff]  }
  0xbc   : > { %2770 = vmatprep.subr.bf16.mxu0 %v16029_v37  ;;  %2856 = vmatprep.subr.bf16.mxu1 %v16057_v44  ;;  %v18208_v34 = vpack.c.bf16 %v443_v33, %v439_v32  ;;  %v16123_v35 = vld [vmem:[%s18065_s27 + $0x728] ss:$48 sps:$4 sm:$0xff]   ;;  %v16131_v37 = vld [vmem:[%s18065_s27 + $0x78c] ss:$48 sps:$4 sm:$0xff]   ;;  %v16120_v44 = vld [vmem:[%s18065_s27 + $0x8a0] ss:$48 sps:$4 sm:$0xff]  }
  0xbd   : > { %v16129_v39 = vld [vmem:[%s18065_s27 + $0x788] ss:$48 sps:$4 sm:$0xff]   ;;  %v16179_v6 = vld [vmem:[%s18065_s27 + $0xa8c] ss:$48 sps:$4 sm:$0xff]   ;;  %v16192_v33 = vld [vmem:[%s18065_s27 + $0x130] ss:$48 sps:$4 sm:$0xff]  }
  0xbe   : > { %v16141_v47 = vld [vmem:[%s18065_s27 + $0x848] ss:$48 sps:$4 sm:$0xff]  }
  0xbf   : > { %2771 = vmatpush1.bf16.msra.mxu0 %v16032_v38  ;;  %2857 = vmatpush1.bf16.msra.mxu1 %v16061_v48  ;;  %v16116_v38 = vld [vmem:[%s18065_s27 + $0x844] ss:$48 sps:$4 sm:$0xff]   ;;  %v16126_v48 = vld [vmem:[%s18065_s27 + $0x900] ss:$48 sps:$4 sm:$0xff]   ;;  %v16177_v8 = vld [vmem:[%s18065_s27 + $0xa88] ss:$48 sps:$4 sm:$0xff]  }
  0xc0   : > { %2772 = vmatprep.subr.bf16.mxu0 %v16035_v41  ;;  %2858 = vmatprep.subr.bf16.mxu1 %v16063_v51  ;;  %v16137_v41 = vld [vmem:[%s18065_s27 + $0x7ec] ss:$48 sps:$4 sm:$0xff]   ;;  %v16134_v51 = vld [vmem:[%s18065_s27 + $0x964] ss:$48 sps:$4 sm:$0xff]   ;;  %v16207_v32 = vld [vmem:[%s18065_s27 + $0x78] ss:$48 sps:$4 sm:$0xff]  }
  0xc3   : > { %2773 = vmatpush1.bf16.msra.mxu0 %v16038_v43  ;;  %2859 = vmatpush1.bf16.msra.mxu1 %v16067_v54  ;;  %v16135_v43 = vld [vmem:[%s18065_s27 + $0x7e8] ss:$48 sps:$4 sm:$0xff]   ;;  %v16155_v54 = vld [vmem:[%s18065_s27 + $0x90c] ss:$48 sps:$4 sm:$0xff]  }
  0xc4   : > { %2774 = vmatprep.subr.bf16.mxu0 %v16041_v45  ;;  %2860 = vmatprep.subr.bf16.mxu1 %v16069_v55  ;;  %v16143_v45 = vld [vmem:[%s18065_s27 + $0x84c] ss:$48 sps:$4 sm:$0xff]   ;;  %v16140_v55 = vld [vmem:[%s18065_s27 + $0x9c4] ss:$48 sps:$4 sm:$0xff]  }
  0xc7   : > { %2775 = vmatpush1.bf16.msra.mxu0 %v16044_v50  ;;  %2861 = vmatpush1.bf16.msra.mxu1 %v16073_v57  ;;  %v16149_v50 = vld [vmem:[%s18065_s27 + $0x8ac] ss:$48 sps:$4 sm:$0xff]   ;;  %v16138_v57 = vld [vmem:[%s18065_s27 + $0x9c0] ss:$48 sps:$4 sm:$0xff]  }
  0xc8   : > { %2776 = vmatprep.subr.bf16.mxu0 %v16047_v52  ;;  %2862 = vmatprep.subr.bf16.mxu1 %v16075_v59  ;;  %v16147_v52 = vld [vmem:[%s18065_s27 + $0x8a8] ss:$48 sps:$4 sm:$0xff]   ;;  %v16146_v59 = vld [vmem:[%s18065_s27 + $0xa24] ss:$48 sps:$4 sm:$0xff]  }
  0xcb   : > { %2777 = vmatpush1.bf16.msra.mxu0 %v16050_v53  ;;  %2863 = vmatpush1.bf16.msra.mxu1 %v16080_v61  ;;  %v16132_v53 = vld [vmem:[%s18065_s27 + $0x960] ss:$48 sps:$4 sm:$0xff]  }
  0xcc   : > { %2778 = vmatprep.subr.bf16.mxu0 %v16053_v56  ;;  %2864 = vmatprep.subr.bf16.mxu1 %v16081_v63  ;;  %v16153_v56 = vld [vmem:[%s18065_s27 + $0x908] ss:$48 sps:$4 sm:$0xff]   ;;  %v16144_v61 = vld [vmem:[%s18065_s27 + $0xa20] ss:$48 sps:$4 sm:$0xff]   ;;  %v16152_v63 = vld [vmem:[%s18065_s27 + $0xa84] ss:$48 sps:$4 sm:$0xff]  }
  0xcf   : > { %2779 = vmatpush1.bf16.msra.mxu0 %v16056_v58  ;;  %2865 = vmatpush1.bf16.msra.mxu1 %v16086_v1  ;;  %v16161_v58 = vld [vmem:[%s18065_s27 + $0x96c] ss:$48 sps:$4 sm:$0xff]   ;;  %v16150_v1 = vld [vmem:[%s18065_s27 + $0xa80] ss:$48 sps:$4 sm:$0xff]  }
  0xd0   : > { %2780 = vmatprep.subr.bf16.mxu0 %v16059_v60  ;;  %2866 = vmatprep.subr.bf16.mxu1 %v16087_v3  ;;  %v16159_v60 = vld [vmem:[%s18065_s27 + $0x968] ss:$48 sps:$4 sm:$0xff]   ;;  %v16158_v3 = vld [vmem:[%s18065_s27 + $0xae4] ss:$48 sps:$4 sm:$0xff]  }
  0xd3   : > { %2781 = vmatpush1.bf16.msra.mxu0 %v16062_v62  ;;  %2867 = vmatpush1.bf16.msra.mxu1 %v16092_v7  ;;  %v16167_v62 = vld [vmem:[%s18065_s27 + $0x9cc] ss:$48 sps:$4 sm:$0xff]   ;;  %v16164_v7 = vld [vmem:[%s18065_s27 + $0xb44] ss:$48 sps:$4 sm:$0xff]  }
  0xd4   : > { %2782 = vmatprep.subr.bf16.mxu0 %v16065_v0  ;;  %2868 = vmatprep.subr.bf16.mxu1 %v16093_v9  ;;  %v16165_v0 = vld [vmem:[%s18065_s27 + $0x9c8] ss:$48 sps:$4 sm:$0xff]   ;;  %v16162_v9 = vld [vmem:[%s18065_s27 + $0xb40] ss:$48 sps:$4 sm:$0xff]  }
  0xd7   : > { %2783 = vmatpush1.bf16.msra.mxu0 %v16068_v2  ;;  %2869 = vmatpush1.bf16.msra.mxu1 %v16098_v12  ;;  %v16173_v2 = vld [vmem:[%s18065_s27 + $0xa2c] ss:$48 sps:$4 sm:$0xff]   ;;  %v16170_v12 = vld [vmem:[%s18065_s27 + $0xba4] ss:$48 sps:$4 sm:$0xff]  }
  0xd8   : > { %2784 = vmatprep.subr.bf16.mxu0 %v16071_v4  ;;  %2870 = vmatprep.subr.bf16.mxu1 %v16099_v14  ;;  %v16171_v4 = vld [vmem:[%s18065_s27 + $0xa28] ss:$48 sps:$4 sm:$0xff]   ;;  %v438_v14 = vld [vmem:[#allocation10 + $0x10] sm:$0xff] }
  0xdb   : > { %2785 = vmatpush1.bf16.msra.mxu0 %v16074_v5  ;;  %2871 = vmatpush1.bf16.msra.mxu1 %v16104_v16  ;;  %v16156_v5 = vld [vmem:[%s18065_s27 + $0xae0] ss:$48 sps:$4 sm:$0xff]  }
  0xdc   : > { %2797 = vmatprep.subr.bf16.mxu0 %v16079_v10  ;;  %2883 = vmatprep.subr.bf16.mxu1 %v16107_v18  ;;  %v16185_v10 = vld [vmem:[%s18065_s27 + $0xaec] ss:$48 sps:$4 sm:$0xff]   ;;  %v442_v16 = vld [vmem:[#allocation10 + $0x30] sm:$0xff] }
  0xdd   : > { %v16176_v18 = vld [vmem:[%s18065_s27 + $0x14] ss:$48 sps:$4 sm:$0xff]  }
  0xde   : > { %2787 = vmatmul.mubr.bf16.vlgmr.msra.gmra.mrb[0].mxu0 %v18184_v11  ;;  %2873 = vmatmul.mubr.bf16.vlgmr.msra.gmra.mrb[0].mxu1 %v18184_v11 }
  0xdf   : > { %2798 = vmatpush1.bf16.msra.mxu0 %v16077_v13  ;;  %2884 = vmatpush1.bf16.msra.mxu1 %v16105_v20  ;;  %v16168_v13 = vld [vmem:[%s18065_s27 + $0xba0] ss:$48 sps:$4 sm:$0xff]   ;;  %v16189_v20 = vld [vmem:[%s18065_s27 + $0xb48] ss:$48 sps:$4 sm:$0xff]  }
  0xe0   : > { %2799 = vmatprep.subr.bf16.mxu0 %v16085_v15  ;;  %2885 = vmatprep.subr.bf16.mxu1 %v16113_v22  ;;  %v16183_v15 = vld [vmem:[%s18065_s27 + $0xae8] ss:$48 sps:$4 sm:$0xff]   ;;  %v16197_v22 = vld [vmem:[%s18065_s27 + $0xbac] ss:$48 sps:$4 sm:$0xff]  }
  0xe1   : > { %2829 = vmatprep.mubr.bf16.mxu0 %v18208_v34  ;;  %2915 = vmatprep.mubr.bf16.mxu1 %v18208_v34 }
  0xe3   : > { %2800 = vmatpush1.bf16.msra.mxu0 %v16083_v17  ;;  %2886 = vmatpush1.bf16.msra.mxu1 %v16111_v24  ;;  %v16191_v17 = vld [vmem:[%s18065_s27 + $0xb4c] ss:$48 sps:$4 sm:$0xff]   ;;  %v16195_v24 = vld [vmem:[%s18065_s27 + $0xba8] ss:$48 sps:$4 sm:$0xff]  }
  0xe4   : > { %2801 = vmatprep.subr.bf16.mxu0 %v16091_v19  ;;  %2887 = vmatprep.subr.bf16.mxu1 %v16119_v26  ;;  %v18256_v19 = vpack.c.bf16 %v442_v16, %v438_v14  ;;  %v16203_v26 = vld [vmem:[%s18065_s27 + $0x1c] ss:$48 sps:$4 sm:$0xff]   ;;  %v16260_v14 = vld [vmem:[%s18065_s27 + $0x554] ss:$48 sps:$4 sm:$0xff]   ;;  %v16258_v16 = vld [vmem:[%s18065_s27 + $0x550] ss:$48 sps:$4 sm:$0xff]  }
  0xe7   : > { %2802 = vmatpush1.bf16.msra.mxu0 %v16089_v21  ;;  %2888 = vmatpush1.bf16.msra.mxu1 %v16117_v29  ;;  %v16174_v21 = vld [vmem:[%s18065_s27 + $0x10] ss:$48 sps:$4 sm:$0xff]  }
  0xe8   : > { %2803 = vmatprep.subr.bf16.mxu0 %v16097_v23  ;;  %2889 = vmatprep.subr.bf16.mxu1 %v16125_v31  ;;  %v16182_v23 = vld [vmem:[%s18065_s27 + $0x74] ss:$48 sps:$4 sm:$0xff]   ;;  %v16186_v29 = vld [vmem:[%s18065_s27 + $0xd0] ss:$48 sps:$4 sm:$0xff]  }
  0xe9   : > { %v16194_v31 = vld [vmem:[%s18065_s27 + $0x134] ss:$48 sps:$4 sm:$0xff]  }
  0xeb   : > { %2804 = vmatpush1.bf16.msra.mxu0 %v16095_v25  ;;  %2890 = vmatpush1.bf16.msra.mxu1 %v16123_v35  ;;  %v16180_v25 = vld [vmem:[%s18065_s27 + $0x70] ss:$48 sps:$4 sm:$0xff]   ;;  %v16215_v35 = vld [vmem:[%s18065_s27 + $0xdc] ss:$48 sps:$4 sm:$0xff]  }
  0xec   : > { %2805 = vmatprep.subr.bf16.mxu0 %v16103_v27  ;;  %2891 = vmatprep.subr.bf16.mxu1 %v16131_v37  ;;  %v16188_v27 = vld [vmem:[%s18065_s27 + $0xd4] ss:$48 sps:$4 sm:$0xff]   ;;  %v16213_v37 = vld [vmem:[%s18065_s27 + $0xd8] ss:$48 sps:$4 sm:$0xff]  }
  0xef   : > { %2806 = vmatpush1.bf16.msra.mxu0 %v16101_v28  ;;  %2892 = vmatpush1.bf16.msra.mxu1 %v16129_v39  ;;  %v16201_v28 = vld [vmem:[%s18065_s27 + $0x18] ss:$48 sps:$4 sm:$0xff]   ;;  %v16221_v39 = vld [vmem:[%s18065_s27 + $0x13c] ss:$48 sps:$4 sm:$0xff]  }
  0xf0   : > { %2807 = vmatprep.subr.bf16.mxu0 %v16110_v30  ;;  %2893 = vmatprep.subr.bf16.mxu1 %v16137_v41  ;;  %v16209_v30 = vld [vmem:[%s18065_s27 + $0x7c] ss:$48 sps:$4 sm:$0xff]   ;;  %v16219_v41 = vld [vmem:[%s18065_s27 + $0x138] ss:$48 sps:$4 sm:$0xff]  }
  0xf3   : > { %2808 = vmatpush1.bf16.msra.mxu0 %v16108_v36  ;;  %2894 = vmatpush1.bf16.msra.mxu1 %v16135_v43  ;;  %v16200_v36 = vld [vmem:[%s18065_s27 + $0x194] ss:$48 sps:$4 sm:$0xff]   ;;  %v16227_v43 = vld [vmem:[%s18065_s27 + $0x19c] ss:$48 sps:$4 sm:$0xff]  }
  0xf4   : > { %2809 = vmatprep.subr.bf16.mxu0 %v16116_v38  ;;  %2895 = vmatprep.subr.bf16.mxu1 %v16143_v45  ;;  %v16198_v38 = vld [vmem:[%s18065_s27 + $0x190] ss:$48 sps:$4 sm:$0xff]   ;;  %v16225_v45 = vld [vmem:[%s18065_s27 + $0x198] ss:$48 sps:$4 sm:$0xff]  }
  0xf7   : > { %2810 = vmatpush1.bf16.msra.mxu0 %v16114_v40  ;;  %2896 = vmatpush1.bf16.msra.mxu1 %v16141_v47  ;;  %v16206_v40 = vld [vmem:[%s18065_s27 + $0x1f4] ss:$48 sps:$4 sm:$0xff]   ;;  %v16233_v47 = vld [vmem:[%s18065_s27 + $0x1fc] ss:$48 sps:$4 sm:$0xff]  }
  0xf8   : > { %2811 = vmatprep.subr.bf16.mxu0 %v16122_v42  ;;  %2897 = vmatprep.subr.bf16.mxu1 %v16149_v50  ;;  %v16204_v42 = vld [vmem:[%s18065_s27 + $0x1f0] ss:$48 sps:$4 sm:$0xff]   ;;  %v16231_v50 = vld [vmem:[%s18065_s27 + $0x1f8] ss:$48 sps:$4 sm:$0xff]  }
  0xfb   : > { %2812 = vmatpush1.bf16.msra.mxu0 %v16120_v44  ;;  %2898 = vmatpush1.bf16.msra.mxu1 %v16147_v52  ;;  %v16212_v44 = vld [vmem:[%s18065_s27 + $0x254] ss:$48 sps:$4 sm:$0xff]   ;;  %v16239_v52 = vld [vmem:[%s18065_s27 + $0x25c] ss:$48 sps:$4 sm:$0xff]  }
  0xfc   : > { %2813 = vmatprep.subr.bf16.mxu0 %v16128_v46  ;;  %2899 = vmatprep.subr.bf16.mxu1 %v16155_v54  ;;  %v16210_v46 = vld [vmem:[%s18065_s27 + $0x250] ss:$48 sps:$4 sm:$0xff]   ;;  %v16237_v54 = vld [vmem:[%s18065_s27 + $0x258] ss:$48 sps:$4 sm:$0xff]  }
  0xff   : > { %2814 = vmatpush1.bf16.msra.mxu0 %v16126_v48  ;;  %2900 = vmatpush1.bf16.msra.mxu1 %v16153_v56  ;;  %v16218_v48 = vld [vmem:[%s18065_s27 + $0x2b4] ss:$48 sps:$4 sm:$0xff]   ;;  %v16245_v56 = vld [vmem:[%s18065_s27 + $0x2bc] ss:$48 sps:$4 sm:$0xff]  }
 0x100   : > { %2815 = vmatprep.subr.bf16.mxu0 %v16134_v51  ;;  %2901 = vmatprep.subr.bf16.mxu1 %v16161_v58  ;;  %v16216_v51 = vld [vmem:[%s18065_s27 + $0x2b0] ss:$48 sps:$4 sm:$0xff]   ;;  %v16243_v58 = vld [vmem:[%s18065_s27 + $0x2b8] ss:$48 sps:$4 sm:$0xff]  }
 0x103   : > { %2816 = vmatpush1.bf16.msra.mxu0 %v16132_v53  ;;  %2902 = vmatpush1.bf16.msra.mxu1 %v16159_v60  ;;  %v16224_v53 = vld [vmem:[%s18065_s27 + $0x314] ss:$48 sps:$4 sm:$0xff]   ;;  %v16251_v60 = vld [vmem:[%s18065_s27 + $0x31c] ss:$48 sps:$4 sm:$0xff]  }
 0x104   : > { %2817 = vmatprep.subr.bf16.mxu0 %v16140_v55  ;;  %2903 = vmatprep.subr.bf16.mxu1 %v16167_v62  ;;  %v16222_v55 = vld [vmem:[%s18065_s27 + $0x310] ss:$48 sps:$4 sm:$0xff]   ;;  %v16249_v62 = vld [vmem:[%s18065_s27 + $0x318] ss:$48 sps:$4 sm:$0xff]  }
 0x107   : > { %2818 = vmatpush1.bf16.msra.mxu0 %v16138_v57  ;;  %2904 = vmatpush1.bf16.msra.mxu1 %v16165_v0  ;;  %v16230_v57 = vld [vmem:[%s18065_s27 + $0x374] ss:$48 sps:$4 sm:$0xff]   ;;  %v16257_v0 = vld [vmem:[%s18065_s27 + $0x37c] ss:$48 sps:$4 sm:$0xff]  }
 0x108   : > { %2819 = vmatprep.subr.bf16.mxu0 %v16146_v59  ;;  %2905 = vmatprep.subr.bf16.mxu1 %v16173_v2  ;;  %v16228_v59 = vld [vmem:[%s18065_s27 + $0x370] ss:$48 sps:$4 sm:$0xff]   ;;  %v16255_v2 = vld [vmem:[%s18065_s27 + $0x378] ss:$48 sps:$4 sm:$0xff]  }
 0x10b   : > { %2820 = vmatpush1.bf16.msra.mxu0 %v16144_v61  ;;  %2906 = vmatpush1.bf16.msra.mxu1 %v16171_v4  ;;  %v16236_v61 = vld [vmem:[%s18065_s27 + $0x3d4] ss:$48 sps:$4 sm:$0xff]   ;;  %v16263_v4 = vld [vmem:[%s18065_s27 + $0x3dc] ss:$48 sps:$4 sm:$0xff]  }
 0x10c   : > { %2821 = vmatprep.subr.bf16.mxu0 %v16152_v63  ;;  %2907 = vmatprep.subr.bf16.mxu1 %v16179_v6  ;;  %v16234_v63 = vld [vmem:[%s18065_s27 + $0x3d0] ss:$48 sps:$4 sm:$0xff]   ;;  %v16261_v6 = vld [vmem:[%s18065_s27 + $0x3d8] ss:$48 sps:$4 sm:$0xff]  }
 0x10f   : > { %2822 = vmatpush1.bf16.msra.mxu0 %v16150_v1  ;;  %2908 = vmatpush1.bf16.msra.mxu1 %v16177_v8  ;;  %v16242_v1 = vld [vmem:[%s18065_s27 + $0x434] ss:$48 sps:$4 sm:$0xff]   ;;  %v16269_v8 = vld [vmem:[%s18065_s27 + $0x43c] ss:$48 sps:$4 sm:$0xff]  }
 0x110   : > { %2823 = vmatprep.subr.bf16.mxu0 %v16158_v3  ;;  %2909 = vmatprep.subr.bf16.mxu1 %v16185_v10  ;;  %v16240_v3 = vld [vmem:[%s18065_s27 + $0x430] ss:$48 sps:$4 sm:$0xff]   ;;  %v16267_v10 = vld [vmem:[%s18065_s27 + $0x438] ss:$48 sps:$4 sm:$0xff]  }
 0x113   : > { %2824 = vmatpush1.bf16.msra.mxu0 %v16156_v5  ;;  %2910 = vmatpush1.bf16.msra.mxu1 %v16183_v15  ;;  %v16248_v5 = vld [vmem:[%s18065_s27 + $0x494] ss:$48 sps:$4 sm:$0xff]   ;;  %v16273_v15 = vld [vmem:[%s18065_s27 + $0x498] ss:$48 sps:$4 sm:$0xff]  }
 0x114   : > { %2825 = vmatprep.subr.bf16.mxu0 %v16164_v7  ;;  %2911 = vmatprep.subr.bf16.mxu1 %v16191_v17  ;;  %v16246_v7 = vld [vmem:[%s18065_s27 + $0x490] ss:$48 sps:$4 sm:$0xff]   ;;  %v16281_v17 = vld [vmem:[%s18065_s27 + $0x4fc] ss:$48 sps:$4 sm:$0xff]  }
 0x117   : > { %2826 = vmatpush1.bf16.msra.mxu0 %v16162_v9  ;;  %2912 = vmatpush1.bf16.msra.mxu1 %v16189_v20  ;;  %v16254_v9 = vld [vmem:[%s18065_s27 + $0x4f4] ss:$48 sps:$4 sm:$0xff]   ;;  %v16279_v20 = vld [vmem:[%s18065_s27 + $0x4f8] ss:$48 sps:$4 sm:$0xff]  }
 0x118   : > { %2827 = vmatprep.subr.bf16.mxu0 %v16170_v12  ;;  %2913 = vmatprep.subr.bf16.mxu1 %v16197_v22  ;;  %v16252_v12 = vld [vmem:[%s18065_s27 + $0x4f0] ss:$48 sps:$4 sm:$0xff]   ;;  %v16287_v22 = vld [vmem:[%s18065_s27 + $0x55c] ss:$48 sps:$4 sm:$0xff]  }
 0x11b   : > { %2828 = vmatpush1.bf16.msra.mxu0 %v16168_v13  ;;  %2914 = vmatpush1.bf16.msra.mxu1 %v16195_v24  ;;  %v16275_v13 = vld [vmem:[%s18065_s27 + $0x49c] ss:$48 sps:$4 sm:$0xff]   ;;  %v16285_v24 = vld [vmem:[%s18065_s27 + $0x558] ss:$48 sps:$4 sm:$0xff]  }
 0x11c   : > { %2926 = vmatprep.subr.bf16.mxu0 %v16176_v18  ;;  %3012 = vmatprep.subr.bf16.mxu1 %v16203_v26  ;;  %v16266_v18 = vld [vmem:[%s18065_s27 + $0x5b4] ss:$48 sps:$4 sm:$0xff]   ;;  %v16293_v26 = vld [vmem:[%s18065_s27 + $0x5bc] ss:$48 sps:$4 sm:$0xff]  }
 0x11e   : > { %2830 = vmatmul.mubr.bf16.vlgmr.msra.gmra.mrb[0].mxu0 %v18256_v19  ;;  %2916 = vmatmul.mubr.bf16.vlgmr.msra.gmra.mrb[0].mxu1 %v18256_v19 }
 0x11f   : > { %2927 = vmatpush1.bf16.msra.mxu0 %v16174_v21  ;;  %2958 = vmatprep.mubr.bf16.mxu0 %v18157_v49  ;;  %v16264_v21 = vld [vmem:[%s18065_s27 + $0x5b0] ss:$48 sps:$4 sm:$0xff]  }
 0x120   : > { %2928 = vmatprep.subr.bf16.mxu0 %v16182_v23  ;;  %3013 = vmatpush1.bf16.msra.mxu1 %v16201_v28  ;;  %v16272_v23 = vld [vmem:[%s18065_s27 + $0x614] ss:$48 sps:$4 sm:$0xff]   ;;  %v16291_v28 = vld [vmem:[%s18065_s27 + $0x5b8] ss:$48 sps:$4 sm:$0xff]  }
 0x121   : > { %3044 = vmatprep.mubr.bf16.mxu1 %v18157_v49  ;;  %3014 = vmatprep.subr.bf16.mxu1 %v16209_v30  ;;  %v16299_v30 = vld [vmem:[%s18065_s27 + $0x61c] ss:$48 sps:$4 sm:$0xff]  }
 0x123   : > { %2929 = vmatpush1.bf16.msra.mxu0 %v16180_v25  ;;  %v16270_v25 = vld [vmem:[%s18065_s27 + $0x610] ss:$48 sps:$4 sm:$0xff]  }
 0x124   : > { %2930 = vmatprep.subr.bf16.mxu0 %v16188_v27  ;;  %3015 = vmatpush1.bf16.msra.mxu1 %v16207_v32  ;;  %v16278_v27 = vld [vmem:[%s18065_s27 + $0x674] ss:$48 sps:$4 sm:$0xff]   ;;  %v16297_v32 = vld [vmem:[%s18065_s27 + $0x618] ss:$48 sps:$4 sm:$0xff]  }
 0x125   : > { %3016 = vmatprep.subr.bf16.mxu1 %v16215_v35  ;;  %v16305_v35 = vld [vmem:[%s18065_s27 + $0x67c] ss:$48 sps:$4 sm:$0xff]  }
 0x127   : > { %2931 = vmatpush1.bf16.msra.mxu0 %v16186_v29  ;;  %v16276_v29 = vld [vmem:[%s18065_s27 + $0x670] ss:$48 sps:$4 sm:$0xff]  }
 0x128   : > { %2932 = vmatprep.subr.bf16.mxu0 %v16194_v31  ;;  %3017 = vmatpush1.bf16.msra.mxu1 %v16213_v37  ;;  %v16284_v31 = vld [vmem:[%s18065_s27 + $0x6d4] ss:$48 sps:$4 sm:$0xff]   ;;  %v16303_v37 = vld [vmem:[%s18065_s27 + $0x678] ss:$48 sps:$4 sm:$0xff]  }
 0x129   : > { %3018 = vmatprep.subr.bf16.mxu1 %v16221_v39  ;;  %v16311_v39 = vld [vmem:[%s18065_s27 + $0x6dc] ss:$48 sps:$4 sm:$0xff]  }
 0x12b   : > { %2933 = vmatpush1.bf16.msra.mxu0 %v16192_v33  ;;  %v16282_v33 = vld [vmem:[%s18065_s27 + $0x6d0] ss:$48 sps:$4 sm:$0xff]  }
 0x12c   : > { %2934 = vmatprep.subr.bf16.mxu0 %v16200_v36  ;;  %3019 = vmatpush1.bf16.msra.mxu1 %v16219_v41  ;;  %v16290_v36 = vld [vmem:[%s18065_s27 + $0x734] ss:$48 sps:$4 sm:$0xff]   ;;  %v16309_v41 = vld [vmem:[%s18065_s27 + $0x6d8] ss:$48 sps:$4 sm:$0xff]  }
 0x12d   : > { %3020 = vmatprep.subr.bf16.mxu1 %v16227_v43  ;;  %v16317_v43 = vld [vmem:[%s18065_s27 + $0x73c] ss:$48 sps:$4 sm:$0xff]  }
 0x12f   : > { %2935 = vmatpush1.bf16.msra.mxu0 %v16198_v38  ;;  %v16288_v38 = vld [vmem:[%s18065_s27 + $0x730] ss:$48 sps:$4 sm:$0xff]  }
 0x130   : > { %2936 = vmatprep.subr.bf16.mxu0 %v16206_v40  ;;  %3021 = vmatpush1.bf16.msra.mxu1 %v16225_v45  ;;  %v16296_v40 = vld [vmem:[%s18065_s27 + $0x794] ss:$48 sps:$4 sm:$0xff]   ;;  %v16315_v45 = vld [vmem:[%s18065_s27 + $0x738] ss:$48 sps:$4 sm:$0xff]  }
 0x131   : > { %3022 = vmatprep.subr.bf16.mxu1 %v16233_v47  ;;  %v16323_v47 = vld [vmem:[%s18065_s27 + $0x79c] ss:$48 sps:$4 sm:$0xff]  }
 0x133   : > { %2937 = vmatpush1.bf16.msra.mxu0 %v16204_v42  ;;  %v16294_v42 = vld [vmem:[%s18065_s27 + $0x790] ss:$48 sps:$4 sm:$0xff]  }
 0x134   : > { %2938 = vmatprep.subr.bf16.mxu0 %v16212_v44  ;;  %3023 = vmatpush1.bf16.msra.mxu1 %v16231_v50  ;;  %v16302_v44 = vld [vmem:[%s18065_s27 + $0x7f4] ss:$48 sps:$4 sm:$0xff]   ;;  %v16321_v50 = vld [vmem:[%s18065_s27 + $0x798] ss:$48 sps:$4 sm:$0xff]  }
 0x135   : > { %3024 = vmatprep.subr.bf16.mxu1 %v16239_v52  ;;  %v16329_v52 = vld [vmem:[%s18065_s27 + $0x7fc] ss:$48 sps:$4 sm:$0xff]  }
 0x137   : > { %2939 = vmatpush1.bf16.msra.mxu0 %v16210_v46  ;;  %v16300_v46 = vld [vmem:[%s18065_s27 + $0x7f0] ss:$48 sps:$4 sm:$0xff]  }
 0x138   : > { %2940 = vmatprep.subr.bf16.mxu0 %v16218_v48  ;;  %3025 = vmatpush1.bf16.msra.mxu1 %v16237_v54  ;;  %v16308_v48 = vld [vmem:[%s18065_s27 + $0x854] ss:$48 sps:$4 sm:$0xff]   ;;  %v16327_v54 = vld [vmem:[%s18065_s27 + $0x7f8] ss:$48 sps:$4 sm:$0xff]  }
 0x139   : > { %3026 = vmatprep.subr.bf16.mxu1 %v16245_v56  ;;  %v16335_v56 = vld [vmem:[%s18065_s27 + $0x85c] ss:$48 sps:$4 sm:$0xff]  }
 0x13b   : > { %2941 = vmatpush1.bf16.msra.mxu0 %v16216_v51  ;;  %v16306_v51 = vld [vmem:[%s18065_s27 + $0x850] ss:$48 sps:$4 sm:$0xff]  }
 0x13c   : > { %2942 = vmatprep.subr.bf16.mxu0 %v16224_v53  ;;  %3027 = vmatpush1.bf16.msra.mxu1 %v16243_v58  ;;  %v16314_v53 = vld [vmem:[%s18065_s27 + $0x8b4] ss:$48 sps:$4 sm:$0xff]   ;;  %v16333_v58 = vld [vmem:[%s18065_s27 + $0x858] ss:$48 sps:$4 sm:$0xff]  }
 0x13d   : > { %3028 = vmatprep.subr.bf16.mxu1 %v16251_v60  ;;  %v16341_v60 = vld [vmem:[%s18065_s27 + $0x8bc] ss:$48 sps:$4 sm:$0xff]  }
 0x13f   : > { %2943 = vmatpush1.bf16.msra.mxu0 %v16222_v55  ;;  %v16312_v55 = vld [vmem:[%s18065_s27 + $0x8b0] ss:$48 sps:$4 sm:$0xff]  }
 0x140   : > { %2944 = vmatprep.subr.bf16.mxu0 %v16230_v57  ;;  %3029 = vmatpush1.bf16.msra.mxu1 %v16249_v62  ;;  %v16320_v57 = vld [vmem:[%s18065_s27 + $0x914] ss:$48 sps:$4 sm:$0xff]   ;;  %v16339_v62 = vld [vmem:[%s18065_s27 + $0x8b8] ss:$48 sps:$4 sm:$0xff]  }
 0x141   : > { %3030 = vmatprep.subr.bf16.mxu1 %v16257_v0  ;;  %v16347_v0 = vld [vmem:[%s18065_s27 + $0x91c] ss:$48 sps:$4 sm:$0xff]  }
 0x143   : > { %2945 = vmatpush1.bf16.msra.mxu0 %v16228_v59  ;;  %v16318_v59 = vld [vmem:[%s18065_s27 + $0x910] ss:$48 sps:$4 sm:$0xff]  }
 0x144   : > { %2946 = vmatprep.subr.bf16.mxu0 %v16236_v61  ;;  %3031 = vmatpush1.bf16.msra.mxu1 %v16255_v2  ;;  %v16326_v61 = vld [vmem:[%s18065_s27 + $0x974] ss:$48 sps:$4 sm:$0xff]   ;;  %v16345_v2 = vld [vmem:[%s18065_s27 + $0x918] ss:$48 sps:$4 sm:$0xff]  }
 0x145   : > { %3032 = vmatprep.subr.bf16.mxu1 %v16263_v4  ;;  %v16353_v4 = vld [vmem:[%s18065_s27 + $0x97c] ss:$48 sps:$4 sm:$0xff]  }
 0x147   : > { %2947 = vmatpush1.bf16.msra.mxu0 %v16234_v63  ;;  %v16324_v63 = vld [vmem:[%s18065_s27 + $0x970] ss:$48 sps:$4 sm:$0xff]  }
 0x148   : > { %2948 = vmatprep.subr.bf16.mxu0 %v16242_v1  ;;  %3033 = vmatpush1.bf16.msra.mxu1 %v16261_v6  ;;  %v16332_v1 = vld [vmem:[%s18065_s27 + $0x9d4] ss:$48 sps:$4 sm:$0xff]   ;;  %v16351_v6 = vld [vmem:[%s18065_s27 + $0x978] ss:$48 sps:$4 sm:$0xff]  }
 0x149   : > { %3034 = vmatprep.subr.bf16.mxu1 %v16269_v8  ;;  %v16359_v8 = vld [vmem:[%s18065_s27 + $0x9dc] ss:$48 sps:$4 sm:$0xff]  }
 0x14b   : > { %2949 = vmatpush1.bf16.msra.mxu0 %v16240_v3  ;;  %v16330_v3 = vld [vmem:[%s18065_s27 + $0x9d0] ss:$48 sps:$4 sm:$0xff]  }
 0x14c   : > { %2950 = vmatprep.subr.bf16.mxu0 %v16248_v5  ;;  %3035 = vmatpush1.bf16.msra.mxu1 %v16267_v10  ;;  %v16338_v5 = vld [vmem:[%s18065_s27 + $0xa34] ss:$48 sps:$4 sm:$0xff]   ;;  %v16357_v10 = vld [vmem:[%s18065_s27 + $0x9d8] ss:$48 sps:$4 sm:$0xff]  }
 0x14d   : > { %3036 = vmatprep.subr.bf16.mxu1 %v16275_v13  ;;  %v16365_v13 = vld [vmem:[%s18065_s27 + $0xa3c] ss:$48 sps:$4 sm:$0xff]  }
 0x14f   : > { %2951 = vmatpush1.bf16.msra.mxu0 %v16246_v7  ;;  %v16336_v7 = vld [vmem:[%s18065_s27 + $0xa30] ss:$48 sps:$4 sm:$0xff]  }
 0x150   : > { %2952 = vmatprep.subr.bf16.mxu0 %v16254_v9  ;;  %3037 = vmatpush1.bf16.msra.mxu1 %v16273_v15  ;;  %v16344_v9 = vld [vmem:[%s18065_s27 + $0xa94] ss:$48 sps:$4 sm:$0xff]   ;;  %v16363_v15 = vld [vmem:[%s18065_s27 + $0xa38] ss:$48 sps:$4 sm:$0xff]  }
 0x151   : > { %3038 = vmatprep.subr.bf16.mxu1 %v16281_v17  ;;  %v16368_v17 = vld [vmem:[%s18065_s27 + $0xa9c] ss:$48 sps:$4 sm:$0xff]  }
 0x153   : > { %2953 = vmatpush1.bf16.msra.mxu0 %v16252_v12  ;;  %v16342_v12 = vld [vmem:[%s18065_s27 + $0xa90] ss:$48 sps:$4 sm:$0xff]  }
 0x154   : > { %2954 = vmatprep.subr.bf16.mxu0 %v16260_v14  ;;  %3039 = vmatpush1.bf16.msra.mxu1 %v16279_v20  ;;  %v16350_v14 = vld [vmem:[%s18065_s27 + $0xaf4] ss:$48 sps:$4 sm:$0xff]   ;;  %v16366_v20 = vld [vmem:[%s18065_s27 + $0xa98] ss:$48 sps:$4 sm:$0xff]  }
 0x155   : > { %3040 = vmatprep.subr.bf16.mxu1 %v16287_v22  ;;  %v16371_v22 = vld [vmem:[%s18065_s27 + $0xafc] ss:$48 sps:$4 sm:$0xff]  }
 0x157   : > { %2955 = vmatpush1.bf16.msra.mxu0 %v16258_v16  ;;  %v16348_v16 = vld [vmem:[%s18065_s27 + $0xaf0] ss:$48 sps:$4 sm:$0xff]  }
 0x158   : > { %2956 = vmatprep.subr.bf16.mxu0 %v16266_v18  ;;  %3041 = vmatpush1.bf16.msra.mxu1 %v16285_v24  ;;  %v16356_v18 = vld [vmem:[%s18065_s27 + $0xb54] ss:$48 sps:$4 sm:$0xff]   ;;  %v16369_v24 = vld [vmem:[%s18065_s27 + $0xaf8] ss:$48 sps:$4 sm:$0xff]  }
 0x159   : > { %3042 = vmatprep.subr.bf16.mxu1 %v16293_v26  ;;  %v16374_v26 = vld [vmem:[%s18065_s27 + $0xb5c] ss:$48 sps:$4 sm:$0xff]  }
 0x15b   : > { %2957 = vmatpush1.bf16.msra.mxu0 %v16264_v21  ;;  %v16354_v21 = vld [vmem:[%s18065_s27 + $0xb50] ss:$48 sps:$4 sm:$0xff]  }
 0x15c   : > { %2969 = vmatprep.subr.bf16.mxu0 %v16272_v23  ;;  %3043 = vmatpush1.bf16.msra.mxu1 %v16291_v28  ;;  %v16362_v23 = vld [vmem:[%s18065_s27 + $0xbb4] ss:$48 sps:$4 sm:$0xff]   ;;  %v16372_v28 = vld [vmem:[%s18065_s27 + $0xb58] ss:$48 sps:$4 sm:$0xff]  }
 0x15d   : > { %3055 = vmatprep.subr.bf16.mxu1 %v16299_v30  ;;  %v16378_v30 = vld [vmem:[%s18065_s27 + $0x20] ss:$48 sps:$4 sm:$0xff]  }
 0x15e   : > { %2959 = vmatmul.mubr.bf16.vlgmr.msra.gmra.mrb[4].mxu0 %v18184_v11 }
 0x15f   : > { %2970 = vmatpush1.bf16.msra.mxu0 %v16270_v25  ;;  %3001 = vmatprep.mubr.bf16.mxu0 %v18208_v34  ;;  %v16360_v25 = vld [vmem:[%s18065_s27 + $0xbb0] ss:$48 sps:$4 sm:$0xff]  }
 0x160   : > { %2971 = vmatprep.subr.bf16.mxu0 %v16278_v27  ;;  %3045 = vmatmul.mubr.bf16.vlgmr.msra.gmra.mrb[4].mxu1 %v18184_v11  ;;  %v16380_v27 = vld [vmem:[%s18065_s27 + $0x24] ss:$48 sps:$4 sm:$0xff]  }
 0x161   : > { %3056 = vmatpush1.bf16.msra.mxu1 %v16297_v32  ;;  %3087 = vmatprep.mubr.bf16.mxu1 %v18208_v34  ;;  %v16383_v32 = vld [vmem:[%s18065_s27 + $0x84] ss:$48 sps:$4 sm:$0xff]  }
 0x162   : > { %3057 = vmatprep.subr.bf16.mxu1 %v16305_v35  ;;  %v16386_v35 = vld [vmem:[%s18065_s27 + $0x2c] ss:$48 sps:$4 sm:$0xff]  }
 0x163   : > { %2972 = vmatpush1.bf16.msra.mxu0 %v16276_v29  ;;  %v16377_v29 = vld [vmem:[%s18065_s27 + $0xbbc] ss:$48 sps:$4 sm:$0xff]  }
 0x164   : > { %2973 = vmatprep.subr.bf16.mxu0 %v16284_v31  ;;  %v16375_v31 = vld [vmem:[%s18065_s27 + $0xbb8] ss:$48 sps:$4 sm:$0xff]  }
 0x165   : > { %3058 = vmatpush1.bf16.msra.mxu1 %v16303_v37  ;;  %v16384_v37 = vld [vmem:[%s18065_s27 + $0x28] ss:$48 sps:$4 sm:$0xff]  }
 0x166   : > { %3059 = vmatprep.subr.bf16.mxu1 %v16311_v39  ;;  %v16392_v39 = vld [vmem:[%s18065_s27 + $0x8c] ss:$48 sps:$4 sm:$0xff]  }
 0x167   : > { %2974 = vmatpush1.bf16.msra.mxu0 %v16282_v33  ;;  %v16381_v33 = vld [vmem:[%s18065_s27 + $0x80] ss:$48 sps:$4 sm:$0xff]  }
 0x168   : > { %2975 = vmatprep.subr.bf16.mxu0 %v16290_v36  ;;  %v16389_v36 = vld [vmem:[%s18065_s27 + $0xe4] ss:$48 sps:$4 sm:$0xff]  }
 0x169   : > { %3060 = vmatpush1.bf16.msra.mxu1 %v16309_v41  ;;  %v16390_v41 = vld [vmem:[%s18065_s27 + $0x88] ss:$48 sps:$4 sm:$0xff]  }
 0x16a   : > { %3061 = vmatprep.subr.bf16.mxu1 %v16317_v43  ;;  %v16398_v43 = vld [vmem:[%s18065_s27 + $0xec] ss:$48 sps:$4 sm:$0xff]  }
 0x16b   : > { %2976 = vmatpush1.bf16.msra.mxu0 %v16288_v38  ;;  %v16387_v38 = vld [vmem:[%s18065_s27 + $0xe0] ss:$48 sps:$4 sm:$0xff]  }
 0x16c   : > { %2977 = vmatprep.subr.bf16.mxu0 %v16296_v40  ;;  %v16395_v40 = vld [vmem:[%s18065_s27 + $0x144] ss:$48 sps:$4 sm:$0xff]  }
 0x16d   : > { %3062 = vmatpush1.bf16.msra.mxu1 %v16315_v45  ;;  %v16396_v45 = vld [vmem:[%s18065_s27 + $0xe8] ss:$48 sps:$4 sm:$0xff]  }
 0x16e   : > { %3063 = vmatprep.subr.bf16.mxu1 %v16323_v47  ;;  %v16404_v47 = vld [vmem:[%s18065_s27 + $0x14c] ss:$48 sps:$4 sm:$0xff]  }
 0x16f   : > { %2978 = vmatpush1.bf16.msra.mxu0 %v16294_v42  ;;  %v16393_v42 = vld [vmem:[%s18065_s27 + $0x140] ss:$48 sps:$4 sm:$0xff]  }
 0x170   : > { %2979 = vmatprep.subr.bf16.mxu0 %v16302_v44  ;;  %v16401_v44 = vld [vmem:[%s18065_s27 + $0x1a4] ss:$48 sps:$4 sm:$0xff]  }
 0x171   : > { %3064 = vmatpush1.bf16.msra.mxu1 %v16321_v50  ;;  %v16402_v50 = vld [vmem:[%s18065_s27 + $0x148] ss:$48 sps:$4 sm:$0xff]  }
 0x172   : > { %3065 = vmatprep.subr.bf16.mxu1 %v16329_v52  ;;  %v16413_v52 = vld [vmem:[%s18065_s27 + $0x264] ss:$48 sps:$4 sm:$0xff]  }
 0x173   : > { %2980 = vmatpush1.bf16.msra.mxu0 %v16300_v46  ;;  %v16399_v46 = vld [vmem:[%s18065_s27 + $0x1a0] ss:$48 sps:$4 sm:$0xff]  }
 0x174   : > { %2981 = vmatprep.subr.bf16.mxu0 %v16308_v48  ;;  %v16407_v48 = vld [vmem:[%s18065_s27 + $0x204] ss:$48 sps:$4 sm:$0xff]  }
 0x175   : > { %3066 = vmatpush1.bf16.msra.mxu1 %v16327_v54  ;;  %v16411_v54 = vld [vmem:[%s18065_s27 + $0x260] ss:$48 sps:$4 sm:$0xff]  }
 0x176   : > { %3067 = vmatprep.subr.bf16.mxu1 %v16335_v56  ;;  %v16419_v56 = vld [vmem:[%s18065_s27 + $0x2c4] ss:$48 sps:$4 sm:$0xff]  }
 0x177   : > { %2982 = vmatpush1.bf16.msra.mxu0 %v16306_v51  ;;  %v16405_v51 = vld [vmem:[%s18065_s27 + $0x200] ss:$48 sps:$4 sm:$0xff]  }
 0x178   : > { %2983 = vmatprep.subr.bf16.mxu0 %v16314_v53  ;;  %v16408_v53 = vld [vmem:[%s18065_s27 + $0x1a8] ss:$48 sps:$4 sm:$0xff]  }
 0x179   : > { %3068 = vmatpush1.bf16.msra.mxu1 %v16333_v58  ;;  %v16417_v58 = vld [vmem:[%s18065_s27 + $0x2c0] ss:$48 sps:$4 sm:$0xff]  }
 0x17a   : > { %3069 = vmatprep.subr.bf16.mxu1 %v16341_v60  ;;  %v16425_v60 = vld [vmem:[%s18065_s27 + $0x324] ss:$48 sps:$4 sm:$0xff]  }
 0x17b   : > { %2984 = vmatpush1.bf16.msra.mxu0 %v16312_v55  ;;  %v16416_v55 = vld [vmem:[%s18065_s27 + $0x20c] ss:$48 sps:$4 sm:$0xff]  }
 0x17c   : > { %2985 = vmatprep.subr.bf16.mxu0 %v16320_v57  ;;  %v16414_v57 = vld [vmem:[%s18065_s27 + $0x208] ss:$48 sps:$4 sm:$0xff]  }
 0x17d   : > { %3070 = vmatpush1.bf16.msra.mxu1 %v16339_v62  ;;  %v16423_v62 = vld [vmem:[%s18065_s27 + $0x320] ss:$48 sps:$4 sm:$0xff]  }
 0x17e   : > { %3071 = vmatprep.subr.bf16.mxu1 %v16347_v0  ;;  %v16431_v0 = vld [vmem:[%s18065_s27 + $0x384] ss:$48 sps:$4 sm:$0xff]  }
 0x17f   : > { %2986 = vmatpush1.bf16.msra.mxu0 %v16318_v59  ;;  %v16422_v59 = vld [vmem:[%s18065_s27 + $0x26c] ss:$48 sps:$4 sm:$0xff]  }
 0x180   : > { %2987 = vmatprep.subr.bf16.mxu0 %v16326_v61  ;;  %v16420_v61 = vld [vmem:[%s18065_s27 + $0x268] ss:$48 sps:$4 sm:$0xff]  }
 0x181   : > { %3072 = vmatpush1.bf16.msra.mxu1 %v16345_v2  ;;  %v16429_v2 = vld [vmem:[%s18065_s27 + $0x380] ss:$48 sps:$4 sm:$0xff]  }
 0x182   : > { %3073 = vmatprep.subr.bf16.mxu1 %v16353_v4  ;;  %v16437_v4 = vld [vmem:[%s18065_s27 + $0x3e4] ss:$48 sps:$4 sm:$0xff]  }
 0x183   : > { %2988 = vmatpush1.bf16.msra.mxu0 %v16324_v63  ;;  %v16428_v63 = vld [vmem:[%s18065_s27 + $0x2cc] ss:$48 sps:$4 sm:$0xff]  }
 0x184   : > { %2989 = vmatprep.subr.bf16.mxu0 %v16332_v1  ;;  %v16426_v1 = vld [vmem:[%s18065_s27 + $0x2c8] ss:$48 sps:$4 sm:$0xff]  }
 0x185   : > { %3074 = vmatpush1.bf16.msra.mxu1 %v16351_v6  ;;  %v16435_v6 = vld [vmem:[%s18065_s27 + $0x3e0] ss:$48 sps:$4 sm:$0xff]  }
 0x186   : > { %3075 = vmatprep.subr.bf16.mxu1 %v16359_v8  ;;  %v16443_v8 = vld [vmem:[%s18065_s27 + $0x444] ss:$48 sps:$4 sm:$0xff]  }
 0x187   : > { %2990 = vmatpush1.bf16.msra.mxu0 %v16330_v3  ;;  %v16434_v3 = vld [vmem:[%s18065_s27 + $0x32c] ss:$48 sps:$4 sm:$0xff]  }
 0x188   : > { %2991 = vmatprep.subr.bf16.mxu0 %v16338_v5  ;;  %v16432_v5 = vld [vmem:[%s18065_s27 + $0x328] ss:$48 sps:$4 sm:$0xff]  }
 0x189   : > { %3076 = vmatpush1.bf16.msra.mxu1 %v16357_v10  ;;  %v16441_v10 = vld [vmem:[%s18065_s27 + $0x440] ss:$48 sps:$4 sm:$0xff]  }
 0x18a   : > { %3077 = vmatprep.subr.bf16.mxu1 %v16365_v13  ;;  %v16449_v13 = vld [vmem:[%s18065_s27 + $0x4a4] ss:$48 sps:$4 sm:$0xff]  }
 0x18b   : > { %2992 = vmatpush1.bf16.msra.mxu0 %v16336_v7  ;;  %v16440_v7 = vld [vmem:[%s18065_s27 + $0x38c] ss:$48 sps:$4 sm:$0xff]  }
 0x18c   : > { %2993 = vmatprep.subr.bf16.mxu0 %v16344_v9  ;;  %v16438_v9 = vld [vmem:[%s18065_s27 + $0x388] ss:$48 sps:$4 sm:$0xff]  }
 0x18d   : > { %3078 = vmatpush1.bf16.msra.mxu1 %v16363_v15  ;;  %v16447_v15 = vld [vmem:[%s18065_s27 + $0x4a0] ss:$48 sps:$4 sm:$0xff]  }
 0x18e   : > { %3079 = vmatprep.subr.bf16.mxu1 %v16368_v17  ;;  %v16455_v17 = vld [vmem:[%s18065_s27 + $0x504] ss:$48 sps:$4 sm:$0xff]  }
 0x18f   : > { %2994 = vmatpush1.bf16.msra.mxu0 %v16342_v12  ;;  %v16446_v12 = vld [vmem:[%s18065_s27 + $0x3ec] ss:$48 sps:$4 sm:$0xff]  }
 0x190   : > { %2995 = vmatprep.subr.bf16.mxu0 %v16350_v14  ;;  %v16444_v14 = vld [vmem:[%s18065_s27 + $0x3e8] ss:$48 sps:$4 sm:$0xff]  }
 0x191   : > { %3080 = vmatpush1.bf16.msra.mxu1 %v16366_v20  ;;  %v16453_v20 = vld [vmem:[%s18065_s27 + $0x500] ss:$48 sps:$4 sm:$0xff]  }
 0x192   : > { %3081 = vmatprep.subr.bf16.mxu1 %v16371_v22  ;;  %v16461_v22 = vld [vmem:[%s18065_s27 + $0x564] ss:$48 sps:$4 sm:$0xff]  }
 0x193   : > { %2996 = vmatpush1.bf16.msra.mxu0 %v16348_v16  ;;  %v16452_v16 = vld [vmem:[%s18065_s27 + $0x44c] ss:$48 sps:$4 sm:$0xff]  }
 0x194   : > { %2997 = vmatprep.subr.bf16.mxu0 %v16356_v18  ;;  %v16450_v18 = vld [vmem:[%s18065_s27 + $0x448] ss:$48 sps:$4 sm:$0xff]  }
 0x195   : > { %3082 = vmatpush1.bf16.msra.mxu1 %v16369_v24  ;;  %v16459_v24 = vld [vmem:[%s18065_s27 + $0x560] ss:$48 sps:$4 sm:$0xff]  }
 0x196   : > { %3083 = vmatprep.subr.bf16.mxu1 %v16374_v26  ;;  %v16467_v26 = vld [vmem:[%s18065_s27 + $0x5c4] ss:$48 sps:$4 sm:$0xff]  }
 0x197   : > { %2998 = vmatpush1.bf16.msra.mxu0 %v16354_v21  ;;  %v16458_v21 = vld [vmem:[%s18065_s27 + $0x4ac] ss:$48 sps:$4 sm:$0xff]  }
 0x198   : > { %2999 = vmatprep.subr.bf16.mxu0 %v16362_v23  ;;  %v16456_v23 = vld [vmem:[%s18065_s27 + $0x4a8] ss:$48 sps:$4 sm:$0xff]  }
 0x199   : > { %3084 = vmatpush1.bf16.msra.mxu1 %v16372_v28  ;;  %v16465_v28 = vld [vmem:[%s18065_s27 + $0x5c0] ss:$48 sps:$4 sm:$0xff]  }
 0x19a   : > { %3085 = vmatprep.subr.bf16.mxu1 %v16377_v29  ;;  %v16470_v29 = vld [vmem:[%s18065_s27 + $0x56c] ss:$48 sps:$4 sm:$0xff]  }
 0x19b   : > { %3000 = vmatpush1.bf16.msra.mxu0 %v16360_v25  ;;  %v16464_v25 = vld [vmem:[%s18065_s27 + $0x50c] ss:$48 sps:$4 sm:$0xff]  }
 0x19c   : > { %3098 = vmatprep.subr.bf16.mxu0 %v16380_v27  ;;  %v16462_v27 = vld [vmem:[%s18065_s27 + $0x508] ss:$48 sps:$4 sm:$0xff]  }
 0x19d   : > { %3086 = vmatpush1.bf16.msra.mxu1 %v16375_v31  ;;  %v16468_v31 = vld [vmem:[%s18065_s27 + $0x568] ss:$48 sps:$4 sm:$0xff]  }
 0x19e   : > { %3002 = vmatmul.mubr.bf16.vlgmr.msra.gmra.mrb[4].mxu0 %v18256_v19  ;;  %3184 = vmatprep.subr.bf16.mxu1 %v16386_v35  ;;  %v16479_v35 = vld [vmem:[%s18065_s27 + $0x684] ss:$48 sps:$4 sm:$0xff]  }
 0x19f   : > { %3099 = vmatpush1.bf16.msra.mxu0 %v16378_v30  ;;  %3130 = vmatprep.mubr.bf16.mxu0 %v18157_v49  ;;  %v16473_v30 = vld [vmem:[%s18065_s27 + $0x624] ss:$48 sps:$4 sm:$0xff]  }
 0x1a0   : > { %3100 = vmatprep.subr.bf16.mxu0 %v16383_v32  ;;  %3088 = vmatmul.mubr.bf16.vlgmr.msra.gmra.mrb[4].mxu1 %v18256_v19  ;;  %v16471_v32 = vld [vmem:[%s18065_s27 + $0x620] ss:$48 sps:$4 sm:$0xff]  }
 0x1a1   : > { %3185 = vmatpush1.bf16.msra.mxu1 %v16384_v37  ;;  %3216 = vmatprep.mubr.bf16.mxu1 %v18157_v49  ;;  %v16410_v49 = vld [vmem:[%s18065_s27 + $0x1ac] ss:$48 sps:$4 sm:$0xff]   ;;  %v16477_v37 = vld [vmem:[%s18065_s27 + $0x680] ss:$48 sps:$4 sm:$0xff]  }
 0x1a2   : > { %3186 = vmatprep.subr.bf16.mxu1 %v16392_v39  ;;  %v16485_v39 = vld [vmem:[%s18065_s27 + $0x6e4] ss:$48 sps:$4 sm:$0xff]  }
 0x1a3   : > { %3101 = vmatpush1.bf16.msra.mxu0 %v16381_v33  ;;  %v16476_v33 = vld [vmem:[%s18065_s27 + $0x5cc] ss:$48 sps:$4 sm:$0xff]  }
 0x1a4   : > { %3102 = vmatprep.subr.bf16.mxu0 %v16389_v36  ;;  %v16474_v36 = vld [vmem:[%s18065_s27 + $0x5c8] ss:$48 sps:$4 sm:$0xff]  }
 0x1a5   : > { %3187 = vmatpush1.bf16.msra.mxu1 %v16390_v41  ;;  %v16483_v41 = vld [vmem:[%s18065_s27 + $0x6e0] ss:$48 sps:$4 sm:$0xff]  }
 0x1a6   : > { %3188 = vmatprep.subr.bf16.mxu1 %v16398_v43  ;;  %v16491_v43 = vld [vmem:[%s18065_s27 + $0x744] ss:$48 sps:$4 sm:$0xff]  }
 0x1a7   : > { %3103 = vmatpush1.bf16.msra.mxu0 %v16387_v38  ;;  %v16482_v38 = vld [vmem:[%s18065_s27 + $0x62c] ss:$48 sps:$4 sm:$0xff]  }
 0x1a8   : > { %3104 = vmatprep.subr.bf16.mxu0 %v16395_v40  ;;  %v16480_v40 = vld [vmem:[%s18065_s27 + $0x628] ss:$48 sps:$4 sm:$0xff]  }
 0x1a9   : > { %3189 = vmatpush1.bf16.msra.mxu1 %v16396_v45  ;;  %v16489_v45 = vld [vmem:[%s18065_s27 + $0x740] ss:$48 sps:$4 sm:$0xff]  }
 0x1aa   : > { %3190 = vmatprep.subr.bf16.mxu1 %v16404_v47  ;;  %v16497_v47 = vld [vmem:[%s18065_s27 + $0x7a4] ss:$48 sps:$4 sm:$0xff]  }
 0x1ab   : > { %3105 = vmatpush1.bf16.msra.mxu0 %v16393_v42  ;;  %v16488_v42 = vld [vmem:[%s18065_s27 + $0x68c] ss:$48 sps:$4 sm:$0xff]  }
 0x1ac   : > { %3106 = vmatprep.subr.bf16.mxu0 %v16401_v44  ;;  %v16486_v44 = vld [vmem:[%s18065_s27 + $0x688] ss:$48 sps:$4 sm:$0xff]  }
 0x1ad   : > { %3191 = vmatpush1.bf16.msra.mxu1 %v16402_v50  ;;  %v16495_v50 = vld [vmem:[%s18065_s27 + $0x7a0] ss:$48 sps:$4 sm:$0xff]  }
 0x1ae   : > { %3192 = vmatprep.subr.bf16.mxu1 %v16410_v49  ;;  %v16498_v49 = vld [vmem:[%s18065_s27 + $0x748] ss:$48 sps:$4 sm:$0xff]  }
 0x1af   : > { %3107 = vmatpush1.bf16.msra.mxu0 %v16399_v46  ;;  %v16494_v46 = vld [vmem:[%s18065_s27 + $0x6ec] ss:$48 sps:$4 sm:$0xff]  }
 0x1b0   : > { %3108 = vmatprep.subr.bf16.mxu0 %v16407_v48  ;;  %v16492_v48 = vld [vmem:[%s18065_s27 + $0x6e8] ss:$48 sps:$4 sm:$0xff]  }
 0x1b1   : > { %3193 = vmatpush1.bf16.msra.mxu1 %v16408_v53  ;;  %v16506_v53 = vld [vmem:[%s18065_s27 + $0x7ac] ss:$48 sps:$4 sm:$0xff]  }
 0x1b2   : > { %3194 = vmatprep.subr.bf16.mxu1 %v16416_v55 }
 0x1b3   : > { %3109 = vmatpush1.bf16.msra.mxu0 %v16405_v51  ;;  %v16500_v51 = vld [vmem:[%s18065_s27 + $0x74c] ss:$48 sps:$4 sm:$0xff]  }
 0x1b4   : > { %3110 = vmatprep.subr.bf16.mxu0 %v16413_v52  ;;  %v16501_v52 = vld [vmem:[%s18065_s27 + $0x800] ss:$48 sps:$4 sm:$0xff]  }
 0x1b5   : > { %3195 = vmatpush1.bf16.msra.mxu1 %v16414_v57  ;;  %v16512_v57 = vld [vmem:[%s18065_s27 + $0x80c] ss:$48 sps:$4 sm:$0xff]  }
 0x1b6   : > { %3196 = vmatprep.subr.bf16.mxu1 %v16422_v59  ;;  %v16515_v59 = vld [vmem:[%s18065_s27 + $0x8c4] ss:$48 sps:$4 sm:$0xff]  }
 0x1b7   : > { %3111 = vmatpush1.bf16.msra.mxu0 %v16411_v54  ;;  %v16504_v54 = vld [vmem:[%s18065_s27 + $0x7a8] ss:$48 sps:$4 sm:$0xff]  }
 0x1b8   : > { %3112 = vmatprep.subr.bf16.mxu0 %v16419_v56  ;;  %v16507_v56 = vld [vmem:[%s18065_s27 + $0x860] ss:$48 sps:$4 sm:$0xff]  }
 0x1b9   : > { %3197 = vmatpush1.bf16.msra.mxu1 %v16420_v61 }
 0x1ba   : > { %3198 = vmatprep.subr.bf16.mxu1 %v16428_v63  ;;  %v16513_v63 = vld [vmem:[%s18065_s27 + $0x8c0] ss:$48 sps:$4 sm:$0xff]  }
 0x1bb   : > { %3113 = vmatpush1.bf16.msra.mxu0 %v16417_v58 }
 0x1bc   : > { %3114 = vmatprep.subr.bf16.mxu0 %v16425_v60 }
 0x1bd   : > { %3199 = vmatpush1.bf16.msra.mxu1 %v16426_v1  ;;  %v16521_v1 = vld [vmem:[%s18065_s27 + $0x924] ss:$48 sps:$4 sm:$0xff]  }
 0x1be   : > { %3200 = vmatprep.subr.bf16.mxu1 %v16434_v3  ;;  %v16516_v3 = vld [vmem:[%s18065_s27 + $0x868] ss:$48 sps:$4 sm:$0xff]  }
 0x1bf   : > { %3115 = vmatpush1.bf16.msra.mxu0 %v16423_v62  ;;  %v16510_v62 = vld [vmem:[%s18065_s27 + $0x808] ss:$48 sps:$4 sm:$0xff]  }
 0x1c0   : > { %3116 = vmatprep.subr.bf16.mxu0 %v16431_v0  ;;  %v16518_v0 = vld [vmem:[%s18065_s27 + $0x86c] ss:$48 sps:$4 sm:$0xff]  }
 0x1c1   : > { %3201 = vmatpush1.bf16.msra.mxu1 %v16432_v5  ;;  %v16519_v5 = vld [vmem:[%s18065_s27 + $0x920] ss:$48 sps:$4 sm:$0xff]  }
 0x1c2   : > { %3202 = vmatprep.subr.bf16.mxu1 %v16440_v7 }
 0x1c3   : > { %3117 = vmatpush1.bf16.msra.mxu0 %v16429_v2 }
 0x1c4   : > { %3118 = vmatprep.subr.bf16.mxu0 %v16437_v4 }
 0x1c5   : > { %3203 = vmatpush1.bf16.msra.mxu1 %v16438_v9 }
 0x1c6   : > { %3204 = vmatprep.subr.bf16.mxu1 %v16446_v12  ;;  %v16525_v12 = vld [vmem:[%s18065_s27 + $0x980] ss:$48 sps:$4 sm:$0xff]  }
 0x1c7   : > { %3119 = vmatpush1.bf16.msra.mxu0 %v16435_v6  ;;  %v16524_v6 = vld [vmem:[%s18065_s27 + $0x8cc] ss:$48 sps:$4 sm:$0xff]  }
 0x1c8   : > { %3120 = vmatprep.subr.bf16.mxu0 %v16443_v8  ;;  %v16527_v8 = vld [vmem:[%s18065_s27 + $0x984] ss:$48 sps:$4 sm:$0xff]  }
 0x1c9   : > { %3205 = vmatpush1.bf16.msra.mxu1 %v16444_v14  ;;  %v16533_v14 = vld [vmem:[%s18065_s27 + $0x9e4] ss:$48 sps:$4 sm:$0xff]  }
 0x1ca   : > { %3206 = vmatprep.subr.bf16.mxu1 %v16452_v16  ;;  %v16531_v16 = vld [vmem:[%s18065_s27 + $0x9e0] ss:$48 sps:$4 sm:$0xff]  }
 0x1cb   : > { %3121 = vmatpush1.bf16.msra.mxu0 %v16441_v10  ;;  %v16522_v10 = vld [vmem:[%s18065_s27 + $0x8c8] ss:$48 sps:$4 sm:$0xff]  }
 0x1cc   : > { %3122 = vmatprep.subr.bf16.mxu0 %v16449_v13  ;;  %v16530_v13 = vld [vmem:[%s18065_s27 + $0x92c] ss:$48 sps:$4 sm:$0xff]  }
 0x1cd   : > { %3207 = vmatpush1.bf16.msra.mxu1 %v16450_v18  ;;  %v16539_v18 = vld [vmem:[%s18065_s27 + $0xa44] ss:$48 sps:$4 sm:$0xff]  }
 0x1ce   : > { %3208 = vmatprep.subr.bf16.mxu1 %v16458_v21  ;;  %v16537_v21 = vld [vmem:[%s18065_s27 + $0xa40] ss:$48 sps:$4 sm:$0xff]  }
 0x1cf   : > { %3123 = vmatpush1.bf16.msra.mxu0 %v16447_v15  ;;  %v16528_v15 = vld [vmem:[%s18065_s27 + $0x928] ss:$48 sps:$4 sm:$0xff]  }
 0x1d0   : > { %3124 = vmatprep.subr.bf16.mxu0 %v16455_v17  ;;  %v16536_v17 = vld [vmem:[%s18065_s27 + $0x98c] ss:$48 sps:$4 sm:$0xff]  }
 0x1d1   : > { %3209 = vmatpush1.bf16.msra.mxu1 %v16456_v23  ;;  %v16545_v23 = vld [vmem:[%s18065_s27 + $0xaa4] ss:$48 sps:$4 sm:$0xff]  }
 0x1d2   : > { %3210 = vmatprep.subr.bf16.mxu1 %v16464_v25  ;;  %v16543_v25 = vld [vmem:[%s18065_s27 + $0xaa0] ss:$48 sps:$4 sm:$0xff]  }
 0x1d3   : > { %3125 = vmatpush1.bf16.msra.mxu0 %v16453_v20  ;;  %v16534_v20 = vld [vmem:[%s18065_s27 + $0x988] ss:$48 sps:$4 sm:$0xff]  }
 0x1d4   : > { %3126 = vmatprep.subr.bf16.mxu0 %v16461_v22  ;;  %v16542_v22 = vld [vmem:[%s18065_s27 + $0x9ec] ss:$48 sps:$4 sm:$0xff]  }
 0x1d5   : > { %3211 = vmatpush1.bf16.msra.mxu1 %v16462_v27  ;;  %v16551_v27 = vld [vmem:[%s18065_s27 + $0xb04] ss:$48 sps:$4 sm:$0xff]  }
 0x1d6   : > { %3212 = vmatprep.subr.bf16.mxu1 %v16470_v29  ;;  %v16549_v29 = vld [vmem:[%s18065_s27 + $0xb00] ss:$48 sps:$4 sm:$0xff]  }
 0x1d7   : > { %3127 = vmatpush1.bf16.msra.mxu0 %v16459_v24  ;;  %v16540_v24 = vld [vmem:[%s18065_s27 + $0x9e8] ss:$48 sps:$4 sm:$0xff]  }
 0x1d8   : > { %3128 = vmatprep.subr.bf16.mxu0 %v16467_v26  ;;  %v16548_v26 = vld [vmem:[%s18065_s27 + $0xa4c] ss:$48 sps:$4 sm:$0xff]  }
 0x1d9   : > { %3213 = vmatpush1.bf16.msra.mxu1 %v16468_v31  ;;  %v16557_v31 = vld [vmem:[%s18065_s27 + $0xb64] ss:$48 sps:$4 sm:$0xff]  }
 0x1da   : > { %3214 = vmatprep.subr.bf16.mxu1 %v16476_v33  ;;  %v16555_v33 = vld [vmem:[%s18065_s27 + $0xb60] ss:$48 sps:$4 sm:$0xff]  }
 0x1db   : > { %3129 = vmatpush1.bf16.msra.mxu0 %v16465_v28  ;;  %v16546_v28 = vld [vmem:[%s18065_s27 + $0xa48] ss:$48 sps:$4 sm:$0xff]  }
 0x1dc   : > { %3141 = vmatprep.subr.bf16.mxu0 %v16473_v30  ;;  %v16554_v30 = vld [vmem:[%s18065_s27 + $0xaac] ss:$48 sps:$4 sm:$0xff]  }
 0x1dd   : > { %3215 = vmatpush1.bf16.msra.mxu1 %v16474_v36  ;;  %v16563_v36 = vld [vmem:[%s18065_s27 + $0xbc4] ss:$48 sps:$4 sm:$0xff]  }
 0x1de   : > { %3131 = vmatmul.mubr.bf16.vlgmr.msra.gmra.mrb[8].mxu0 %v18184_v11  ;;  %3227 = vmatprep.subr.bf16.mxu1 %v16482_v38  ;;  %v16561_v38 = vld [vmem:[%s18065_s27 + $0xbc0] ss:$48 sps:$4 sm:$0xff]  }
 0x1df   : > { %3142 = vmatpush1.bf16.msra.mxu0 %v16471_v32  ;;  %3173 = vmatprep.mubr.bf16.mxu0 %v18208_v34  ;;  %v16552_v32 = vld [vmem:[%s18065_s27 + $0xaa8] ss:$48 sps:$4 sm:$0xff]  }
 0x1e0   : > { %3143 = vmatprep.subr.bf16.mxu0 %v16479_v35  ;;  %3217 = vmatmul.mubr.bf16.vlgmr.msra.gmra.mrb[8].mxu1 %v18184_v11  ;;  %v16503_v11 = vld [vmem:[%s18065_s27 + $0x804] ss:$48 sps:$4 sm:$0xff]   ;;  %v16560_v35 = vld [vmem:[%s18065_s27 + $0xb0c] ss:$48 sps:$4 sm:$0xff]  }
 0x1e1   : > { %3228 = vmatpush1.bf16.msra.mxu1 %v16480_v40  ;;  %3259 = vmatprep.mubr.bf16.mxu1 %v18208_v34  ;;  %v16509_v34 = vld [vmem:[%s18065_s27 + $0x864] ss:$48 sps:$4 sm:$0xff]   ;;  %v16564_v40 = vld [vmem:[%s18065_s27 + $0xb68] ss:$48 sps:$4 sm:$0xff]  }
 0x1e2   : > { %3229 = vmatprep.subr.bf16.mxu1 %v16488_v42  ;;  %v16567_v42 = vld [vmem:[%s18065_s27 + $0xbc8] ss:$48 sps:$4 sm:$0xff]  }
 0x1e3   : > { %3144 = vmatpush1.bf16.msra.mxu0 %v16477_v37  ;;  %v16558_v37 = vld [vmem:[%s18065_s27 + $0xb08] ss:$48 sps:$4 sm:$0xff]  }
 0x1e4   : > { %3145 = vmatprep.subr.bf16.mxu0 %v16485_v39  ;;  %v16566_v39 = vld [vmem:[%s18065_s27 + $0xb6c] ss:$48 sps:$4 sm:$0xff]  }
 0x1e5   : > { %3230 = vmatpush1.bf16.msra.mxu1 %v16486_v44 }
 0x1e6   : > { %3231 = vmatprep.subr.bf16.mxu1 %v16494_v46 }
 0x1e7   : > { %3146 = vmatpush1.bf16.msra.mxu0 %v16483_v41  ;;  %v16569_v41 = vld [vmem:[%s18065_s27 + $0xbcc] ss:$48 sps:$4 sm:$0xff]   ;;  %s17816_s27 = smov 64  }
 0x1e8   : > { %3147 = vmatprep.subr.bf16.mxu0 %v16491_v43  ;;  %v17814_v43 = vmov 0.0  }
 0x1e9   : > { %3232 = vmatpush1.bf16.msra.mxu1 %v16492_v48 }
 0x1ea   : > { %3233 = vmatprep.subr.bf16.mxu1 %v16500_v51 }
 0x1eb   : > { %3148 = vmatpush1.bf16.msra.mxu0 %v16489_v45 }
 0x1ec   : > { %3149 = vmatprep.subr.bf16.mxu0 %v16497_v47 }
 0x1ed   : > { %3234 = vmatpush1.bf16.msra.mxu1 %v16498_v49 }
 0x1ee   : > { %3235 = vmatprep.subr.bf16.mxu1 %v16506_v53 }
 0x1ef   : > { %3150 = vmatpush1.bf16.msra.mxu0 %v16495_v50 }
 0x1f0   : > { %3151 = vmatprep.subr.bf16.mxu0 %v16503_v11 }
 0x1f1   : > { %v18491_v55 = vpop.f32.mrb[0].mxu0  ;;  %3236 = vmatpush1.bf16.msra.mxu1 %v16504_v54  ;;  %v18506_v2 = vpop.f32.mrb[0].mxu1 }
 0x1f2   : > { %v18495_v58 = vpop.f32.mrb[1].mxu0  ;;  %3237 = vmatprep.subr.bf16.mxu1 %v16512_v57  ;;  %v18509_v4 = vpop.f32.mrb[1].mxu1 }
 0x1f3   : > { %v18498_v60 = vpop.f32.mrb[2].mxu0  ;;  %3152 = vmatpush1.bf16.msra.mxu0 %v16501_v52  ;;  %v18513_v7 = vpop.f32.mrb[2].mxu1  ;;  %v3270_v52 = vpack.c.bf16 %v18491_v55, %v18491_v55 }
 0x1f4   : > { %v18500_v61 = vpop.f32.mrb[3].mxu0  ;;  %3153 = vmatprep.subr.bf16.mxu0 %v16509_v34  ;;  %v18516_v9 = vpop.f32.mrb[3].mxu1  ;;  %v3271_v54 = vpack.c.bf16 %v18498_v60, %v18498_v60 }
 0x1f5   : > { %3238 = vmatpush1.bf16.msra.mxu1 %v16510_v62 }
 0x1f6   : > { %3239 = vmatprep.subr.bf16.mxu1 %v16518_v0 }
 0x1f7   : > { %3154 = vmatpush1.bf16.msra.mxu0 %v16507_v56 }
 0x1f8   : > { %3155 = vmatprep.subr.bf16.mxu0 %v16515_v59 }
 0x1f9   : > { %3240 = vmatpush1.bf16.msra.mxu1 %v16516_v3 }
 0x1fa   : > { %3241 = vmatprep.subr.bf16.mxu1 %v16524_v6 }
 0x1fb   : > { %3156 = vmatpush1.bf16.msra.mxu0 %v16513_v63 }
 0x1fc   : > { %3157 = vmatprep.subr.bf16.mxu0 %v16521_v1 }
 0x1fd   : > { %3242 = vmatpush1.bf16.msra.mxu1 %v16522_v10  ;;  %v18613_v10 = vld [vmem:[%s20430_s1 + $0x8] sm:$0xff] }
 0x1fe   : > { %3243 = vmatprep.subr.bf16.mxu1 %v16530_v13  ;;  %vm3372_vm5 = vcmp.eq.f32.partialorder %v18613_v10, 0.0 }
 0x1ff   : > { %3158 = vmatpush1.bf16.msra.mxu0 %v16519_v5 }
 0x200   : > { %3159 = vmatprep.subr.bf16.mxu0 %v16527_v8  ;;  %v18608_v8 = vld [vmem:[%s20430_s1] sm:$0xff] }
 0x201   : > { %3244 = vmatpush1.bf16.msra.mxu1 %v16528_v15  ;;  %vm3371_vm3 = vcmp.eq.f32.partialorder %v18608_v8, 0.0 }
 0x202   : > { %3245 = vmatprep.subr.bf16.mxu1 %v16536_v17 }
 0x203   : > { %3160 = vmatpush1.bf16.msra.mxu0 %v16525_v12 }
 0x204   : > { %3161 = vmatprep.subr.bf16.mxu0 %v16533_v14 }
 0x205   : > { %3246 = vmatpush1.bf16.msra.mxu1 %v16534_v20 }
 0x206   : > { %3247 = vmatprep.subr.bf16.mxu1 %v16542_v22 }
 0x207   : > { %3162 = vmatpush1.bf16.msra.mxu0 %v16531_v16 }
 0x208   : > { %3163 = vmatprep.subr.bf16.mxu0 %v16539_v18 }
 0x209   : > { %3248 = vmatpush1.bf16.msra.mxu1 %v16540_v24 }
 0x20a   : > { %3249 = vmatprep.subr.bf16.mxu1 %v16548_v26 }
 0x20b   : > { %3164 = vmatpush1.bf16.msra.mxu0 %v16537_v21 }
 0x20c   : > { %3165 = vmatprep.subr.bf16.mxu0 %v16545_v23 }
 0x20d   : > { %3250 = vmatpush1.bf16.msra.mxu1 %v16546_v28 }
 0x20e   : > { %3251 = vmatprep.subr.bf16.mxu1 %v16554_v30 }
 0x20f   : > { %3166 = vmatpush1.bf16.msra.mxu0 %v16543_v25 }
 0x210   : > { %3167 = vmatprep.subr.bf16.mxu0 %v16551_v27 }
 0x211   : > { %3252 = vmatpush1.bf16.msra.mxu1 %v16552_v32 }
 0x212   : > { %3253 = vmatprep.subr.bf16.mxu1 %v16560_v35 }
 0x213   : > { %3168 = vmatpush1.bf16.msra.mxu0 %v16549_v29 }
 0x214   : > { %3169 = vmatprep.subr.bf16.mxu0 %v16557_v31 }
 0x215   : > { %3254 = vmatpush1.bf16.msra.mxu1 %v16558_v37 }
 0x216   : > { %3255 = vmatprep.subr.bf16.mxu1 %v16566_v39 }
 0x217   : > { %3170 = vmatpush1.bf16.msra.mxu0 %v16555_v33 }
 0x218   : > { %3171 = vmatprep.subr.bf16.mxu0 %v16563_v36 }
 0x219   : > { %3256 = vmatpush1.bf16.msra.mxu1 %v16564_v40 }
 0x21a   : > { %3257 = vmatprep.subr.bf16.mxu1 %v16569_v41 }
 0x21b   : > { %3172 = vmatpush1.bf16.msra.mxu0 %v16561_v38 }
 0x21c   : > { %15571 = vmatprep.subr.bf16.mxu0 %v17814_v43 }
 0x21d   : > { %3258 = vmatpush1.bf16.msra.mxu1 %v16567_v42 }
 0x21e   : > { %3174 = vmatmul.mubr.bf16.vlgmr.msra.gmra.mrb[8].mxu0 %v18256_v19  ;;  %15577 = vmatprep.subr.bf16.mxu1 %v17814_v43 }
 0x21f   : > { %15573 = vmatprep.mubr.msk.bf16.mxu0 %vm17815_vm0, %v17814_v43 }
 0x220   : > { %3260 = vmatmul.mubr.bf16.vlgmr.msra.gmra.mrb[8].mxu1 %v18256_v19 }
 0x221   : > { %15579 = vmatprep.mubr.msk.bf16.mxu1 %vm17815_vm0, %v17814_v43 }
 0x271   : > { %v3003_v44 = vpop.f32.mrb[4].mxu0 }
 0x272   : > { %v3272_v45 = vpack.c.bf16 %v3003_v44, %v3003_v44  ;;  %v18556_v46 = vpop.f32.mrb[5].mxu0 }
 0x273   : > { %v3007_v47 = vpop.f32.mrb[6].mxu0  ;;  %v18564_v19 = vpop.f32.mrb[4].mxu1 }
 0x274   : > { %v3281_v48 = vsel %vm3276_vm1, %v3272_v45, 0  ;;  %v3273_v50 = vpack.c.bf16 %v3007_v47, %v3007_v47  ;;  %v18559_v51 = vpop.f32.mrb[7].mxu0  ;;  %v18567_v49 = vpop.f32.mrb[5].mxu1 }
 0x275   : > { %15572 = vmatpush3.bf16.xpose.msra.mxu0 %v3281_v48  ;;  %v18571_v53 = vpop.f32.mrb[6].mxu1 }
 0x276   : > { %v3327_v11 = vsel %vm3276_vm1, %v3273_v50, 0  ;;  %3549 = vrot.lane.b32.xlu1 %v3273_v50, %s17816_s27  ;;  %15583 = vmatprep.subr.bf16.mxu0 %v17814_v43  ;;  %v18573_v34 = vpop.f32.mrb[7].mxu1 }
 0x277   : > { %15578 = vmatpush3.bf16.xpose.msra.mxu1 %v3327_v11 }
 0x278   : > { %15589 = vmatprep.subr.bf16.mxu1 %v17814_v43 }
 0x27c   : > { %15574 = vmatmul.mubr.msk.bf16.vlgmr.msra.gmra.mrb[12].mxu0 %vm3276_vm1, %v3270_v52 }
 0x27d   : > { %15585 = vmatprep.mubr.msk.bf16.mxu0 %vm17815_vm0, %v17814_v43 }
 0x27e   : > { %15580 = vmatmul.mubr.msk.bf16.vlgmr.msra.gmra.mrb[12].mxu1 %vm3276_vm1, %v3271_v54 }
 0x27f   : > { %15591 = vmatprep.mubr.msk.bf16.mxu1 %vm17815_vm0, %v17814_v43 }
 0x2e8   : > { %v3550_v38 = vpop.permute.xlu1 %3549 }
 0x2f1   : > { %v3175_v56 = vpop.f32.mrb[8].mxu0 }
 0x2f2   : > { %v18583_v55 = vpack.c.bf16 %v3175_v56, %v3175_v56  ;;  %v18585_v57 = vpop.f32.mrb[9].mxu0 }
 0x2f3   : > { %v3179_v59 = vpop.f32.mrb[10].mxu0  ;;  %v18596_v1 = vpop.f32.mrb[8].mxu1 }
 0x2f4   : > { %v3405_v60 = vsel %vm3403_vm2, %v18583_v55, 0  ;;  %v18589_v62 = vpack.c.bf16 %v3179_v59, %v3179_v59  ;;  %v18591_v63 = vpop.f32.mrb[11].mxu0  ;;  %v18599_v3 = vpop.f32.mrb[9].mxu1 }
 0x2f5   : > { %15584 = vmatpush3.bf16.msra.mxu0 %v3405_v60  ;;  %v18601_v5 = vpop.f32.mrb[10].mxu1 }
 0x2f6   : > { %v3451_v0 = vsel %vm3403_vm2, %v18589_v62, 0  ;;  %15595 = vmatprep.subr.bf16.mxu0 %v17814_v43  ;;  %v18603_v6 = vpop.f32.mrb[11].mxu1 }
 0x2f7   : > { %15590 = vmatpush3.bf16.msra.mxu1 %v3451_v0 }
 0x2f8   : > { %15601 = vmatprep.subr.bf16.mxu1 %v17814_v43 }
 0x34f   : > { %v3317_v12 = vpop.f32.mrb[12].mxu0 }
 0x350   : > { %v3369_v13 = vmul.f32 0.125, %v3317_v12  ;;  %v15575_v14 = vpop.f32.mrb[13].mxu0 }
 0x351   : > { %v3320_v15 = vpop.f32.mrb[14].mxu0  ;;  %v3363_v16 = vpop.f32.mrb[12].mxu1 }
 0x352   : > { %v3370_v17 = vmul.f32 0.125, %v3363_v16  ;;  %v15576_v18 = vpop.f32.mrb[15].mxu0  ;;  %v15581_v20 = vpop.f32.mrb[13].mxu1  ;;  %v3373_v21 = vsel %vm3371_vm3, -1e+09, %v3369_v13 }
 0x353   : > { %v3366_v22 = vpop.f32.mrb[14].mxu1  ;;  %v3376_v23 = vsel %vm3375_vm4, %v3373_v21, -inf }
 0x354   : > { %v15582_v24 = vpop.f32.mrb[15].mxu1  ;;  %3377 = vmax.xlane.f32.xlu0 %v3376_v23  ;;  %v3374_v25 = vsel %vm3372_vm5, -1e+09, %v3370_v17 }
 0x355   : > { %v3379_v26 = vsel %vm3375_vm4, %v3374_v25, -inf }
 0x358   : > { %3380 = vmax.xlane.f32.xlu0 %v3379_v26 }
 0x36e   : > { %3497 = vrot.lane.b32.xlu0 %v3272_v45, %s17816_s27 }
 0x3e1   : > { %v3378_v27 = vpop.xlane.xlu0 %3377 }
 0x3e2   : > { %v3382_v28 = vsub.f32 %v3373_v21, %v3378_v27 }
 0x3e4   : > { %v3384_v29 = vmul.f32 1.442695, %v3382_v28 }
 0x3e5   : > { %v3381_v30 = vpop.xlane.xlu0 %3380 }
 0x3e6   : > { %17530 = vpow2.f32 %v3384_v29  ;;  %v3383_v31 = vsub.f32 %v3374_v25, %v3381_v30 }
 0x3e8   : > { %v3386_v32 = vmul.f32 1.442695, %v3383_v31 }
 0x3e9   : > { %v3498_v44 = vpop.permute.xlu0 %3497 }
 0x3ea   : > { %17532 = vpow2.f32 %v3386_v32  ;;  %v3503_v48 = vsel %vm3276_vm1, %v3498_v44, 0 }
 0x3f0   : > { %v17531_v33 = vpop.eup %17530 }
 0x3f1   : > { %v3388_v35 = vsel %vm3375_vm4, %v17531_v33, 0.0 }
 0x3f2   : > { %3389 = vadd.xlane.f32.xlu1 %v3388_v35 }
 0x3f4   : > { %v17533_v36 = vpop.eup %17532 }
 0x3f5   : > { %v3391_v37 = vsel %vm3375_vm4, %v17533_v36, 0.0 }
 0x3f6   : > { %3392 = vadd.xlane.f32.xlu1 %v3391_v37 }
 0x407   : > { %3494 = vrot.lane.b32.xlu1 %v3270_v52, %s17816_s27  ;;  %v3555_v52 = vsel %vm3276_vm1, %v3550_v38, 0 }
 0x40b   : > { %3546 = vrot.lane.b32.xlu1 %v3271_v54, %s17816_s27 }
 0x47f   : > { %v3390_v39 = vpop.xlane.xlu1 %3389 }
 0x480   : > { %17534 = vrcp.f32 %v3390_v39 }
 0x483   : > { %v3393_v40 = vpop.xlane.xlu1 %3392 }
 0x484   : > { %17536 = vrcp.f32 %v3393_v40 }
 0x487   : > { %v3495_v54 = vpop.permute.xlu1 %3494 }
 0x48a   : > { %v17535_v41 = vpop.eup %17534 }
 0x48b   : > { %v3395_v42 = vmul.f32 %v17535_v41, %v17531_v33  ;;  %v3547_v56 = vpop.permute.xlu1 %3546 }
 0x48d   : > { %5067 = vst.msk [vmem:[%s18091_s17] sm:$0xff] %vm3375_vm4, %v3395_v42  ;;  %v3398_v45 = vpack.c.bf16 %v3395_v42, %v3395_v42 }
 0x48e   : > { %v17537_v47 = vpop.eup %17536 }
 0x48f   : > { %v3397_v50 = vmul.f32 %v17537_v47, %v17533_v36  ;;  %15586 = vmatmul.mubr.msk.bf16.vlgmr.msra.gmra.mrb[16].mxu0 %vm3375_vm4, %v3398_v45 }
 0x490   : > { %15596 = vmatpush3.bf16.xpose.msra.mxu0 %v3503_v48  ;;  %15597 = vmatprep.mubr.msk.bf16.mxu0 %vm17815_vm0, %v17814_v43 }
 0x491   : > { %5068 = vst.msk [vmem:[%s18091_s17 + $0x8] sm:$0xff] %vm3375_vm4, %v3397_v50  ;;  %v3399_v11 = vpack.c.bf16 %v3397_v50, %v3397_v50  ;;  %15607 = vmatprep.subr.bf16.mxu0 %v17814_v43 }
 0x493   : > { %15592 = vmatmul.mubr.msk.bf16.vlgmr.msra.gmra.mrb[16].mxu1 %vm3375_vm4, %v3399_v11 }
 0x494   : > { %15602 = vmatpush3.bf16.xpose.msra.mxu1 %v3555_v52  ;;  %15603 = vmatprep.mubr.msk.bf16.mxu1 %vm17815_vm0, %v17814_v43 }
 0x495   : > { %15613 = vmatprep.subr.bf16.mxu1 %v17814_v43 }
 0x497   : > { %15598 = vmatmul.mubr.msk.bf16.vlgmr.msra.gmra.mrb[20].mxu0 %vm3276_vm1, %v3495_v54  ;;  %v18670_v54 = vpack.c.bf16 %v18556_v46, %v18556_v46 }
 0x498   : > { %15609 = vmatprep.mubr.msk.bf16.mxu0 %vm17815_vm0, %v17814_v43 }
 0x49b   : > { %15604 = vmatmul.mubr.msk.bf16.vlgmr.msra.gmra.mrb[20].mxu1 %vm3276_vm1, %v3547_v56 }
 0x49c   : > { %15615 = vmatprep.mubr.msk.bf16.mxu1 %vm17815_vm0, %v17814_v43 }
 0x562   : > { %v18648_v59 = vpop.f32.mrb[16].mxu0 }
 0x563   : > { %v15587_v60 = vpop.f32.mrb[17].mxu0 }
 0x564   : > { %v3444_v0 = vpop.f32.mrb[18].mxu0  ;;  %v3726_v60 = vpack.c.bf16 %v18559_v51, %v18559_v51  ;;  %v18690_v51 = vpack.c.bf16 %v18585_v57, %v18585_v57 }
 0x565   : > { %v15588_v12 = vpop.f32.mrb[19].mxu0 }
 0x566   : > { %v18650_v13 = vpop.f32.mrb[16].mxu1  ;;  %v3733_v12 = vsel %vm3276_vm1, %v18670_v54, 0 }
 0x567   : > { %v15593_v14 = vpop.f32.mrb[17].mxu1 }
 0x568   : > { %v3490_v15 = vpop.f32.mrb[18].mxu1  ;;  %v3779_v14 = vsel %vm3276_vm1, %v3726_v60, 0 }
 0x569   : > { %v15594_v16 = vpop.f32.mrb[19].mxu1  ;;  %v3723_v15 = vpack.c.bf16 %v18495_v58, %v18495_v58 }
 0x56a   : > { %v3539_v17 = vpop.f32.mrb[20].mxu0  ;;  %v18697_v16 = vpack.c.bf16 %v18591_v63, %v18591_v63 }
 0x56b   : > { %v3597_v18 = vmul.f32 0.125, %v3539_v17  ;;  %v15599_v20 = vpop.f32.mrb[21].mxu0  ;;  %v3724_v17 = vpack.c.bf16 %v18500_v61, %v18500_v61 }
 0x56c   : > { %v3542_v21 = vpop.f32.mrb[22].mxu0  ;;  %v3899_v57 = vsel %vm3403_vm2, %v18697_v16, 0 }
 0x56d   : > { %v15600_v22 = vpop.f32.mrb[23].mxu0  ;;  %v3599_v23 = vsel %vm3371_vm3, -1e+09, %v3597_v18  ;;  %v3853_v18 = vsel %vm3403_vm2, %v18690_v51, 0 }
 0x56e   : > { %v3591_v24 = vpop.f32.mrb[20].mxu1  ;;  %v3601_v25 = vsel %vm3375_vm4, %v3599_v23, -inf }
 0x56f   : > { %v3598_v26 = vmul.f32 0.125, %v3591_v24  ;;  %v15605_v27 = vpop.f32.mrb[21].mxu1  ;;  %3602 = vmax.xlane.f32.xlu0 %v3601_v25 }
 0x570   : > { %v3594_v28 = vpop.f32.mrb[22].mxu1 }
 0x571   : > { %v15606_v29 = vpop.f32.mrb[23].mxu1  ;;  %v3600_v30 = vsel %vm3372_vm5, -1e+09, %v3598_v26 }
 0x572   : > { %v3604_v31 = vsel %vm3375_vm4, %v3600_v30, -inf }
 0x573   : > { %3605 = vmax.xlane.f32.xlu1 %v3604_v31 }
 0x584   : > { %3675 = vrot.lane.b32.xlu1 %v18589_v62, %s17816_s27 }
 0x5fc   : > { %v3603_v32 = vpop.xlane.xlu0 %3602 }
 0x5fd   : > { %v3607_v33 = vsub.f32 %v3599_v23, %v3603_v32 }
 0x5ff   : > { %v3609_v35 = vmul.f32 1.442695, %v3607_v33 }
 0x600   : > { %v3606_v36 = vpop.xlane.xlu1 %3605 }
 0x601   : > { %17538 = vpow2.f32 %v3609_v35  ;;  %v3608_v37 = vsub.f32 %v3600_v30, %v3606_v36 }
 0x603   : > { %v3611_v38 = vmul.f32 1.442695, %v3608_v37 }
 0x604   : > { %v3676_v39 = vpop.permute.xlu1 %3675 }
 0x605   : > { %17540 = vpow2.f32 %v3611_v38  ;;  %v3681_v40 = vsel %vm3403_vm2, %v3676_v39, 0 }
 0x606   : > { %15614 = vmatpush3.bf16.msra.mxu1 %v3681_v40 }
 0x607   : > { %15625 = vmatprep.subr.bf16.mxu1 %v17814_v43 }
 0x60b   : > { %v17539_v41 = vpop.eup %17538 }
 0x60c   : > { %v3613_v42 = vsel %vm3375_vm4, %v17539_v41, 0.0 }
 0x60d   : > { %3614 = vadd.xlane.f32.xlu0 %v3613_v42 }
 0x60f   : > { %v17541_v62 = vpop.eup %17540 }
 0x610   : > { %v3616_v44 = vsel %vm3375_vm4, %v17541_v62, 0.0 }
 0x611   : > { %3617 = vadd.xlane.f32.xlu0 %v3616_v44 }
 0x627   : > { %3626 = vrot.lane.b32.xlu0 %v18583_v55, %s17816_s27 }
 0x69a   : > { %v3615_v45 = vpop.xlane.xlu0 %3614 }
 0x69b   : > { %17542 = vrcp.f32 %v3615_v45 }
 0x69e   : > { %v3618_v47 = vpop.xlane.xlu0 %3617 }
 0x69f   : > { %17544 = vrcp.f32 %v3618_v47 }
 0x6a2   : > { %v3627_v48 = vpop.permute.xlu0 %3626 }
 0x6a3   : > { %v3632_v50 = vsel %vm3403_vm2, %v3627_v48, 0 }
 0x6a4   : > { %15608 = vmatpush3.bf16.msra.mxu0 %v3632_v50 }
 0x6a5   : > { %v17543_v11 = vpop.eup %17542  ;;  %15619 = vmatprep.subr.bf16.mxu0 %v17814_v43 }
 0x6a6   : > { %v3620_v52 = vmul.f32 %v17543_v11, %v17539_v41 }
 0x6a8   : > { %5069 = vst.msk [vmem:[%s18091_s17 + $0x10] sm:$0xff] %vm3375_vm4, %v3620_v52  ;;  %v3623_v55 = vpack.c.bf16 %v3620_v52, %v3620_v52 }
 0x6a9   : > { %v17545_v56 = vpop.eup %17544 }
 0x6aa   : > { %v3622_v0 = vmul.f32 %v17545_v56, %v17541_v62  ;;  %15610 = vmatmul.mubr.msk.bf16.vlgmr.msra.gmra.mrb[24].mxu0 %vm3375_vm4, %v3623_v55 }
 0x6ab   : > { %15621 = vmatprep.mubr.msk.bf16.mxu0 %vm17815_vm0, %v17814_v43 }
 0x6ac   : > { %5070 = vst.msk [vmem:[%s18091_s17 + $0x18] sm:$0xff] %vm3375_vm4, %v3622_v0  ;;  %v3624_v46 = vpack.c.bf16 %v3622_v0, %v3622_v0 }
 0x6ad   : > { %15620 = vmatpush3.bf16.xpose.msra.mxu0 %v3733_v12 }
 0x6ae   : > { %15616 = vmatmul.mubr.msk.bf16.vlgmr.msra.gmra.mrb[24].mxu1 %vm3375_vm4, %v3624_v46  ;;  %15631 = vmatprep.subr.bf16.mxu0 %v17814_v43 }
 0x6af   : > { %15626 = vmatpush3.bf16.xpose.msra.mxu1 %v3779_v14  ;;  %15627 = vmatprep.mubr.msk.bf16.mxu1 %vm17815_vm0, %v17814_v43 }
 0x6b0   : > { %15637 = vmatprep.subr.bf16.mxu1 %v17814_v43 }
 0x6b4   : > { %15622 = vmatmul.mubr.msk.bf16.vlgmr.msra.gmra.mrb[28].mxu0 %vm3276_vm1, %v3723_v15 }
 0x6b5   : > { %15632 = vmatpush3.bf16.msra.mxu0 %v3853_v18  ;;  %15633 = vmatprep.mubr.msk.bf16.mxu0 %vm17815_vm0, %v17814_v43 }
 0x6b6   : > { %15628 = vmatmul.mubr.msk.bf16.vlgmr.msra.gmra.mrb[28].mxu1 %vm3276_vm1, %v3724_v17  ;;  %15643 = vmatprep.subr.bf16.mxu0 %v17814_v43 }
 0x6b7   : > { %15638 = vmatpush3.bf16.msra.mxu1 %v3899_v57  ;;  %15639 = vmatprep.mubr.msk.bf16.mxu1 %vm17815_vm0, %v17814_v43 }
 0x6b8   : > { %15649 = vmatprep.subr.bf16.mxu1 %v17814_v43 }
 0x77d   : > { %v18713_v58 = vpop.f32.mrb[24].mxu0 }
 0x77e   : > { %v15611_v61 = vpop.f32.mrb[25].mxu0 }
 0x77f   : > { %v3671_v63 = vpop.f32.mrb[26].mxu0 }
 0x780   : > { %v15612_v20 = vpop.f32.mrb[27].mxu0 }
 0x781   : > { %v18715_v21 = vpop.f32.mrb[24].mxu1 }
 0x782   : > { %v15979_v22 = vpack.i.bf16 %v18715_v21, %v18713_v58  ;;  %v15617_v23 = vpop.f32.mrb[25].mxu1 }
 0x783   : > { %v3720_v24 = vpop.f32.mrb[26].mxu1 }
 0x784   : > { %v15618_v25 = vpop.f32.mrb[27].mxu1 }
 0x787   : > { %v3769_v26 = vpop.f32.mrb[28].mxu0 }
 0x788   : > { %v3821_v27 = vmul.f32 0.125, %v3769_v26  ;;  %v15623_v28 = vpop.f32.mrb[29].mxu0 }
 0x789   : > { %v3772_v29 = vpop.f32.mrb[30].mxu0  ;;  %v3815_v30 = vpop.f32.mrb[28].mxu1 }
 0x78a   : > { %v3822_v31 = vmul.f32 0.125, %v3815_v30  ;;  %v15624_v32 = vpop.f32.mrb[31].mxu0  ;;  %v15629_v33 = vpop.f32.mrb[29].mxu1  ;;  %v3823_v35 = vsel %vm3371_vm3, -1e+09, %v3821_v27 }
 0x78b   : > { %v3818_v36 = vpop.f32.mrb[30].mxu1  ;;  %v3825_v37 = vsel %vm3375_vm4, %v3823_v35, -inf }
 0x78c   : > { %v15630_v38 = vpop.f32.mrb[31].mxu1  ;;  %3826 = vmax.xlane.f32.xlu1 %v3825_v37  ;;  %v3824_v39 = vsel %vm3372_vm5, -1e+09, %v3822_v31 }
 0x78d   : > { %v3828_v40 = vsel %vm3375_vm4, %v3824_v39, -inf }
 0x78e   : > { %3829 = vmax.xlane.f32.xlu0 %v3828_v40 }
 0x79d   : > { %3997 = vrot.lane.b32.xlu1 %v3726_v60, %s17816_s27 }
 0x819   : > { %v3827_v41 = vpop.xlane.xlu1 %3826 }
 0x81a   : > { %v3831_v42 = vsub.f32 %v3823_v35, %v3827_v41 }
 0x81b   : > { %v3830_v62 = vpop.xlane.xlu0 %3829 }
 0x81c   : > { %v3833_v44 = vmul.f32 1.442695, %v3831_v42  ;;  %v3832_v45 = vsub.f32 %v3824_v39, %v3830_v62 }
 0x81d   : > { %v3998_v55 = vpop.permute.xlu1 %3997 }
 0x81e   : > { %17546 = vpow2.f32 %v3833_v44  ;;  %v3835_v47 = vmul.f32 1.442695, %v3832_v45 }
 0x820   : > { %17548 = vpow2.f32 %v3835_v47 }
 0x828   : > { %v17547_v48 = vpop.eup %17546 }
 0x829   : > { %v3837_v50 = vsel %vm3375_vm4, %v17547_v48, 0.0 }
 0x82a   : > { %v17549_v11 = vpop.eup %17548  ;;  %3838 = vadd.xlane.f32.xlu0 %v3837_v50 }
 0x82b   : > { %v3840_v52 = vsel %vm3375_vm4, %v17549_v11, 0.0 }
 0x82c   : > { %3841 = vadd.xlane.f32.xlu1 %v3840_v52 }
 0x83d   : > { %3942 = vrot.lane.b32.xlu1 %v3723_v15, %s17816_s27 }
 0x840   : > { %3945 = vrot.lane.b32.xlu0 %v18670_v54, %s17816_s27 }
 0x841   : > { %3994 = vrot.lane.b32.xlu1 %v3724_v17, %s17816_s27  ;;  %v4003_v17 = vsel %vm3276_vm1, %v3998_v55, 0 }
 0x8b7   : > { %v3839_v56 = vpop.xlane.xlu0 %3838 }
 0x8b8   : > { %17550 = vrcp.f32 %v3839_v56 }
 0x8b9   : > { %v3842_v60 = vpop.xlane.xlu1 %3841 }
 0x8ba   : > { %17552 = vrcp.f32 %v3842_v60 }
 0x8bb   : > { %v3946_v14 = vpop.permute.xlu0 %3945 }
 0x8bc   : > { %v3951_v15 = vsel %vm3276_vm1, %v3946_v14, 0 }
 0x8bd   : > { %v3943_v61 = vpop.permute.xlu1 %3942 }
 0x8c1   : > { %v3995_v63 = vpop.permute.xlu1 %3994 }
 0x8c2   : > { %v17551_v0 = vpop.eup %17550 }
 0x8c3   : > { %v3844_v12 = vmul.f32 %v17551_v0, %v17547_v48 }
 0x8c4   : > { %v17553_v46 = vpop.eup %17552 }
 0x8c5   : > { %5071 = vst.msk [vmem:[%s18091_s17 + $0x20] sm:$0xff] %vm3375_vm4, %v3844_v12  ;;  %v3846_v18 = vmul.f32 %v17553_v46, %v17549_v11  ;;  %v3847_v57 = vpack.c.bf16 %v3844_v12, %v3844_v12 }
 0x8c7   : > { %5072 = vst.msk [vmem:[%s18091_s17 + $0x28] sm:$0xff] %vm3375_vm4, %v3846_v18  ;;  %15634 = vmatmul.mubr.msk.bf16.vlgmr.msra.gmra.mrb[32].mxu0 %vm3375_vm4, %v3847_v57  ;;  %v3848_v54 = vpack.c.bf16 %v3846_v18, %v3846_v18 }
 0x8c8   : > { %15644 = vmatpush3.bf16.xpose.msra.mxu0 %v3951_v15  ;;  %15645 = vmatprep.mubr.msk.bf16.mxu0 %vm17815_vm0, %v17814_v43 }
 0x8c9   : > { %15640 = vmatmul.mubr.msk.bf16.vlgmr.msra.gmra.mrb[32].mxu1 %vm3375_vm4, %v3848_v54  ;;  %15655 = vmatprep.subr.bf16.mxu0 %v17814_v43 }
 0x8ca   : > { %15650 = vmatpush3.bf16.xpose.msra.mxu1 %v4003_v17  ;;  %15651 = vmatprep.mubr.msk.bf16.mxu1 %vm17815_vm0, %v17814_v43  ;;  %v18774_v17 = vpack.c.bf16 %v18564_v19, %v18564_v19 }
 0x8cb   : > { %15661 = vmatprep.subr.bf16.mxu1 %v17814_v43 }
 0x8cf   : > { %15646 = vmatmul.mubr.msk.bf16.vlgmr.msra.gmra.mrb[36].mxu0 %vm3276_vm1, %v3943_v61 }
 0x8d0   : > { %15657 = vmatprep.mubr.msk.bf16.mxu0 %vm17815_vm0, %v17814_v43 }
 0x8d1   : > { %15652 = vmatmul.mubr.msk.bf16.vlgmr.msra.gmra.mrb[36].mxu1 %vm3276_vm1, %v3995_v63  ;;  %v4174_v63 = vpack.c.bf16 %v18571_v53, %v18571_v53  ;;  %v18794_v53 = vpack.c.bf16 %v18596_v1, %v18596_v1 }
 0x8d2   : > { %15663 = vmatprep.mubr.msk.bf16.mxu1 %vm17815_vm0, %v17814_v43 }
 0x99a   : > { %v18752_v20 = vpop.f32.mrb[32].mxu0 }
 0x99b   : > { %v15635_v23 = vpop.f32.mrb[33].mxu0 }
 0x99c   : > { %v3892_v24 = vpop.f32.mrb[34].mxu0  ;;  %v18754_v25 = vpop.f32.mrb[32].mxu1 }
 0x99d   : > { %v15636_v26 = vpop.f32.mrb[35].mxu0  ;;  %v15641_v27 = vpop.f32.mrb[33].mxu1  ;;  %v4181_v24 = vsel %vm3276_vm1, %v18774_v17, 0 }
 0x99e   : > { %v3938_v28 = vpop.f32.mrb[34].mxu1  ;;  %v4227_v26 = vsel %vm3276_vm1, %v4174_v63, 0  ;;  %v4171_v27 = vpack.c.bf16 %v18506_v2, %v18506_v2 }
 0x99f   : > { %v15642_v29 = vpop.f32.mrb[35].mxu1  ;;  %v18801_v28 = vpack.c.bf16 %v18601_v5, %v18601_v5 }
 0x9a0   : > { %v4172_v29 = vpack.c.bf16 %v18513_v7, %v18513_v7 }
 0x9a1   : > { %v4347_v1 = vsel %vm3403_vm2, %v18801_v28, 0 }
 0x9a2   : > { %v3987_v30 = vpop.f32.mrb[36].mxu0 }
 0x9a3   : > { %v4045_v31 = vmul.f32 0.125, %v3987_v30  ;;  %v15647_v32 = vpop.f32.mrb[37].mxu0  ;;  %v4301_v30 = vsel %vm3403_vm2, %v18794_v53, 0 }
 0x9a4   : > { %v3990_v33 = vpop.f32.mrb[38].mxu0  ;;  %v4039_v35 = vpop.f32.mrb[36].mxu1 }
 0x9a5   : > { %v4046_v36 = vmul.f32 0.125, %v4039_v35  ;;  %v15648_v37 = vpop.f32.mrb[39].mxu0  ;;  %v15653_v38 = vpop.f32.mrb[37].mxu1  ;;  %v4047_v39 = vsel %vm3371_vm3, -1e+09, %v4045_v31 }
 0x9a6   : > { %v4042_v40 = vpop.f32.mrb[38].mxu1  ;;  %v4049_v41 = vsel %vm3375_vm4, %v4047_v39, -inf }
 0x9a7   : > { %v15654_v42 = vpop.f32.mrb[39].mxu1  ;;  %4050 = vmax.xlane.f32.xlu0 %v4049_v41  ;;  %v4048_v62 = vsel %vm3372_vm5, -1e+09, %v4046_v36 }
 0x9a8   : > { %v4052_v44 = vsel %vm3375_vm4, %v4048_v62, -inf }
 0x9a9   : > { %4053 = vmax.xlane.f32.xlu1 %v4052_v44 }
 0x9ba   : > { %4123 = vrot.lane.b32.xlu1 %v18697_v16, %s17816_s27 }
 0xa34   : > { %v4051_v45 = vpop.xlane.xlu0 %4050 }
 0xa35   : > { %v4055_v47 = vsub.f32 %v4047_v39, %v4051_v45 }
 0xa36   : > { %v4054_v48 = vpop.xlane.xlu1 %4053 }
 0xa37   : > { %v4057_v50 = vmul.f32 1.442695, %v4055_v47  ;;  %v4056_v11 = vsub.f32 %v4048_v62, %v4054_v48 }
 0xa39   : > { %17554 = vpow2.f32 %v4057_v50  ;;  %v4059_v52 = vmul.f32 1.442695, %v4056_v11 }
 0xa3a   : > { %v4124_v55 = vpop.permute.xlu1 %4123 }
 0xa3b   : > { %17556 = vpow2.f32 %v4059_v52  ;;  %v4129_v56 = vsel %vm3403_vm2, %v4124_v55, 0 }
 0xa3c   : > { %15662 = vmatpush3.bf16.msra.mxu1 %v4129_v56 }
 0xa3d   : > { %15673 = vmatprep.subr.bf16.mxu1 %v17814_v43 }
 0xa43   : > { %v17555_v60 = vpop.eup %17554 }
 0xa44   : > { %v4061_v0 = vsel %vm3375_vm4, %v17555_v60, 0.0 }
 0xa45   : > { %v17557_v12 = vpop.eup %17556  ;;  %4062 = vadd.xlane.f32.xlu0 %v4061_v0 }
 0xa46   : > { %v4064_v16 = vsel %vm3375_vm4, %v17557_v12, 0.0 }
 0xa49   : > { %4065 = vadd.xlane.f32.xlu0 %v4064_v16 }
 0xa5f   : > { %4074 = vrot.lane.b32.xlu0 %v18690_v51, %s17816_s27 }
 0xad2   : > { %v4063_v46 = vpop.xlane.xlu0 %4062 }
 0xad3   : > { %17558 = vrcp.f32 %v4063_v46 }
 0xad6   : > { %v4066_v14 = vpop.xlane.xlu0 %4065 }
 0xad7   : > { %17560 = vrcp.f32 %v4066_v14 }
 0xada   : > { %v4075_v18 = vpop.permute.xlu0 %4074 }
 0xadb   : > { %v4080_v57 = vsel %vm3403_vm2, %v4075_v18, 0 }
 0xadc   : > { %15656 = vmatpush3.bf16.msra.mxu0 %v4080_v57 }
 0xadd   : > { %v17559_v15 = vpop.eup %17558  ;;  %15667 = vmatprep.subr.bf16.mxu0 %v17814_v43 }
 0xade   : > { %v4068_v54 = vmul.f32 %v17559_v15, %v17555_v60 }
 0xae0   : > { %5073 = vst.msk [vmem:[%s18091_s17 + $0x30] sm:$0xff] %vm3375_vm4, %v4068_v54  ;;  %v4071_v51 = vpack.c.bf16 %v4068_v54, %v4068_v54 }
 0xae1   : > { %v17561_v61 = vpop.eup %17560 }
 0xae2   : > { %v4070_v23 = vmul.f32 %v17561_v61, %v17557_v12  ;;  %15658 = vmatmul.mubr.msk.bf16.vlgmr.msra.gmra.mrb[40].mxu0 %vm3375_vm4, %v4071_v51 }
 0xae3   : > { %15669 = vmatprep.mubr.msk.bf16.mxu0 %vm17815_vm0, %v17814_v43 }
 0xae4   : > { %5074 = vst.msk [vmem:[%s18091_s17 + $0x38] sm:$0xff] %vm3375_vm4, %v4070_v23  ;;  %v4072_v19 = vpack.c.bf16 %v4070_v23, %v4070_v23 }
 0xae5   : > { %15668 = vmatpush3.bf16.xpose.msra.mxu0 %v4181_v24 }
 0xae6   : > { %15664 = vmatmul.mubr.msk.bf16.vlgmr.msra.gmra.mrb[40].mxu1 %vm3375_vm4, %v4072_v19  ;;  %15679 = vmatprep.subr.bf16.mxu0 %v17814_v43 }
 0xae7   : > { %15674 = vmatpush3.bf16.xpose.msra.mxu1 %v4227_v26  ;;  %15675 = vmatprep.mubr.msk.bf16.mxu1 %vm17815_vm0, %v17814_v43 }
 0xae8   : > { %15685 = vmatprep.subr.bf16.mxu1 %v17814_v43 }
 0xaec   : > { %15670 = vmatmul.mubr.msk.bf16.vlgmr.msra.gmra.mrb[44].mxu0 %vm3276_vm1, %v4171_v27 }
 0xaed   : > { %15680 = vmatpush3.bf16.msra.mxu0 %v4301_v30  ;;  %15681 = vmatprep.mubr.msk.bf16.mxu0 %vm17815_vm0, %v17814_v43 }
 0xaee   : > { %15676 = vmatmul.mubr.msk.bf16.vlgmr.msra.gmra.mrb[44].mxu1 %vm3276_vm1, %v4172_v29  ;;  %15691 = vmatprep.subr.bf16.mxu0 %v17814_v43 }
 0xaef   : > { %15686 = vmatpush3.bf16.msra.mxu1 %v4347_v1  ;;  %15687 = vmatprep.mubr.msk.bf16.mxu1 %vm17815_vm0, %v17814_v43 }
 0xaf0   : > { %15697 = vmatprep.subr.bf16.mxu1 %v17814_v43 }
 0xbb5   : > { %v18817_v2 = vpop.f32.mrb[40].mxu0 }
 0xbb6   : > { %v15659_v7 = vpop.f32.mrb[41].mxu0 }
 0xbb7   : > { %v4119_v5 = vpop.f32.mrb[42].mxu0 }
 0xbb8   : > { %v15660_v31 = vpop.f32.mrb[43].mxu0 }
 0xbb9   : > { %v18819_v32 = vpop.f32.mrb[40].mxu1 }
 0xbba   : > { %v15974_v33 = vpack.i.bf16 %v18819_v32, %v18817_v2  ;;  %v15665_v35 = vpop.f32.mrb[41].mxu1 }
 0xbbb   : > { %v4168_v36 = vpop.f32.mrb[42].mxu1 }
 0xbbc   : > { %v15666_v37 = vpop.f32.mrb[43].mxu1 }
 0xbbf   : > { %v4217_v38 = vpop.f32.mrb[44].mxu0 }
 0xbc0   : > { %v4269_v39 = vmul.f32 0.125, %v4217_v38  ;;  %v15671_v40 = vpop.f32.mrb[45].mxu0 }
 0xbc1   : > { %v4220_v41 = vpop.f32.mrb[46].mxu0  ;;  %v4263_v42 = vpop.f32.mrb[44].mxu1 }
 0xbc2   : > { %v4270_v62 = vmul.f32 0.125, %v4263_v42  ;;  %v15672_v44 = vpop.f32.mrb[47].mxu0  ;;  %v15677_v45 = vpop.f32.mrb[45].mxu1  ;;  %v4271_v47 = vsel %vm3371_vm3, -1e+09, %v4269_v39 }
 0xbc3   : > { %v4266_v48 = vpop.f32.mrb[46].mxu1  ;;  %v4273_v50 = vsel %vm3375_vm4, %v4271_v47, -inf }
 0xbc4   : > { %v15678_v11 = vpop.f32.mrb[47].mxu1  ;;  %4274 = vmax.xlane.f32.xlu1 %v4273_v50  ;;  %v4272_v52 = vsel %vm3372_vm5, -1e+09, %v4270_v62 }
 0xbc5   : > { %v4276_v55 = vsel %vm3375_vm4, %v4272_v52, -inf }
 0xbc6   : > { %4277 = vmax.xlane.f32.xlu0 %v4276_v55 }
 0xbd5   : > { %4445 = vrot.lane.b32.xlu1 %v4174_v63, %s17816_s27 }
 0xc51   : > { %v4275_v56 = vpop.xlane.xlu1 %4274 }
 0xc52   : > { %v4279_v60 = vsub.f32 %v4271_v47, %v4275_v56 }
 0xc53   : > { %v4278_v0 = vpop.xlane.xlu0 %4277 }
 0xc54   : > { %v4281_v12 = vmul.f32 1.442695, %v4279_v60  ;;  %v4280_v16 = vsub.f32 %v4272_v52, %v4278_v0 }
 0xc55   : > { %v4446_v54 = vpop.permute.xlu1 %4445 }
 0xc56   : > { %17562 = vpow2.f32 %v4281_v12  ;;  %v4283_v46 = vmul.f32 1.442695, %v4280_v16 }
 0xc58   : > { %17564 = vpow2.f32 %v4283_v46 }
 0xc60   : > { %v17563_v14 = vpop.eup %17562 }
 0xc61   : > { %v4285_v18 = vsel %vm3375_vm4, %v17563_v14, 0.0 }
 0xc62   : > { %v17565_v57 = vpop.eup %17564  ;;  %4286 = vadd.xlane.f32.xlu0 %v4285_v18 }
 0xc63   : > { %v4288_v15 = vsel %vm3375_vm4, %v17565_v57, 0.0 }
 0xc64   : > { %4289 = vadd.xlane.f32.xlu1 %v4288_v15 }
 0xc75   : > { %4390 = vrot.lane.b32.xlu1 %v4171_v27, %s17816_s27 }
 0xc78   : > { %4393 = vrot.lane.b32.xlu0 %v18774_v17, %s17816_s27 }
 0xc79   : > { %4442 = vrot.lane.b32.xlu1 %v4172_v29, %s17816_s27  ;;  %v4451_v29 = vsel %vm3276_vm1, %v4446_v54, 0 }
 0xcef   : > { %v4287_v51 = vpop.xlane.xlu0 %4286 }
 0xcf0   : > { %17566 = vrcp.f32 %v4287_v51 }
 0xcf1   : > { %v4290_v61 = vpop.xlane.xlu1 %4289 }
 0xcf2   : > { %17568 = vrcp.f32 %v4290_v61 }
 0xcf3   : > { %v4394_v19 = vpop.permute.xlu0 %4393 }
 0xcf4   : > { %v4399_v27 = vsel %vm3276_vm1, %v4394_v19, 0 }
 0xcf5   : > { %v4391_v1 = vpop.permute.xlu1 %4390 }
 0xcf9   : > { %v4443_v7 = vpop.permute.xlu1 %4442 }
 0xcfa   : > { %v17567_v63 = vpop.eup %17566 }
 0xcfb   : > { %v4292_v23 = vmul.f32 %v17567_v63, %v17563_v14 }
 0xcfc   : > { %v17569_v24 = vpop.eup %17568 }
 0xcfd   : > { %5075 = vst.msk [vmem:[%s18091_s17 + $0x40] sm:$0xff] %vm3375_vm4, %v4292_v23  ;;  %v4294_v26 = vmul.f32 %v17569_v24, %v17565_v57  ;;  %v4295_v30 = vpack.c.bf16 %v4292_v23, %v4292_v23 }
 0xcff   : > { %5076 = vst.msk [vmem:[%s18091_s17 + $0x48] sm:$0xff] %vm3375_vm4, %v4294_v26  ;;  %15682 = vmatmul.mubr.msk.bf16.vlgmr.msra.gmra.mrb[48].mxu0 %vm3375_vm4, %v4295_v30  ;;  %v4296_v17 = vpack.c.bf16 %v4294_v26, %v4294_v26 }
 0xd00   : > { %15692 = vmatpush3.bf16.xpose.msra.mxu0 %v4399_v27  ;;  %15693 = vmatprep.mubr.msk.bf16.mxu0 %vm17815_vm0, %v17814_v43 }
 0xd01   : > { %15688 = vmatmul.mubr.msk.bf16.vlgmr.msra.gmra.mrb[48].mxu1 %vm3375_vm4, %v4296_v17  ;;  %15703 = vmatprep.subr.bf16.mxu0 %v17814_v43  ;;  %v18878_v17 = vpack.c.bf16 %v18567_v49, %v18567_v49 }
 0xd02   : > { %15698 = vmatpush3.bf16.xpose.msra.mxu1 %v4451_v29  ;;  %15699 = vmatprep.mubr.msk.bf16.mxu1 %vm17815_vm0, %v17814_v43 }
 0xd03   : > { %15709 = vmatprep.subr.bf16.mxu1 %v17814_v43 }
 0xd07   : > { %15694 = vmatmul.mubr.msk.bf16.vlgmr.msra.gmra.mrb[52].mxu0 %vm3276_vm1, %v4391_v1  ;;  %v4622_v1 = vpack.c.bf16 %v18573_v34, %v18573_v34  ;;  %v18898_v34 = vpack.c.bf16 %v18599_v3, %v18599_v3 }
 0xd08   : > { %15705 = vmatprep.mubr.msk.bf16.mxu0 %vm17815_vm0, %v17814_v43 }
 0xd09   : > { %15700 = vmatmul.mubr.msk.bf16.vlgmr.msra.gmra.mrb[52].mxu1 %vm3276_vm1, %v4443_v7 }
 0xd0a   : > { %15711 = vmatprep.mubr.msk.bf16.mxu1 %vm17815_vm0, %v17814_v43 }
 0xdd2   : > { %v18856_v5 = vpop.f32.mrb[48].mxu0 }
 0xdd3   : > { %v15683_v31 = vpop.f32.mrb[49].mxu0 }
 0xdd4   : > { %v4340_v35 = vpop.f32.mrb[50].mxu0  ;;  %v18858_v36 = vpop.f32.mrb[48].mxu1  ;;  %v4629_v31 = vsel %vm3276_vm1, %v18878_v17, 0 }
 0xdd5   : > { %v15684_v37 = vpop.f32.mrb[51].mxu0  ;;  %v15689_v38 = vpop.f32.mrb[49].mxu1  ;;  %v4675_v35 = vsel %vm3276_vm1, %v4622_v1, 0 }
 0xdd6   : > { %v4386_v39 = vpop.f32.mrb[50].mxu1  ;;  %v4619_v37 = vpack.c.bf16 %v18509_v4, %v18509_v4  ;;  %v18905_v38 = vpack.c.bf16 %v18603_v6, %v18603_v6 }
 0xdd7   : > { %v15690_v40 = vpop.f32.mrb[51].mxu1  ;;  %v4620_v39 = vpack.c.bf16 %v18516_v9, %v18516_v9 }
 0xdd8   : > { %v4749_v40 = vsel %vm3403_vm2, %v18898_v34, 0  ;;  %v4795_v3 = vsel %vm3403_vm2, %v18905_v38, 0 }
 0xdda   : > { %v4435_v41 = vpop.f32.mrb[52].mxu0 }
 0xddb   : > { %v4493_v42 = vmul.f32 0.125, %v4435_v41  ;;  %v15695_v62 = vpop.f32.mrb[53].mxu0 }
 0xddc   : > { %v4438_v44 = vpop.f32.mrb[54].mxu0  ;;  %v4487_v45 = vpop.f32.mrb[52].mxu1 }
 0xddd   : > { %v4494_v47 = vmul.f32 0.125, %v4487_v45  ;;  %v15696_v48 = vpop.f32.mrb[55].mxu0  ;;  %v15701_v50 = vpop.f32.mrb[53].mxu1  ;;  %v4495_v11 = vsel %vm3371_vm3, -1e+09, %v4493_v42 }
 0xdde   : > { %v4490_v52 = vpop.f32.mrb[54].mxu1  ;;  %v4497_v55 = vsel %vm3375_vm4, %v4495_v11, -inf }
 0xddf   : > { %v15702_v56 = vpop.f32.mrb[55].mxu1  ;;  %4498 = vmax.xlane.f32.xlu0 %v4497_v55  ;;  %v4496_v60 = vsel %vm3372_vm5, -1e+09, %v4494_v47 }
 0xde0   : > { %v4500_v0 = vsel %vm3375_vm4, %v4496_v60, -inf }
 0xde1   : > { %4501 = vmax.xlane.f32.xlu1 %v4500_v0 }
 0xdf2   : > { %4571 = vrot.lane.b32.xlu1 %v18801_v28, %s17816_s27 }
 0xe6c   : > { %v4499_v12 = vpop.xlane.xlu0 %4498 }
 0xe6d   : > { %v4503_v16 = vsub.f32 %v4495_v11, %v4499_v12 }
 0xe6e   : > { %v4502_v46 = vpop.xlane.xlu1 %4501 }
 0xe6f   : > { %v4505_v14 = vmul.f32 1.442695, %v4503_v16  ;;  %v4504_v18 = vsub.f32 %v4496_v60, %v4502_v46 }
 0xe71   : > { %17570 = vpow2.f32 %v4505_v14  ;;  %v4507_v57 = vmul.f32 1.442695, %v4504_v18 }
 0xe72   : > { %v4572_v15 = vpop.permute.xlu1 %4571 }
 0xe73   : > { %17572 = vpow2.f32 %v4507_v57  ;;  %v4577_v54 = vsel %vm3403_vm2, %v4572_v15, 0 }
 0xe74   : > { %15710 = vmatpush3.bf16.msra.mxu1 %v4577_v54 }
 0xe75   : > { %15721 = vmatprep.subr.bf16.mxu1 %v17814_v43 }
 0xe7b   : > { %v17571_v51 = vpop.eup %17570 }
 0xe7c   : > { %v4509_v61 = vsel %vm3375_vm4, %v17571_v51, 0.0 }
 0xe7d   : > { %v17573_v63 = vpop.eup %17572  ;;  %4510 = vadd.xlane.f32.xlu0 %v4509_v61 }
 0xe7e   : > { %v4512_v28 = vsel %vm3375_vm4, %v17573_v63, 0.0 }
 0xe81   : > { %4513 = vadd.xlane.f32.xlu0 %v4512_v28 }
 0xe97   : > { %4522 = vrot.lane.b32.xlu0 %v18794_v53, %s17816_s27 }
 0xf0a   : > { %v4511_v23 = vpop.xlane.xlu0 %4510 }
 0xf0b   : > { %17574 = vrcp.f32 %v4511_v23 }
 0xf0e   : > { %v4514_v24 = vpop.xlane.xlu0 %4513 }
 0xf0f   : > { %17576 = vrcp.f32 %v4514_v24 }
 0xf12   : > { %v4523_v19 = vpop.permute.xlu0 %4522 }
 0xf13   : > { %v4528_v26 = vsel %vm3403_vm2, %v4523_v19, 0 }
 0xf14   : > { %15704 = vmatpush3.bf16.msra.mxu0 %v4528_v26 }
 0xf15   : > { %v17575_v30 = vpop.eup %17574  ;;  %15715 = vmatprep.subr.bf16.mxu0 %v17814_v43 }
 0xf16   : > { %v4516_v27 = vmul.f32 %v17575_v30, %v17571_v51 }
 0xf18   : > { %5077 = vst.msk [vmem:[%s18091_s17 + $0x50] sm:$0xff] %vm3375_vm4, %v4516_v27  ;;  %v4519_v53 = vpack.c.bf16 %v4516_v27, %v4516_v27 }
 0xf19   : > { %v17577_v29 = vpop.eup %17576 }
 0xf1a   : > { %v4518_v7 = vmul.f32 %v17577_v29, %v17573_v63  ;;  %15706 = vmatmul.mubr.msk.bf16.vlgmr.msra.gmra.mrb[56].mxu0 %vm3375_vm4, %v4519_v53 }
 0xf1b   : > { %15717 = vmatprep.mubr.msk.bf16.mxu0 %vm17815_vm0, %v17814_v43 }
 0xf1c   : > { %5078 = vst.msk [vmem:[%s18091_s17 + $0x58] sm:$0xff] %vm3375_vm4, %v4518_v7  ;;  %v4520_v49 = vpack.c.bf16 %v4518_v7, %v4518_v7 }
 0xf1d   : > { %15716 = vmatpush3.bf16.xpose.msra.mxu0 %v4629_v31 }
 0xf1e   : > { %15712 = vmatmul.mubr.msk.bf16.vlgmr.msra.gmra.mrb[56].mxu1 %vm3375_vm4, %v4520_v49  ;;  %15727 = vmatprep.subr.bf16.mxu0 %v17814_v43 }
 0xf1f   : > { %15722 = vmatpush3.bf16.xpose.msra.mxu1 %v4675_v35  ;;  %15723 = vmatprep.mubr.msk.bf16.mxu1 %vm17815_vm0, %v17814_v43 }
 0xf20   : > { %15733 = vmatprep.subr.bf16.mxu1 %v17814_v43 }
 0xf24   : > { %15718 = vmatmul.mubr.msk.bf16.vlgmr.msra.gmra.mrb[60].mxu0 %vm3276_vm1, %v4619_v37 }
 0xf25   : > { %15728 = vmatpush3.bf16.msra.mxu0 %v4749_v40  ;;  %15729 = vmatprep.mubr.msk.bf16.mxu0 %vm17815_vm0, %v17814_v43 }
 0xf26   : > { %15724 = vmatmul.mubr.msk.bf16.vlgmr.msra.gmra.mrb[60].mxu1 %vm3276_vm1, %v4620_v39  ;;  %15739 = vmatprep.subr.bf16.mxu0 %v17814_v43 }
 0xf27   : > { %15734 = vmatpush3.bf16.msra.mxu1 %v4795_v3  ;;  %15735 = vmatprep.mubr.msk.bf16.mxu1 %vm17815_vm0, %v17814_v43 }
 0xf28   : > { %15745 = vmatprep.subr.bf16.mxu1 %v17814_v43 }
 0xfed   : > { %v18921_v4 = vpop.f32.mrb[56].mxu0 }
 0xfee   : > { %v15707_v9 = vpop.f32.mrb[57].mxu0 }
 0xfef   : > { %v4567_v6 = vpop.f32.mrb[58].mxu0 }
 0xff0   : > { %v15708_v41 = vpop.f32.mrb[59].mxu0 }
 0xff1   : > { %v18923_v42 = vpop.f32.mrb[56].mxu1 }
 0xff2   : > { %v15989_v62 = vpack.i.bf16 %v18923_v42, %v18921_v4  ;;  %v15713_v44 = vpop.f32.mrb[57].mxu1 }
 0xff3   : > { %v4616_v45 = vpop.f32.mrb[58].mxu1 }
 0xff4   : > { %v15714_v47 = vpop.f32.mrb[59].mxu1 }
 0xff7   : > { %v4665_v48 = vpop.f32.mrb[60].mxu0 }
 0xff8   : > { %v4717_v50 = vmul.f32 0.125, %v4665_v48  ;;  %v15719_v11 = vpop.f32.mrb[61].mxu0 }
 0xff9   : > { %v4668_v52 = vpop.f32.mrb[62].mxu0  ;;  %v4711_v55 = vpop.f32.mrb[60].mxu1 }
 0xffa   : > { %v4718_v56 = vmul.f32 0.125, %v4711_v55  ;;  %v15720_v60 = vpop.f32.mrb[63].mxu0  ;;  %v15725_v0 = vpop.f32.mrb[61].mxu1  ;;  %v4719_v12 = vsel %vm3371_vm3, -1e+09, %v4717_v50 }
 0xffb   : > { %v4714_v16 = vpop.f32.mrb[62].mxu1  ;;  %v4721_v46 = vsel %vm3375_vm4, %v4719_v12, -inf }
 0xffc   : > { %v15726_v14 = vpop.f32.mrb[63].mxu1  ;;  %4722 = vmax.xlane.f32.xlu1 %v4721_v46  ;;  %v4720_v18 = vsel %vm3372_vm5, -1e+09, %v4718_v56 }
 0xffd   : > { %v4724_v57 = vsel %vm3375_vm4, %v4720_v18, -inf }
 0xffe   : > { %4725 = vmax.xlane.f32.xlu0 %v4724_v57 }
0x100d   : > { %4893 = vrot.lane.b32.xlu1 %v4622_v1, %s17816_s27 }
0x1089   : > { %v4723_v15 = vpop.xlane.xlu1 %4722 }
0x108a   : > { %v4727_v54 = vsub.f32 %v4719_v12, %v4723_v15 }
0x108b   : > { %v4726_v51 = vpop.xlane.xlu0 %4725 }
0x108c   : > { %v4729_v61 = vmul.f32 1.442695, %v4727_v54  ;;  %v4728_v63 = vsub.f32 %v4720_v18, %v4726_v51 }
0x108d   : > { %v4894_v30 = vpop.permute.xlu1 %4893 }
0x108e   : > { %17578 = vpow2.f32 %v4729_v61  ;;  %v4731_v28 = vmul.f32 1.442695, %v4728_v63 }
0x1090   : > { %17580 = vpow2.f32 %v4731_v28 }
0x1098   : > { %v17579_v23 = vpop.eup %17578 }
0x1099   : > { %v4733_v24 = vsel %vm3375_vm4, %v17579_v23, 0.0 }
0x109a   : > { %v17581_v19 = vpop.eup %17580  ;;  %4734 = vadd.xlane.f32.xlu0 %v4733_v24 }
0x109b   : > { %v4736_v26 = vsel %vm3375_vm4, %v17581_v19, 0.0 }
0x109c   : > { %4737 = vadd.xlane.f32.xlu1 %v4736_v26 }
0x10ad   : > { %4838 = vrot.lane.b32.xlu1 %v4619_v37, %s17816_s27 }
0x10b0   : > { %4841 = vrot.lane.b32.xlu0 %v18878_v17, %s17816_s27 }
0x10b1   : > { %4890 = vrot.lane.b32.xlu1 %v4620_v39, %s17816_s27  ;;  %v4899_v39 = vsel %vm3276_vm1, %v4894_v30, 0 }
0x1127   : > { %v4735_v27 = vpop.xlane.xlu0 %4734 }
0x1128   : > { %17582 = vrcp.f32 %v4735_v27 }
0x1129   : > { %v4738_v53 = vpop.xlane.xlu1 %4737 }
0x112a   : > { %17584 = vrcp.f32 %v4738_v53 }
0x112b   : > { %v4842_v31 = vpop.permute.xlu0 %4841 }
0x112c   : > { %v4847_v37 = vsel %vm3276_vm1, %v4842_v31, 0 }
0x112d   : > { %v4839_v40 = vpop.permute.xlu1 %4838 }
0x1131   : > { %v4891_v3 = vpop.permute.xlu1 %4890 }
0x1132   : > { %v17583_v29 = vpop.eup %17582 }
0x1133   : > { %v4740_v1 = vmul.f32 %v17583_v29, %v17579_v23 }
0x1134   : > { %v17585_v7 = vpop.eup %17584 }
0x1135   : > { %5079 = vst.msk [vmem:[%s18091_s17 + $0x60] sm:$0xff] %vm3375_vm4, %v4740_v1  ;;  %v4742_v49 = vmul.f32 %v17585_v7, %v17581_v19  ;;  %v4743_v35 = vpack.c.bf16 %v4740_v1, %v4740_v1 }
0x1137   : > { %5080 = vst.msk [vmem:[%s18091_s17 + $0x68] sm:$0xff] %vm3375_vm4, %v4742_v49  ;;  %15730 = vmatmul.mubr.msk.bf16.vlgmr.msra.gmra.mrb[64].mxu0 %vm3375_vm4, %v4743_v35  ;;  %v4744_v17 = vpack.c.bf16 %v4742_v49, %v4742_v49  ;;  %v16572_v35 = vld [vmem:[%s18072_s22 + $0x4] ss:$16 sps:$4 sm:$0xff]  }
0x1138   : > { %15740 = vmatpush3.bf16.xpose.msra.mxu0 %v4847_v37  ;;  %15741 = vmatprep.mubr.msk.bf16.mxu0 %vm17815_vm0, %v17814_v43 }
0x1139   : > { %15736 = vmatmul.mubr.msk.bf16.vlgmr.msra.gmra.mrb[64].mxu1 %vm3375_vm4, %v4744_v17  ;;  %15751 = vmatprep.subr.bf16.mxu0 %v17814_v43 }
0x113a   : > { %15746 = vmatpush3.bf16.xpose.msra.mxu1 %v4899_v39  ;;  %15747 = vmatprep.mubr.msk.bf16.mxu1 %vm17815_vm0, %v17814_v43 }
0x113b   : > { %15757 = vmatprep.subr.bf16.mxu1 %v17814_v43 }
0x113f   : > { %15742 = vmatmul.mubr.msk.bf16.vlgmr.msra.gmra.mrb[68].mxu0 %vm3276_vm1, %v4839_v40  ;;  %v16575_v40 = vld [vmem:[%s18072_s22 + $0x24] ss:$16 sps:$4 sm:$0xff]  }
0x1140   : > { %15753 = vmatprep.mubr.msk.bf16.mxu0 %vm17815_vm0, %v17814_v43 }
0x1141   : > { %15748 = vmatmul.mubr.msk.bf16.vlgmr.msra.gmra.mrb[68].mxu1 %vm3276_vm1, %v4891_v3 }
0x1142   : > { %15759 = vmatprep.mubr.msk.bf16.mxu1 %vm17815_vm0, %v17814_v43 }
0x120a   : > { %v18960_v9 = vpop.f32.mrb[64].mxu0 }
0x120b   : > { %v15731_v6 = vpop.f32.mrb[65].mxu0 }
0x120c   : > { %v4788_v41 = vpop.f32.mrb[66].mxu0  ;;  %v18962_v44 = vpop.f32.mrb[64].mxu1 }
0x120d   : > { %v15732_v45 = vpop.f32.mrb[67].mxu0  ;;  %v15737_v47 = vpop.f32.mrb[65].mxu1  ;;  %v16573_v41 = vld [vmem:[%s18072_s22 + $0x20] ss:$16 sps:$4 sm:$0xff]  }
0x120e   : > { %v4834_v48 = vpop.f32.mrb[66].mxu1  ;;  %v16576_v45 = vld [vmem:[%s18072_s22 + $0x8] ss:$16 sps:$4 sm:$0xff]  }
0x120f   : > { %v15738_v50 = vpop.f32.mrb[67].mxu1  ;;  %v16581_v48 = vld [vmem:[%s18072_s22 + $0x44] ss:$16 sps:$4 sm:$0xff]  }
0x1210   : > { %v16584_v50 = vld [vmem:[%s18072_s22 + $0x2c] ss:$16 sps:$4 sm:$0xff]  }
0x1212   : > { %v4883_v11 = vpop.f32.mrb[68].mxu0 }
0x1213   : > { %v4941_v52 = vmul.f32 0.125, %v4883_v11  ;;  %v15743_v55 = vpop.f32.mrb[69].mxu0  ;;  %v16579_v11 = vld [vmem:[%s18072_s22 + $0x40] ss:$16 sps:$4 sm:$0xff]  }
0x1214   : > { %v4886_v56 = vpop.f32.mrb[70].mxu0  ;;  %v4935_v60 = vpop.f32.mrb[68].mxu1  ;;  %v16587_v55 = vld [vmem:[%s18072_s22 + $0x64] ss:$16 sps:$4 sm:$0xff]  }
0x1215   : > { %v4942_v0 = vmul.f32 0.125, %v4935_v60  ;;  %v15744_v12 = vpop.f32.mrb[71].mxu0  ;;  %v15749_v16 = vpop.f32.mrb[69].mxu1  ;;  %v4943_v43 = vsel %vm3371_vm3, -1e+09, %v4941_v52 }
0x1216   : > { %v4938_v46 = vpop.f32.mrb[70].mxu1  ;;  %v4945_v14 = vsel %vm3375_vm4, %v4943_v43, -inf  ;;  %v16582_v52 = vld [vmem:[%s18072_s22 + $0x28] ss:$16 sps:$4 sm:$0xff]   ;;  %v16590_v56 = vld [vmem:[%s18072_s22 + $0x4c] ss:$16 sps:$4 sm:$0xff]  }
0x1217   : > { %v15750_v18 = vpop.f32.mrb[71].mxu1  ;;  %4946 = vmax.xlane.f32.xlu0 %v4945_v14  ;;  %v4944_v57 = vsel %vm3372_vm5, -1e+09, %v4942_v0  ;;  %v16585_v60 = vld [vmem:[%s18072_s22 + $0x60] ss:$16 sps:$4 sm:$0xff]  }
0x1218   : > { %v4948_v15 = vsel %vm3375_vm4, %v4944_v57, -inf  ;;  %v16588_v0 = vld [vmem:[%s18072_s22 + $0x48] ss:$16 sps:$4 sm:$0xff]   ;;  %v16593_v12 = vld [vmem:[%s18072_s22 + $0x84] ss:$16 sps:$4 sm:$0xff]  }
0x1219   : > { %4949 = vmax.xlane.f32.xlu1 %v4948_v15  ;;  %v16596_v16 = vld [vmem:[%s18072_s22 + $0x6c] ss:$16 sps:$4 sm:$0xff]   ;;  %v16594_v46 = vld [vmem:[%s18072_s22 + $0x68] ss:$16 sps:$4 sm:$0xff]   ;;  %v16599_v14 = vld [vmem:[%s18072_s22 + $0xa4] ss:$16 sps:$4 sm:$0xff]  }
0x121a   : > { %v16602_v18 = vld [vmem:[%s18072_s22 + $0x8c] ss:$16 sps:$4 sm:$0xff]   ;;  %v16600_v15 = vld [vmem:[%s18072_s22 + $0x88] ss:$16 sps:$4 sm:$0xff]  }
0x122a   : > { %5019 = vrot.lane.b32.xlu1 %v18905_v38, %s17816_s27 }
0x122e   : > { %15975 = vrot.lane.b32.xlu1 %v15974_v33, %s17816_s27 }
0x1232   : > { %15980 = vrot.lane.b32.xlu1 %v15979_v22, %s17816_s27 }
0x1236   : > { %15990 = vrot.lane.b32.xlu1 %v15989_v62, %s17816_s27 }
0x12a4   : > { %v4947_v8 = vpop.xlane.xlu0 %4946 }
0x12a5   : > { %v4951_v10 = vsub.f32 %v4943_v43, %v4947_v8  ;;  %v16591_v43 = vld [vmem:[%s18072_s22 + $0x80] ss:$16 sps:$4 sm:$0xff]   ;;  %v16605_v8 = vld [vmem:[%s18072_s22 + $0xc4] ss:$16 sps:$4 sm:$0xff]  }
0x12a6   : > { %v4950_v54 = vpop.xlane.xlu1 %4949 }
0x12a7   : > { %v4953_v51 = vmul.f32 1.442695, %v4951_v10  ;;  %v4952_v38 = vsub.f32 %v4944_v57, %v4950_v54  ;;  %v16597_v57 = vld [vmem:[%s18072_s22 + $0xa0] ss:$16 sps:$4 sm:$0xff]   ;;  %v16608_v10 = vld [vmem:[%s18072_s22 + $0xac] ss:$16 sps:$4 sm:$0xff]  }
0x12a8   : > { %v16603_v54 = vld [vmem:[%s18072_s22 + $0xc0] ss:$16 sps:$4 sm:$0xff]  }
0x12a9   : > { %17586 = vpow2.f32 %v4953_v51  ;;  %v4955_v61 = vmul.f32 1.442695, %v4952_v38  ;;  %v16606_v51 = vld [vmem:[%s18072_s22 + $0xa8] ss:$16 sps:$4 sm:$0xff]   ;;  %v16611_v38 = vld [vmem:[%s18072_s22 + $0xe4] ss:$16 sps:$4 sm:$0xff]  }
0x12aa   : > { %v5020_v63 = vpop.permute.xlu1 %5019 }
0x12ab   : > { %17588 = vpow2.f32 %v4955_v61  ;;  %v5025_v2 = vsel %vm3403_vm2, %v5020_v63, 0  ;;  %v16614_v61 = vld [vmem:[%s18072_s22 + $0xcc] ss:$16 sps:$4 sm:$0xff]   ;;  %v16609_v63 = vld [vmem:[%s18072_s22 + $0xe0] ss:$16 sps:$4 sm:$0xff]  }
0x12ac   : > { %15758 = vmatpush3.bf16.msra.mxu1 %v5025_v2  ;;  %v16612_v2 = vld [vmem:[%s18072_s22 + $0xc8] ss:$16 sps:$4 sm:$0xff]  }
0x12ae   : > { %v15976_v32 = vpop.permute.xlu1 %15975 }
0x12af   : > { %v15978_v58 = vunpack.i.h.bf16 %v15976_v32  ;;  %v15977_v21 = vunpack.i.l.bf16 %v15976_v32  ;;  %v16617_v32 = vld [vmem:[%s18072_s22 + $0x104] ss:$16 sps:$4 sm:$0xff]  }
0x12b1   : > { %v5117_v22 = vsel %vm3276_vm1, %v18752_v20, %v15977_v21  ;;  %v5118_v33 = vsel %vm3276_vm1, %v18754_v25, %v15978_v58  ;;  %v16620_v58 = vld [vmem:[%s18072_s22 + $0xec] ss:$16 sps:$4 sm:$0xff]   ;;  %v16615_v21 = vld [vmem:[%s18072_s22 + $0x100] ss:$16 sps:$4 sm:$0xff]  }
0x12b2   : > { %v15981_v4 = vpop.permute.xlu1 %15980  ;;  %v5124_v42 = vpack.c.bf16 %v5118_v33, %v5117_v22  ;;  %v16618_v22 = vld [vmem:[%s18072_s22 + $0xe8] ss:$16 sps:$4 sm:$0xff]   ;;  %v16623_v33 = vld [vmem:[%s18072_s22 + $0x124] ss:$16 sps:$4 sm:$0xff]  }
0x12b3   : > { %v17587_v62 = vpop.eup %17586  ;;  %v15983_v28 = vunpack.i.h.bf16 %v15981_v4  ;;  %v15982_v23 = vunpack.i.l.bf16 %v15981_v4  ;;  %v16626_v4 = vld [vmem:[%s18072_s22 + $0x10c] ss:$16 sps:$4 sm:$0xff]  }
0x12b4   : > { %v4957_v24 = vsel %vm3375_vm4, %v17587_v62, 0.0 }
0x12b5   : > { %v17589_v19 = vpop.eup %17588  ;;  %v5116_v26 = vsel %vm3276_vm1, %v18650_v13, %v15983_v28  ;;  %v5115_v30 = vsel %vm3276_vm1, %v18648_v59, %v15982_v23  ;;  %4958 = vadd.xlane.f32.xlu0 %v4957_v24  ;;  %v16578_v59 = vld [vmem:[%s18072_s22 + $0xc] ss:$16 sps:$4 sm:$0xff]   ;;  %v16629_v28 = vld [vmem:[%s18072_s22 + $0x144] ss:$16 sps:$4 sm:$0xff]   ;;  %v16627_v24 = vld [vmem:[%s18072_s22 + $0x140] ss:$16 sps:$4 sm:$0xff]  }
0x12b6   : > { %v18994_v20 = vpack.c.bf16 %v5116_v26, %v5115_v30  ;;  %v15991_v25 = vpop.permute.xlu1 %15990  ;;  %v4960_v29 = vsel %vm3375_vm4, %v17589_v19, 0.0  ;;  %5981 = vmatprep.subr.bf16.mxu1 %v16578_v59  ;;  %v16632_v23 = vld [vmem:[%s18072_s22 + $0x12c] ss:$16 sps:$4 sm:$0xff]   ;;  %v16635_v26 = vld [vmem:[%s18072_s22 + $0x164] ss:$16 sps:$4 sm:$0xff]  }
0x12b7   : > { %v15993_v27 = vunpack.i.h.bf16 %v15991_v25  ;;  %v15992_v53 = vunpack.i.l.bf16 %v15991_v25  ;;  %v16638_v30 = vld [vmem:[%s18072_s22 + $0x14c] ss:$16 sps:$4 sm:$0xff]   ;;  %v16633_v25 = vld [vmem:[%s18072_s22 + $0x160] ss:$16 sps:$4 sm:$0xff]   ;;  %v16647_v59 = vld [vmem:[%s18072_s22 + $0x1a4] ss:$16 sps:$4 sm:$0xff]  }
0x12b9   : > { %v5120_v1 = vsel %vm3276_vm1, %v18858_v36, %v15993_v27  ;;  %v5119_v7 = vsel %vm3276_vm1, %v18856_v5, %v15992_v53  ;;  %4961 = vadd.xlane.f32.xlu0 %v4960_v29  ;;  %v16636_v27 = vld [vmem:[%s18072_s22 + $0x148] ss:$16 sps:$4 sm:$0xff]   ;;  %v16641_v53 = vld [vmem:[%s18072_s22 + $0x184] ss:$16 sps:$4 sm:$0xff]   ;;  %v16644_v29 = vld [vmem:[%s18072_s22 + $0x16c] ss:$16 sps:$4 sm:$0xff]  }
0x12ba   : > { %v19001_v13 = vpack.c.bf16 %v5120_v1, %v5119_v7  ;;  %v16639_v1 = vld [vmem:[%s18072_s22 + $0x180] ss:$16 sps:$4 sm:$0xff]   ;;  %v16642_v7 = vld [vmem:[%s18072_s22 + $0x168] ss:$16 sps:$4 sm:$0xff]  }
0x12cf   : > { %4970 = vrot.lane.b32.xlu0 %v18898_v34, %s17816_s27  ;;  %v16570_v34 = vld [vmem:[%s18072_s22] ss:$16 sps:$4 sm:$0xff]  }
0x1342   : > { %v4959_v31 = vpop.xlane.xlu0 %4958 }
0x1343   : > { %17590 = vrcp.f32 %v4959_v31  ;;  %v16650_v31 = vld [vmem:[%s18072_s22 + $0x18c] ss:$16 sps:$4 sm:$0xff]  }
0x1346   : > { %v4962_v49 = vpop.xlane.xlu0 %4961 }
0x1347   : > { %17592 = vrcp.f32 %v4962_v49  ;;  %v16645_v49 = vld [vmem:[%s18072_s22 + $0x1a0] ss:$16 sps:$4 sm:$0xff]  }
0x134a   : > { %v4971_v36 = vpop.permute.xlu0 %4970 }
0x134b   : > { %v4976_v5 = vsel %vm3403_vm2, %v4971_v36, 0  ;;  %v16653_v36 = vld [vmem:[%s18072_s22 + $0x1c4] ss:$16 sps:$4 sm:$0xff]  }
0x134c   : > { %15752 = vmatpush3.bf16.msra.mxu0 %v4976_v5  ;;  %v16656_v5 = vld [vmem:[%s18072_s22 + $0x1ac] ss:$16 sps:$4 sm:$0xff]  }
0x134d   : > { %v17591_v37 = vpop.eup %17590  ;;  %5895 = vmatprep.subr.bf16.mxu0 %v16572_v35  ;;  %v16648_v35 = vld [vmem:[%s18072_s22 + $0x188] ss:$16 sps:$4 sm:$0xff]  }
0x134e   : > { %v4964_v17 = vmul.f32 %v17591_v37, %v17587_v62  ;;  %v16624_v62 = vld [vmem:[%s18072_s22 + $0x108] ss:$16 sps:$4 sm:$0xff]   ;;  %v16651_v37 = vld [vmem:[%s18072_s22 + $0x1c0] ss:$16 sps:$4 sm:$0xff]  }
0x1350   : > { %5081 = vst.msk [vmem:[%s18091_s17 + $0x70] sm:$0xff] %vm3375_vm4, %v4964_v17  ;;  %v4967_v39 = vpack.c.bf16 %v4964_v17, %v4964_v17  ;;  %v16654_v17 = vld [vmem:[%s18072_s22 + $0x1a8] ss:$16 sps:$4 sm:$0xff]  }
0x1351   : > { %v17593_v3 = vpop.eup %17592 }
0x1352   : > { %v4966_v6 = vmul.f32 %v17593_v3, %v17589_v19  ;;  %15754 = vmatmul.mubr.msk.bf16.vlgmr.msra.gmra.mrb[72].mxu0 %vm3375_vm4, %v4967_v39  ;;  %v16630_v19 = vld [vmem:[%s18072_s22 + $0x128] ss:$16 sps:$4 sm:$0xff]   ;;  %v16662_v39 = vld [vmem:[%s18072_s22 + $0x1cc] ss:$16 sps:$4 sm:$0xff]  }
0x1353   : > { %5896 = vmatpush1.bf16.msra.mxu0 %v16570_v34  ;;  %5927 = vmatprep.mubr.bf16.mxu0 %v5124_v42  ;;  %v16659_v34 = vld [vmem:[%s18072_s22 + $0x1e4] ss:$16 sps:$4 sm:$0xff]   ;;  %v16660_v3 = vld [vmem:[%s18072_s22 + $0x1c8] ss:$16 sps:$4 sm:$0xff]  }
0x1354   : > { %5082 = vst.msk [vmem:[%s18091_s17 + $0x78] sm:$0xff] %vm3375_vm4, %v4966_v6  ;;  %5897 = vmatprep.subr.bf16.mxu0 %v16575_v40  ;;  %v4968_v47 = vpack.c.bf16 %v4966_v6, %v4966_v6  ;;  %v16657_v40 = vld [vmem:[%s18072_s22 + $0x1e0] ss:$16 sps:$4 sm:$0xff]   ;;  %v16665_v6 = vld [vmem:[%s18072_s22 + $0x1ec] ss:$16 sps:$4 sm:$0xff]  }
0x1356   : > { %15760 = vmatmul.mubr.msk.bf16.vlgmr.msra.gmra.mrb[72].mxu1 %vm3375_vm4, %v4968_v47  ;;  %v16668_v47 = vld [vmem:[%s18072_s22 + $0x204] ss:$16 sps:$4 sm:$0xff]  }
0x1357   : > { %5898 = vmatpush1.bf16.msra.mxu0 %v16573_v41  ;;  %5982 = vmatpush1.bf16.msra.mxu1 %v16576_v45  ;;  %v16663_v41 = vld [vmem:[%s18072_s22 + $0x1e8] ss:$16 sps:$4 sm:$0xff]   ;;  %v16666_v45 = vld [vmem:[%s18072_s22 + $0x200] ss:$16 sps:$4 sm:$0xff]  }
0x1358   : > { %6013 = vmatprep.mubr.bf16.mxu1 %v5124_v42  ;;  %5899 = vmatprep.subr.bf16.mxu0 %v16581_v48  ;;  %v16621_v42 = vld [vmem:[%s18072_s22 + $0x120] ss:$16 sps:$4 sm:$0xff]   ;;  %v16669_v48 = vld [vmem:[%s18072_s22 + $0x208] ss:$16 sps:$4 sm:$0xff]  }
0x1359   : > { %5983 = vmatprep.subr.bf16.mxu1 %v16584_v50  ;;  %v16671_v50 = vld [vmem:[%s18072_s22 + $0x20c] ss:$16 sps:$4 sm:$0xff]  }
0x135b   : > { %5900 = vmatpush1.bf16.msra.mxu0 %v16579_v11  ;;  %5984 = vmatpush1.bf16.msra.mxu1 %v16582_v52  ;;  %v16674_v11 = vld [vmem:[%s18072_s22 + $0x224] ss:$16 sps:$4 sm:$0xff]   ;;  %v16677_v52 = vld [vmem:[%s18072_s22 + $0x22c] ss:$16 sps:$4 sm:$0xff]  }
0x135c   : > { %5901 = vmatprep.subr.bf16.mxu0 %v16587_v55  ;;  %5985 = vmatprep.subr.bf16.mxu1 %v16590_v56  ;;  %v16672_v55 = vld [vmem:[%s18072_s22 + $0x220] ss:$16 sps:$4 sm:$0xff]   ;;  %v16675_v56 = vld [vmem:[%s18072_s22 + $0x228] ss:$16 sps:$4 sm:$0xff]  }
0x135f   : > { %5902 = vmatpush1.bf16.msra.mxu0 %v16585_v60  ;;  %5986 = vmatpush1.bf16.msra.mxu1 %v16588_v0  ;;  %v16683_v60 = vld [vmem:[%s18072_s22 + $0x24c] ss:$16 sps:$4 sm:$0xff]   ;;  %v16678_v0 = vld [vmem:[%s18072_s22 + $0x240] ss:$16 sps:$4 sm:$0xff]  }
0x1360   : > { %5903 = vmatprep.subr.bf16.mxu0 %v16593_v12  ;;  %5987 = vmatprep.subr.bf16.mxu1 %v16596_v16  ;;  %v16681_v12 = vld [vmem:[%s18072_s22 + $0x248] ss:$16 sps:$4 sm:$0xff]   ;;  %v16686_v16 = vld [vmem:[%s18072_s22 + $0x264] ss:$16 sps:$4 sm:$0xff]  }
0x1363   : > { %5904 = vmatpush1.bf16.msra.mxu0 %v16591_v43  ;;  %5988 = vmatpush1.bf16.msra.mxu1 %v16594_v46  ;;  %v16689_v43 = vld [vmem:[%s18072_s22 + $0x26c] ss:$16 sps:$4 sm:$0xff]   ;;  %v16684_v46 = vld [vmem:[%s18072_s22 + $0x260] ss:$16 sps:$4 sm:$0xff]  }
0x1364   : > { %5905 = vmatprep.subr.bf16.mxu0 %v16599_v14  ;;  %5989 = vmatprep.subr.bf16.mxu1 %v16602_v18  ;;  %v16687_v14 = vld [vmem:[%s18072_s22 + $0x268] ss:$16 sps:$4 sm:$0xff]   ;;  %v16692_v18 = vld [vmem:[%s18072_s22 + $0x284] ss:$16 sps:$4 sm:$0xff]  }
0x1367   : > { %5906 = vmatpush1.bf16.msra.mxu0 %v16597_v57  ;;  %5990 = vmatpush1.bf16.msra.mxu1 %v16600_v15  ;;  %v16695_v57 = vld [vmem:[%s18072_s22 + $0x28c] ss:$16 sps:$4 sm:$0xff]   ;;  %v16690_v15 = vld [vmem:[%s18072_s22 + $0x280] ss:$16 sps:$4 sm:$0xff]  }
0x1368   : > { %5907 = vmatprep.subr.bf16.mxu0 %v16605_v8  ;;  %5991 = vmatprep.subr.bf16.mxu1 %v16608_v10  ;;  %v16693_v8 = vld [vmem:[%s18072_s22 + $0x288] ss:$16 sps:$4 sm:$0xff]   ;;  %v16698_v10 = vld [vmem:[%s18072_s22 + $0x2a4] ss:$16 sps:$4 sm:$0xff]  }
0x136b   : > { %5908 = vmatpush1.bf16.msra.mxu0 %v16603_v54  ;;  %5992 = vmatpush1.bf16.msra.mxu1 %v16606_v51  ;;  %v16701_v54 = vld [vmem:[%s18072_s22 + $0x2ac] ss:$16 sps:$4 sm:$0xff]   ;;  %v16696_v51 = vld [vmem:[%s18072_s22 + $0x2a0] ss:$16 sps:$4 sm:$0xff]  }
0x136c   : > { %5909 = vmatprep.subr.bf16.mxu0 %v16611_v38  ;;  %5993 = vmatprep.subr.bf16.mxu1 %v16614_v61  ;;  %v16699_v38 = vld [vmem:[%s18072_s22 + $0x2a8] ss:$16 sps:$4 sm:$0xff]   ;;  %v16704_v61 = vld [vmem:[%s18072_s22 + $0x2c4] ss:$16 sps:$4 sm:$0xff]  }
0x136f   : > { %5910 = vmatpush1.bf16.msra.mxu0 %v16609_v63  ;;  %5994 = vmatpush1.bf16.msra.mxu1 %v16612_v2  ;;  %v16707_v63 = vld [vmem:[%s18072_s22 + $0x2cc] ss:$16 sps:$4 sm:$0xff]   ;;  %v16702_v2 = vld [vmem:[%s18072_s22 + $0x2c0] ss:$16 sps:$4 sm:$0xff]  }
0x1370   : > { %5911 = vmatprep.subr.bf16.mxu0 %v16617_v32  ;;  %5995 = vmatprep.subr.bf16.mxu1 %v16620_v58  ;;  %v16705_v32 = vld [vmem:[%s18072_s22 + $0x2c8] ss:$16 sps:$4 sm:$0xff]   ;;  %v16710_v58 = vld [vmem:[%s18072_s22 + $0x2e4] ss:$16 sps:$4 sm:$0xff]  }
0x1373   : > { %5912 = vmatpush1.bf16.msra.mxu0 %v16615_v21  ;;  %5996 = vmatpush1.bf16.msra.mxu1 %v16618_v22  ;;  %v16713_v21 = vld [vmem:[%s18072_s22 + $0x2ec] ss:$16 sps:$4 sm:$0xff]   ;;  %v16708_v22 = vld [vmem:[%s18072_s22 + $0x2e0] ss:$16 sps:$4 sm:$0xff]  }
0x1374   : > { %5913 = vmatprep.subr.bf16.mxu0 %v16623_v33  ;;  %5997 = vmatprep.subr.bf16.mxu1 %v16626_v4  ;;  %v16711_v33 = vld [vmem:[%s18072_s22 + $0x2e8] ss:$16 sps:$4 sm:$0xff]   ;;  %v16716_v4 = vld [vmem:[%s18072_s22 + $0x304] ss:$16 sps:$4 sm:$0xff]  }
0x1377   : > { %5914 = vmatpush1.bf16.msra.mxu0 %v16621_v42  ;;  %5998 = vmatpush1.bf16.msra.mxu1 %v16624_v62  ;;  %v16719_v42 = vld [vmem:[%s18072_s22 + $0x30c] ss:$16 sps:$4 sm:$0xff]   ;;  %v16714_v62 = vld [vmem:[%s18072_s22 + $0x300] ss:$16 sps:$4 sm:$0xff]  }
0x1378   : > { %5915 = vmatprep.subr.bf16.mxu0 %v16629_v28  ;;  %5999 = vmatprep.subr.bf16.mxu1 %v16632_v23  ;;  %v16717_v28 = vld [vmem:[%s18072_s22 + $0x308] ss:$16 sps:$4 sm:$0xff]   ;;  %v16722_v23 = vld [vmem:[%s18072_s22 + $0x324] ss:$16 sps:$4 sm:$0xff]  }
0x137b   : > { %5916 = vmatpush1.bf16.msra.mxu0 %v16627_v24  ;;  %6000 = vmatpush1.bf16.msra.mxu1 %v16630_v19  ;;  %v16725_v24 = vld [vmem:[%s18072_s22 + $0x32c] ss:$16 sps:$4 sm:$0xff]   ;;  %v16720_v19 = vld [vmem:[%s18072_s22 + $0x320] ss:$16 sps:$4 sm:$0xff]  }
0x137c   : > { %5917 = vmatprep.subr.bf16.mxu0 %v16635_v26  ;;  %6001 = vmatprep.subr.bf16.mxu1 %v16638_v30  ;;  %v16723_v26 = vld [vmem:[%s18072_s22 + $0x328] ss:$16 sps:$4 sm:$0xff]   ;;  %v16728_v30 = vld [vmem:[%s18072_s22 + $0x344] ss:$16 sps:$4 sm:$0xff]  }
0x137f   : > { %5918 = vmatpush1.bf16.msra.mxu0 %v16633_v25  ;;  %6002 = vmatpush1.bf16.msra.mxu1 %v16636_v27  ;;  %v16731_v25 = vld [vmem:[%s18072_s22 + $0x34c] ss:$16 sps:$4 sm:$0xff]   ;;  %v16726_v27 = vld [vmem:[%s18072_s22 + $0x340] ss:$16 sps:$4 sm:$0xff]  }
0x1380   : > { %5919 = vmatprep.subr.bf16.mxu0 %v16641_v53  ;;  %6003 = vmatprep.subr.bf16.mxu1 %v16644_v29  ;;  %v16729_v53 = vld [vmem:[%s18072_s22 + $0x348] ss:$16 sps:$4 sm:$0xff]   ;;  %v16734_v29 = vld [vmem:[%s18072_s22 + $0x364] ss:$16 sps:$4 sm:$0xff]  }
0x1383   : > { %5920 = vmatpush1.bf16.msra.mxu0 %v16639_v1  ;;  %6004 = vmatpush1.bf16.msra.mxu1 %v16642_v7  ;;  %v16737_v1 = vld [vmem:[%s18072_s22 + $0x36c] ss:$16 sps:$4 sm:$0xff]   ;;  %v16732_v7 = vld [vmem:[%s18072_s22 + $0x360] ss:$16 sps:$4 sm:$0xff]  }
0x1384   : > { %5921 = vmatprep.subr.bf16.mxu0 %v16647_v59  ;;  %6005 = vmatprep.subr.bf16.mxu1 %v16650_v31  ;;  %v16735_v59 = vld [vmem:[%s18072_s22 + $0x368] ss:$16 sps:$4 sm:$0xff]   ;;  %v16740_v31 = vld [vmem:[%s18072_s22 + $0x384] ss:$16 sps:$4 sm:$0xff]  }
0x1387   : > { %5922 = vmatpush1.bf16.msra.mxu0 %v16645_v49  ;;  %6006 = vmatpush1.bf16.msra.mxu1 %v16648_v35  ;;  %v16743_v49 = vld [vmem:[%s18072_s22 + $0x38c] ss:$16 sps:$4 sm:$0xff]   ;;  %v16738_v35 = vld [vmem:[%s18072_s22 + $0x380] ss:$16 sps:$4 sm:$0xff]  }
0x1388   : > { %5923 = vmatprep.subr.bf16.mxu0 %v16653_v36  ;;  %6007 = vmatprep.subr.bf16.mxu1 %v16656_v5  ;;  %v16741_v36 = vld [vmem:[%s18072_s22 + $0x388] ss:$16 sps:$4 sm:$0xff]   ;;  %v16746_v5 = vld [vmem:[%s18072_s22 + $0x3a4] ss:$16 sps:$4 sm:$0xff]  }
0x138b   : > { %5924 = vmatpush1.bf16.msra.mxu0 %v16651_v37  ;;  %6008 = vmatpush1.bf16.msra.mxu1 %v16654_v17  ;;  %v16749_v37 = vld [vmem:[%s18072_s22 + $0x3ac] ss:$16 sps:$4 sm:$0xff]   ;;  %v16744_v17 = vld [vmem:[%s18072_s22 + $0x3a0] ss:$16 sps:$4 sm:$0xff]  }
0x138c   : > { %5925 = vmatprep.subr.bf16.mxu0 %v16659_v34  ;;  %6009 = vmatprep.subr.bf16.mxu1 %v16662_v39  ;;  %v16747_v34 = vld [vmem:[%s18072_s22 + $0x3a8] ss:$16 sps:$4 sm:$0xff]   ;;  %v16752_v39 = vld [vmem:[%s18072_s22 + $0x3c4] ss:$16 sps:$4 sm:$0xff]  }
0x138f   : > { %5926 = vmatpush1.bf16.msra.mxu0 %v16657_v40  ;;  %6010 = vmatpush1.bf16.msra.mxu1 %v16660_v3  ;;  %v16755_v40 = vld [vmem:[%s18072_s22 + $0x3cc] ss:$16 sps:$4 sm:$0xff]   ;;  %v16750_v3 = vld [vmem:[%s18072_s22 + $0x3c0] ss:$16 sps:$4 sm:$0xff]  }
0x1390   : > { %6011 = vmatprep.subr.bf16.mxu1 %v16665_v6  ;;  %5938 = vmatprep.subr.bf16.mxu0 %v16668_v47  ;;  %v16753_v6 = vld [vmem:[%s18072_s22 + $0x3c8] ss:$16 sps:$4 sm:$0xff]  }
0x1391   : > { %v16759_v47 = vld [vmem:[%s18072_s22 + $0x3e8] ss:$16 sps:$4 sm:$0xff]  }
0x1392   : > { %5928 = vmatmul.mubr.bf16.vlgmr.msra.gmra.mrb[76].mxu0 %v18994_v20 }
0x1393   : > { %6012 = vmatpush1.bf16.msra.mxu1 %v16663_v41  ;;  %5939 = vmatpush1.bf16.msra.mxu0 %v16666_v45  ;;  %v16756_v41 = vld [vmem:[%s18072_s22 + $0x3e0] ss:$16 sps:$4 sm:$0xff]   ;;  %v16758_v45 = vld [vmem:[%s18072_s22 + $0x3e4] ss:$16 sps:$4 sm:$0xff]  }
0x1394   : > { %6024 = vmatprep.subr.bf16.mxu1 %v16671_v50  ;;  %5940 = vmatprep.subr.bf16.mxu0 %v16674_v11 }
0x1396   : > { %6014 = vmatmul.mubr.bf16.vlgmr.msra.gmra.mrb[76].mxu1 %v18994_v20  ;;  %v16680_v20 = vld [vmem:[%s18072_s22 + $0x244] ss:$16 sps:$4 sm:$0xff]  }
0x1397   : > { %6025 = vmatpush1.bf16.msra.mxu1 %v16669_v48  ;;  %5941 = vmatpush1.bf16.msra.mxu0 %v16672_v55  ;;  %v16761_v48 = vld [vmem:[%s18072_s22 + $0x3ec] ss:$16 sps:$4 sm:$0xff]   ;;  %s17817_s22 = smov [#allocation10]  }
0x1398   : > { %6026 = vmatprep.subr.bf16.mxu1 %v16677_v52  ;;  %5942 = vmatprep.subr.bf16.mxu0 %v16680_v20 }
0x139b   : > { %6027 = vmatpush1.bf16.msra.mxu1 %v16675_v56  ;;  %5943 = vmatpush1.bf16.msra.mxu0 %v16678_v0 }
0x139c   : > { %6028 = vmatprep.subr.bf16.mxu1 %v16683_v60  ;;  %5944 = vmatprep.subr.bf16.mxu0 %v16686_v16 }
0x139f   : > { %6029 = vmatpush1.bf16.msra.mxu1 %v16681_v12  ;;  %5945 = vmatpush1.bf16.msra.mxu0 %v16684_v46 }
0x13a0   : > { %6030 = vmatprep.subr.bf16.mxu1 %v16689_v43  ;;  %5946 = vmatprep.subr.bf16.mxu0 %v16692_v18 }
0x13a3   : > { %6031 = vmatpush1.bf16.msra.mxu1 %v16687_v14  ;;  %5947 = vmatpush1.bf16.msra.mxu0 %v16690_v15 }
0x13a4   : > { %6032 = vmatprep.subr.bf16.mxu1 %v16695_v57  ;;  %5948 = vmatprep.subr.bf16.mxu0 %v16698_v10  ;;  %v17602_v10 = vld [vmem:[#allocation10] sm:$0xff] }
0x13a7   : > { %6033 = vmatpush1.bf16.msra.mxu1 %v16693_v8  ;;  %5949 = vmatpush1.bf16.msra.mxu0 %v16696_v51 }
0x13a8   : > { %6034 = vmatprep.subr.bf16.mxu1 %v16701_v54  ;;  %5950 = vmatprep.subr.bf16.mxu0 %v16704_v61  ;;  %v17603_v61 = vld [vmem:[#allocation10 + $0x8] sm:$0xff] }
0x13ab   : > { %6035 = vmatpush1.bf16.msra.mxu1 %v16699_v38  ;;  %5951 = vmatpush1.bf16.msra.mxu0 %v16702_v2 }
0x13ac   : > { %6036 = vmatprep.subr.bf16.mxu1 %v16707_v63  ;;  %5952 = vmatprep.subr.bf16.mxu0 %v16710_v58 }
0x13af   : > { %6037 = vmatpush1.bf16.msra.mxu1 %v16705_v32  ;;  %5953 = vmatpush1.bf16.msra.mxu0 %v16708_v22  ;;  %v17605_v22 = vld [vmem:[#allocation10 + $0x10] sm:$0xff] }
0x13b0   : > { %6038 = vmatprep.subr.bf16.mxu1 %v16713_v21  ;;  %5954 = vmatprep.subr.bf16.mxu0 %v16716_v4  ;;  %v17606_v4 = vld [vmem:[#allocation10 + $0x28] sm:$0xff] }
0x13b3   : > { %6039 = vmatpush1.bf16.msra.mxu1 %v16711_v33  ;;  %5955 = vmatpush1.bf16.msra.mxu0 %v16714_v62  ;;  %v17607_v62 = vld [vmem:[#allocation10 + $0x18] sm:$0xff] }
0x13b4   : > { %6040 = vmatprep.subr.bf16.mxu1 %v16719_v42  ;;  %5956 = vmatprep.subr.bf16.mxu0 %v16722_v23  ;;  %v17608_v23 = vld [vmem:[#allocation10 + $0x30] sm:$0xff] }
0x13b7   : > { %6041 = vmatpush1.bf16.msra.mxu1 %v16717_v28  ;;  %5957 = vmatpush1.bf16.msra.mxu0 %v16720_v19 }
0x13b8   : > { %6042 = vmatprep.subr.bf16.mxu1 %v16725_v24  ;;  %5958 = vmatprep.subr.bf16.mxu0 %v16728_v30  ;;  %v17609_v30 = vld [vmem:[#allocation10 + $0x38] sm:$0xff] }
0x13bb   : > { %6043 = vmatpush1.bf16.msra.mxu1 %v16723_v26  ;;  %5959 = vmatpush1.bf16.msra.mxu0 %v16726_v27 }
0x13bc   : > { %6044 = vmatprep.subr.bf16.mxu1 %v16731_v25  ;;  %5960 = vmatprep.subr.bf16.mxu0 %v16734_v29 }
0x13bf   : > { %6045 = vmatpush1.bf16.msra.mxu1 %v16729_v53  ;;  %5961 = vmatpush1.bf16.msra.mxu0 %v16732_v7  ;;  %v6132_v7 = vld [vmem:[%s18078_s18 + $0x40] sm:$0xff] }
0x13c0   : > { %6046 = vmatprep.subr.bf16.mxu1 %v16737_v1  ;;  %5962 = vmatprep.subr.bf16.mxu0 %v16740_v31  ;;  %v6124_v1 = vld [vmem:[%s18078_s18] sm:$0xff] }
0x13c1   : > { %v14475_v31 = vcombine.low %v6124_v1, %v6132_v7 }
0x13c3   : > { %6047 = vmatpush1.bf16.msra.mxu1 %v16735_v59  ;;  %5963 = vmatpush1.bf16.msra.mxu0 %v16738_v35  ;;  %v6125_v59 = vld [vmem:[%s18078_s18 + $0x8] sm:$0xff] }
0x13c4   : > { %6048 = vmatprep.subr.bf16.mxu1 %v16743_v49  ;;  %5964 = vmatprep.subr.bf16.mxu0 %v16746_v5  ;;  %v14476_v49 = vcombine.high %v6124_v1, %v6132_v7  ;;  %v6133_v35 = vld [vmem:[%s18078_s18 + $0x48] sm:$0xff]  ;;  %v6148_v5 = vld [vmem:[%s18078_s18 + $0xc0] sm:$0xff] }
0x13c5   : > { %v6237_v1 = vld [vmem:[%s18078_s18 + $0x388] sm:$0xff] }
0x13c6   : > { %v6245_v7 = vld [vmem:[%s18078_s18 + $0x3c8] sm:$0xff] }
0x13c7   : > { %6049 = vmatpush1.bf16.msra.mxu1 %v16741_v36  ;;  %5965 = vmatpush1.bf16.msra.mxu0 %v16744_v17  ;;  %v6140_v36 = vld [vmem:[%s18078_s18 + $0x80] sm:$0xff]  ;;  %v14478_v17 = vcombine.high %v6125_v59, %v6133_v35 }
0x13c8   : > { %6050 = vmatprep.subr.bf16.mxu1 %v16749_v37  ;;  %5966 = vmatprep.subr.bf16.mxu0 %v16752_v39  ;;  %v14477_v37 = vcombine.low %v6125_v59, %v6133_v35  ;;  %v6141_v39 = vld [vmem:[%s18078_s18 + $0x88] sm:$0xff]  ;;  %v14590_v35 = vcombine.high %v6237_v1, %v6245_v7 }
0x13cb   : > { %6051 = vmatpush1.bf16.msra.mxu1 %v16747_v34  ;;  %5967 = vmatpush1.bf16.msra.mxu0 %v16750_v3  ;;  %v14492_v34 = vcombine.high %v6140_v36, %v6148_v5  ;;  %v6156_v3 = vld [vmem:[%s18078_s18 + $0x100] sm:$0xff] }
0x13cc   : > { %6052 = vmatprep.subr.bf16.mxu1 %v16755_v40  ;;  %5968 = vmatprep.subr.bf16.mxu0 %v16758_v45  ;;  %v6149_v40 = vld [vmem:[%s18078_s18 + $0xc8] sm:$0xff] }
0x13cd   : > { %v6157_v45 = vld [vmem:[%s18078_s18 + $0x108] sm:$0xff] }
0x13cf   : > { %6053 = vmatpush1.bf16.msra.mxu1 %v16753_v6  ;;  %5969 = vmatpush1.bf16.msra.mxu0 %v16756_v41  ;;  %v14494_v6 = vcombine.high %v6141_v39, %v6149_v40  ;;  %v6164_v41 = vld [vmem:[%s18078_s18 + $0x140] sm:$0xff] }
0x13d0   : > { %6054 = vmatprep.subr.bf16.mxu1 %v16761_v48  ;;  %9196 = vmatprep.subr.bf16.mxu0 %v14476_v49  ;;  %v14491_v48 = vcombine.low %v6140_v36, %v6148_v5  ;;  %v6252_v36 = vld [vmem:[%s18078_s18 + $0x400] sm:$0xff] }
0x13d1   : > { %v6260_v5 = vld [vmem:[%s18078_s18 + $0x440] sm:$0xff] }
0x13d3   : > { %6055 = vmatpush1.bf16.msra.mxu1 %v16759_v47  ;;  %v6165_v47 = vld [vmem:[%s18078_s18 + $0x148] sm:$0xff] }
0x13d4   : > { %9282 = vmatprep.subr.bf16.mxu1 %v14478_v17  ;;  %v6261_v17 = vld [vmem:[%s18078_s18 + $0x448] sm:$0xff] }
0x1425   : > { %v5012_v50 = vpop.f32.mrb[72].mxu0 }
0x1426   : > { %v15755_v11 = vpop.f32.mrb[73].mxu0 }
0x1427   : > { %v5015_v52 = vpop.f32.mrb[74].mxu0  ;;  %v14508_v11 = vcombine.high %v6156_v3, %v6164_v41 }
0x1428   : > { %v15756_v55 = vpop.f32.mrb[75].mxu0  ;;  %v14510_v52 = vcombine.high %v6157_v45, %v6165_v47 }
0x1429   : > { %v5061_v56 = vpop.f32.mrb[72].mxu1  ;;  %v6172_v55 = vld [vmem:[%s18078_s18 + $0x180] sm:$0xff] }
0x142a   : > { %v15984_v20 = vpack.i.bf16 %v5061_v56, %v5012_v50  ;;  %v15761_v60 = vpop.f32.mrb[73].mxu1  ;;  %v14493_v50 = vcombine.low %v6141_v39, %v6149_v40  ;;  %v6180_v56 = vld [vmem:[%s18078_s18 + $0x1c0] sm:$0xff]  ;;  %v14589_v39 = vcombine.low %v6237_v1, %v6245_v7  ;;  %v14604_v40 = vcombine.high %v6252_v36, %v6260_v5 }
0x142b   : > { %v5064_v0 = vpop.f32.mrb[74].mxu1  ;;  %v6181_v60 = vld [vmem:[%s18078_s18 + $0x1c8] sm:$0xff] }
0x142c   : > { %v15762_v12 = vpop.f32.mrb[75].mxu1  ;;  %15985 = vrot.lane.b32.xlu0 %v15984_v20, %s17816_s27  ;;  %v6173_v20 = vld [vmem:[%s18078_s18 + $0x188] sm:$0xff]  ;;  %v14507_v0 = vcombine.low %v6156_v3, %v6164_v41  ;;  %v6276_v41 = vld [vmem:[%s18078_s18 + $0x4c0] sm:$0xff] }
0x142d   : > { %v14509_v12 = vcombine.low %v6157_v45, %v6165_v47  ;;  %v6269_v45 = vld [vmem:[%s18078_s18 + $0x488] sm:$0xff] }
0x142e   : > { %v6277_v47 = vld [vmem:[%s18078_s18 + $0x4c8] sm:$0xff] }
0x149e   : > { %v15986_v16 = vpop.permute.xlu0 %15985 }
0x149f   : > { %v15988_v43 = vunpack.i.h.bf16 %v15986_v16  ;;  %v15987_v46 = vunpack.i.l.bf16 %v15986_v16  ;;  %v14524_v16 = vcombine.high %v6172_v55, %v6180_v56 }
0x14a1   : > { %v5121_v14 = vsel %vm3276_vm1, %v18960_v9, %v15987_v46  ;;  %v5122_v18 = vsel %vm3276_vm1, %v18962_v44, %v15988_v43  ;;  %v17604_v44 = vld [vmem:[#allocation10 + $0x20] sm:$0xff]  ;;  %v14526_v43 = vcombine.high %v6173_v20, %v6181_v60 }
0x14a2   : > { %v5126_v57 = vpack.c.bf16 %v5122_v18, %v5121_v14  ;;  %v6188_v46 = vld [vmem:[%s18078_s18 + $0x200] sm:$0xff]  ;;  %v6189_v18 = vld [vmem:[%s18078_s18 + $0x208] sm:$0xff] }
0x14a3   : > { %v6196_v14 = vld [vmem:[%s18078_s18 + $0x240] sm:$0xff] }
0x14a4   : > { %5970 = vmatprep.mubr.bf16.mxu0 %v5126_v57  ;;  %6056 = vmatprep.mubr.bf16.mxu1 %v5126_v57  ;;  %v6197_v57 = vld [vmem:[%s18078_s18 + $0x248] sm:$0xff] }
0x14a5   : > { %5971 = vmatmul.mubr.bf16.vlgmr.msra.gmra.mrb[76].mxu0 %v19001_v13  ;;  %6057 = vmatmul.mubr.bf16.vlgmr.msra.gmra.mrb[76].mxu1 %v19001_v13 }
0x14a6   : > { %9197 = vmatpush1.bf16.msra.mxu0 %v14475_v31  ;;  %9283 = vmatpush1.bf16.msra.mxu1 %v14477_v37  ;;  %v6253_v37 = vld [vmem:[%s18078_s18 + $0x408] sm:$0xff] }
0x14a7   : > { %9198 = vmatprep.subr.bf16.mxu0 %v14492_v34  ;;  %9284 = vmatprep.subr.bf16.mxu1 %v14494_v6  ;;  %v14606_v3 = vcombine.high %v6253_v37, %v6261_v17  ;;  %v6268_v6 = vld [vmem:[%s18078_s18 + $0x480] sm:$0xff] }
0x14aa   : > { %9199 = vmatpush1.bf16.msra.mxu0 %v14491_v48  ;;  %9285 = vmatpush1.bf16.msra.mxu1 %v14493_v50  ;;  %v14603_v48 = vcombine.low %v6252_v36, %v6260_v5  ;;  %v14605_v50 = vcombine.low %v6253_v37, %v6261_v17  ;;  %v6325_v36 = vld [vmem:[%s18078_s18 + $0x648] sm:$0xff] }
0x14ab   : > { %9200 = vmatprep.subr.bf16.mxu0 %v14508_v11  ;;  %9286 = vmatprep.subr.bf16.mxu1 %v14510_v52  ;;  %v14620_v11 = vcombine.high %v6268_v6, %v6276_v41  ;;  %v14622_v52 = vcombine.high %v6269_v45, %v6277_v47 }
0x14ae   : > { %9201 = vmatpush1.bf16.msra.mxu0 %v14507_v0  ;;  %9287 = vmatpush1.bf16.msra.mxu1 %v14509_v12  ;;  %v14619_v0 = vcombine.low %v6268_v6, %v6276_v41  ;;  %v14621_v12 = vcombine.low %v6269_v45, %v6277_v47  ;;  %v6341_v41 = vld [vmem:[%s18078_s18 + $0x6c8] sm:$0xff]  ;;  %v6348_v45 = vld [vmem:[%s18078_s18 + $0x700] sm:$0xff] }
0x14af   : > { %9202 = vmatprep.subr.bf16.mxu0 %v14524_v16  ;;  %9288 = vmatprep.subr.bf16.mxu1 %v14526_v43  ;;  %v6356_v47 = vld [vmem:[%s18078_s18 + $0x740] sm:$0xff] }
0x1578   : > { %v5972_v15 = vpop.f32.mrb[76].mxu0  ;;  %v6058_v8 = vpop.f32.mrb[76].mxu1 }
0x1579   : > { %v19149_v54 = vadd.f32 %v17602_v10, %v5972_v15  ;;  %v5974_v51 = vpop.f32.mrb[77].mxu0  ;;  %v6060_v38 = vpop.f32.mrb[77].mxu1  ;;  %v19155_v33 = vadd.f32 %v17605_v22, %v6058_v8  ;;  %v14523_v15 = vcombine.low %v6172_v55, %v6180_v56  ;;  %v14525_v8 = vcombine.low %v6173_v20, %v6181_v60  ;;  %v6284_v55 = vld [vmem:[%s18078_s18 + $0x500] sm:$0xff]  ;;  %v6285_v20 = vld [vmem:[%s18078_s18 + $0x508] sm:$0xff] }
0x157a   : > { %v19151_v63 = vadd.f32 %v17603_v61, %v5974_v51  ;;  %v5976_v9 = vpop.f32.mrb[78].mxu0  ;;  %v6062_v2 = vpop.f32.mrb[78].mxu1  ;;  %v19161_v28 = vadd.f32 %v17607_v62, %v6060_v38  ;;  %v14540_v10 = vcombine.high %v6188_v46, %v6196_v14  ;;  %v14542_v51 = vcombine.high %v6189_v18, %v6197_v57  ;;  %v6204_v38 = vld [vmem:[%s18078_s18 + $0x280] sm:$0xff]  ;;  %v6221_v62 = vld [vmem:[%s18078_s18 + $0x308] sm:$0xff] }
0x157b   : > { %v19153_v32 = vadd.f32 %v17604_v44, %v5976_v9  ;;  %v5978_v58 = vpop.f32.mrb[79].mxu0  ;;  %v6064_v21 = vpop.f32.mrb[79].mxu1  ;;  %v19163_v24 = vadd.f32 %v17608_v23, %v6062_v2  ;;  %v6212_v61 = vld [vmem:[%s18078_s18 + $0x2c0] sm:$0xff]  ;;  %v6205_v9 = vld [vmem:[%s18078_s18 + $0x288] sm:$0xff]  ;;  %9203 = vmatpush1.bf16.msra.mxu0 %v14523_v15  ;;  %v14539_v44 = vcombine.low %v6188_v46, %v6196_v14  ;;  %9289 = vmatpush1.bf16.msra.mxu1 %v14525_v8 }
0x157c   : > { %v6067_v13 = vadd.f32 %v19151_v63, %v19149_v54  ;;  %v19159_v42 = vadd.f32 %v17606_v4, %v5978_v58  ;;  %v19168_v25 = vadd.f32 %v17609_v30, %v6064_v21  ;;  %v6213_v2 = vld [vmem:[%s18078_s18 + $0x2c8] sm:$0xff]  ;;  %9204 = vmatprep.subr.bf16.mxu0 %v14540_v10  ;;  %v14541_v58 = vcombine.low %v6189_v18, %v6197_v57  ;;  %v6228_v4 = vld [vmem:[%s18078_s18 + $0x340] sm:$0xff] }
0x157d   : > { %v14556_v21 = vcombine.high %v6204_v38, %v6212_v61  ;;  %9290 = vmatprep.subr.bf16.mxu1 %v14542_v51  ;;  %v14558_v22 = vcombine.high %v6205_v9, %v6213_v2  ;;  %v6229_v23 = vld [vmem:[%s18078_s18 + $0x348] sm:$0xff]  ;;  %v6292_v56 = vld [vmem:[%s18078_s18 + $0x540] sm:$0xff] }
0x157e   : > { %v6072_v19 = vadd.f32 %v19159_v42, %v19153_v32  ;;  %v6068_v26 = vadd.f32 %v19155_v33, %v6067_v13  ;;  %v6220_v13 = vld [vmem:[%s18078_s18 + $0x300] sm:$0xff]  ;;  %v14573_v31 = vcombine.low %v6221_v62, %v6229_v23  ;;  %v6293_v60 = vld [vmem:[%s18078_s18 + $0x548] sm:$0xff]  ;;  %v14636_v16 = vcombine.high %v6284_v55, %v6292_v56 }
0x157f   : > { %9205 = vmatpush1.bf16.msra.mxu0 %v14539_v44  ;;  %9291 = vmatpush1.bf16.msra.mxu1 %v14541_v58  ;;  %v14572_v30 = vcombine.high %v6220_v13, %v6228_v4  ;;  %v14571_v59 = vcombine.low %v6220_v13, %v6228_v4  ;;  %v14638_v43 = vcombine.high %v6285_v20, %v6293_v60 }
0x1580   : > { %v6069_v27 = vadd.f32 %v19161_v28, %v6068_v26  ;;  %v6073_v53 = vadd.f32 %v19163_v24, %v6072_v19  ;;  %v14555_v19 = vcombine.low %v6204_v38, %v6212_v61  ;;  %9206 = vmatprep.subr.bf16.mxu0 %v14556_v21  ;;  %v14557_v26 = vcombine.low %v6205_v9, %v6213_v2 }
0x1581   : > { %9292 = vmatprep.subr.bf16.mxu1 %v14558_v22  ;;  %v14635_v46 = vcombine.low %v6284_v55, %v6292_v56  ;;  %v14637_v14 = vcombine.low %v6285_v20, %v6293_v60  ;;  %v6357_v55 = vld [vmem:[%s18078_s18 + $0x748] sm:$0xff]  ;;  %v6364_v20 = vld [vmem:[%s18078_s18 + $0x780] sm:$0xff] }
0x1582   : > { %6070 = vadd.xlane.f32.xlu0 %v6069_v27  ;;  %v6074_v29 = vadd.f32 %v19168_v25, %v6073_v53  ;;  %v14574_v27 = vcombine.high %v6221_v62, %v6229_v23  ;;  %v6236_v53 = vld [vmem:[%s18078_s18 + $0x380] sm:$0xff] }
0x1583   : > { %9207 = vmatpush1.bf16.msra.mxu0 %v14555_v19  ;;  %9293 = vmatpush1.bf16.msra.mxu1 %v14557_v26  ;;  %v6300_v26 = vld [vmem:[%s18078_s18 + $0x580] sm:$0xff] }
0x1584   : > { %6075 = vadd.xlane.f32.xlu1 %v6074_v29  ;;  %v6244_v29 = vld [vmem:[%s18078_s18 + $0x3c0] sm:$0xff]  ;;  %9208 = vmatprep.subr.bf16.mxu0 %v14572_v30 }
0x1585   : > { %v14588_v49 = vcombine.high %v6236_v53, %v6244_v29  ;;  %9294 = vmatprep.subr.bf16.mxu1 %v14574_v27  ;;  %v14587_v34 = vcombine.low %v6236_v53, %v6244_v29  ;;  %v6308_v30 = vld [vmem:[%s18078_s18 + $0x5c0] sm:$0xff]  ;;  %v6309_v53 = vld [vmem:[%s18078_s18 + $0x5c8] sm:$0xff] }
0x1586   : > { %v14652_v27 = vcombine.high %v6300_v26, %v6308_v30  ;;  %v14651_v29 = vcombine.low %v6300_v26, %v6308_v30  ;;  %v6372_v60 = vld [vmem:[%s18078_s18 + $0x7c0] sm:$0xff] }
0x1587   : > { %9209 = vmatpush1.bf16.msra.mxu0 %v14571_v59  ;;  %9295 = vmatpush1.bf16.msra.mxu1 %v14573_v31  ;;  %v6316_v59 = vld [vmem:[%s18078_s18 + $0x600] sm:$0xff] }
0x1588   : > { %9210 = vmatprep.subr.bf16.mxu0 %v14588_v49  ;;  %9296 = vmatprep.subr.bf16.mxu1 %v14590_v35  ;;  %v6324_v31 = vld [vmem:[%s18078_s18 + $0x640] sm:$0xff]  ;;  %v6317_v49 = vld [vmem:[%s18078_s18 + $0x608] sm:$0xff] }
0x1589   : > { %v14668_v35 = vcombine.high %v6316_v59, %v6324_v31  ;;  %v14667_v5 = vcombine.low %v6316_v59, %v6324_v31  ;;  %v14669_v37 = vcombine.low %v6317_v49, %v6325_v36  ;;  %v14670_v17 = vcombine.high %v6317_v49, %v6325_v36  ;;  %v6412_v59 = vld [vmem:[%s18078_s18 + $0x900] sm:$0xff]  ;;  %v6421_v36 = vld [vmem:[%s18078_s18 + $0x948] sm:$0xff] }
0x158a   : > { %v6420_v49 = vld [vmem:[%s18078_s18 + $0x940] sm:$0xff] }
0x158b   : > { %9211 = vmatpush1.bf16.msra.mxu0 %v14587_v34  ;;  %9297 = vmatpush1.bf16.msra.mxu1 %v14589_v39  ;;  %v6332_v34 = vld [vmem:[%s18078_s18 + $0x680] sm:$0xff] }
0x158c   : > { %9212 = vmatprep.subr.bf16.mxu0 %v14604_v40  ;;  %9298 = vmatprep.subr.bf16.mxu1 %v14606_v3  ;;  %v6340_v39 = vld [vmem:[%s18078_s18 + $0x6c0] sm:$0xff]  ;;  %v6333_v40 = vld [vmem:[%s18078_s18 + $0x688] sm:$0xff] }
0x158d   : > { %v14683_v3 = vcombine.low %v6332_v34, %v6340_v39  ;;  %v14684_v6 = vcombine.high %v6332_v34, %v6340_v39  ;;  %v6428_v39 = vld [vmem:[%s18078_s18 + $0x980] sm:$0xff] }
0x158f   : > { %9213 = vmatpush1.bf16.msra.mxu0 %v14603_v48  ;;  %9299 = vmatpush1.bf16.msra.mxu1 %v14605_v50  ;;  %v14685_v48 = vcombine.low %v6333_v40, %v6341_v41  ;;  %v14686_v50 = vcombine.high %v6333_v40, %v6341_v41  ;;  %v6436_v40 = vld [vmem:[%s18078_s18 + $0x9c0] sm:$0xff]  ;;  %v14763_v41 = vcombine.low %v6412_v59, %v6420_v49 }
0x1590   : > { %9214 = vmatprep.subr.bf16.mxu0 %v14620_v11  ;;  %9300 = vmatprep.subr.bf16.mxu1 %v14622_v52  ;;  %v14700_v11 = vcombine.high %v6348_v45, %v6356_v47  ;;  %v6349_v52 = vld [vmem:[%s18078_s18 + $0x708] sm:$0xff] }
0x1591   : > { %v14702_v56 = vcombine.high %v6349_v52, %v6357_v55 }
0x1593   : > { %9215 = vmatpush1.bf16.msra.mxu0 %v14619_v0  ;;  %9301 = vmatpush1.bf16.msra.mxu1 %v14621_v12  ;;  %v6365_v0 = vld [vmem:[%s18078_s18 + $0x788] sm:$0xff] }
0x1594   : > { %9216 = vmatprep.subr.bf16.mxu0 %v14636_v16  ;;  %9302 = vmatprep.subr.bf16.mxu1 %v14638_v43  ;;  %v6373_v12 = vld [vmem:[%s18078_s18 + $0x7c8] sm:$0xff]  ;;  %v14699_v16 = vcombine.low %v6348_v45, %v6356_v47  ;;  %v14701_v43 = vcombine.low %v6349_v52, %v6357_v55  ;;  %v14780_v47 = vcombine.high %v6428_v39, %v6436_v40 }
0x1595   : > { %v6445_v52 = vld [vmem:[%s18078_s18 + $0xa08] sm:$0xff] }
0x1596   : > { %v6453_v55 = vld [vmem:[%s18078_s18 + $0xa48] sm:$0xff] }
0x1597   : > { %9217 = vmatpush1.bf16.msra.mxu0 %v14635_v46  ;;  %9303 = vmatpush1.bf16.msra.mxu1 %v14637_v14  ;;  %v14716_v46 = vcombine.high %v6364_v20, %v6372_v60  ;;  %v14718_v14 = vcombine.high %v6365_v0, %v6373_v12 }
0x1598   : > { %9218 = vmatprep.subr.bf16.mxu0 %v14652_v27 }
0x159b   : > { %9219 = vmatpush1.bf16.msra.mxu0 %v14651_v29  ;;  %v6404_v29 = vld [vmem:[%s18078_s18 + $0x8c0] sm:$0xff] }
0x159c   : > { %9220 = vmatprep.subr.bf16.mxu0 %v14668_v35  ;;  %v6413_v35 = vld [vmem:[%s18078_s18 + $0x908] sm:$0xff] }
0x159d   : > { %v14766_v34 = vcombine.high %v6413_v35, %v6421_v36  ;;  %v14765_v45 = vcombine.low %v6413_v35, %v6421_v36 }
0x159f   : > { %9221 = vmatpush1.bf16.msra.mxu0 %v14667_v5 }
0x15a0   : > { %9222 = vmatprep.subr.bf16.mxu0 %v14684_v6  ;;  %v6437_v6 = vld [vmem:[%s18078_s18 + $0x9c8] sm:$0xff] }
0x15a3   : > { %9223 = vmatpush1.bf16.msra.mxu0 %v14683_v3  ;;  %v6429_v3 = vld [vmem:[%s18078_s18 + $0x988] sm:$0xff] }
0x15a4   : > { %9224 = vmatprep.subr.bf16.mxu0 %v14700_v11  ;;  %v6452_v11 = vld [vmem:[%s18078_s18 + $0xa40] sm:$0xff] }
0x15a7   : > { %9225 = vmatpush1.bf16.msra.mxu0 %v14699_v16  ;;  %v6468_v16 = vld [vmem:[%s18078_s18 + $0xac0] sm:$0xff] }
0x15a8   : > { %9226 = vmatprep.subr.bf16.mxu0 %v14716_v46  ;;  %v6469_v46 = vld [vmem:[%s18078_s18 + $0xac8] sm:$0xff] }
0x160f   : > { %v6071_v18 = vpop.xlane.xlu0 %6070 }
0x1610   : > { %v6078_v57 = vmul.f32 0.001953125, %v6071_v18  ;;  %v14715_v18 = vcombine.low %v6364_v20, %v6372_v60  ;;  %v14781_v20 = vcombine.low %v6429_v3, %v6437_v6 }
0x1611   : > { %v6076_v15 = vpop.xlane.xlu1 %6075 }
0x1612   : > { %v19218_v8 = vsub.f32 %v19149_v54, %v6078_v57  ;;  %v19221_v10 = vsub.f32 %v19151_v63, %v6078_v57  ;;  %v6079_v51 = vmul.f32 0.001953125, %v6076_v15  ;;  %v19224_v38 = vsub.f32 %v19155_v33, %v6078_v57  ;;  %9227 = vmatpush1.bf16.msra.mxu0 %v14715_v18  ;;  %v6380_v15 = vld [vmem:[%s18078_s18 + $0x800] sm:$0xff] }
0x1613   : > { %v19227_v61 = vsub.f32 %v19161_v28, %v6078_v57  ;;  %v14717_v57 = vcombine.low %v6365_v0, %v6373_v12  ;;  %v14798_v0 = vcombine.high %v6445_v52, %v6453_v55  ;;  %v6460_v12 = vld [vmem:[%s18078_s18 + $0xa80] sm:$0xff]  ;;  %v14797_v18 = vcombine.low %v6445_v52, %v6453_v55 }
0x1614   : > { %v19230_v9 = vsub.f32 %v19153_v32, %v6079_v51  ;;  %v19233_v2 = vsub.f32 %v19159_v42, %v6079_v51  ;;  %v6088_v54 = vmul.f32 %v19218_v8, %v19218_v8  ;;  %v6089_v63 = vmul.f32 %v19221_v10, %v19221_v10 }
0x1615   : > { %v19240_v44 = vsub.f32 %v19163_v24, %v6079_v51  ;;  %v6090_v33 = vmul.f32 %v19224_v38, %v19224_v38  ;;  %v6091_v58 = vmul.f32 %v19227_v61, %v19227_v61  ;;  %v19251_v24 = vsub.f32 %v19168_v25, %v6079_v51  ;;  %v6301_v25 = vld [vmem:[%s18078_s18 + $0x588] sm:$0xff]  ;;  %v6388_v51 = vld [vmem:[%s18078_s18 + $0x840] sm:$0xff] }
0x1616   : > { %v6096_v28 = vadd.f32 %v6089_v63, %v6088_v54  ;;  %v6092_v32 = vmul.f32 %v19230_v9, %v19230_v9  ;;  %v6093_v42 = vmul.f32 %v19233_v2, %v19233_v2  ;;  %v14653_v1 = vcombine.low %v6301_v25, %v6309_v53  ;;  %v6381_v54 = vld [vmem:[%s18078_s18 + $0x808] sm:$0xff] }
0x1617   : > { %v6094_v22 = vmul.f32 %v19240_v44, %v19240_v44  ;;  %v6095_v23 = vmul.f32 %v19251_v24, %v19251_v24  ;;  %v14654_v7 = vcombine.high %v6301_v25, %v6309_v53  ;;  %v14732_v63 = vcombine.high %v6380_v15, %v6388_v51  ;;  %v6396_v53 = vld [vmem:[%s18078_s18 + $0x880] sm:$0xff] }
0x1618   : > { %v6097_v21 = vadd.f32 %v6096_v28, %v6090_v33  ;;  %v6101_v13 = vadd.f32 %v6093_v42, %v6092_v32  ;;  %v6389_v33 = vld [vmem:[%s18078_s18 + $0x848] sm:$0xff]  ;;  %v14731_v28 = vcombine.low %v6380_v15, %v6388_v51  ;;  %v14747_v5 = vcombine.low %v6396_v53, %v6404_v29  ;;  %v6476_v51 = vld [vmem:[%s18078_s18 + $0xb00] sm:$0xff] }
0x1619   : > { %9304 = vmatprep.subr.bf16.mxu1 %v14654_v7  ;;  %v14733_v32 = vcombine.low %v6381_v54, %v6389_v33  ;;  %v14734_v42 = vcombine.high %v6381_v54, %v6389_v33  ;;  %9239 = vmatprep.subr.bf16.mxu0 %v14732_v63  ;;  %v6484_v54 = vld [vmem:[%s18078_s18 + $0xb40] sm:$0xff]  ;;  %v6477_v63 = vld [vmem:[%s18078_s18 + $0xb08] sm:$0xff] }
0x161a   : > { %v6098_v4 = vadd.f32 %v6097_v21, %v6091_v58  ;;  %v6102_v62 = vadd.f32 %v6101_v13, %v6094_v22  ;;  %9305 = vmatpush1.bf16.msra.mxu1 %v14653_v1  ;;  %v6397_v1 = vld [vmem:[%s18078_s18 + $0x888] sm:$0xff] }
0x161b   : > { %9306 = vmatprep.subr.bf16.mxu1 %v14670_v17  ;;  %v14764_v17 = vcombine.high %v6412_v59, %v6420_v49  ;;  %v6485_v33 = vld [vmem:[%s18078_s18 + $0xb48] sm:$0xff]  ;;  %v6516_v59 = vld [vmem:[%s18078_s18 + $0xc40] sm:$0xff] }
0x161c   : > { %6099 = vadd.xlane.f32.xlu0 %v6098_v4  ;;  %v6103_v19 = vadd.f32 %v6102_v62, %v6095_v23 }
0x161e   : > { %9307 = vmatpush1.bf16.msra.mxu1 %v14669_v37 }
0x161f   : > { %9308 = vmatprep.subr.bf16.mxu1 %v14686_v50  ;;  %v6444_v50 = vld [vmem:[%s18078_s18 + $0xa00] sm:$0xff] }
0x1620   : > { %6104 = vadd.xlane.f32.xlu0 %v6103_v19  ;;  %v14796_v60 = vcombine.high %v6444_v50, %v6452_v11 }
0x1622   : > { %9309 = vmatpush1.bf16.msra.mxu1 %v14685_v48  ;;  %v14782_v48 = vcombine.high %v6429_v3, %v6437_v6 }
0x1623   : > { %9310 = vmatprep.subr.bf16.mxu1 %v14702_v56  ;;  %v14779_v56 = vcombine.low %v6428_v39, %v6436_v40  ;;  %v6533_v39 = vld [vmem:[%s18078_s18 + $0xcc8] sm:$0xff] }
0x1626   : > { %9311 = vmatpush1.bf16.msra.mxu1 %v14701_v43  ;;  %v6461_v43 = vld [vmem:[%s18078_s18 + $0xa88] sm:$0xff] }
0x1627   : > { %9312 = vmatprep.subr.bf16.mxu1 %v14718_v14  ;;  %v14795_v14 = vcombine.low %v6444_v50, %v6452_v11  ;;  %v14814_v15 = vcombine.high %v6461_v43, %v6469_v46  ;;  %v6549_v50 = vld [vmem:[%s18078_s18 + $0xd48] sm:$0xff] }
0x162a   : > { %9313 = vmatpush1.bf16.msra.mxu1 %v14717_v57  ;;  %v14812_v57 = vcombine.high %v6460_v12, %v6468_v16 }
0x162b   : > { %9325 = vmatprep.subr.bf16.mxu1 %v14734_v42  ;;  %v14828_v42 = vcombine.high %v6476_v51, %v6484_v54 }
0x16a9   : > { %v6100_v58 = vpop.xlane.xlu0 %6099 }
0x16aa   : > { %v6106_v21 = vmul.f32 0.001953125, %v6100_v58  ;;  %v14830_v58 = vcombine.high %v6477_v63, %v6485_v33 }
0x16ac   : > { %v6108_v22 = vadd.f32 1e-05, %v6106_v21  ;;  %v6492_v21 = vld [vmem:[%s18078_s18 + $0xb80] sm:$0xff] }
0x16ad   : > { %v6105_v13 = vpop.xlane.xlu0 %6104 }
0x16ae   : > { %v6107_v4 = vmul.f32 0.001953125, %v6105_v13  ;;  %17594 = vrsqrt.f32 %v6108_v22  ;;  %v6500_v22 = vld [vmem:[%s18078_s18 + $0xbc0] sm:$0xff]  ;;  %v6493_v13 = vld [vmem:[%s18078_s18 + $0xb88] sm:$0xff] }
0x16af   : > { %v14843_v49 = vcombine.low %v6492_v21, %v6500_v22 }
0x16b0   : > { %v6109_v62 = vadd.f32 1e-05, %v6107_v4  ;;  %v6501_v4 = vld [vmem:[%s18078_s18 + $0xbc8] sm:$0xff] }
0x16b1   : > { %v14845_v35 = vcombine.low %v6493_v13, %v6501_v4 }
0x16b2   : > { %17596 = vrsqrt.f32 %v6109_v62  ;;  %v14827_v62 = vcombine.low %v6476_v51, %v6484_v54  ;;  %v6581_v51 = vld [vmem:[%s18078_s18 + $0xe48] sm:$0xff] }
0x16b8   : > { %v19281_v23 = vpop.eup %17594 }
0x16b9   : > { %v19287_v26 = vmul.f32 %v19281_v23, %v19221_v10  ;;  %v19295_v25 = vmul.f32 %v19281_v23, %v19218_v8 }
0x16bc   : > { %v19283_v19 = vpop.eup %17596 }
0x16bd   : > { %v19291_v30 = vmul.f32 %v19283_v19, %v19233_v2  ;;  %v19299_v27 = vmul.f32 %v19283_v19, %v19230_v9  ;;  %v19304_v10 = vmul.f32 %v19283_v19, %v19251_v24  ;;  %v6405_v2 = vld [vmem:[%s18078_s18 + $0x8c8] sm:$0xff]  ;;  %v19319_v9 = vmul.f32 %v19281_v23, %v19227_v61 }
0x16be   : > { %v14748_v24 = vcombine.high %v6396_v53, %v6404_v29  ;;  %v14750_v31 = vcombine.high %v6397_v1, %v6405_v2  ;;  %v14749_v37 = vcombine.low %v6397_v1, %v6405_v2  ;;  %v14829_v53 = vcombine.low %v6477_v63, %v6485_v33  ;;  %v6508_v2 = vld [vmem:[%s18078_s18 + $0xc00] sm:$0xff] }
0x16bf   : > { %v19311_v7 = vpack.c.bf16 %v19291_v30, %v19287_v26  ;;  %v19315_v8 = vpack.c.bf16 %v19299_v27, %v19295_v25  ;;  %v19331_v61 = vpack.c.bf16 %v19304_v10, %v19319_v9  ;;  %v14844_v29 = vcombine.high %v6492_v21, %v6500_v22  ;;  %v6597_v21 = vld [vmem:[%s18078_s18 + $0xec8] sm:$0xff] }
0x16c0   : > { %v14846_v1 = vcombine.high %v6493_v13, %v6501_v4  ;;  %v14860_v36 = vcombine.high %v6508_v2, %v6516_v59  ;;  %v14859_v40 = vcombine.low %v6508_v2, %v6516_v59  ;;  %v6613_v2 = vld [vmem:[%s18078_s18 + $0xf48] sm:$0xff] }
0x16c1   : > { %9228 = vmatprep.mubr.bf16.mxu0 %v19311_v7  ;;  %9314 = vmatprep.mubr.bf16.mxu1 %v19311_v7 }
0x16c2   : > { %9229 = vmatmul.mubr.bf16.vlgmr.msra.gmra.mrb[80].mxu0 %v19315_v8  ;;  %9315 = vmatmul.mubr.bf16.vlgmr.msra.gmra.mrb[80].mxu1 %v19315_v8 }
0x16c3   : > { %9240 = vmatpush1.bf16.msra.mxu0 %v14731_v28  ;;  %9326 = vmatpush1.bf16.msra.mxu1 %v14733_v32  ;;  %v14811_v28 = vcombine.low %v6460_v12, %v6468_v16  ;;  %v14813_v32 = vcombine.low %v6461_v43, %v6469_v46  ;;  %v6565_v12 = vld [vmem:[%s18078_s18 + $0xdc8] sm:$0xff] }
0x16c4   : > { %9271 = vmatprep.mubr.bf16.mxu0 %v19331_v61  ;;  %9357 = vmatprep.mubr.bf16.mxu1 %v19331_v61 }
0x16c5   : > { %9241 = vmatprep.subr.bf16.mxu0 %v14748_v24  ;;  %9327 = vmatprep.subr.bf16.mxu1 %v14750_v31  ;;  %v6509_v24 = vld [vmem:[%s18078_s18 + $0xc08] sm:$0xff] }
0x16c6   : > { %v6517_v31 = vld [vmem:[%s18078_s18 + $0xc48] sm:$0xff] }
0x16c7   : > { %9242 = vmatpush1.bf16.msra.mxu0 %v14747_v5  ;;  %9328 = vmatpush1.bf16.msra.mxu1 %v14749_v37  ;;  %v14862_v5 = vcombine.high %v6509_v24, %v6517_v31  ;;  %v6524_v37 = vld [vmem:[%s18078_s18 + $0xc80] sm:$0xff]  ;;  %v14861_v3 = vcombine.low %v6509_v24, %v6517_v31 }
0x16c8   : > { %9243 = vmatprep.subr.bf16.mxu0 %v14764_v17  ;;  %9329 = vmatprep.subr.bf16.mxu1 %v14766_v34  ;;  %v6532_v17 = vld [vmem:[%s18078_s18 + $0xcc0] sm:$0xff]  ;;  %v6525_v34 = vld [vmem:[%s18078_s18 + $0xc88] sm:$0xff] }
0x16c9   : > { %v14876_v6 = vcombine.high %v6524_v37, %v6532_v17  ;;  %v14875_v11 = vcombine.low %v6524_v37, %v6532_v17  ;;  %v14877_v52 = vcombine.low %v6525_v34, %v6533_v39  ;;  %v6629_v37 = vld [vmem:[%s18078_s18 + $0xfc8] sm:$0xff] }
0x16cb   : > { %9244 = vmatpush1.bf16.msra.mxu0 %v14763_v41  ;;  %9330 = vmatpush1.bf16.msra.mxu1 %v14765_v45  ;;  %v14878_v41 = vcombine.high %v6525_v34, %v6533_v39  ;;  %v6540_v45 = vld [vmem:[%s18078_s18 + $0xd00] sm:$0xff] }
0x16cc   : > { %9245 = vmatprep.subr.bf16.mxu0 %v14780_v47  ;;  %9331 = vmatprep.subr.bf16.mxu1 %v14782_v48  ;;  %v6548_v47 = vld [vmem:[%s18078_s18 + $0xd40] sm:$0xff]  ;;  %v6541_v48 = vld [vmem:[%s18078_s18 + $0xd08] sm:$0xff] }
0x16cd   : > { %v14892_v55 = vcombine.high %v6540_v45, %v6548_v47  ;;  %v14891_v16 = vcombine.low %v6540_v45, %v6548_v47  ;;  %v14893_v43 = vcombine.low %v6541_v48, %v6549_v50  ;;  %v6135_v45 = vld [vmem:[%s18078_s18 + $0x58] sm:$0xff] }
0x16cf   : > { %9246 = vmatpush1.bf16.msra.mxu0 %v14779_v56  ;;  %9332 = vmatpush1.bf16.msra.mxu1 %v14781_v20  ;;  %v14894_v56 = vcombine.high %v6541_v48, %v6549_v50  ;;  %v6556_v20 = vld [vmem:[%s18078_s18 + $0xd80] sm:$0xff]  ;;  %v19393_v50 = vmul.f32 %v19283_v19, %v19240_v44 }
0x16d0   : > { %9247 = vmatprep.subr.bf16.mxu0 %v14796_v60  ;;  %9333 = vmatprep.subr.bf16.mxu1 %v14798_v0  ;;  %v6564_v60 = vld [vmem:[%s18078_s18 + $0xdc0] sm:$0xff]  ;;  %v6557_v0 = vld [vmem:[%s18078_s18 + $0xd88] sm:$0xff] }
0x16d1   : > { %v14908_v46 = vcombine.high %v6556_v20, %v6564_v60  ;;  %v14907_v54 = vcombine.low %v6556_v20, %v6564_v60  ;;  %v14909_v63 = vcombine.low %v6557_v0, %v6565_v12  ;;  %v6150_v20 = vld [vmem:[%s18078_s18 + $0xd0] sm:$0xff]  ;;  %v6143_v60 = vld [vmem:[%s18078_s18 + $0x98] sm:$0xff] }
0x16d3   : > { %9248 = vmatpush1.bf16.msra.mxu0 %v14795_v14  ;;  %9334 = vmatpush1.bf16.msra.mxu1 %v14797_v18  ;;  %v14910_v14 = vcombine.high %v6557_v0, %v6565_v12  ;;  %v6572_v18 = vld [vmem:[%s18078_s18 + $0xe00] sm:$0xff]  ;;  %v6151_v0 = vld [vmem:[%s18078_s18 + $0xd8] sm:$0xff] }
0x16d4   : > { %9249 = vmatprep.subr.bf16.mxu0 %v14812_v57  ;;  %9335 = vmatprep.subr.bf16.mxu1 %v14814_v15  ;;  %v6580_v57 = vld [vmem:[%s18078_s18 + $0xe40] sm:$0xff]  ;;  %v6573_v15 = vld [vmem:[%s18078_s18 + $0xe08] sm:$0xff] }
0x16d5   : > { %v14924_v33 = vcombine.high %v6572_v18, %v6580_v57  ;;  %v14923_v22 = vcombine.low %v6572_v18, %v6580_v57  ;;  %v14925_v13 = vcombine.low %v6573_v15, %v6581_v51  ;;  %v14497_v57 = vcombine.low %v6143_v60, %v6151_v0 }
0x16d7   : > { %9250 = vmatpush1.bf16.msra.mxu0 %v14811_v28  ;;  %9336 = vmatpush1.bf16.msra.mxu1 %v14813_v32  ;;  %v14926_v28 = vcombine.high %v6573_v15, %v6581_v51  ;;  %v6588_v32 = vld [vmem:[%s18078_s18 + $0xe80] sm:$0xff] }
0x16d8   : > { %9251 = vmatprep.subr.bf16.mxu0 %v14828_v42  ;;  %9337 = vmatprep.subr.bf16.mxu1 %v14830_v58  ;;  %v6596_v42 = vld [vmem:[%s18078_s18 + $0xec0] sm:$0xff]  ;;  %v6589_v58 = vld [vmem:[%s18078_s18 + $0xe88] sm:$0xff] }
0x16d9   : > { %v14940_v4 = vcombine.high %v6588_v32, %v6596_v42  ;;  %v14939_v59 = vcombine.low %v6588_v32, %v6596_v42  ;;  %v14941_v24 = vcombine.low %v6589_v58, %v6597_v21 }
0x16db   : > { %9252 = vmatpush1.bf16.msra.mxu0 %v14827_v62  ;;  %9338 = vmatpush1.bf16.msra.mxu1 %v14829_v53  ;;  %v14942_v62 = vcombine.high %v6589_v58, %v6597_v21  ;;  %v6604_v53 = vld [vmem:[%s18078_s18 + $0xf00] sm:$0xff] }
0x16dc   : > { %9253 = vmatprep.subr.bf16.mxu0 %v14844_v29  ;;  %9339 = vmatprep.subr.bf16.mxu1 %v14846_v1  ;;  %v6612_v29 = vld [vmem:[%s18078_s18 + $0xf40] sm:$0xff]  ;;  %v6605_v1 = vld [vmem:[%s18078_s18 + $0xf08] sm:$0xff] }
0x16dd   : > { %v14956_v31 = vcombine.high %v6604_v53, %v6612_v29  ;;  %v14955_v17 = vcombine.low %v6604_v53, %v6612_v29  ;;  %v14957_v34 = vcombine.low %v6605_v1, %v6613_v2 }
0x16df   : > { %9254 = vmatpush1.bf16.msra.mxu0 %v14843_v49  ;;  %9340 = vmatpush1.bf16.msra.mxu1 %v14845_v35  ;;  %v14958_v49 = vcombine.high %v6605_v1, %v6613_v2  ;;  %v6620_v35 = vld [vmem:[%s18078_s18 + $0xf80] sm:$0xff] }
0x16e0   : > { %9255 = vmatprep.subr.bf16.mxu0 %v14860_v36  ;;  %9341 = vmatprep.subr.bf16.mxu1 %v14862_v5  ;;  %v6628_v36 = vld [vmem:[%s18078_s18 + $0xfc0] sm:$0xff]  ;;  %v6621_v5 = vld [vmem:[%s18078_s18 + $0xf88] sm:$0xff] }
0x16e1   : > { %v14972_v39 = vcombine.high %v6620_v35, %v6628_v36  ;;  %v14971_v47 = vcombine.low %v6620_v35, %v6628_v36  ;;  %v14973_v48 = vcombine.low %v6621_v5, %v6629_v37 }
0x16e3   : > { %9256 = vmatpush1.bf16.msra.mxu0 %v14859_v40  ;;  %9342 = vmatpush1.bf16.msra.mxu1 %v14861_v3  ;;  %v14974_v40 = vcombine.high %v6621_v5, %v6629_v37  ;;  %v6126_v3 = vld [vmem:[%s18078_s18 + $0x10] sm:$0xff] }
0x16e4   : > { %9257 = vmatprep.subr.bf16.mxu0 %v14876_v6  ;;  %9343 = vmatprep.subr.bf16.mxu1 %v14878_v41  ;;  %v6134_v6 = vld [vmem:[%s18078_s18 + $0x50] sm:$0xff]  ;;  %v6127_v41 = vld [vmem:[%s18078_s18 + $0x18] sm:$0xff] }
0x16e5   : > { %v14479_v12 = vcombine.low %v6126_v3, %v6134_v6  ;;  %v14481_v19 = vcombine.low %v6127_v41, %v6135_v45 }
0x16e7   : > { %9258 = vmatpush1.bf16.msra.mxu0 %v14875_v11  ;;  %9344 = vmatpush1.bf16.msra.mxu1 %v14877_v52  ;;  %v14480_v11 = vcombine.high %v6126_v3, %v6134_v6  ;;  %v14482_v52 = vcombine.high %v6127_v41, %v6135_v45 }
0x16e8   : > { %9259 = vmatprep.subr.bf16.mxu0 %v14892_v55  ;;  %9345 = vmatprep.subr.bf16.mxu1 %v14894_v56  ;;  %v6142_v55 = vld [vmem:[%s18078_s18 + $0x90] sm:$0xff]  ;;  %v19398_v56 = vmul.f32 %v19281_v23, %v19224_v38  ;;  %v6159_v23 = vld [vmem:[%s18078_s18 + $0x118] sm:$0xff] }
0x16e9   : > { %v6166_v38 = vld [vmem:[%s18078_s18 + $0x150] sm:$0xff]  ;;  %v14495_v18 = vcombine.low %v6142_v55, %v6150_v20 }
0x16ea   : > { %v19405_v44 = vpack.c.bf16 %v19393_v50, %v19398_v56 }
0x16eb   : > { %9260 = vmatpush1.bf16.msra.mxu0 %v14891_v16  ;;  %9346 = vmatpush1.bf16.msra.mxu1 %v14893_v43  ;;  %v14496_v16 = vcombine.high %v6142_v55, %v6150_v20  ;;  %v14498_v43 = vcombine.high %v6143_v60, %v6151_v0 }
0x16ec   : > { %9261 = vmatprep.subr.bf16.mxu0 %v14908_v46  ;;  %9347 = vmatprep.subr.bf16.mxu1 %v14910_v14  ;;  %v6158_v46 = vld [vmem:[%s18078_s18 + $0x110] sm:$0xff]  ;;  %v6167_v14 = vld [vmem:[%s18078_s18 + $0x158] sm:$0xff] }
0x16ed   : > { %v14512_v15 = vcombine.high %v6158_v46, %v6166_v38  ;;  %v14514_v51 = vcombine.high %v6159_v23, %v6167_v14  ;;  %v14511_v32 = vcombine.low %v6158_v46, %v6166_v38  ;;  %v14513_v42 = vcombine.low %v6159_v23, %v6167_v14 }
0x16ef   : > { %9262 = vmatpush1.bf16.msra.mxu0 %v14907_v54  ;;  %9348 = vmatpush1.bf16.msra.mxu1 %v14909_v63  ;;  %v6174_v54 = vld [vmem:[%s18078_s18 + $0x190] sm:$0xff] }
0x16f0   : > { %9263 = vmatprep.subr.bf16.mxu0 %v14924_v33  ;;  %9349 = vmatprep.subr.bf16.mxu1 %v14926_v28  ;;  %v6182_v63 = vld [vmem:[%s18078_s18 + $0x1d0] sm:$0xff]  ;;  %v6175_v33 = vld [vmem:[%s18078_s18 + $0x198] sm:$0xff] }
0x16f1   : > { %v6183_v28 = vld [vmem:[%s18078_s18 + $0x1d8] sm:$0xff]  ;;  %v14528_v58 = vcombine.high %v6174_v54, %v6182_v63  ;;  %v14527_v53 = vcombine.low %v6174_v54, %v6182_v63 }
0x16f2   : > { %v14530_v21 = vcombine.high %v6175_v33, %v6183_v28  ;;  %v14529_v29 = vcombine.low %v6175_v33, %v6183_v28 }
0x16f3   : > { %9264 = vmatpush1.bf16.msra.mxu0 %v14923_v22  ;;  %9350 = vmatpush1.bf16.msra.mxu1 %v14925_v13  ;;  %v6190_v22 = vld [vmem:[%s18078_s18 + $0x210] sm:$0xff] }
0x16f4   : > { %9265 = vmatprep.subr.bf16.mxu0 %v14940_v4  ;;  %9351 = vmatprep.subr.bf16.mxu1 %v14942_v62  ;;  %v6198_v13 = vld [vmem:[%s18078_s18 + $0x250] sm:$0xff]  ;;  %v6191_v4 = vld [vmem:[%s18078_s18 + $0x218] sm:$0xff] }
0x16f5   : > { %v6199_v62 = vld [vmem:[%s18078_s18 + $0x258] sm:$0xff]  ;;  %v14544_v1 = vcombine.high %v6190_v22, %v6198_v13  ;;  %v14543_v35 = vcombine.low %v6190_v22, %v6198_v13 }
0x16f6   : > { %v14546_v2 = vcombine.high %v6191_v4, %v6199_v62  ;;  %v14545_v36 = vcombine.low %v6191_v4, %v6199_v62 }
0x16f7   : > { %9266 = vmatpush1.bf16.msra.mxu0 %v14939_v59  ;;  %9352 = vmatpush1.bf16.msra.mxu1 %v14941_v24  ;;  %v6206_v59 = vld [vmem:[%s18078_s18 + $0x290] sm:$0xff] }
0x16f8   : > { %9267 = vmatprep.subr.bf16.mxu0 %v14956_v31  ;;  %9353 = vmatprep.subr.bf16.mxu1 %v14958_v49  ;;  %v6214_v24 = vld [vmem:[%s18078_s18 + $0x2d0] sm:$0xff]  ;;  %v6207_v31 = vld [vmem:[%s18078_s18 + $0x298] sm:$0xff] }
0x16f9   : > { %v6215_v49 = vld [vmem:[%s18078_s18 + $0x2d8] sm:$0xff]  ;;  %v14560_v5 = vcombine.high %v6206_v59, %v6214_v24  ;;  %v14559_v3 = vcombine.low %v6206_v59, %v6214_v24 }
0x16fa   : > { %v14562_v37 = vcombine.high %v6207_v31, %v6215_v49  ;;  %v14561_v6 = vcombine.low %v6207_v31, %v6215_v49 }
0x16fb   : > { %9268 = vmatpush1.bf16.msra.mxu0 %v14955_v17  ;;  %9354 = vmatpush1.bf16.msra.mxu1 %v14957_v34  ;;  %v6222_v17 = vld [vmem:[%s18078_s18 + $0x310] sm:$0xff] }
0x16fc   : > { %9269 = vmatprep.subr.bf16.mxu0 %v14972_v39  ;;  %9355 = vmatprep.subr.bf16.mxu1 %v14974_v40  ;;  %v6230_v34 = vld [vmem:[%s18078_s18 + $0x350] sm:$0xff]  ;;  %v6223_v39 = vld [vmem:[%s18078_s18 + $0x318] sm:$0xff] }
0x16fd   : > { %v6231_v40 = vld [vmem:[%s18078_s18 + $0x358] sm:$0xff]  ;;  %v14576_v41 = vcombine.high %v6222_v17, %v6230_v34  ;;  %v14575_v55 = vcombine.low %v6222_v17, %v6230_v34 }
0x16fe   : > { %v14578_v45 = vcombine.high %v6223_v39, %v6231_v40  ;;  %v14577_v20 = vcombine.low %v6223_v39, %v6231_v40 }
0x16ff   : > { %9270 = vmatpush1.bf16.msra.mxu0 %v14971_v47  ;;  %9356 = vmatpush1.bf16.msra.mxu1 %v14973_v48  ;;  %v6238_v47 = vld [vmem:[%s18078_s18 + $0x390] sm:$0xff] }
0x1700   : > { %9368 = vmatprep.subr.bf16.mxu0 %v14480_v11  ;;  %9454 = vmatprep.subr.bf16.mxu1 %v14482_v52  ;;  %v6246_v48 = vld [vmem:[%s18078_s18 + $0x3d0] sm:$0xff]  ;;  %v6239_v11 = vld [vmem:[%s18078_s18 + $0x398] sm:$0xff] }
0x1701   : > { %v6247_v52 = vld [vmem:[%s18078_s18 + $0x3d8] sm:$0xff]  ;;  %v14592_v60 = vcombine.high %v6238_v47, %v6246_v48  ;;  %v14591_v46 = vcombine.low %v6238_v47, %v6246_v48 }
0x1702   : > { %9272 = vmatmul.mubr.bf16.vlgmr.msra.gmra.mrb[80].mxu0 %v19405_v44  ;;  %9358 = vmatmul.mubr.bf16.vlgmr.msra.gmra.mrb[80].mxu1 %v19405_v44  ;;  %v14594_v0 = vcombine.high %v6239_v11, %v6247_v52  ;;  %v14593_v38 = vcombine.low %v6239_v11, %v6247_v52 }
0x1703   : > { %9369 = vmatpush1.bf16.msra.mxu0 %v14479_v12  ;;  %9400 = vmatprep.mubr.bf16.mxu0 %v19311_v7  ;;  %v6254_v12 = vld [vmem:[%s18078_s18 + $0x410] sm:$0xff] }
0x1704   : > { %9455 = vmatpush1.bf16.msra.mxu1 %v14481_v19  ;;  %9486 = vmatprep.mubr.bf16.mxu1 %v19311_v7  ;;  %v6262_v19 = vld [vmem:[%s18078_s18 + $0x450] sm:$0xff] }
0x1705   : > { %9370 = vmatprep.subr.bf16.mxu0 %v14496_v16  ;;  %9456 = vmatprep.subr.bf16.mxu1 %v14498_v43  ;;  %v6255_v16 = vld [vmem:[%s18078_s18 + $0x418] sm:$0xff]  ;;  %v14608_v23 = vcombine.high %v6254_v12, %v6262_v19  ;;  %v14607_v54 = vcombine.low %v6254_v12, %v6262_v19 }
0x1706   : > { %v6263_v43 = vld [vmem:[%s18078_s18 + $0x458] sm:$0xff] }
0x1707   : > { %9371 = vmatpush1.bf16.msra.mxu0 %v14495_v18  ;;  %v14610_v14 = vcombine.high %v6255_v16, %v6263_v43  ;;  %v6270_v18 = vld [vmem:[%s18078_s18 + $0x490] sm:$0xff]  ;;  %v14609_v63 = vcombine.low %v6255_v16, %v6263_v43 }
0x1708   : > { %9457 = vmatpush1.bf16.msra.mxu1 %v14497_v57  ;;  %9372 = vmatprep.subr.bf16.mxu0 %v14512_v15  ;;  %v6278_v57 = vld [vmem:[%s18078_s18 + $0x4d0] sm:$0xff]  ;;  %v6271_v15 = vld [vmem:[%s18078_s18 + $0x498] sm:$0xff] }
0x1709   : > { %9458 = vmatprep.subr.bf16.mxu1 %v14514_v51  ;;  %v6279_v51 = vld [vmem:[%s18078_s18 + $0x4d8] sm:$0xff]  ;;  %v14624_v33 = vcombine.high %v6270_v18, %v6278_v57  ;;  %v14623_v22 = vcombine.low %v6270_v18, %v6278_v57 }
0x170a   : > { %v14626_v28 = vcombine.high %v6271_v15, %v6279_v51  ;;  %v14625_v13 = vcombine.low %v6271_v15, %v6279_v51 }
0x170b   : > { %9373 = vmatpush1.bf16.msra.mxu0 %v14511_v32  ;;  %v6286_v32 = vld [vmem:[%s18078_s18 + $0x510] sm:$0xff] }
0x170c   : > { %9459 = vmatpush1.bf16.msra.mxu1 %v14513_v42  ;;  %9374 = vmatprep.subr.bf16.mxu0 %v14528_v58  ;;  %v6294_v42 = vld [vmem:[%s18078_s18 + $0x550] sm:$0xff]  ;;  %v6287_v58 = vld [vmem:[%s18078_s18 + $0x518] sm:$0xff] }
0x170d   : > { %9460 = vmatprep.subr.bf16.mxu1 %v14530_v21  ;;  %v6295_v21 = vld [vmem:[%s18078_s18 + $0x558] sm:$0xff]  ;;  %v14640_v4 = vcombine.high %v6286_v32, %v6294_v42  ;;  %v14639_v59 = vcombine.low %v6286_v32, %v6294_v42 }
0x170e   : > { %v14642_v62 = vcombine.high %v6287_v58, %v6295_v21  ;;  %v14641_v24 = vcombine.low %v6287_v58, %v6295_v21 }
0x170f   : > { %9375 = vmatpush1.bf16.msra.mxu0 %v14527_v53  ;;  %v6302_v53 = vld [vmem:[%s18078_s18 + $0x590] sm:$0xff] }
0x1710   : > { %9461 = vmatpush1.bf16.msra.mxu1 %v14529_v29  ;;  %9376 = vmatprep.subr.bf16.mxu0 %v14544_v1  ;;  %v6310_v29 = vld [vmem:[%s18078_s18 + $0x5d0] sm:$0xff]  ;;  %v6303_v1 = vld [vmem:[%s18078_s18 + $0x598] sm:$0xff] }
0x1711   : > { %9462 = vmatprep.subr.bf16.mxu1 %v14546_v2  ;;  %v6311_v2 = vld [vmem:[%s18078_s18 + $0x5d8] sm:$0xff]  ;;  %v14656_v31 = vcombine.high %v6302_v53, %v6310_v29  ;;  %v14655_v17 = vcombine.low %v6302_v53, %v6310_v29 }
0x1712   : > { %v14658_v49 = vcombine.high %v6303_v1, %v6311_v2  ;;  %v14657_v34 = vcombine.low %v6303_v1, %v6311_v2  ;;  %v6407_v53 = vld [vmem:[%s18078_s18 + $0x8d8] sm:$0xff]  ;;  %v6414_v2 = vld [vmem:[%s18078_s18 + $0x910] sm:$0xff] }
0x1713   : > { %9377 = vmatpush1.bf16.msra.mxu0 %v14543_v35  ;;  %v6318_v35 = vld [vmem:[%s18078_s18 + $0x610] sm:$0xff] }
0x1714   : > { %9463 = vmatpush1.bf16.msra.mxu1 %v14545_v36  ;;  %9378 = vmatprep.subr.bf16.mxu0 %v14560_v5  ;;  %v6326_v36 = vld [vmem:[%s18078_s18 + $0x650] sm:$0xff]  ;;  %v6319_v5 = vld [vmem:[%s18078_s18 + $0x618] sm:$0xff] }
0x1715   : > { %9464 = vmatprep.subr.bf16.mxu1 %v14562_v37  ;;  %v6327_v37 = vld [vmem:[%s18078_s18 + $0x658] sm:$0xff]  ;;  %v14672_v39 = vcombine.high %v6318_v35, %v6326_v36  ;;  %v14671_v47 = vcombine.low %v6318_v35, %v6326_v36 }
0x1716   : > { %v14674_v40 = vcombine.high %v6319_v5, %v6327_v37  ;;  %v14673_v48 = vcombine.low %v6319_v5, %v6327_v37 }
0x1717   : > { %9379 = vmatpush1.bf16.msra.mxu0 %v14559_v3  ;;  %v6334_v3 = vld [vmem:[%s18078_s18 + $0x690] sm:$0xff] }
0x1718   : > { %9465 = vmatpush1.bf16.msra.mxu1 %v14561_v6  ;;  %9380 = vmatprep.subr.bf16.mxu0 %v14576_v41  ;;  %v6342_v6 = vld [vmem:[%s18078_s18 + $0x6d0] sm:$0xff]  ;;  %v6335_v41 = vld [vmem:[%s18078_s18 + $0x698] sm:$0xff] }
0x1719   : > { %9466 = vmatprep.subr.bf16.mxu1 %v14578_v45  ;;  %v6343_v45 = vld [vmem:[%s18078_s18 + $0x6d8] sm:$0xff]  ;;  %v14688_v11 = vcombine.high %v6334_v3, %v6342_v6  ;;  %v14687_v12 = vcombine.low %v6334_v3, %v6342_v6 }
0x171a   : > { %v14690_v52 = vcombine.high %v6335_v41, %v6343_v45  ;;  %v14689_v19 = vcombine.low %v6335_v41, %v6343_v45 }
0x171b   : > { %9381 = vmatpush1.bf16.msra.mxu0 %v14575_v55  ;;  %v6350_v55 = vld [vmem:[%s18078_s18 + $0x710] sm:$0xff] }
0x171c   : > { %9467 = vmatpush1.bf16.msra.mxu1 %v14577_v20  ;;  %9382 = vmatprep.subr.bf16.mxu0 %v14592_v60  ;;  %v6358_v20 = vld [vmem:[%s18078_s18 + $0x750] sm:$0xff]  ;;  %v6351_v60 = vld [vmem:[%s18078_s18 + $0x718] sm:$0xff] }
0x171d   : > { %9468 = vmatprep.subr.bf16.mxu1 %v14594_v0  ;;  %v6359_v0 = vld [vmem:[%s18078_s18 + $0x758] sm:$0xff]  ;;  %v14704_v16 = vcombine.high %v6350_v55, %v6358_v20  ;;  %v14703_v18 = vcombine.low %v6350_v55, %v6358_v20 }
0x171e   : > { %v14706_v43 = vcombine.high %v6351_v60, %v6359_v0  ;;  %v14705_v57 = vcombine.low %v6351_v60, %v6359_v0 }
0x171f   : > { %9383 = vmatpush1.bf16.msra.mxu0 %v14591_v46  ;;  %v6366_v46 = vld [vmem:[%s18078_s18 + $0x790] sm:$0xff] }
0x1720   : > { %9469 = vmatpush1.bf16.msra.mxu1 %v14593_v38  ;;  %9384 = vmatprep.subr.bf16.mxu0 %v14608_v23  ;;  %v6374_v38 = vld [vmem:[%s18078_s18 + $0x7d0] sm:$0xff]  ;;  %v6367_v23 = vld [vmem:[%s18078_s18 + $0x798] sm:$0xff] }
0x1721   : > { %9470 = vmatprep.subr.bf16.mxu1 %v14610_v14  ;;  %v6375_v14 = vld [vmem:[%s18078_s18 + $0x7d8] sm:$0xff]  ;;  %v14720_v15 = vcombine.high %v6366_v46, %v6374_v38  ;;  %v14719_v32 = vcombine.low %v6366_v46, %v6374_v38 }
0x1722   : > { %v14722_v51 = vcombine.high %v6367_v23, %v6375_v14  ;;  %v14721_v42 = vcombine.low %v6367_v23, %v6375_v14 }
0x1723   : > { %9385 = vmatpush1.bf16.msra.mxu0 %v14607_v54  ;;  %v6382_v54 = vld [vmem:[%s18078_s18 + $0x810] sm:$0xff] }
0x1724   : > { %9471 = vmatpush1.bf16.msra.mxu1 %v14609_v63  ;;  %9386 = vmatprep.subr.bf16.mxu0 %v14624_v33  ;;  %v6390_v63 = vld [vmem:[%s18078_s18 + $0x850] sm:$0xff]  ;;  %v6383_v33 = vld [vmem:[%s18078_s18 + $0x818] sm:$0xff] }
0x1725   : > { %9472 = vmatprep.subr.bf16.mxu1 %v14626_v28  ;;  %v6391_v28 = vld [vmem:[%s18078_s18 + $0x858] sm:$0xff]  ;;  %v14736_v58 = vcombine.high %v6382_v54, %v6390_v63 }
0x1726   : > { %v14738_v21 = vcombine.high %v6383_v33, %v6391_v28  ;;  %v14737_v29 = vcombine.low %v6383_v33, %v6391_v28 }
0x1727   : > { %9387 = vmatpush1.bf16.msra.mxu0 %v14623_v22  ;;  %v6398_v22 = vld [vmem:[%s18078_s18 + $0x890] sm:$0xff] }
0x1728   : > { %9473 = vmatpush1.bf16.msra.mxu1 %v14625_v13  ;;  %9388 = vmatprep.subr.bf16.mxu0 %v14640_v4  ;;  %v6406_v13 = vld [vmem:[%s18078_s18 + $0x8d0] sm:$0xff]  ;;  %v14735_v4 = vcombine.low %v6382_v54, %v6390_v63 }
0x1729   : > { %9474 = vmatprep.subr.bf16.mxu1 %v14642_v62  ;;  %v6399_v62 = vld [vmem:[%s18078_s18 + $0x898] sm:$0xff]  ;;  %v14752_v1 = vcombine.high %v6398_v22, %v6406_v13  ;;  %v14751_v35 = vcombine.low %v6398_v22, %v6406_v13 }
0x172a   : > { %v14753_v36 = vcombine.low %v6399_v62, %v6407_v53 }
0x172b   : > { %9389 = vmatpush1.bf16.msra.mxu0 %v14639_v59  ;;  %v6422_v59 = vld [vmem:[%s18078_s18 + $0x950] sm:$0xff] }
0x172c   : > { %9475 = vmatpush1.bf16.msra.mxu1 %v14641_v24  ;;  %9390 = vmatprep.subr.bf16.mxu0 %v14656_v31  ;;  %v14754_v24 = vcombine.high %v6399_v62, %v6407_v53  ;;  %v6415_v31 = vld [vmem:[%s18078_s18 + $0x918] sm:$0xff]  ;;  %v14768_v5 = vcombine.high %v6414_v2, %v6422_v59  ;;  %v14767_v3 = vcombine.low %v6414_v2, %v6422_v59  ;;  %v6510_v53 = vld [vmem:[%s18078_s18 + $0xc10] sm:$0xff] }
0x172d   : > { %9476 = vmatprep.subr.bf16.mxu1 %v14658_v49  ;;  %v6423_v49 = vld [vmem:[%s18078_s18 + $0x958] sm:$0xff] }
0x172e   : > { %v14770_v37 = vcombine.high %v6415_v31, %v6423_v49  ;;  %v14769_v6 = vcombine.low %v6415_v31, %v6423_v49  ;;  %v6519_v2 = vld [vmem:[%s18078_s18 + $0xc58] sm:$0xff] }
0x172f   : > { %9391 = vmatpush1.bf16.msra.mxu0 %v14655_v17  ;;  %v6430_v17 = vld [vmem:[%s18078_s18 + $0x990] sm:$0xff] }
0x1730   : > { %9477 = vmatpush1.bf16.msra.mxu1 %v14657_v34  ;;  %9392 = vmatprep.subr.bf16.mxu0 %v14672_v39  ;;  %v6438_v34 = vld [vmem:[%s18078_s18 + $0x9d0] sm:$0xff]  ;;  %v6431_v39 = vld [vmem:[%s18078_s18 + $0x998] sm:$0xff] }
0x1731   : > { %9478 = vmatprep.subr.bf16.mxu1 %v14674_v40  ;;  %v6439_v40 = vld [vmem:[%s18078_s18 + $0x9d8] sm:$0xff]  ;;  %v14784_v41 = vcombine.high %v6430_v17, %v6438_v34  ;;  %v14783_v55 = vcombine.low %v6430_v17, %v6438_v34 }
0x1732   : > { %v14786_v45 = vcombine.high %v6431_v39, %v6439_v40  ;;  %v14785_v20 = vcombine.low %v6431_v39, %v6439_v40 }
0x1733   : > { %9393 = vmatpush1.bf16.msra.mxu0 %v14671_v47  ;;  %v6446_v47 = vld [vmem:[%s18078_s18 + $0xa10] sm:$0xff] }
0x1734   : > { %9479 = vmatpush1.bf16.msra.mxu1 %v14673_v48  ;;  %9394 = vmatprep.subr.bf16.mxu0 %v14688_v11  ;;  %v6454_v48 = vld [vmem:[%s18078_s18 + $0xa50] sm:$0xff]  ;;  %v6447_v11 = vld [vmem:[%s18078_s18 + $0xa18] sm:$0xff] }
0x1735   : > { %9480 = vmatprep.subr.bf16.mxu1 %v14690_v52  ;;  %v6455_v52 = vld [vmem:[%s18078_s18 + $0xa58] sm:$0xff]  ;;  %v14800_v60 = vcombine.high %v6446_v47, %v6454_v48  ;;  %v14799_v46 = vcombine.low %v6446_v47, %v6454_v48 }
0x1736   : > { %v14802_v0 = vcombine.high %v6447_v11, %v6455_v52  ;;  %v14801_v38 = vcombine.low %v6447_v11, %v6455_v52 }
0x1737   : > { %9395 = vmatpush1.bf16.msra.mxu0 %v14687_v12  ;;  %v6462_v12 = vld [vmem:[%s18078_s18 + $0xa90] sm:$0xff] }
0x1738   : > { %9481 = vmatpush1.bf16.msra.mxu1 %v14689_v19  ;;  %9396 = vmatprep.subr.bf16.mxu0 %v14704_v16  ;;  %v6470_v19 = vld [vmem:[%s18078_s18 + $0xad0] sm:$0xff]  ;;  %v6463_v16 = vld [vmem:[%s18078_s18 + $0xa98] sm:$0xff] }
0x1739   : > { %9482 = vmatprep.subr.bf16.mxu1 %v14706_v43  ;;  %v6471_v43 = vld [vmem:[%s18078_s18 + $0xad8] sm:$0xff]  ;;  %v14816_v23 = vcombine.high %v6462_v12, %v6470_v19  ;;  %v14815_v54 = vcombine.low %v6462_v12, %v6470_v19 }
0x173a   : > { %v14818_v14 = vcombine.high %v6463_v16, %v6471_v43  ;;  %v14817_v63 = vcombine.low %v6463_v16, %v6471_v43 }
0x173b   : > { %9397 = vmatpush1.bf16.msra.mxu0 %v14703_v18  ;;  %v6478_v18 = vld [vmem:[%s18078_s18 + $0xb10] sm:$0xff] }
0x173c   : > { %9483 = vmatpush1.bf16.msra.mxu1 %v14705_v57  ;;  %9398 = vmatprep.subr.bf16.mxu0 %v14720_v15  ;;  %v6486_v57 = vld [vmem:[%s18078_s18 + $0xb50] sm:$0xff]  ;;  %v6479_v15 = vld [vmem:[%s18078_s18 + $0xb18] sm:$0xff] }
0x173d   : > { %9484 = vmatprep.subr.bf16.mxu1 %v14722_v51  ;;  %v6487_v51 = vld [vmem:[%s18078_s18 + $0xb58] sm:$0xff]  ;;  %v14832_v33 = vcombine.high %v6478_v18, %v6486_v57  ;;  %v14831_v22 = vcombine.low %v6478_v18, %v6486_v57 }
0x173e   : > { %v14834_v28 = vcombine.high %v6479_v15, %v6487_v51  ;;  %v14833_v13 = vcombine.low %v6479_v15, %v6487_v51 }
0x173f   : > { %9399 = vmatpush1.bf16.msra.mxu0 %v14719_v32  ;;  %v6494_v32 = vld [vmem:[%s18078_s18 + $0xb90] sm:$0xff] }
0x1740   : > { %9485 = vmatpush1.bf16.msra.mxu1 %v14721_v42  ;;  %9411 = vmatprep.subr.bf16.mxu0 %v14736_v58  ;;  %v6502_v42 = vld [vmem:[%s18078_s18 + $0xbd0] sm:$0xff]  ;;  %v6495_v58 = vld [vmem:[%s18078_s18 + $0xb98] sm:$0xff] }
0x1741   : > { %9497 = vmatprep.subr.bf16.mxu1 %v14738_v21  ;;  %v6503_v21 = vld [vmem:[%s18078_s18 + $0xbd8] sm:$0xff]  ;;  %v14847_v59 = vcombine.low %v6494_v32, %v6502_v42 }
0x1742   : > { %9401 = vmatmul.mubr.bf16.vlgmr.msra.gmra.mrb[84].mxu0 %v19315_v8  ;;  %v14850_v62 = vcombine.high %v6495_v58, %v6503_v21 }
0x1743   : > { %9487 = vmatmul.mubr.bf16.vlgmr.msra.gmra.mrb[84].mxu1 %v19315_v8  ;;  %9412 = vmatpush1.bf16.msra.mxu0 %v14735_v4  ;;  %v14848_v4 = vcombine.high %v6494_v32, %v6502_v42 }
0x1744   : > { %9443 = vmatprep.mubr.bf16.mxu0 %v19331_v61  ;;  %9498 = vmatpush1.bf16.msra.mxu1 %v14737_v29  ;;  %v6518_v29 = vld [vmem:[%s18078_s18 + $0xc50] sm:$0xff] }
0x1745   : > { %9529 = vmatprep.mubr.bf16.mxu1 %v19331_v61  ;;  %9413 = vmatprep.subr.bf16.mxu0 %v14752_v1  ;;  %v6511_v1 = vld [vmem:[%s18078_s18 + $0xc18] sm:$0xff]  ;;  %v14864_v31 = vcombine.high %v6510_v53, %v6518_v29  ;;  %v14863_v17 = vcombine.low %v6510_v53, %v6518_v29 }
0x1746   : > { %9499 = vmatprep.subr.bf16.mxu1 %v14754_v24  ;;  %v14849_v24 = vcombine.low %v6495_v58, %v6503_v21  ;;  %v14866_v49 = vcombine.high %v6511_v1, %v6519_v2  ;;  %v14865_v34 = vcombine.low %v6511_v1, %v6519_v2 }
0x1747   : > { %9414 = vmatpush1.bf16.msra.mxu0 %v14751_v35  ;;  %v6526_v35 = vld [vmem:[%s18078_s18 + $0xc90] sm:$0xff] }
0x1748   : > { %9500 = vmatpush1.bf16.msra.mxu1 %v14753_v36  ;;  %9415 = vmatprep.subr.bf16.mxu0 %v14768_v5  ;;  %v6534_v36 = vld [vmem:[%s18078_s18 + $0xcd0] sm:$0xff]  ;;  %v6527_v5 = vld [vmem:[%s18078_s18 + $0xc98] sm:$0xff] }
0x1749   : > { %9501 = vmatprep.subr.bf16.mxu1 %v14770_v37  ;;  %v6535_v37 = vld [vmem:[%s18078_s18 + $0xcd8] sm:$0xff]  ;;  %v14880_v39 = vcombine.high %v6526_v35, %v6534_v36  ;;  %v14879_v47 = vcombine.low %v6526_v35, %v6534_v36 }
0x174a   : > { %v14882_v40 = vcombine.high %v6527_v5, %v6535_v37  ;;  %v14881_v48 = vcombine.low %v6527_v5, %v6535_v37 }
0x174b   : > { %9416 = vmatpush1.bf16.msra.mxu0 %v14767_v3  ;;  %v6542_v3 = vld [vmem:[%s18078_s18 + $0xd10] sm:$0xff] }
0x174c   : > { %9502 = vmatpush1.bf16.msra.mxu1 %v14769_v6  ;;  %9417 = vmatprep.subr.bf16.mxu0 %v14784_v41  ;;  %v6550_v6 = vld [vmem:[%s18078_s18 + $0xd50] sm:$0xff]  ;;  %v6543_v41 = vld [vmem:[%s18078_s18 + $0xd18] sm:$0xff] }
0x174d   : > { %9503 = vmatprep.subr.bf16.mxu1 %v14786_v45  ;;  %v6551_v45 = vld [vmem:[%s18078_s18 + $0xd58] sm:$0xff]  ;;  %v14896_v11 = vcombine.high %v6542_v3, %v6550_v6  ;;  %v14895_v12 = vcombine.low %v6542_v3, %v6550_v6 }
0x174e   : > { %v14898_v52 = vcombine.high %v6543_v41, %v6551_v45  ;;  %v14897_v19 = vcombine.low %v6543_v41, %v6551_v45 }
0x174f   : > { %9418 = vmatpush1.bf16.msra.mxu0 %v14783_v55  ;;  %v6558_v55 = vld [vmem:[%s18078_s18 + $0xd90] sm:$0xff] }
0x1750   : > { %9504 = vmatpush1.bf16.msra.mxu1 %v14785_v20  ;;  %9419 = vmatprep.subr.bf16.mxu0 %v14800_v60  ;;  %v6566_v20 = vld [vmem:[%s18078_s18 + $0xdd0] sm:$0xff]  ;;  %v6559_v60 = vld [vmem:[%s18078_s18 + $0xd98] sm:$0xff] }
0x1751   : > { %9505 = vmatprep.subr.bf16.mxu1 %v14802_v0  ;;  %v6567_v0 = vld [vmem:[%s18078_s18 + $0xdd8] sm:$0xff]  ;;  %v14912_v16 = vcombine.high %v6558_v55, %v6566_v20  ;;  %v14911_v18 = vcombine.low %v6558_v55, %v6566_v20  ;;  %v6153_v55 = vld [vmem:[%s18078_s18 + $0xe8] sm:$0xff] }
0x1752   : > { %v14914_v43 = vcombine.high %v6559_v60, %v6567_v0  ;;  %v14913_v57 = vcombine.low %v6559_v60, %v6567_v0  ;;  %v6160_v0 = vld [vmem:[%s18078_s18 + $0x120] sm:$0xff] }
0x1753   : > { %9420 = vmatpush1.bf16.msra.mxu0 %v14799_v46  ;;  %v6574_v46 = vld [vmem:[%s18078_s18 + $0xe10] sm:$0xff] }
0x1754   : > { %9506 = vmatpush1.bf16.msra.mxu1 %v14801_v38  ;;  %9421 = vmatprep.subr.bf16.mxu0 %v14816_v23  ;;  %v6582_v38 = vld [vmem:[%s18078_s18 + $0xe50] sm:$0xff]  ;;  %v6575_v23 = vld [vmem:[%s18078_s18 + $0xe18] sm:$0xff] }
0x1755   : > { %9507 = vmatprep.subr.bf16.mxu1 %v14818_v14  ;;  %v6583_v14 = vld [vmem:[%s18078_s18 + $0xe58] sm:$0xff]  ;;  %v14928_v15 = vcombine.high %v6574_v46, %v6582_v38  ;;  %v14927_v32 = vcombine.low %v6574_v46, %v6582_v38 }
0x1756   : > { %v14930_v51 = vcombine.high %v6575_v23, %v6583_v14  ;;  %v14929_v42 = vcombine.low %v6575_v23, %v6583_v14 }
0x1757   : > { %9422 = vmatpush1.bf16.msra.mxu0 %v14815_v54  ;;  %v6590_v54 = vld [vmem:[%s18078_s18 + $0xe90] sm:$0xff] }
0x1758   : > { %9508 = vmatpush1.bf16.msra.mxu1 %v14817_v63  ;;  %9423 = vmatprep.subr.bf16.mxu0 %v14832_v33  ;;  %v6598_v63 = vld [vmem:[%s18078_s18 + $0xed0] sm:$0xff]  ;;  %v6591_v33 = vld [vmem:[%s18078_s18 + $0xe98] sm:$0xff] }
0x1759   : > { %9509 = vmatprep.subr.bf16.mxu1 %v14834_v28  ;;  %v6599_v28 = vld [vmem:[%s18078_s18 + $0xed8] sm:$0xff]  ;;  %v14944_v58 = vcombine.high %v6590_v54, %v6598_v63  ;;  %v14943_v53 = vcombine.low %v6590_v54, %v6598_v63 }
0x175a   : > { %v14946_v21 = vcombine.high %v6591_v33, %v6599_v28  ;;  %v14945_v29 = vcombine.low %v6591_v33, %v6599_v28 }
0x175b   : > { %9424 = vmatpush1.bf16.msra.mxu0 %v14831_v22  ;;  %v6606_v22 = vld [vmem:[%s18078_s18 + $0xf10] sm:$0xff] }
0x175c   : > { %9510 = vmatpush1.bf16.msra.mxu1 %v14833_v13  ;;  %9425 = vmatprep.subr.bf16.mxu0 %v14848_v4  ;;  %v6614_v13 = vld [vmem:[%s18078_s18 + $0xf50] sm:$0xff]  ;;  %v6607_v4 = vld [vmem:[%s18078_s18 + $0xf18] sm:$0xff] }
0x175d   : > { %9511 = vmatprep.subr.bf16.mxu1 %v14850_v62  ;;  %v6615_v62 = vld [vmem:[%s18078_s18 + $0xf58] sm:$0xff]  ;;  %v14960_v1 = vcombine.high %v6606_v22, %v6614_v13  ;;  %v14959_v35 = vcombine.low %v6606_v22, %v6614_v13 }
0x175e   : > { %v14962_v2 = vcombine.high %v6607_v4, %v6615_v62  ;;  %v14961_v36 = vcombine.low %v6607_v4, %v6615_v62 }
0x175f   : > { %9426 = vmatpush1.bf16.msra.mxu0 %v14847_v59  ;;  %v6622_v59 = vld [vmem:[%s18078_s18 + $0xf90] sm:$0xff] }
0x1760   : > { %9512 = vmatpush1.bf16.msra.mxu1 %v14849_v24  ;;  %9427 = vmatprep.subr.bf16.mxu0 %v14864_v31  ;;  %v6630_v24 = vld [vmem:[%s18078_s18 + $0xfd0] sm:$0xff]  ;;  %v6623_v31 = vld [vmem:[%s18078_s18 + $0xf98] sm:$0xff] }
0x1761   : > { %9513 = vmatprep.subr.bf16.mxu1 %v14866_v49  ;;  %v6631_v49 = vld [vmem:[%s18078_s18 + $0xfd8] sm:$0xff]  ;;  %v14976_v5 = vcombine.high %v6622_v59, %v6630_v24  ;;  %v14975_v3 = vcombine.low %v6622_v59, %v6630_v24 }
0x1762   : > { %v14978_v37 = vcombine.high %v6623_v31, %v6631_v49  ;;  %v14977_v6 = vcombine.low %v6623_v31, %v6631_v49 }
0x1763   : > { %9428 = vmatpush1.bf16.msra.mxu0 %v14863_v17  ;;  %v6128_v17 = vld [vmem:[%s18078_s18 + $0x20] sm:$0xff] }
0x1764   : > { %9514 = vmatpush1.bf16.msra.mxu1 %v14865_v34  ;;  %9429 = vmatprep.subr.bf16.mxu0 %v14880_v39  ;;  %v6136_v34 = vld [vmem:[%s18078_s18 + $0x60] sm:$0xff]  ;;  %v6129_v39 = vld [vmem:[%s18078_s18 + $0x28] sm:$0xff] }
0x1765   : > { %9515 = vmatprep.subr.bf16.mxu1 %v14882_v40  ;;  %v6137_v40 = vld [vmem:[%s18078_s18 + $0x68] sm:$0xff]  ;;  %v14484_v41 = vcombine.high %v6128_v17, %v6136_v34 }
0x1766   : > { %v14486_v45 = vcombine.high %v6129_v39, %v6137_v40  ;;  %v14485_v20 = vcombine.low %v6129_v39, %v6137_v40 }
0x1767   : > { %9430 = vmatpush1.bf16.msra.mxu0 %v14879_v47  ;;  %v6144_v47 = vld [vmem:[%s18078_s18 + $0xa0] sm:$0xff] }
0x1768   : > { %9516 = vmatpush1.bf16.msra.mxu1 %v14881_v48  ;;  %9431 = vmatprep.subr.bf16.mxu0 %v14896_v11  ;;  %v6152_v48 = vld [vmem:[%s18078_s18 + $0xe0] sm:$0xff]  ;;  %v14483_v11 = vcombine.low %v6128_v17, %v6136_v34 }
0x1769   : > { %9517 = vmatprep.subr.bf16.mxu1 %v14898_v52  ;;  %v6145_v52 = vld [vmem:[%s18078_s18 + $0xa8] sm:$0xff]  ;;  %v14500_v60 = vcombine.high %v6144_v47, %v6152_v48  ;;  %v14499_v46 = vcombine.low %v6144_v47, %v6152_v48 }
0x176a   : > { %v14501_v38 = vcombine.low %v6145_v52, %v6153_v55 }
0x176b   : > { %9432 = vmatpush1.bf16.msra.mxu0 %v14895_v12  ;;  %v6168_v12 = vld [vmem:[%s18078_s18 + $0x160] sm:$0xff] }
0x176c   : > { %9518 = vmatpush1.bf16.msra.mxu1 %v14897_v19  ;;  %9433 = vmatprep.subr.bf16.mxu0 %v14912_v16  ;;  %v14502_v19 = vcombine.high %v6145_v52, %v6153_v55  ;;  %v6161_v16 = vld [vmem:[%s18078_s18 + $0x128] sm:$0xff]  ;;  %v14516_v23 = vcombine.high %v6160_v0, %v6168_v12  ;;  %v14515_v54 = vcombine.low %v6160_v0, %v6168_v12  ;;  %v6256_v55 = vld [vmem:[%s18078_s18 + $0x420] sm:$0xff] }
0x176d   : > { %9519 = vmatprep.subr.bf16.mxu1 %v14914_v43  ;;  %v6169_v43 = vld [vmem:[%s18078_s18 + $0x168] sm:$0xff] }
0x176e   : > { %v14518_v14 = vcombine.high %v6161_v16, %v6169_v43  ;;  %v14517_v63 = vcombine.low %v6161_v16, %v6169_v43  ;;  %v6265_v0 = vld [vmem:[%s18078_s18 + $0x468] sm:$0xff] }
0x176f   : > { %9434 = vmatpush1.bf16.msra.mxu0 %v14911_v18  ;;  %v6176_v18 = vld [vmem:[%s18078_s18 + $0x1a0] sm:$0xff] }
0x1770   : > { %9520 = vmatpush1.bf16.msra.mxu1 %v14913_v57  ;;  %9435 = vmatprep.subr.bf16.mxu0 %v14928_v15  ;;  %v6184_v57 = vld [vmem:[%s18078_s18 + $0x1e0] sm:$0xff]  ;;  %v6177_v15 = vld [vmem:[%s18078_s18 + $0x1a8] sm:$0xff] }
0x1771   : > { %9521 = vmatprep.subr.bf16.mxu1 %v14930_v51  ;;  %v6185_v51 = vld [vmem:[%s18078_s18 + $0x1e8] sm:$0xff]  ;;  %v14532_v33 = vcombine.high %v6176_v18, %v6184_v57  ;;  %v14531_v22 = vcombine.low %v6176_v18, %v6184_v57 }
0x1772   : > { %v14534_v28 = vcombine.high %v6177_v15, %v6185_v51  ;;  %v14533_v13 = vcombine.low %v6177_v15, %v6185_v51 }
0x1773   : > { %9436 = vmatpush1.bf16.msra.mxu0 %v14927_v32  ;;  %v6192_v32 = vld [vmem:[%s18078_s18 + $0x220] sm:$0xff] }
0x1774   : > { %9522 = vmatpush1.bf16.msra.mxu1 %v14929_v42  ;;  %9437 = vmatprep.subr.bf16.mxu0 %v14944_v58  ;;  %v6200_v42 = vld [vmem:[%s18078_s18 + $0x260] sm:$0xff]  ;;  %v6193_v58 = vld [vmem:[%s18078_s18 + $0x228] sm:$0xff] }
0x1775   : > { %9523 = vmatprep.subr.bf16.mxu1 %v14946_v21  ;;  %v6201_v21 = vld [vmem:[%s18078_s18 + $0x268] sm:$0xff]  ;;  %v14548_v4 = vcombine.high %v6192_v32, %v6200_v42  ;;  %v14547_v59 = vcombine.low %v6192_v32, %v6200_v42 }
0x1776   : > { %v14550_v62 = vcombine.high %v6193_v58, %v6201_v21  ;;  %v14549_v24 = vcombine.low %v6193_v58, %v6201_v21 }
0x1777   : > { %9438 = vmatpush1.bf16.msra.mxu0 %v14943_v53  ;;  %v6208_v53 = vld [vmem:[%s18078_s18 + $0x2a0] sm:$0xff] }
0x1778   : > { %9524 = vmatpush1.bf16.msra.mxu1 %v14945_v29  ;;  %9439 = vmatprep.subr.bf16.mxu0 %v14960_v1  ;;  %v6216_v29 = vld [vmem:[%s18078_s18 + $0x2e0] sm:$0xff]  ;;  %v6209_v1 = vld [vmem:[%s18078_s18 + $0x2a8] sm:$0xff] }
0x1779   : > { %9525 = vmatprep.subr.bf16.mxu1 %v14962_v2  ;;  %v6217_v2 = vld [vmem:[%s18078_s18 + $0x2e8] sm:$0xff]  ;;  %v14564_v31 = vcombine.high %v6208_v53, %v6216_v29  ;;  %v14563_v17 = vcombine.low %v6208_v53, %v6216_v29 }
0x177a   : > { %v14566_v49 = vcombine.high %v6209_v1, %v6217_v2  ;;  %v14565_v34 = vcombine.low %v6209_v1, %v6217_v2 }
0x177b   : > { %9440 = vmatpush1.bf16.msra.mxu0 %v14959_v35  ;;  %v6224_v35 = vld [vmem:[%s18078_s18 + $0x320] sm:$0xff] }
0x177c   : > { %9526 = vmatpush1.bf16.msra.mxu1 %v14961_v36  ;;  %9441 = vmatprep.subr.bf16.mxu0 %v14976_v5  ;;  %v6232_v36 = vld [vmem:[%s18078_s18 + $0x360] sm:$0xff]  ;;  %v6225_v5 = vld [vmem:[%s18078_s18 + $0x328] sm:$0xff] }
0x177d   : > { %9527 = vmatprep.subr.bf16.mxu1 %v14978_v37  ;;  %v6233_v37 = vld [vmem:[%s18078_s18 + $0x368] sm:$0xff]  ;;  %v14580_v39 = vcombine.high %v6224_v35, %v6232_v36  ;;  %v14579_v47 = vcombine.low %v6224_v35, %v6232_v36 }
0x177e   : > { %v14582_v40 = vcombine.high %v6225_v5, %v6233_v37  ;;  %v14581_v48 = vcombine.low %v6225_v5, %v6233_v37 }
0x177f   : > { %9442 = vmatpush1.bf16.msra.mxu0 %v14975_v3  ;;  %v6240_v3 = vld [vmem:[%s18078_s18 + $0x3a0] sm:$0xff] }
0x1780   : > { %9528 = vmatpush1.bf16.msra.mxu1 %v14977_v6  ;;  %9540 = vmatprep.subr.bf16.mxu0 %v14484_v41  ;;  %v6248_v6 = vld [vmem:[%s18078_s18 + $0x3e0] sm:$0xff]  ;;  %v6241_v41 = vld [vmem:[%s18078_s18 + $0x3a8] sm:$0xff] }
0x1781   : > { %9626 = vmatprep.subr.bf16.mxu1 %v14486_v45  ;;  %v6249_v45 = vld [vmem:[%s18078_s18 + $0x3e8] sm:$0xff]  ;;  %v14595_v12 = vcombine.low %v6240_v3, %v6248_v6 }
0x1782   : > { %9444 = vmatmul.mubr.bf16.vlgmr.msra.gmra.mrb[84].mxu0 %v19405_v44  ;;  %v14598_v52 = vcombine.high %v6241_v41, %v6249_v45 }
0x1783   : > { %9530 = vmatmul.mubr.bf16.vlgmr.msra.gmra.mrb[84].mxu1 %v19405_v44  ;;  %9541 = vmatpush1.bf16.msra.mxu0 %v14483_v11  ;;  %v14596_v11 = vcombine.high %v6240_v3, %v6248_v6 }
0x1784   : > { %9572 = vmatprep.mubr.bf16.mxu0 %v19311_v7  ;;  %9627 = vmatpush1.bf16.msra.mxu1 %v14485_v20  ;;  %v6264_v20 = vld [vmem:[%s18078_s18 + $0x460] sm:$0xff] }
0x1785   : > { %9658 = vmatprep.mubr.bf16.mxu1 %v19311_v7  ;;  %9542 = vmatprep.subr.bf16.mxu0 %v14500_v60  ;;  %v6257_v60 = vld [vmem:[%s18078_s18 + $0x428] sm:$0xff]  ;;  %v14612_v16 = vcombine.high %v6256_v55, %v6264_v20  ;;  %v14611_v18 = vcombine.low %v6256_v55, %v6264_v20 }
0x1786   : > { %9628 = vmatprep.subr.bf16.mxu1 %v14502_v19  ;;  %v14597_v19 = vcombine.low %v6241_v41, %v6249_v45  ;;  %v14614_v43 = vcombine.high %v6257_v60, %v6265_v0  ;;  %v14613_v57 = vcombine.low %v6257_v60, %v6265_v0 }
0x1787   : > { %9543 = vmatpush1.bf16.msra.mxu0 %v14499_v46  ;;  %v6272_v46 = vld [vmem:[%s18078_s18 + $0x4a0] sm:$0xff] }
0x1788   : > { %9629 = vmatpush1.bf16.msra.mxu1 %v14501_v38  ;;  %9544 = vmatprep.subr.bf16.mxu0 %v14516_v23  ;;  %v6280_v38 = vld [vmem:[%s18078_s18 + $0x4e0] sm:$0xff]  ;;  %v6273_v23 = vld [vmem:[%s18078_s18 + $0x4a8] sm:$0xff] }
0x1789   : > { %9630 = vmatprep.subr.bf16.mxu1 %v14518_v14  ;;  %v6281_v14 = vld [vmem:[%s18078_s18 + $0x4e8] sm:$0xff]  ;;  %v14628_v15 = vcombine.high %v6272_v46, %v6280_v38  ;;  %v14627_v32 = vcombine.low %v6272_v46, %v6280_v38 }
0x178a   : > { %v14630_v51 = vcombine.high %v6273_v23, %v6281_v14  ;;  %v14629_v42 = vcombine.low %v6273_v23, %v6281_v14 }
0x178b   : > { %9545 = vmatpush1.bf16.msra.mxu0 %v14515_v54  ;;  %v6288_v54 = vld [vmem:[%s18078_s18 + $0x520] sm:$0xff] }
0x178c   : > { %9631 = vmatpush1.bf16.msra.mxu1 %v14517_v63  ;;  %9546 = vmatprep.subr.bf16.mxu0 %v14532_v33  ;;  %v6296_v63 = vld [vmem:[%s18078_s18 + $0x560] sm:$0xff]  ;;  %v6289_v33 = vld [vmem:[%s18078_s18 + $0x528] sm:$0xff] }
0x178d   : > { %9632 = vmatprep.subr.bf16.mxu1 %v14534_v28  ;;  %v6297_v28 = vld [vmem:[%s18078_s18 + $0x568] sm:$0xff]  ;;  %v14644_v58 = vcombine.high %v6288_v54, %v6296_v63  ;;  %v14643_v53 = vcombine.low %v6288_v54, %v6296_v63 }
0x178e   : > { %v14646_v21 = vcombine.high %v6289_v33, %v6297_v28  ;;  %v14645_v29 = vcombine.low %v6289_v33, %v6297_v28 }
0x178f   : > { %9547 = vmatpush1.bf16.msra.mxu0 %v14531_v22  ;;  %v6304_v22 = vld [vmem:[%s18078_s18 + $0x5a0] sm:$0xff] }
0x1790   : > { %9633 = vmatpush1.bf16.msra.mxu1 %v14533_v13  ;;  %9548 = vmatprep.subr.bf16.mxu0 %v14548_v4  ;;  %v6312_v13 = vld [vmem:[%s18078_s18 + $0x5e0] sm:$0xff]  ;;  %v6305_v4 = vld [vmem:[%s18078_s18 + $0x5a8] sm:$0xff] }
0x1791   : > { %9634 = vmatprep.subr.bf16.mxu1 %v14550_v62  ;;  %v6313_v62 = vld [vmem:[%s18078_s18 + $0x5e8] sm:$0xff]  ;;  %v14660_v1 = vcombine.high %v6304_v22, %v6312_v13  ;;  %v14659_v35 = vcombine.low %v6304_v22, %v6312_v13 }
0x1792   : > { %v14662_v2 = vcombine.high %v6305_v4, %v6313_v62  ;;  %v14661_v36 = vcombine.low %v6305_v4, %v6313_v62  ;;  %v6409_v22 = vld [vmem:[%s18078_s18 + $0x8e8] sm:$0xff]  ;;  %v6416_v62 = vld [vmem:[%s18078_s18 + $0x920] sm:$0xff] }
0x1793   : > { %9549 = vmatpush1.bf16.msra.mxu0 %v14547_v59  ;;  %v6320_v59 = vld [vmem:[%s18078_s18 + $0x620] sm:$0xff] }
0x1794   : > { %9635 = vmatpush1.bf16.msra.mxu1 %v14549_v24  ;;  %9550 = vmatprep.subr.bf16.mxu0 %v14564_v31  ;;  %v6328_v24 = vld [vmem:[%s18078_s18 + $0x660] sm:$0xff]  ;;  %v6321_v31 = vld [vmem:[%s18078_s18 + $0x628] sm:$0xff] }
0x1795   : > { %9636 = vmatprep.subr.bf16.mxu1 %v14566_v49  ;;  %v6329_v49 = vld [vmem:[%s18078_s18 + $0x668] sm:$0xff]  ;;  %v14676_v5 = vcombine.high %v6320_v59, %v6328_v24  ;;  %v14675_v3 = vcombine.low %v6320_v59, %v6328_v24 }
0x1796   : > { %v14678_v37 = vcombine.high %v6321_v31, %v6329_v49  ;;  %v14677_v6 = vcombine.low %v6321_v31, %v6329_v49 }
0x1797   : > { %9551 = vmatpush1.bf16.msra.mxu0 %v14563_v17  ;;  %v6336_v17 = vld [vmem:[%s18078_s18 + $0x6a0] sm:$0xff] }
0x1798   : > { %9637 = vmatpush1.bf16.msra.mxu1 %v14565_v34  ;;  %9552 = vmatprep.subr.bf16.mxu0 %v14580_v39  ;;  %v6344_v34 = vld [vmem:[%s18078_s18 + $0x6e0] sm:$0xff]  ;;  %v6337_v39 = vld [vmem:[%s18078_s18 + $0x6a8] sm:$0xff] }
0x1799   : > { %9638 = vmatprep.subr.bf16.mxu1 %v14582_v40  ;;  %v6345_v40 = vld [vmem:[%s18078_s18 + $0x6e8] sm:$0xff]  ;;  %v14692_v41 = vcombine.high %v6336_v17, %v6344_v34  ;;  %v14691_v55 = vcombine.low %v6336_v17, %v6344_v34 }
0x179a   : > { %v14694_v45 = vcombine.high %v6337_v39, %v6345_v40  ;;  %v14693_v20 = vcombine.low %v6337_v39, %v6345_v40 }
0x179b   : > { %9553 = vmatpush1.bf16.msra.mxu0 %v14579_v47  ;;  %v6352_v47 = vld [vmem:[%s18078_s18 + $0x720] sm:$0xff] }
0x179c   : > { %9639 = vmatpush1.bf16.msra.mxu1 %v14581_v48  ;;  %9554 = vmatprep.subr.bf16.mxu0 %v14596_v11  ;;  %v6360_v48 = vld [vmem:[%s18078_s18 + $0x760] sm:$0xff]  ;;  %v6353_v11 = vld [vmem:[%s18078_s18 + $0x728] sm:$0xff] }
0x179d   : > { %9640 = vmatprep.subr.bf16.mxu1 %v14598_v52  ;;  %v6361_v52 = vld [vmem:[%s18078_s18 + $0x768] sm:$0xff]  ;;  %v14708_v60 = vcombine.high %v6352_v47, %v6360_v48  ;;  %v14707_v46 = vcombine.low %v6352_v47, %v6360_v48 }
0x179e   : > { %v14710_v0 = vcombine.high %v6353_v11, %v6361_v52  ;;  %v14709_v38 = vcombine.low %v6353_v11, %v6361_v52 }
0x179f   : > { %9555 = vmatpush1.bf16.msra.mxu0 %v14595_v12  ;;  %v6368_v12 = vld [vmem:[%s18078_s18 + $0x7a0] sm:$0xff] }
0x17a0   : > { %9641 = vmatpush1.bf16.msra.mxu1 %v14597_v19  ;;  %9556 = vmatprep.subr.bf16.mxu0 %v14612_v16  ;;  %v6376_v19 = vld [vmem:[%s18078_s18 + $0x7e0] sm:$0xff]  ;;  %v6369_v16 = vld [vmem:[%s18078_s18 + $0x7a8] sm:$0xff] }
0x17a1   : > { %9642 = vmatprep.subr.bf16.mxu1 %v14614_v43  ;;  %v6377_v43 = vld [vmem:[%s18078_s18 + $0x7e8] sm:$0xff]  ;;  %v14724_v23 = vcombine.high %v6368_v12, %v6376_v19  ;;  %v14723_v54 = vcombine.low %v6368_v12, %v6376_v19 }
0x17a2   : > { %v14726_v14 = vcombine.high %v6369_v16, %v6377_v43  ;;  %v14725_v63 = vcombine.low %v6369_v16, %v6377_v43 }
0x17a3   : > { %9557 = vmatpush1.bf16.msra.mxu0 %v14611_v18  ;;  %v6384_v18 = vld [vmem:[%s18078_s18 + $0x820] sm:$0xff] }
0x17a4   : > { %9643 = vmatpush1.bf16.msra.mxu1 %v14613_v57  ;;  %9558 = vmatprep.subr.bf16.mxu0 %v14628_v15  ;;  %v6392_v57 = vld [vmem:[%s18078_s18 + $0x860] sm:$0xff]  ;;  %v6385_v15 = vld [vmem:[%s18078_s18 + $0x828] sm:$0xff] }
0x17a5   : > { %9644 = vmatprep.subr.bf16.mxu1 %v14630_v51  ;;  %v6393_v51 = vld [vmem:[%s18078_s18 + $0x868] sm:$0xff]  ;;  %v14740_v33 = vcombine.high %v6384_v18, %v6392_v57 }
0x17a6   : > { %v14742_v28 = vcombine.high %v6385_v15, %v6393_v51  ;;  %v14741_v13 = vcombine.low %v6385_v15, %v6393_v51 }
0x17a7   : > { %9559 = vmatpush1.bf16.msra.mxu0 %v14627_v32  ;;  %v6400_v32 = vld [vmem:[%s18078_s18 + $0x8a0] sm:$0xff] }
0x17a8   : > { %9645 = vmatpush1.bf16.msra.mxu1 %v14629_v42  ;;  %9560 = vmatprep.subr.bf16.mxu0 %v14644_v58  ;;  %v6408_v42 = vld [vmem:[%s18078_s18 + $0x8e0] sm:$0xff]  ;;  %v14739_v58 = vcombine.low %v6384_v18, %v6392_v57 }
0x17a9   : > { %9646 = vmatprep.subr.bf16.mxu1 %v14646_v21  ;;  %v6401_v21 = vld [vmem:[%s18078_s18 + $0x8a8] sm:$0xff]  ;;  %v14756_v4 = vcombine.high %v6400_v32, %v6408_v42  ;;  %v14755_v59 = vcombine.low %v6400_v32, %v6408_v42  ;;  %v6496_v57 = vld [vmem:[%s18078_s18 + $0xba0] sm:$0xff] }
0x17aa   : > { %v14757_v24 = vcombine.low %v6401_v21, %v6409_v22 }
0x17ab   : > { %9561 = vmatpush1.bf16.msra.mxu0 %v14643_v53  ;;  %v6424_v53 = vld [vmem:[%s18078_s18 + $0x960] sm:$0xff] }
0x17ac   : > { %9647 = vmatpush1.bf16.msra.mxu1 %v14645_v29  ;;  %9562 = vmatprep.subr.bf16.mxu0 %v14660_v1  ;;  %v14758_v29 = vcombine.high %v6401_v21, %v6409_v22  ;;  %v6417_v1 = vld [vmem:[%s18078_s18 + $0x928] sm:$0xff]  ;;  %v14772_v31 = vcombine.high %v6416_v62, %v6424_v53  ;;  %v14771_v17 = vcombine.low %v6416_v62, %v6424_v53 }
0x17ad   : > { %9648 = vmatprep.subr.bf16.mxu1 %v14662_v2  ;;  %v6425_v2 = vld [vmem:[%s18078_s18 + $0x968] sm:$0xff] }
0x17ae   : > { %v14774_v49 = vcombine.high %v6417_v1, %v6425_v2  ;;  %v14773_v34 = vcombine.low %v6417_v1, %v6425_v2 }
0x17af   : > { %9563 = vmatpush1.bf16.msra.mxu0 %v14659_v35  ;;  %v6432_v35 = vld [vmem:[%s18078_s18 + $0x9a0] sm:$0xff] }
0x17b0   : > { %9649 = vmatpush1.bf16.msra.mxu1 %v14661_v36  ;;  %9564 = vmatprep.subr.bf16.mxu0 %v14676_v5  ;;  %v6440_v36 = vld [vmem:[%s18078_s18 + $0x9e0] sm:$0xff]  ;;  %v6433_v5 = vld [vmem:[%s18078_s18 + $0x9a8] sm:$0xff] }
0x17b1   : > { %9650 = vmatprep.subr.bf16.mxu1 %v14678_v37  ;;  %v6441_v37 = vld [vmem:[%s18078_s18 + $0x9e8] sm:$0xff]  ;;  %v14788_v39 = vcombine.high %v6432_v35, %v6440_v36  ;;  %v14787_v47 = vcombine.low %v6432_v35, %v6440_v36 }
0x17b2   : > { %v14790_v40 = vcombine.high %v6433_v5, %v6441_v37  ;;  %v14789_v48 = vcombine.low %v6433_v5, %v6441_v37 }
0x17b3   : > { %9565 = vmatpush1.bf16.msra.mxu0 %v14675_v3  ;;  %v6448_v3 = vld [vmem:[%s18078_s18 + $0xa20] sm:$0xff] }
0x17b4   : > { %9651 = vmatpush1.bf16.msra.mxu1 %v14677_v6  ;;  %9566 = vmatprep.subr.bf16.mxu0 %v14692_v41  ;;  %v6456_v6 = vld [vmem:[%s18078_s18 + $0xa60] sm:$0xff]  ;;  %v6449_v41 = vld [vmem:[%s18078_s18 + $0xa28] sm:$0xff] }
0x17b5   : > { %9652 = vmatprep.subr.bf16.mxu1 %v14694_v45  ;;  %v6457_v45 = vld [vmem:[%s18078_s18 + $0xa68] sm:$0xff]  ;;  %v14804_v11 = vcombine.high %v6448_v3, %v6456_v6  ;;  %v14803_v12 = vcombine.low %v6448_v3, %v6456_v6 }
0x17b6   : > { %v14806_v52 = vcombine.high %v6449_v41, %v6457_v45  ;;  %v14805_v19 = vcombine.low %v6449_v41, %v6457_v45  ;;  %v6513_v3 = vld [vmem:[%s18078_s18 + $0xc28] sm:$0xff] }
0x17b7   : > { %9567 = vmatpush1.bf16.msra.mxu0 %v14691_v55  ;;  %v6464_v55 = vld [vmem:[%s18078_s18 + $0xaa0] sm:$0xff]  ;;  %v6521_v6 = vld [vmem:[%s18078_s18 + $0xc68] sm:$0xff] }
0x17b8   : > { %9653 = vmatpush1.bf16.msra.mxu1 %v14693_v20  ;;  %9568 = vmatprep.subr.bf16.mxu0 %v14708_v60  ;;  %v6472_v20 = vld [vmem:[%s18078_s18 + $0xae0] sm:$0xff]  ;;  %v6465_v60 = vld [vmem:[%s18078_s18 + $0xaa8] sm:$0xff] }
0x17b9   : > { %9654 = vmatprep.subr.bf16.mxu1 %v14710_v0  ;;  %v6473_v0 = vld [vmem:[%s18078_s18 + $0xae8] sm:$0xff]  ;;  %v14820_v16 = vcombine.high %v6464_v55, %v6472_v20  ;;  %v14819_v18 = vcombine.low %v6464_v55, %v6472_v20  ;;  %v6528_v55 = vld [vmem:[%s18078_s18 + $0xca0] sm:$0xff] }
0x17ba   : > { %v14822_v43 = vcombine.high %v6465_v60, %v6473_v0  ;;  %v14821_v15 = vcombine.low %v6465_v60, %v6473_v0  ;;  %v6536_v20 = vld [vmem:[%s18078_s18 + $0xce0] sm:$0xff]  ;;  %v6529_v60 = vld [vmem:[%s18078_s18 + $0xca8] sm:$0xff] }
0x17bb   : > { %9569 = vmatpush1.bf16.msra.mxu0 %v14707_v46  ;;  %v6480_v46 = vld [vmem:[%s18078_s18 + $0xb20] sm:$0xff]  ;;  %v6537_v0 = vld [vmem:[%s18078_s18 + $0xce8] sm:$0xff] }
0x17bc   : > { %9655 = vmatpush1.bf16.msra.mxu1 %v14709_v38  ;;  %9570 = vmatprep.subr.bf16.mxu0 %v14724_v23  ;;  %v6488_v38 = vld [vmem:[%s18078_s18 + $0xb60] sm:$0xff]  ;;  %v6481_v23 = vld [vmem:[%s18078_s18 + $0xb28] sm:$0xff] }
0x17bd   : > { %9656 = vmatprep.subr.bf16.mxu1 %v14726_v14  ;;  %v6489_v14 = vld [vmem:[%s18078_s18 + $0xb68] sm:$0xff]  ;;  %v14836_v51 = vcombine.high %v6480_v46, %v6488_v38 }
0x17be   : > { %v14838_v42 = vcombine.high %v6481_v23, %v6489_v14  ;;  %v14837_v62 = vcombine.low %v6481_v23, %v6489_v14  ;;  %v6545_v23 = vld [vmem:[%s18078_s18 + $0xd28] sm:$0xff] }
0x17bf   : > { %9571 = vmatpush1.bf16.msra.mxu0 %v14723_v54  ;;  %v6504_v54 = vld [vmem:[%s18078_s18 + $0xbe0] sm:$0xff]  ;;  %v6553_v14 = vld [vmem:[%s18078_s18 + $0xd68] sm:$0xff] }
0x17c0   : > { %9657 = vmatpush1.bf16.msra.mxu1 %v14725_v63  ;;  %9583 = vmatprep.subr.bf16.mxu0 %v14740_v33  ;;  %v6497_v63 = vld [vmem:[%s18078_s18 + $0xba8] sm:$0xff]  ;;  %v14852_v53 = vcombine.high %v6496_v57, %v6504_v54 }
0x17c1   : > { %9669 = vmatprep.subr.bf16.mxu1 %v14742_v28  ;;  %v6505_v33 = vld [vmem:[%s18078_s18 + $0xbe8] sm:$0xff] }
0x17c2   : > { %9573 = vmatmul.mubr.bf16.vlgmr.msra.gmra.mrb[88].mxu0 %v19315_v8 }
0x17c3   : > { %9659 = vmatmul.mubr.bf16.vlgmr.msra.gmra.mrb[88].mxu1 %v19315_v8  ;;  %9584 = vmatpush1.bf16.msra.mxu0 %v14739_v58 }
0x17c4   : > { %9615 = vmatprep.mubr.bf16.mxu0 %v19331_v61  ;;  %9670 = vmatpush1.bf16.msra.mxu1 %v14741_v13 }
0x17c5   : > { %9701 = vmatprep.mubr.bf16.mxu1 %v19331_v61  ;;  %9585 = vmatprep.subr.bf16.mxu0 %v14756_v4  ;;  %v14835_v4 = vcombine.low %v6480_v46, %v6488_v38  ;;  %v6544_v46 = vld [vmem:[%s18078_s18 + $0xd20] sm:$0xff] }
0x17c6   : > { %9671 = vmatprep.subr.bf16.mxu1 %v14758_v29  ;;  %v14854_v29 = vcombine.high %v6497_v63, %v6505_v33  ;;  %v6552_v38 = vld [vmem:[%s18078_s18 + $0xd60] sm:$0xff] }
0x17c7   : > { %9586 = vmatpush1.bf16.msra.mxu0 %v14755_v59 }
0x17c8   : > { %9672 = vmatpush1.bf16.msra.mxu1 %v14757_v24  ;;  %9587 = vmatprep.subr.bf16.mxu0 %v14772_v31 }
0x17c9   : > { %9673 = vmatprep.subr.bf16.mxu1 %v14774_v49 }
0x17cb   : > { %9588 = vmatpush1.bf16.msra.mxu0 %v14771_v17  ;;  %v6512_v17 = vld [vmem:[%s18078_s18 + $0xc20] sm:$0xff] }
0x17cc   : > { %9674 = vmatpush1.bf16.msra.mxu1 %v14773_v34  ;;  %9589 = vmatprep.subr.bf16.mxu0 %v14788_v39  ;;  %v6520_v34 = vld [vmem:[%s18078_s18 + $0xc60] sm:$0xff] }
0x17cd   : > { %9675 = vmatprep.subr.bf16.mxu1 %v14790_v40 }
0x17cf   : > { %9590 = vmatpush1.bf16.msra.mxu0 %v14787_v47  ;;  %v14851_v47 = vcombine.low %v6496_v57, %v6504_v54  ;;  %v14885_v57 = vcombine.low %v6529_v60, %v6537_v0  ;;  %v6560_v54 = vld [vmem:[%s18078_s18 + $0xda0] sm:$0xff] }
0x17d0   : > { %9676 = vmatpush1.bf16.msra.mxu1 %v14789_v48  ;;  %9591 = vmatprep.subr.bf16.mxu0 %v14804_v11  ;;  %v14853_v48 = vcombine.low %v6497_v63, %v6505_v33  ;;  %v14868_v11 = vcombine.high %v6512_v17, %v6520_v34  ;;  %v6568_v63 = vld [vmem:[%s18078_s18 + $0xde0] sm:$0xff]  ;;  %v6561_v33 = vld [vmem:[%s18078_s18 + $0xda8] sm:$0xff] }
0x17d1   : > { %9677 = vmatprep.subr.bf16.mxu1 %v14806_v52  ;;  %v14870_v52 = vcombine.high %v6513_v3, %v6521_v6 }
0x17d3   : > { %9592 = vmatpush1.bf16.msra.mxu0 %v14803_v12  ;;  %v14867_v12 = vcombine.low %v6512_v17, %v6520_v34  ;;  %v6608_v17 = vld [vmem:[%s18078_s18 + $0xf20] sm:$0xff] }
0x17d4   : > { %9678 = vmatpush1.bf16.msra.mxu1 %v14805_v19  ;;  %9593 = vmatprep.subr.bf16.mxu0 %v14820_v16  ;;  %v14869_v19 = vcombine.low %v6513_v3, %v6521_v6  ;;  %v14884_v16 = vcombine.high %v6528_v55, %v6536_v20  ;;  %v6616_v34 = vld [vmem:[%s18078_s18 + $0xf60] sm:$0xff]  ;;  %v6609_v3 = vld [vmem:[%s18078_s18 + $0xf28] sm:$0xff] }
0x17d5   : > { %v9273_v28 = vpop.f32.mrb[80].mxu0  ;;  %v9359_v32 = vpop.f32.mrb[80].mxu1  ;;  %9679 = vmatprep.subr.bf16.mxu1 %v14822_v43  ;;  %v14886_v43 = vcombine.high %v6529_v60, %v6537_v0  ;;  %v6617_v6 = vld [vmem:[%s18078_s18 + $0xf68] sm:$0xff] }
0x17d6   : > { %v9275_v58 = vpop.f32.mrb[81].mxu0  ;;  %v9361_v21 = vpop.f32.mrb[81].mxu1  ;;  %v9884_v1 = vmax.f32 %v9273_v28, 0.0  ;;  %v9886_v2 = vmax.f32 %v9359_v32, 0.0  ;;  %v6569_v28 = vld [vmem:[%s18078_s18 + $0xde8] sm:$0xff]  ;;  %v14899_v32 = vcombine.low %v6544_v46, %v6552_v38 }
0x17d7   : > { %v9277_v22 = vpop.f32.mrb[82].mxu0  ;;  %v9363_v13 = vpop.f32.mrb[82].mxu1  ;;  %9594 = vmatpush1.bf16.msra.mxu0 %v14819_v18  ;;  %v9885_v35 = vmax.f32 %v9275_v58, 0.0  ;;  %v9887_v36 = vmax.f32 %v9361_v21, 0.0  ;;  %v14883_v18 = vcombine.low %v6528_v55, %v6536_v20  ;;  %v14916_v58 = vcombine.high %v6560_v54, %v6568_v63  ;;  %v6624_v55 = vld [vmem:[%s18078_s18 + $0xfa0] sm:$0xff]  ;;  %v6625_v60 = vld [vmem:[%s18078_s18 + $0xfa8] sm:$0xff] }
0x17d8   : > { %v9900_v59 = vmax.f32 %v9277_v22, 0.0  ;;  %v9902_v24 = vmax.f32 %v9363_v13, 0.0  ;;  %9680 = vmatpush1.bf16.msra.mxu1 %v14821_v15  ;;  %v9279_v31 = vpop.f32.mrb[83].mxu0  ;;  %v9365_v49 = vpop.f32.mrb[83].mxu1  ;;  %9595 = vmatprep.subr.bf16.mxu0 %v14836_v51  ;;  %v14900_v15 = vcombine.high %v6544_v46, %v6552_v38  ;;  %v14902_v51 = vcombine.high %v6545_v23, %v6553_v14  ;;  %v6576_v22 = vld [vmem:[%s18078_s18 + $0xe20] sm:$0xff]  ;;  %v6633_v0 = vld [vmem:[%s18078_s18 + $0xfe8] sm:$0xff] }
0x17d9   : > { %v9901_v5 = vmax.f32 %v9279_v31, 0.0  ;;  %v9903_v37 = vmax.f32 %v9365_v49, 0.0  ;;  %9681 = vmatprep.subr.bf16.mxu1 %v14838_v42  ;;  %v14901_v42 = vcombine.low %v6545_v23, %v6553_v14  ;;  %v14918_v21 = vcombine.high %v6561_v33, %v6569_v28  ;;  %v6584_v13 = vld [vmem:[%s18078_s18 + $0xe60] sm:$0xff]  ;;  %v6593_v31 = vld [vmem:[%s18078_s18 + $0xea8] sm:$0xff]  ;;  %v6130_v46 = vld [vmem:[%s18078_s18 + $0x30] sm:$0xff] }
0x17da   : > { %v19641_v39 = vpack.c.bf16 %v9900_v59, %v9884_v1  ;;  %v19643_v40 = vpack.c.bf16 %v9902_v24, %v9886_v2  ;;  %v14932_v1 = vcombine.high %v6576_v22, %v6584_v13  ;;  %v6592_v59 = vld [vmem:[%s18078_s18 + $0xea0] sm:$0xff]  ;;  %v6601_v49 = vld [vmem:[%s18078_s18 + $0xee8] sm:$0xff]  ;;  %v6138_v38 = vld [vmem:[%s18078_s18 + $0x70] sm:$0xff] }
0x17db   : > { %v19647_v41 = vpack.c.bf16 %v9901_v5, %v9885_v35  ;;  %v19649_v45 = vpack.c.bf16 %v9903_v37, %v9887_v36  ;;  %9596 = vmatpush1.bf16.msra.mxu0 %v14835_v4  ;;  %v6577_v4 = vld [vmem:[%s18078_s18 + $0xe28] sm:$0xff]  ;;  %v6600_v24 = vld [vmem:[%s18078_s18 + $0xee0] sm:$0xff]  ;;  %v14931_v35 = vcombine.low %v6576_v22, %v6584_v13  ;;  %v14950_v37 = vcombine.high %v6593_v31, %v6601_v49  ;;  %v6131_v23 = vld [vmem:[%s18078_s18 + $0x38] sm:$0xff] }
0x17dc   : > { %9682 = vmatpush1.bf16.msra.mxu1 %v14837_v62  ;;  %9597 = vmatprep.subr.bf16.mxu0 %v14852_v53  ;;  %v6585_v62 = vld [vmem:[%s18078_s18 + $0xe68] sm:$0xff]  ;;  %v14915_v53 = vcombine.low %v6560_v54, %v6568_v63  ;;  %v14948_v5 = vcombine.high %v6592_v59, %v6600_v24  ;;  %v6632_v20 = vld [vmem:[%s18078_s18 + $0xfe0] sm:$0xff]  ;;  %v6139_v14 = vld [vmem:[%s18078_s18 + $0x78] sm:$0xff] }
0x17dd   : > { %9683 = vmatprep.subr.bf16.mxu1 %v14854_v29  ;;  %v14917_v29 = vcombine.low %v6561_v33, %v6569_v28  ;;  %v14934_v2 = vcombine.high %v6577_v4, %v6585_v62  ;;  %v14933_v36 = vcombine.low %v6577_v4, %v6585_v62  ;;  %v6146_v54 = vld [vmem:[%s18078_s18 + $0xb0] sm:$0xff]  ;;  %v14487_v33 = vcombine.low %v6130_v46, %v6138_v38  ;;  %v6147_v28 = vld [vmem:[%s18078_s18 + $0xb8] sm:$0xff] }
0x17de   : > { %v6154_v63 = vld [vmem:[%s18078_s18 + $0xf0] sm:$0xff]  ;;  %v6163_v4 = vld [vmem:[%s18078_s18 + $0x138] sm:$0xff] }
0x17df   : > { %9598 = vmatpush1.bf16.msra.mxu0 %v14851_v47  ;;  %v14947_v47 = vcombine.low %v6592_v59, %v6600_v24  ;;  %v6170_v22 = vld [vmem:[%s18078_s18 + $0x170] sm:$0xff]  ;;  %v6171_v62 = vld [vmem:[%s18078_s18 + $0x178] sm:$0xff] }
0x17e0   : > { %9684 = vmatpush1.bf16.msra.mxu1 %v14853_v48  ;;  %9599 = vmatprep.subr.bf16.mxu0 %v14868_v11  ;;  %v14949_v48 = vcombine.low %v6593_v31, %v6601_v49  ;;  %v14964_v11 = vcombine.high %v6608_v17, %v6616_v34  ;;  %v6178_v59 = vld [vmem:[%s18078_s18 + $0x1b0] sm:$0xff]  ;;  %v6179_v31 = vld [vmem:[%s18078_s18 + $0x1b8] sm:$0xff] }
0x17e1   : > { %9685 = vmatprep.subr.bf16.mxu1 %v14870_v52  ;;  %v14966_v52 = vcombine.high %v6609_v3, %v6617_v6  ;;  %v6186_v24 = vld [vmem:[%s18078_s18 + $0x1f0] sm:$0xff]  ;;  %v6187_v49 = vld [vmem:[%s18078_s18 + $0x1f8] sm:$0xff] }
0x17e3   : > { %9600 = vmatpush1.bf16.msra.mxu0 %v14867_v12  ;;  %v14963_v12 = vcombine.low %v6608_v17, %v6616_v34  ;;  %v6202_v17 = vld [vmem:[%s18078_s18 + $0x270] sm:$0xff]  ;;  %v6195_v34 = vld [vmem:[%s18078_s18 + $0x238] sm:$0xff] }
0x17e4   : > { %9686 = vmatpush1.bf16.msra.mxu1 %v14869_v19  ;;  %9601 = vmatprep.subr.bf16.mxu0 %v14884_v16  ;;  %v14965_v19 = vcombine.low %v6609_v3, %v6617_v6  ;;  %v14980_v16 = vcombine.high %v6624_v55, %v6632_v20  ;;  %v6203_v3 = vld [vmem:[%s18078_s18 + $0x278] sm:$0xff]  ;;  %v14535_v6 = vcombine.low %v6178_v59, %v6186_v24 }
0x17e5   : > { %9687 = vmatprep.subr.bf16.mxu1 %v14886_v43  ;;  %v14982_v43 = vcombine.high %v6625_v60, %v6633_v0 }
0x17e7   : > { %9602 = vmatpush1.bf16.msra.mxu0 %v14883_v18  ;;  %v14979_v18 = vcombine.low %v6624_v55, %v6632_v20  ;;  %v6218_v55 = vld [vmem:[%s18078_s18 + $0x2f0] sm:$0xff]  ;;  %v6211_v20 = vld [vmem:[%s18078_s18 + $0x2b8] sm:$0xff] }
0x17e8   : > { %9688 = vmatpush1.bf16.msra.mxu1 %v14885_v57  ;;  %9603 = vmatprep.subr.bf16.mxu0 %v14900_v15  ;;  %v14981_v57 = vcombine.low %v6625_v60, %v6633_v0  ;;  %v14488_v15 = vcombine.high %v6130_v46, %v6138_v38  ;;  %v6219_v60 = vld [vmem:[%s18078_s18 + $0x2f8] sm:$0xff]  ;;  %v6234_v46 = vld [vmem:[%s18078_s18 + $0x370] sm:$0xff] }
0x17e9   : > { %9689 = vmatprep.subr.bf16.mxu1 %v14902_v51  ;;  %v14490_v51 = vcombine.high %v6131_v23, %v6139_v14  ;;  %v6227_v38 = vld [vmem:[%s18078_s18 + $0x338] sm:$0xff] }
0x17eb   : > { %9604 = vmatpush1.bf16.msra.mxu0 %v14899_v32  ;;  %v6155_v32 = vld [vmem:[%s18078_s18 + $0xf8] sm:$0xff] }
0x17ec   : > { %9690 = vmatpush1.bf16.msra.mxu1 %v14901_v42  ;;  %9605 = vmatprep.subr.bf16.mxu0 %v14916_v58  ;;  %v14489_v42 = vcombine.low %v6131_v23, %v6139_v14  ;;  %v14504_v58 = vcombine.high %v6146_v54, %v6154_v63  ;;  %v14506_v13 = vcombine.high %v6147_v28, %v6155_v32  ;;  %v6235_v23 = vld [vmem:[%s18078_s18 + $0x378] sm:$0xff] }
0x17ed   : > { %9691 = vmatprep.subr.bf16.mxu1 %v14918_v21  ;;  %v6162_v21 = vld [vmem:[%s18078_s18 + $0x130] sm:$0xff] }
0x17ef   : > { %9606 = vmatpush1.bf16.msra.mxu0 %v14915_v53  ;;  %v14503_v53 = vcombine.low %v6146_v54, %v6154_v63  ;;  %v6250_v54 = vld [vmem:[%s18078_s18 + $0x3f0] sm:$0xff]  ;;  %v6243_v63 = vld [vmem:[%s18078_s18 + $0x3b8] sm:$0xff] }
0x17f0   : > { %9692 = vmatpush1.bf16.msra.mxu1 %v14917_v29  ;;  %9607 = vmatprep.subr.bf16.mxu0 %v14932_v1  ;;  %v14505_v29 = vcombine.low %v6147_v28, %v6155_v32  ;;  %v14520_v1 = vcombine.high %v6162_v21, %v6170_v22  ;;  %v14585_v32 = vcombine.low %v6227_v38, %v6235_v23 }
0x17f1   : > { %9693 = vmatprep.subr.bf16.mxu1 %v14934_v2  ;;  %v14522_v2 = vcombine.high %v6163_v4, %v6171_v62 }
0x17f3   : > { %9608 = vmatpush1.bf16.msra.mxu0 %v14931_v35  ;;  %v14519_v35 = vcombine.low %v6162_v21, %v6170_v22  ;;  %v6258_v21 = vld [vmem:[%s18078_s18 + $0x430] sm:$0xff] }
0x17f4   : > { %9694 = vmatpush1.bf16.msra.mxu1 %v14933_v36  ;;  %9609 = vmatprep.subr.bf16.mxu0 %v14948_v5  ;;  %v14521_v36 = vcombine.low %v6163_v4, %v6171_v62  ;;  %v14536_v5 = vcombine.high %v6178_v59, %v6186_v24  ;;  %v6266_v22 = vld [vmem:[%s18078_s18 + $0x470] sm:$0xff]  ;;  %v6267_v4 = vld [vmem:[%s18078_s18 + $0x478] sm:$0xff] }
0x17f5   : > { %9695 = vmatprep.subr.bf16.mxu1 %v14950_v37  ;;  %v6194_v37 = vld [vmem:[%s18078_s18 + $0x230] sm:$0xff]  ;;  %v6275_v24 = vld [vmem:[%s18078_s18 + $0x4b8] sm:$0xff] }
0x17f6   : > { %v14551_v0 = vcombine.low %v6194_v37, %v6202_v17  ;;  %v6282_v59 = vld [vmem:[%s18078_s18 + $0x4f0] sm:$0xff] }
0x17f7   : > { %9610 = vmatpush1.bf16.msra.mxu0 %v14947_v47  ;;  %v14537_v47 = vcombine.low %v6179_v31, %v6187_v49 }
0x17f8   : > { %9696 = vmatpush1.bf16.msra.mxu1 %v14949_v48  ;;  %9611 = vmatprep.subr.bf16.mxu0 %v14964_v11  ;;  %v14552_v48 = vcombine.high %v6194_v37, %v6202_v17  ;;  %v14554_v11 = vcombine.high %v6195_v34, %v6203_v3  ;;  %v6298_v37 = vld [vmem:[%s18078_s18 + $0x570] sm:$0xff]  ;;  %v6291_v17 = vld [vmem:[%s18078_s18 + $0x538] sm:$0xff] }
0x17f9   : > { %9697 = vmatprep.subr.bf16.mxu1 %v14966_v52  ;;  %v6210_v52 = vld [vmem:[%s18078_s18 + $0x2b0] sm:$0xff] }
0x17fa   : > { %v14567_v14 = vcombine.low %v6210_v52, %v6218_v55 }
0x17fb   : > { %9612 = vmatpush1.bf16.msra.mxu0 %v14963_v12  ;;  %v14553_v12 = vcombine.low %v6195_v34, %v6203_v3  ;;  %v6299_v34 = vld [vmem:[%s18078_s18 + $0x578] sm:$0xff] }
0x17fc   : > { %9698 = vmatpush1.bf16.msra.mxu1 %v14965_v19  ;;  %9613 = vmatprep.subr.bf16.mxu0 %v14980_v16  ;;  %v14568_v19 = vcombine.high %v6210_v52, %v6218_v55  ;;  %v14570_v16 = vcombine.high %v6211_v20, %v6219_v60  ;;  %v6314_v52 = vld [vmem:[%s18078_s18 + $0x5f0] sm:$0xff]  ;;  %v6307_v55 = vld [vmem:[%s18078_s18 + $0x5b8] sm:$0xff] }
0x17fd   : > { %9699 = vmatprep.subr.bf16.mxu1 %v14982_v43  ;;  %v6226_v43 = vld [vmem:[%s18078_s18 + $0x330] sm:$0xff] }
0x17fe   : > { %v14583_v28 = vcombine.low %v6226_v43, %v6234_v46 }
0x17ff   : > { %9614 = vmatpush1.bf16.msra.mxu0 %v14979_v18  ;;  %v14569_v18 = vcombine.low %v6211_v20, %v6219_v60  ;;  %v6315_v20 = vld [vmem:[%s18078_s18 + $0x5f8] sm:$0xff] }
0x1800   : > { %9700 = vmatpush1.bf16.msra.mxu1 %v14981_v57  ;;  %9712 = vmatprep.subr.bf16.mxu0 %v14488_v15  ;;  %v14584_v57 = vcombine.high %v6226_v43, %v6234_v46  ;;  %v14586_v15 = vcombine.high %v6227_v38, %v6235_v23  ;;  %v6330_v43 = vld [vmem:[%s18078_s18 + $0x670] sm:$0xff]  ;;  %v6323_v46 = vld [vmem:[%s18078_s18 + $0x638] sm:$0xff] }
0x1801   : > { %9798 = vmatprep.subr.bf16.mxu1 %v14490_v51  ;;  %v6242_v51 = vld [vmem:[%s18078_s18 + $0x3b0] sm:$0xff]  ;;  %v6331_v38 = vld [vmem:[%s18078_s18 + $0x678] sm:$0xff] }
0x1802   : > { %9616 = vmatmul.mubr.bf16.vlgmr.msra.gmra.mrb[88].mxu0 %v19405_v44  ;;  %v14599_v62 = vcombine.low %v6242_v51, %v6250_v54 }
0x1803   : > { %9702 = vmatmul.mubr.bf16.vlgmr.msra.gmra.mrb[88].mxu1 %v19405_v44  ;;  %9713 = vmatpush1.bf16.msra.mxu0 %v14487_v33  ;;  %v6251_v33 = vld [vmem:[%s18078_s18 + $0x3f8] sm:$0xff] }
0x1804   : > { %9744 = vmatprep.mubr.bf16.mxu0 %v19311_v7  ;;  %9799 = vmatpush1.bf16.msra.mxu1 %v14489_v42  ;;  %v14600_v42 = vcombine.high %v6242_v51, %v6250_v54  ;;  %v6346_v51 = vld [vmem:[%s18078_s18 + $0x6f0] sm:$0xff]  ;;  %v6339_v54 = vld [vmem:[%s18078_s18 + $0x6b8] sm:$0xff] }
0x1805   : > { %9830 = vmatprep.mubr.bf16.mxu1 %v19311_v7  ;;  %9714 = vmatprep.subr.bf16.mxu0 %v14504_v58  ;;  %v14538_v7 = vcombine.high %v6179_v31, %v6187_v49  ;;  %v14602_v58 = vcombine.high %v6243_v63, %v6251_v33  ;;  %v6283_v31 = vld [vmem:[%s18078_s18 + $0x4f8] sm:$0xff]  ;;  %v14615_v49 = vcombine.low %v6258_v21, %v6266_v22 }
0x1806   : > { %9800 = vmatprep.subr.bf16.mxu1 %v14506_v13  ;;  %v6259_v13 = vld [vmem:[%s18078_s18 + $0x438] sm:$0xff] }
0x1807   : > { %9715 = vmatpush1.bf16.msra.mxu0 %v14503_v53  ;;  %v14601_v53 = vcombine.low %v6243_v63, %v6251_v33  ;;  %v6347_v63 = vld [vmem:[%s18078_s18 + $0x6f8] sm:$0xff] }
0x1808   : > { %9801 = vmatpush1.bf16.msra.mxu1 %v14505_v29  ;;  %9716 = vmatprep.subr.bf16.mxu0 %v14520_v1  ;;  %v14616_v29 = vcombine.high %v6258_v21, %v6266_v22  ;;  %v14618_v1 = vcombine.high %v6259_v13, %v6267_v4  ;;  %v6362_v21 = vld [vmem:[%s18078_s18 + $0x770] sm:$0xff]  ;;  %v6355_v22 = vld [vmem:[%s18078_s18 + $0x738] sm:$0xff] }
0x1809   : > { %9802 = vmatprep.subr.bf16.mxu1 %v14522_v2  ;;  %v6274_v2 = vld [vmem:[%s18078_s18 + $0x4b0] sm:$0xff] }
0x180a   : > { %v14631_v3 = vcombine.low %v6274_v2, %v6282_v59 }
0x180b   : > { %9717 = vmatpush1.bf16.msra.mxu0 %v14519_v35  ;;  %v14617_v35 = vcombine.low %v6259_v13, %v6267_v4  ;;  %v6363_v13 = vld [vmem:[%s18078_s18 + $0x778] sm:$0xff] }
0x180c   : > { %9803 = vmatpush1.bf16.msra.mxu1 %v14521_v36  ;;  %9718 = vmatprep.subr.bf16.mxu0 %v14536_v5  ;;  %v14632_v36 = vcombine.high %v6274_v2, %v6282_v59  ;;  %v14634_v5 = vcombine.high %v6275_v24, %v6283_v31  ;;  %v6378_v2 = vld [vmem:[%s18078_s18 + $0x7f0] sm:$0xff]  ;;  %v6371_v59 = vld [vmem:[%s18078_s18 + $0x7b8] sm:$0xff] }
0x180d   : > { %9804 = vmatprep.subr.bf16.mxu1 %v14538_v7  ;;  %v6290_v7 = vld [vmem:[%s18078_s18 + $0x530] sm:$0xff] }
0x180e   : > { %v14647_v60 = vcombine.low %v6290_v7, %v6298_v37 }
0x180f   : > { %9719 = vmatpush1.bf16.msra.mxu0 %v14535_v6  ;;  %v14633_v6 = vcombine.low %v6275_v24, %v6283_v31  ;;  %v6379_v24 = vld [vmem:[%s18078_s18 + $0x7f8] sm:$0xff] }
0x1810   : > { %9805 = vmatpush1.bf16.msra.mxu1 %v14537_v47  ;;  %9720 = vmatprep.subr.bf16.mxu0 %v14552_v48  ;;  %v14648_v47 = vcombine.high %v6290_v7, %v6298_v37  ;;  %v14650_v48 = vcombine.high %v6291_v17, %v6299_v34  ;;  %v6394_v7 = vld [vmem:[%s18078_s18 + $0x870] sm:$0xff]  ;;  %v6387_v37 = vld [vmem:[%s18078_s18 + $0x838] sm:$0xff] }
0x1811   : > { %9806 = vmatprep.subr.bf16.mxu1 %v14554_v11  ;;  %v6306_v11 = vld [vmem:[%s18078_s18 + $0x5b0] sm:$0xff] }
0x1812   : > { %v14663_v23 = vcombine.low %v6306_v11, %v6314_v52 }
0x1813   : > { %9721 = vmatpush1.bf16.msra.mxu0 %v14551_v0  ;;  %v14649_v0 = vcombine.low %v6291_v17, %v6299_v34  ;;  %v6395_v17 = vld [vmem:[%s18078_s18 + $0x878] sm:$0xff] }
0x1814   : > { %9807 = vmatpush1.bf16.msra.mxu1 %v14553_v12  ;;  %9722 = vmatprep.subr.bf16.mxu0 %v14568_v19  ;;  %v14664_v12 = vcombine.high %v6306_v11, %v6314_v52  ;;  %v14666_v19 = vcombine.high %v6307_v55, %v6315_v20  ;;  %v6410_v11 = vld [vmem:[%s18078_s18 + $0x8f0] sm:$0xff] }
0x1815   : > { %9808 = vmatprep.subr.bf16.mxu1 %v14570_v16  ;;  %v6322_v16 = vld [vmem:[%s18078_s18 + $0x630] sm:$0xff] }
0x1816   : > { %v14679_v33 = vcombine.low %v6322_v16, %v6330_v43 }
0x1817   : > { %9723 = vmatpush1.bf16.msra.mxu0 %v14567_v14  ;;  %v14665_v14 = vcombine.low %v6307_v55, %v6315_v20  ;;  %v6403_v55 = vld [vmem:[%s18078_s18 + $0x8b8] sm:$0xff] }
0x1818   : > { %9809 = vmatpush1.bf16.msra.mxu1 %v14569_v18  ;;  %9724 = vmatprep.subr.bf16.mxu0 %v14584_v57  ;;  %v14680_v18 = vcombine.high %v6322_v16, %v6330_v43  ;;  %v14682_v57 = vcombine.high %v6323_v46, %v6331_v38  ;;  %v6411_v20 = vld [vmem:[%s18078_s18 + $0x8f8] sm:$0xff] }
0x1819   : > { %9810 = vmatprep.subr.bf16.mxu1 %v14586_v15  ;;  %v6338_v15 = vld [vmem:[%s18078_s18 + $0x6b0] sm:$0xff]  ;;  %v14762_v16 = vcombine.high %v6403_v55, %v6411_v20  ;;  %v6419_v43 = vld [vmem:[%s18078_s18 + $0x938] sm:$0xff] }
0x181a   : > { %v14695_v4 = vcombine.low %v6338_v15, %v6346_v51 }
0x181b   : > { %9725 = vmatpush1.bf16.msra.mxu0 %v14583_v28  ;;  %v14681_v28 = vcombine.low %v6323_v46, %v6331_v38  ;;  %v6427_v46 = vld [vmem:[%s18078_s18 + $0x978] sm:$0xff] }
0x181c   : > { %9811 = vmatpush1.bf16.msra.mxu1 %v14585_v32  ;;  %9726 = vmatprep.subr.bf16.mxu0 %v14600_v42  ;;  %v14696_v32 = vcombine.high %v6338_v15, %v6346_v51  ;;  %v14698_v42 = vcombine.high %v6339_v54, %v6347_v63  ;;  %v6442_v15 = vld [vmem:[%s18078_s18 + $0x9f0] sm:$0xff]  ;;  %v6435_v51 = vld [vmem:[%s18078_s18 + $0x9b8] sm:$0xff] }
0x181d   : > { %9812 = vmatprep.subr.bf16.mxu1 %v14602_v58  ;;  %v6354_v58 = vld [vmem:[%s18078_s18 + $0x730] sm:$0xff] }
0x181e   : > { %v14711_v31 = vcombine.low %v6354_v58, %v6362_v21 }
0x181f   : > { %9727 = vmatpush1.bf16.msra.mxu0 %v14599_v62  ;;  %v14697_v62 = vcombine.low %v6339_v54, %v6347_v63  ;;  %v14777_v63 = vcombine.low %v6419_v43, %v6427_v46 }
0x1820   : > { %9813 = vmatpush1.bf16.msra.mxu1 %v14601_v53  ;;  %9728 = vmatprep.subr.bf16.mxu0 %v14616_v29  ;;  %v14712_v53 = vcombine.high %v6354_v58, %v6362_v21  ;;  %v14714_v29 = vcombine.high %v6355_v22, %v6363_v13  ;;  %v6459_v58 = vld [vmem:[%s18078_s18 + $0xa78] sm:$0xff] }
0x1821   : > { %9814 = vmatprep.subr.bf16.mxu1 %v14618_v1  ;;  %v6370_v1 = vld [vmem:[%s18078_s18 + $0x7b0] sm:$0xff] }
0x1822   : > { %v14727_v34 = vcombine.low %v6370_v1, %v6378_v2 }
0x1823   : > { %9729 = vmatpush1.bf16.msra.mxu0 %v14615_v49  ;;  %v14713_v49 = vcombine.low %v6355_v22, %v6363_v13 }
0x1824   : > { %9815 = vmatpush1.bf16.msra.mxu1 %v14617_v35  ;;  %9730 = vmatprep.subr.bf16.mxu0 %v14632_v36  ;;  %v14728_v35 = vcombine.high %v6370_v1, %v6378_v2  ;;  %v14730_v36 = vcombine.high %v6371_v59, %v6379_v24  ;;  %v6475_v1 = vld [vmem:[%s18078_s18 + $0xaf8] sm:$0xff] }
0x1825   : > { %9816 = vmatprep.subr.bf16.mxu1 %v14634_v5  ;;  %v6386_v5 = vld [vmem:[%s18078_s18 + $0x830] sm:$0xff] }
0x1826   : > { %v14743_v52 = vcombine.low %v6386_v5, %v6394_v7 }
0x1827   : > { %9731 = vmatpush1.bf16.msra.mxu0 %v14631_v3  ;;  %v14729_v3 = vcombine.low %v6371_v59, %v6379_v24 }
0x1828   : > { %9817 = vmatpush1.bf16.msra.mxu1 %v14633_v6  ;;  %9732 = vmatprep.subr.bf16.mxu0 %v14648_v47  ;;  %v14744_v6 = vcombine.high %v6386_v5, %v6394_v7  ;;  %v14746_v47 = vcombine.high %v6387_v37, %v6395_v17  ;;  %v6491_v5 = vld [vmem:[%s18078_s18 + $0xb78] sm:$0xff] }
0x1829   : > { %9818 = vmatprep.subr.bf16.mxu1 %v14650_v48  ;;  %v6402_v48 = vld [vmem:[%s18078_s18 + $0x8b0] sm:$0xff] }
0x182a   : > { %v14759_v38 = vcombine.low %v6402_v48, %v6410_v11 }
0x182b   : > { %9733 = vmatpush1.bf16.msra.mxu0 %v14647_v60  ;;  %v14745_v60 = vcombine.low %v6387_v37, %v6395_v17 }
0x182c   : > { %9819 = vmatpush1.bf16.msra.mxu1 %v14649_v0  ;;  %9734 = vmatprep.subr.bf16.mxu0 %v14664_v12  ;;  %v14760_v0 = vcombine.high %v6402_v48, %v6410_v11  ;;  %v6418_v12 = vld [vmem:[%s18078_s18 + $0x930] sm:$0xff]  ;;  %v6499_v48 = vld [vmem:[%s18078_s18 + $0xbb8] sm:$0xff] }
0x182d   : > { %9820 = vmatprep.subr.bf16.mxu1 %v14666_v19  ;;  %v6426_v19 = vld [vmem:[%s18078_s18 + $0x970] sm:$0xff]  ;;  %v6507_v11 = vld [vmem:[%s18078_s18 + $0xbf8] sm:$0xff] }
0x182e   : > { %v14775_v54 = vcombine.low %v6418_v12, %v6426_v19 }
0x182f   : > { %9735 = vmatpush1.bf16.msra.mxu0 %v14663_v23  ;;  %v14761_v23 = vcombine.low %v6403_v55, %v6411_v20 }
0x1830   : > { %9821 = vmatpush1.bf16.msra.mxu1 %v14665_v14  ;;  %9736 = vmatprep.subr.bf16.mxu0 %v14680_v18  ;;  %v14776_v14 = vcombine.high %v6418_v12, %v6426_v19  ;;  %v14778_v18 = vcombine.high %v6419_v43, %v6427_v46 }
0x1831   : > { %9822 = vmatprep.subr.bf16.mxu1 %v14682_v57  ;;  %v6434_v57 = vld [vmem:[%s18078_s18 + $0x9b0] sm:$0xff] }
0x1832   : > { %v14791_v21 = vcombine.low %v6434_v57, %v6442_v15 }
0x1833   : > { %9737 = vmatpush1.bf16.msra.mxu0 %v14679_v33  ;;  %v14792_v33 = vcombine.high %v6434_v57, %v6442_v15 }
0x1834   : > { %9823 = vmatpush1.bf16.msra.mxu1 %v14681_v28  ;;  %9738 = vmatprep.subr.bf16.mxu0 %v14696_v32  ;;  %v6450_v28 = vld [vmem:[%s18078_s18 + $0xa30] sm:$0xff] }
0x1835   : > { %9824 = vmatprep.subr.bf16.mxu1 %v14698_v42  ;;  %v6458_v32 = vld [vmem:[%s18078_s18 + $0xa70] sm:$0xff]  ;;  %v6451_v42 = vld [vmem:[%s18078_s18 + $0xa38] sm:$0xff] }
0x1836   : > { %v14808_v13 = vcombine.high %v6450_v28, %v6458_v32  ;;  %v14807_v2 = vcombine.low %v6450_v28, %v6458_v32  ;;  %v14809_v59 = vcombine.low %v6451_v42, %v6459_v58  ;;  %v6515_v28 = vld [vmem:[%s18078_s18 + $0xc38] sm:$0xff] }
0x1837   : > { %9739 = vmatpush1.bf16.msra.mxu0 %v14695_v4  ;;  %v14810_v4 = vcombine.high %v6451_v42, %v6459_v58  ;;  %v6523_v32 = vld [vmem:[%s18078_s18 + $0xc78] sm:$0xff] }
0x1838   : > { %9825 = vmatpush1.bf16.msra.mxu1 %v14697_v62  ;;  %9740 = vmatprep.subr.bf16.mxu0 %v14712_v53  ;;  %v6466_v62 = vld [vmem:[%s18078_s18 + $0xab0] sm:$0xff] }
0x1839   : > { %9826 = vmatprep.subr.bf16.mxu1 %v14714_v29  ;;  %v6474_v53 = vld [vmem:[%s18078_s18 + $0xaf0] sm:$0xff]  ;;  %v6467_v29 = vld [vmem:[%s18078_s18 + $0xab8] sm:$0xff] }
0x183a   : > { %v14824_v24 = vcombine.high %v6466_v62, %v6474_v53  ;;  %v14823_v7 = vcombine.low %v6466_v62, %v6474_v53  ;;  %v14825_v37 = vcombine.low %v6467_v29, %v6475_v1  ;;  %v14874_v62 = vcombine.high %v6515_v28, %v6523_v32  ;;  %v6530_v53 = vld [vmem:[%s18078_s18 + $0xcb0] sm:$0xff] }
0x183b   : > { %9741 = vmatpush1.bf16.msra.mxu0 %v14711_v31  ;;  %v14826_v31 = vcombine.high %v6467_v29, %v6475_v1  ;;  %v6538_v29 = vld [vmem:[%s18078_s18 + $0xcf0] sm:$0xff]  ;;  %v6531_v1 = vld [vmem:[%s18078_s18 + $0xcb8] sm:$0xff] }
0x183c   : > { %9827 = vmatpush1.bf16.msra.mxu1 %v14713_v49  ;;  %9742 = vmatprep.subr.bf16.mxu0 %v14728_v35  ;;  %v6482_v49 = vld [vmem:[%s18078_s18 + $0xb30] sm:$0xff] }
0x183d   : > { %9828 = vmatprep.subr.bf16.mxu1 %v14730_v36  ;;  %v6490_v35 = vld [vmem:[%s18078_s18 + $0xb70] sm:$0xff]  ;;  %v6483_v36 = vld [vmem:[%s18078_s18 + $0xb38] sm:$0xff] }
0x183e   : > { %v14840_v17 = vcombine.high %v6482_v49, %v6490_v35  ;;  %v14841_v12 = vcombine.low %v6483_v36, %v6491_v5 }
0x183f   : > { %9743 = vmatpush1.bf16.msra.mxu0 %v14727_v34  ;;  %v6498_v34 = vld [vmem:[%s18078_s18 + $0xbb0] sm:$0xff] }
0x1840   : > { %9829 = vmatpush1.bf16.msra.mxu1 %v14729_v3  ;;  %9755 = vmatprep.subr.bf16.mxu0 %v14744_v6  ;;  %v14842_v6 = vcombine.high %v6483_v36, %v6491_v5  ;;  %v6554_v36 = vld [vmem:[%s18078_s18 + $0xd70] sm:$0xff]  ;;  %v6547_v5 = vld [vmem:[%s18078_s18 + $0xd38] sm:$0xff] }
0x1841   : > { %9841 = vmatprep.subr.bf16.mxu1 %v14746_v47  ;;  %v6506_v47 = vld [vmem:[%s18078_s18 + $0xbf0] sm:$0xff] }
0x1842   : > { %9745 = vmatmul.mubr.bf16.vlgmr.msra.gmra.mrb[92].mxu0 %v19315_v8 }
0x1843   : > { %9831 = vmatmul.mubr.bf16.vlgmr.msra.gmra.mrb[92].mxu1 %v19315_v8  ;;  %9756 = vmatpush1.bf16.msra.mxu0 %v14743_v52  ;;  %v6443_v8 = vld [vmem:[%s18078_s18 + $0x9f8] sm:$0xff] }
0x1844   : > { %9787 = vmatprep.mubr.bf16.mxu0 %v19331_v61  ;;  %9842 = vmatpush1.bf16.msra.mxu1 %v14745_v60  ;;  %v14793_v22 = vcombine.low %v6435_v51, %v6443_v8 }
0x1845   : > { %9873 = vmatprep.mubr.bf16.mxu1 %v19331_v61  ;;  %9757 = vmatprep.subr.bf16.mxu0 %v14760_v0  ;;  %v14794_v61 = vcombine.high %v6435_v51, %v6443_v8  ;;  %v14839_v0 = vcombine.low %v6482_v49, %v6490_v35  ;;  %v6546_v35 = vld [vmem:[%s18078_s18 + $0xd30] sm:$0xff] }
0x1846   : > { %9843 = vmatprep.subr.bf16.mxu1 %v14762_v16 }
0x1847   : > { %9758 = vmatpush1.bf16.msra.mxu0 %v14759_v38  ;;  %v14856_v38 = vcombine.high %v6498_v34, %v6506_v47 }
0x1848   : > { %9844 = vmatpush1.bf16.msra.mxu1 %v14761_v23  ;;  %9759 = vmatprep.subr.bf16.mxu0 %v14776_v14  ;;  %v14858_v23 = vcombine.high %v6499_v48, %v6507_v11  ;;  %v6514_v14 = vld [vmem:[%s18078_s18 + $0xc30] sm:$0xff] }
0x1849   : > { %9845 = vmatprep.subr.bf16.mxu1 %v14778_v18 }
0x184b   : > { %9760 = vmatpush1.bf16.msra.mxu0 %v14775_v54  ;;  %v6522_v54 = vld [vmem:[%s18078_s18 + $0xc70] sm:$0xff] }
0x184c   : > { %9846 = vmatpush1.bf16.msra.mxu1 %v14777_v63  ;;  %9761 = vmatprep.subr.bf16.mxu0 %v14792_v33 }
0x184d   : > { %9847 = vmatprep.subr.bf16.mxu1 %v14794_v61 }
0x184f   : > { %9762 = vmatpush1.bf16.msra.mxu0 %v14791_v21  ;;  %v14855_v21 = vcombine.low %v6498_v34, %v6506_v47  ;;  %v14904_v34 = vcombine.high %v6546_v35, %v6554_v36  ;;  %v6570_v47 = vld [vmem:[%s18078_s18 + $0xdf0] sm:$0xff] }
0x1850   : > { %9848 = vmatpush1.bf16.msra.mxu1 %v14793_v22  ;;  %9763 = vmatprep.subr.bf16.mxu0 %v14808_v13  ;;  %v14857_v13 = vcombine.low %v6499_v48, %v6507_v11  ;;  %v6563_v48 = vld [vmem:[%s18078_s18 + $0xdb8] sm:$0xff] }
0x1851   : > { %9849 = vmatprep.subr.bf16.mxu1 %v14810_v4  ;;  %v14872_v4 = vcombine.high %v6514_v14, %v6522_v54  ;;  %v6571_v11 = vld [vmem:[%s18078_s18 + $0xdf8] sm:$0xff] }
0x1853   : > { %9764 = vmatpush1.bf16.msra.mxu0 %v14807_v2  ;;  %v6539_v2 = vld [vmem:[%s18078_s18 + $0xcf8] sm:$0xff] }
0x1854   : > { %9850 = vmatpush1.bf16.msra.mxu1 %v14809_v59  ;;  %9765 = vmatprep.subr.bf16.mxu0 %v14824_v24  ;;  %v14871_v59 = vcombine.low %v6514_v14, %v6522_v54  ;;  %v14873_v24 = vcombine.low %v6515_v28, %v6523_v32  ;;  %v14890_v49 = vcombine.high %v6531_v1, %v6539_v2  ;;  %v6594_v14 = vld [vmem:[%s18078_s18 + $0xeb0] sm:$0xff]  ;;  %v6611_v32 = vld [vmem:[%s18078_s18 + $0xf38] sm:$0xff] }
0x1855   : > { %v9445_v3 = vpop.f32.mrb[84].mxu0  ;;  %9851 = vmatprep.subr.bf16.mxu1 %v14826_v31  ;;  %v14888_v31 = vcombine.high %v6530_v53, %v6538_v29  ;;  %v6618_v28 = vld [vmem:[%s18078_s18 + $0xf70] sm:$0xff] }
0x1856   : > { %v9531_v52 = vpop.f32.mrb[84].mxu1  ;;  %v9447_v55 = vpop.f32.mrb[85].mxu0  ;;  %v9888_v19 = vmax.f32 %v9445_v3, 0.0 }
0x1857   : > { %v9533_v20 = vpop.f32.mrb[85].mxu1  ;;  %v9449_v60 = vpop.f32.mrb[86].mxu0  ;;  %9766 = vmatpush1.bf16.msra.mxu0 %v14823_v7  ;;  %v9890_v18 = vmax.f32 %v9531_v52, 0.0  ;;  %v9889_v57 = vmax.f32 %v9447_v55, 0.0  ;;  %v6555_v7 = vld [vmem:[%s18078_s18 + $0xd78] sm:$0xff]  ;;  %v14903_v52 = vcombine.low %v6546_v35, %v6554_v36 }
0x1858   : > { %v9904_v16 = vmax.f32 %v9449_v60, 0.0  ;;  %v9535_v43 = vpop.f32.mrb[86].mxu1  ;;  %9852 = vmatpush1.bf16.msra.mxu1 %v14825_v37  ;;  %v9451_v46 = vpop.f32.mrb[87].mxu0  ;;  %9767 = vmatprep.subr.bf16.mxu0 %v14840_v17  ;;  %v9891_v63 = vmax.f32 %v9533_v20, 0.0  ;;  %v14887_v37 = vcombine.low %v6530_v53, %v6538_v29  ;;  %v14889_v17 = vcombine.low %v6531_v1, %v6539_v2  ;;  %v6626_v29 = vld [vmem:[%s18078_s18 + $0xfb0] sm:$0xff]  ;;  %v6627_v2 = vld [vmem:[%s18078_s18 + $0xfb8] sm:$0xff] }
0x1859   : > { %v9906_v15 = vmax.f32 %v9535_v43, 0.0  ;;  %v9905_v51 = vmax.f32 %v9451_v46, 0.0  ;;  %v9537_v8 = vpop.f32.mrb[87].mxu1  ;;  %9853 = vmatprep.subr.bf16.mxu1 %v14842_v6  ;;  %v14906_v3 = vcombine.high %v6547_v5, %v6555_v7  ;;  %v6562_v6 = vld [vmem:[%s18078_s18 + $0xdb0] sm:$0xff]  ;;  %v14905_v55 = vcombine.low %v6547_v5, %v6555_v7 }
0x185a   : > { %v19785_v33 = vpack.c.bf16 %v9904_v16, %v9888_v19  ;;  %v9907_v61 = vmax.f32 %v9537_v8, 0.0  ;;  %v14920_v20 = vcombine.high %v6562_v6, %v6570_v47  ;;  %v14922_v60 = vcombine.high %v6563_v48, %v6571_v11  ;;  %v6579_v19 = vld [vmem:[%s18078_s18 + $0xe38] sm:$0xff]  ;;  %v6634_v1 = vld [vmem:[%s18078_s18 + $0xff0] sm:$0xff] }
0x185b   : > { %v19789_v42 = vpack.c.bf16 %v9906_v15, %v9890_v18  ;;  %v19791_v58 = vpack.c.bf16 %v9905_v51, %v9889_v57  ;;  %9768 = vmatpush1.bf16.msra.mxu0 %v14839_v0  ;;  %v6578_v0 = vld [vmem:[%s18078_s18 + $0xe30] sm:$0xff]  ;;  %v6587_v16 = vld [vmem:[%s18078_s18 + $0xe78] sm:$0xff]  ;;  %v14919_v43 = vcombine.low %v6562_v6, %v6570_v47  ;;  %v14921_v46 = vcombine.low %v6563_v48, %v6571_v11 }
0x185c   : > { %v19793_v22 = vpack.c.bf16 %v9907_v61, %v9891_v63  ;;  %9854 = vmatpush1.bf16.msra.mxu1 %v14841_v12  ;;  %9769 = vmatprep.subr.bf16.mxu0 %v14856_v38  ;;  %v6586_v12 = vld [vmem:[%s18078_s18 + $0xe70] sm:$0xff]  ;;  %v6595_v57 = vld [vmem:[%s18078_s18 + $0xeb8] sm:$0xff]  ;;  %v14937_v8 = vcombine.low %v6579_v19, %v6587_v16  ;;  %v14983_v36 = vcombine.low %v6626_v29, %v6634_v1 }
0x185d   : > { %9855 = vmatprep.subr.bf16.mxu1 %v14858_v23  ;;  %v14936_v38 = vcombine.high %v6578_v0, %v6586_v12  ;;  %v14938_v23 = vcombine.high %v6579_v19, %v6587_v16  ;;  %v6602_v18 = vld [vmem:[%s18078_s18 + $0xef0] sm:$0xff]  ;;  %v6603_v15 = vld [vmem:[%s18078_s18 + $0xef8] sm:$0xff]  ;;  %v14935_v51 = vcombine.low %v6578_v0, %v6586_v12 }
0x185e   : > { %v14952_v54 = vcombine.high %v6594_v14, %v6602_v18  ;;  %v14954_v63 = vcombine.high %v6595_v57, %v6603_v15  ;;  %v6610_v61 = vld [vmem:[%s18078_s18 + $0xf30] sm:$0xff]  ;;  %v16773_v6 = vld [vmem:[%s18080_s13 + $0x2c] ss:$16 sps:$4 sm:$0xff]   ;;  %v16771_v48 = vld [vmem:[%s18080_s13 + $0x28] ss:$16 sps:$4 sm:$0xff]  }
0x185f   : > { %9770 = vmatpush1.bf16.msra.mxu0 %v14855_v21  ;;  %v6619_v21 = vld [vmem:[%s18078_s18 + $0xf78] sm:$0xff]  ;;  %v16764_v7 = vld [vmem:[%s18080_s13 + $0x4] ss:$16 sps:$4 sm:$0xff]   ;;  %v16768_v47 = vld [vmem:[%s18080_s13 + $0x20] ss:$16 sps:$4 sm:$0xff]  }
0x1860   : > { %9856 = vmatpush1.bf16.msra.mxu1 %v14857_v13  ;;  %9771 = vmatprep.subr.bf16.mxu0 %v14872_v4  ;;  %v14951_v13 = vcombine.low %v6594_v14, %v6602_v18  ;;  %v14953_v4 = vcombine.low %v6595_v57, %v6603_v15  ;;  %v14970_v53 = vcombine.high %v6611_v32, %v6619_v21  ;;  %v16776_v11 = vld [vmem:[%s18080_s13 + $0x44] ss:$16 sps:$4 sm:$0xff]   ;;  %v16783_v0 = vld [vmem:[%s18080_s13 + $0x68] ss:$16 sps:$4 sm:$0xff]   ;;  %v16791_v19 = vld [vmem:[%s18080_s13 + $0x8c] ss:$16 sps:$4 sm:$0xff]  }
0x1861   : > { %9857 = vmatprep.subr.bf16.mxu1 %v14874_v62  ;;  %v14968_v62 = vcombine.high %v6610_v61, %v6618_v28  ;;  %v16788_v12 = vld [vmem:[%s18080_s13 + $0x84] ss:$16 sps:$4 sm:$0xff]   ;;  %v16786_v16 = vld [vmem:[%s18080_s13 + $0x80] ss:$16 sps:$4 sm:$0xff]   ;;  %v16795_v14 = vld [vmem:[%s18080_s13 + $0xa8] ss:$16 sps:$4 sm:$0xff]  }
0x1862   : > { %v16800_v18 = vld [vmem:[%s18080_s13 + $0xc4] ss:$16 sps:$4 sm:$0xff]   ;;  %v16803_v57 = vld [vmem:[%s18080_s13 + $0xcc] ss:$16 sps:$4 sm:$0xff]   ;;  %v16798_v15 = vld [vmem:[%s18080_s13 + $0xc0] ss:$16 sps:$4 sm:$0xff]  }
0x1863   : > { %9772 = vmatpush1.bf16.msra.mxu0 %v14871_v59  ;;  %v6635_v59 = vld [vmem:[%s18078_s18 + $0xff8] sm:$0xff]  ;;  %s13763_s18 = sshll.u32 %s17817_s22, 4  ;;  %s13764_s18 = int_to_ptr.vmem [resolvable:$true] %s13763_s18 }
0x1864   : > { %9858 = vmatpush1.bf16.msra.mxu1 %v14873_v24  ;;  %9773 = vmatprep.subr.bf16.mxu0 %v14888_v31  ;;  %v14967_v24 = vcombine.low %v6610_v61, %v6618_v28  ;;  %v14969_v31 = vcombine.low %v6611_v32, %v6619_v21  ;;  %v14986_v35 = vcombine.high %v6627_v2, %v6635_v59  ;;  %v16807_v61 = vld [vmem:[%s18080_s13 + $0xe8] ss:$16 sps:$4 sm:$0xff]   ;;  %v16812_v28 = vld [vmem:[%s18080_s13 + $0x104] ss:$16 sps:$4 sm:$0xff]   ;;  %v16815_v32 = vld [vmem:[%s18080_s13 + $0x10c] ss:$16 sps:$4 sm:$0xff]   ;;  %p17737_p11 = scmp.lt.s32.totalorder %s13764_s18, %s13764_s18 }
0x1865   : > { %9859 = vmatprep.subr.bf16.mxu1 %v14890_v49  ;;  %v14984_v49 = vcombine.high %v6626_v29, %v6634_v1  ;;  %v14985_v5 = vcombine.low %v6627_v2, %v6635_v59  ;;  %v16810_v21 = vld [vmem:[%s18080_s13 + $0x100] ss:$16 sps:$4 sm:$0xff]   ;;  %v16819_v29 = vld [vmem:[%s18080_s13 + $0x128] ss:$16 sps:$4 sm:$0xff]   ;;  %v16824_v1 = vld [vmem:[%s18080_s13 + $0x144] ss:$16 sps:$4 sm:$0xff]  }
0x1866   : > { %v16827_v2 = vld [vmem:[%s18080_s13 + $0x14c] ss:$16 sps:$4 sm:$0xff]   ;;  %v16822_v59 = vld [vmem:[%s18080_s13 + $0x140] ss:$16 sps:$4 sm:$0xff]  }
0x1867   : > { %9774 = vmatpush1.bf16.msra.mxu0 %v14887_v37  ;;  %v16767_v37 = vld [vmem:[%s18080_s13 + $0xc] ss:$16 sps:$4 sm:$0xff]  }
0x1868   : > { %9860 = vmatpush1.bf16.msra.mxu1 %v14889_v17  ;;  %9775 = vmatprep.subr.bf16.mxu0 %v14904_v34  ;;  %v16762_v17 = vld [vmem:[%s18080_s13] ss:$16 sps:$4 sm:$0xff]   ;;  %v16765_v34 = vld [vmem:[%s18080_s13 + $0x8] ss:$16 sps:$4 sm:$0xff]  }
0x1869   : > { %9861 = vmatprep.subr.bf16.mxu1 %v14906_v3  ;;  %v16770_v3 = vld [vmem:[%s18080_s13 + $0x24] ss:$16 sps:$4 sm:$0xff]  }
0x186b   : > { %9776 = vmatpush1.bf16.msra.mxu0 %v14903_v52  ;;  %v16779_v52 = vld [vmem:[%s18080_s13 + $0x4c] ss:$16 sps:$4 sm:$0xff]  }
0x186c   : > { %9862 = vmatpush1.bf16.msra.mxu1 %v14905_v55  ;;  %9777 = vmatprep.subr.bf16.mxu0 %v14920_v20  ;;  %v16777_v55 = vld [vmem:[%s18080_s13 + $0x48] ss:$16 sps:$4 sm:$0xff]   ;;  %v16782_v20 = vld [vmem:[%s18080_s13 + $0x64] ss:$16 sps:$4 sm:$0xff]  }
0x186d   : > { %9863 = vmatprep.subr.bf16.mxu1 %v14922_v60  ;;  %v16785_v60 = vld [vmem:[%s18080_s13 + $0x6c] ss:$16 sps:$4 sm:$0xff]  }
0x186f   : > { %9778 = vmatpush1.bf16.msra.mxu0 %v14919_v43  ;;  %v16789_v43 = vld [vmem:[%s18080_s13 + $0x88] ss:$16 sps:$4 sm:$0xff]  }
0x1870   : > { %9864 = vmatpush1.bf16.msra.mxu1 %v14921_v46  ;;  %9779 = vmatprep.subr.bf16.mxu0 %v14936_v38  ;;  %v16794_v46 = vld [vmem:[%s18080_s13 + $0xa4] ss:$16 sps:$4 sm:$0xff]   ;;  %v16797_v38 = vld [vmem:[%s18080_s13 + $0xac] ss:$16 sps:$4 sm:$0xff]  }
0x1871   : > { %9865 = vmatprep.subr.bf16.mxu1 %v14938_v23  ;;  %v16792_v23 = vld [vmem:[%s18080_s13 + $0xa0] ss:$16 sps:$4 sm:$0xff]  }
0x1873   : > { %9780 = vmatpush1.bf16.msra.mxu0 %v14935_v51  ;;  %v16801_v51 = vld [vmem:[%s18080_s13 + $0xc8] ss:$16 sps:$4 sm:$0xff]  }
0x1874   : > { %9866 = vmatpush1.bf16.msra.mxu1 %v14937_v8  ;;  %9781 = vmatprep.subr.bf16.mxu0 %v14952_v54  ;;  %v16806_v8 = vld [vmem:[%s18080_s13 + $0xe4] ss:$16 sps:$4 sm:$0xff]   ;;  %v16809_v54 = vld [vmem:[%s18080_s13 + $0xec] ss:$16 sps:$4 sm:$0xff]  }
0x1875   : > { %9867 = vmatprep.subr.bf16.mxu1 %v14954_v63  ;;  %v16804_v63 = vld [vmem:[%s18080_s13 + $0xe0] ss:$16 sps:$4 sm:$0xff]  }
0x1877   : > { %9782 = vmatpush1.bf16.msra.mxu0 %v14951_v13  ;;  %v16813_v13 = vld [vmem:[%s18080_s13 + $0x108] ss:$16 sps:$4 sm:$0xff]  }
0x1878   : > { %9868 = vmatpush1.bf16.msra.mxu1 %v14953_v4  ;;  %9783 = vmatprep.subr.bf16.mxu0 %v14968_v62  ;;  %v16818_v4 = vld [vmem:[%s18080_s13 + $0x124] ss:$16 sps:$4 sm:$0xff]   ;;  %v16821_v62 = vld [vmem:[%s18080_s13 + $0x12c] ss:$16 sps:$4 sm:$0xff]  }
0x1879   : > { %9869 = vmatprep.subr.bf16.mxu1 %v14970_v53  ;;  %v16816_v53 = vld [vmem:[%s18080_s13 + $0x120] ss:$16 sps:$4 sm:$0xff]  }
0x187b   : > { %9784 = vmatpush1.bf16.msra.mxu0 %v14967_v24  ;;  %v16825_v24 = vld [vmem:[%s18080_s13 + $0x148] ss:$16 sps:$4 sm:$0xff]  }
0x187c   : > { %9870 = vmatpush1.bf16.msra.mxu1 %v14969_v31  ;;  %9785 = vmatprep.subr.bf16.mxu0 %v14984_v49  ;;  %v16830_v31 = vld [vmem:[%s18080_s13 + $0x164] ss:$16 sps:$4 sm:$0xff]   ;;  %v16833_v49 = vld [vmem:[%s18080_s13 + $0x16c] ss:$16 sps:$4 sm:$0xff]  }
0x187d   : > { %9871 = vmatprep.subr.bf16.mxu1 %v14986_v35  ;;  %v16828_v35 = vld [vmem:[%s18080_s13 + $0x160] ss:$16 sps:$4 sm:$0xff]  }
0x187f   : > { %9786 = vmatpush1.bf16.msra.mxu0 %v14983_v36  ;;  %v16831_v36 = vld [vmem:[%s18080_s13 + $0x168] ss:$16 sps:$4 sm:$0xff]  }
0x1880   : > { %9872 = vmatpush1.bf16.msra.mxu1 %v14985_v5  ;;  %13004 = vmatprep.subr.bf16.mxu0 %v16764_v7  ;;  %v16836_v5 = vld [vmem:[%s18080_s13 + $0x184] ss:$16 sps:$4 sm:$0xff]   ;;  %v16839_v7 = vld [vmem:[%s18080_s13 + $0x18c] ss:$16 sps:$4 sm:$0xff]  }
0x1881   : > { %13348 = vmatprep.subr.bf16.mxu1 %v16767_v37  ;;  %v16834_v37 = vld [vmem:[%s18080_s13 + $0x180] ss:$16 sps:$4 sm:$0xff]  }
0x1882   : > { %9788 = vmatmul.mubr.bf16.vlgmr.msra.gmra.mrb[92].mxu0 %v19405_v44 }
0x1883   : > { %9874 = vmatmul.mubr.bf16.vlgmr.msra.gmra.mrb[92].mxu1 %v19405_v44  ;;  %13005 = vmatpush1.bf16.msra.mxu0 %v16762_v17  ;;  %v16774_v44 = vld [vmem:[%s18080_s13 + $0x40] ss:$16 sps:$4 sm:$0xff]   ;;  %v16837_v17 = vld [vmem:[%s18080_s13 + $0x188] ss:$16 sps:$4 sm:$0xff]  }
0x1884   : > { %13036 = vmatprep.mubr.bf16.mxu0 %v19647_v41  ;;  %13349 = vmatpush1.bf16.msra.mxu1 %v16765_v34  ;;  %v16842_v34 = vld [vmem:[%s18080_s13 + $0x1a4] ss:$16 sps:$4 sm:$0xff]  }
0x1885   : > { %13380 = vmatprep.mubr.bf16.mxu1 %v19647_v41  ;;  %13006 = vmatprep.subr.bf16.mxu0 %v16770_v3  ;;  %v16780_v41 = vld [vmem:[%s18080_s13 + $0x60] ss:$16 sps:$4 sm:$0xff]   ;;  %v16845_v3 = vld [vmem:[%s18080_s13 + $0x1ac] ss:$16 sps:$4 sm:$0xff]  }
0x1886   : > { %13350 = vmatprep.subr.bf16.mxu1 %v16773_v6  ;;  %v16840_v6 = vld [vmem:[%s18080_s13 + $0x1a0] ss:$16 sps:$4 sm:$0xff]  }
0x1887   : > { %13007 = vmatpush1.bf16.msra.mxu0 %v16768_v47  ;;  %v16843_v47 = vld [vmem:[%s18080_s13 + $0x1a8] ss:$16 sps:$4 sm:$0xff]  }
0x1888   : > { %13351 = vmatpush1.bf16.msra.mxu1 %v16771_v48  ;;  %13008 = vmatprep.subr.bf16.mxu0 %v16776_v11  ;;  %v16848_v48 = vld [vmem:[%s18080_s13 + $0x1c4] ss:$16 sps:$4 sm:$0xff]   ;;  %v16851_v11 = vld [vmem:[%s18080_s13 + $0x1cc] ss:$16 sps:$4 sm:$0xff]  }
0x1889   : > { %13352 = vmatprep.subr.bf16.mxu1 %v16779_v52  ;;  %v16846_v52 = vld [vmem:[%s18080_s13 + $0x1c0] ss:$16 sps:$4 sm:$0xff]  }
0x188b   : > { %13009 = vmatpush1.bf16.msra.mxu0 %v16774_v44  ;;  %v16849_v44 = vld [vmem:[%s18080_s13 + $0x1c8] ss:$16 sps:$4 sm:$0xff]  }
0x188c   : > { %13353 = vmatpush1.bf16.msra.mxu1 %v16777_v55  ;;  %13010 = vmatprep.subr.bf16.mxu0 %v16782_v20  ;;  %v16854_v55 = vld [vmem:[%s18080_s13 + $0x1e4] ss:$16 sps:$4 sm:$0xff]   ;;  %v16857_v20 = vld [vmem:[%s18080_s13 + $0x1ec] ss:$16 sps:$4 sm:$0xff]  }
0x188d   : > { %13354 = vmatprep.subr.bf16.mxu1 %v16785_v60  ;;  %v16852_v60 = vld [vmem:[%s18080_s13 + $0x1e0] ss:$16 sps:$4 sm:$0xff]  }
0x188f   : > { %13011 = vmatpush1.bf16.msra.mxu0 %v16780_v41  ;;  %v16855_v41 = vld [vmem:[%s18080_s13 + $0x1e8] ss:$16 sps:$4 sm:$0xff]  }
0x1890   : > { %13355 = vmatpush1.bf16.msra.mxu1 %v16783_v0  ;;  %13012 = vmatprep.subr.bf16.mxu0 %v16788_v12  ;;  %v16860_v0 = vld [vmem:[%s18080_s13 + $0x204] ss:$16 sps:$4 sm:$0xff]   ;;  %v16863_v12 = vld [vmem:[%s18080_s13 + $0x20c] ss:$16 sps:$4 sm:$0xff]  }
0x1891   : > { %13356 = vmatprep.subr.bf16.mxu1 %v16791_v19  ;;  %v16858_v19 = vld [vmem:[%s18080_s13 + $0x200] ss:$16 sps:$4 sm:$0xff]  }
0x1893   : > { %13013 = vmatpush1.bf16.msra.mxu0 %v16786_v16  ;;  %v16861_v16 = vld [vmem:[%s18080_s13 + $0x208] ss:$16 sps:$4 sm:$0xff]  }
0x1894   : > { %13357 = vmatpush1.bf16.msra.mxu1 %v16789_v43  ;;  %13014 = vmatprep.subr.bf16.mxu0 %v16794_v46  ;;  %v16866_v43 = vld [vmem:[%s18080_s13 + $0x224] ss:$16 sps:$4 sm:$0xff]   ;;  %v16869_v46 = vld [vmem:[%s18080_s13 + $0x22c] ss:$16 sps:$4 sm:$0xff]  }
0x1895   : > { %13358 = vmatprep.subr.bf16.mxu1 %v16797_v38  ;;  %v16864_v38 = vld [vmem:[%s18080_s13 + $0x220] ss:$16 sps:$4 sm:$0xff]  }
0x1897   : > { %13015 = vmatpush1.bf16.msra.mxu0 %v16792_v23  ;;  %v16867_v23 = vld [vmem:[%s18080_s13 + $0x228] ss:$16 sps:$4 sm:$0xff]  }
0x1898   : > { %13359 = vmatpush1.bf16.msra.mxu1 %v16795_v14  ;;  %13016 = vmatprep.subr.bf16.mxu0 %v16800_v18  ;;  %v16872_v14 = vld [vmem:[%s18080_s13 + $0x244] ss:$16 sps:$4 sm:$0xff]   ;;  %v16875_v18 = vld [vmem:[%s18080_s13 + $0x24c] ss:$16 sps:$4 sm:$0xff]  }
0x1899   : > { %13360 = vmatprep.subr.bf16.mxu1 %v16803_v57  ;;  %v16873_v57 = vld [vmem:[%s18080_s13 + $0x248] ss:$16 sps:$4 sm:$0xff]  }
0x189b   : > { %13017 = vmatpush1.bf16.msra.mxu0 %v16798_v15  ;;  %v16878_v15 = vld [vmem:[%s18080_s13 + $0x264] ss:$16 sps:$4 sm:$0xff]  }
0x189c   : > { %13361 = vmatpush1.bf16.msra.mxu1 %v16801_v51  ;;  %13018 = vmatprep.subr.bf16.mxu0 %v16806_v8  ;;  %v16881_v51 = vld [vmem:[%s18080_s13 + $0x26c] ss:$16 sps:$4 sm:$0xff]   ;;  %v16879_v8 = vld [vmem:[%s18080_s13 + $0x268] ss:$16 sps:$4 sm:$0xff]  }
0x189d   : > { %13362 = vmatprep.subr.bf16.mxu1 %v16809_v54  ;;  %v16884_v54 = vld [vmem:[%s18080_s13 + $0x284] ss:$16 sps:$4 sm:$0xff]  }
0x189f   : > { %13019 = vmatpush1.bf16.msra.mxu0 %v16804_v63  ;;  %v16887_v63 = vld [vmem:[%s18080_s13 + $0x28c] ss:$16 sps:$4 sm:$0xff]  }
0x18a0   : > { %13363 = vmatpush1.bf16.msra.mxu1 %v16807_v61  ;;  %13020 = vmatprep.subr.bf16.mxu0 %v16812_v28  ;;  %v16882_v61 = vld [vmem:[%s18080_s13 + $0x280] ss:$16 sps:$4 sm:$0xff]   ;;  %v16885_v28 = vld [vmem:[%s18080_s13 + $0x288] ss:$16 sps:$4 sm:$0xff]  }
0x18a1   : > { %13364 = vmatprep.subr.bf16.mxu1 %v16815_v32  ;;  %v16890_v32 = vld [vmem:[%s18080_s13 + $0x2a4] ss:$16 sps:$4 sm:$0xff]  }
0x18a3   : > { %13021 = vmatpush1.bf16.msra.mxu0 %v16810_v21  ;;  %v16893_v21 = vld [vmem:[%s18080_s13 + $0x2ac] ss:$16 sps:$4 sm:$0xff]  }
0x18a4   : > { %13365 = vmatpush1.bf16.msra.mxu1 %v16813_v13  ;;  %13022 = vmatprep.subr.bf16.mxu0 %v16818_v4  ;;  %v16888_v13 = vld [vmem:[%s18080_s13 + $0x2a0] ss:$16 sps:$4 sm:$0xff]   ;;  %v16891_v4 = vld [vmem:[%s18080_s13 + $0x2a8] ss:$16 sps:$4 sm:$0xff]  }
0x18a5   : > { %13366 = vmatprep.subr.bf16.mxu1 %v16821_v62  ;;  %v16896_v62 = vld [vmem:[%s18080_s13 + $0x2c4] ss:$16 sps:$4 sm:$0xff]  }
0x18a7   : > { %13023 = vmatpush1.bf16.msra.mxu0 %v16816_v53 }
0x18a8   : > { %13367 = vmatpush1.bf16.msra.mxu1 %v16819_v29  ;;  %13024 = vmatprep.subr.bf16.mxu0 %v16824_v1  ;;  %v16899_v29 = vld [vmem:[%s18080_s13 + $0x2cc] ss:$16 sps:$4 sm:$0xff]  }
0x18a9   : > { %13368 = vmatprep.subr.bf16.mxu1 %v16827_v2 }
0x18ab   : > { %13025 = vmatpush1.bf16.msra.mxu0 %v16822_v59  ;;  %v16894_v59 = vld [vmem:[%s18080_s13 + $0x2c0] ss:$16 sps:$4 sm:$0xff]  }
0x18ac   : > { %13369 = vmatpush1.bf16.msra.mxu1 %v16825_v24  ;;  %13026 = vmatprep.subr.bf16.mxu0 %v16830_v31 }
0x18ad   : > { %13370 = vmatprep.subr.bf16.mxu1 %v16833_v49  ;;  %v16897_v49 = vld [vmem:[%s18080_s13 + $0x2c8] ss:$16 sps:$4 sm:$0xff]  }
0x18af   : > { %13027 = vmatpush1.bf16.msra.mxu0 %v16828_v35  ;;  %v16902_v35 = vld [vmem:[%s18080_s13 + $0x2e4] ss:$16 sps:$4 sm:$0xff]  }
0x18b0   : > { %13371 = vmatpush1.bf16.msra.mxu1 %v16831_v36  ;;  %13028 = vmatprep.subr.bf16.mxu0 %v16836_v5 }
0x18b1   : > { %13372 = vmatprep.subr.bf16.mxu1 %v16839_v7 }
0x18b3   : > { %13029 = vmatpush1.bf16.msra.mxu0 %v16834_v37 }
0x18b4   : > { %13373 = vmatpush1.bf16.msra.mxu1 %v16837_v17  ;;  %13030 = vmatprep.subr.bf16.mxu0 %v16842_v34  ;;  %v16905_v17 = vld [vmem:[%s18080_s13 + $0x2ec] ss:$16 sps:$4 sm:$0xff]  }
0x18b5   : > { %13374 = vmatprep.subr.bf16.mxu1 %v16845_v3 }
0x18b7   : > { %13031 = vmatpush1.bf16.msra.mxu0 %v16840_v6 }
0x18b8   : > { %13375 = vmatpush1.bf16.msra.mxu1 %v16843_v47  ;;  %13032 = vmatprep.subr.bf16.mxu0 %v16848_v48 }
0x18b9   : > { %13376 = vmatprep.subr.bf16.mxu1 %v16851_v11 }
0x18bb   : > { %13033 = vmatpush1.bf16.msra.mxu0 %v16846_v52 }
0x18bc   : > { %13377 = vmatpush1.bf16.msra.mxu1 %v16849_v44  ;;  %13034 = vmatprep.subr.bf16.mxu0 %v16854_v55 }
0x18bd   : > { %13378 = vmatprep.subr.bf16.mxu1 %v16857_v20 }
0x18bf   : > { %13035 = vmatpush1.bf16.msra.mxu0 %v16852_v60  ;;  %v16900_v60 = vld [vmem:[%s18080_s13 + $0x2e0] ss:$16 sps:$4 sm:$0xff]  }
0x18c0   : > { %13379 = vmatpush1.bf16.msra.mxu1 %v16855_v41  ;;  %13047 = vmatprep.subr.bf16.mxu0 %v16860_v0  ;;  %v16903_v0 = vld [vmem:[%s18080_s13 + $0x2e8] ss:$16 sps:$4 sm:$0xff]  }
0x18c1   : > { %13391 = vmatprep.subr.bf16.mxu1 %v16863_v12  ;;  %v16908_v12 = vld [vmem:[%s18080_s13 + $0x304] ss:$16 sps:$4 sm:$0xff]  }
0x18c2   : > { %13037 = vmatmul.mubr.bf16.vlgmr.msra.gmra.mrb[96].mxu0 %v19641_v39 }
0x18c3   : > { %13381 = vmatmul.mubr.bf16.vlgmr.msra.gmra.mrb[96].mxu1 %v19641_v39  ;;  %13048 = vmatpush1.bf16.msra.mxu0 %v16858_v19  ;;  %v16870_v39 = vld [vmem:[%s18080_s13 + $0x240] ss:$16 sps:$4 sm:$0xff]   ;;  %v16911_v19 = vld [vmem:[%s18080_s13 + $0x30c] ss:$16 sps:$4 sm:$0xff]  }
0x18c4   : > { %13079 = vmatprep.mubr.bf16.mxu0 %v19649_v45  ;;  %13392 = vmatpush1.bf16.msra.mxu1 %v16861_v16  ;;  %v16906_v16 = vld [vmem:[%s18080_s13 + $0x300] ss:$16 sps:$4 sm:$0xff]  }
0x18c5   : > { %13423 = vmatprep.mubr.bf16.mxu1 %v19649_v45  ;;  %13049 = vmatprep.subr.bf16.mxu0 %v16866_v43  ;;  %v16876_v45 = vld [vmem:[%s18080_s13 + $0x260] ss:$16 sps:$4 sm:$0xff]   ;;  %v16909_v43 = vld [vmem:[%s18080_s13 + $0x308] ss:$16 sps:$4 sm:$0xff]  }
0x18c6   : > { %13393 = vmatprep.subr.bf16.mxu1 %v16869_v46  ;;  %v16914_v46 = vld [vmem:[%s18080_s13 + $0x324] ss:$16 sps:$4 sm:$0xff]  }
0x18c7   : > { %13050 = vmatpush1.bf16.msra.mxu0 %v16864_v38  ;;  %v16917_v38 = vld [vmem:[%s18080_s13 + $0x32c] ss:$16 sps:$4 sm:$0xff]  }
0x18c8   : > { %13394 = vmatpush1.bf16.msra.mxu1 %v16867_v23  ;;  %13051 = vmatprep.subr.bf16.mxu0 %v16872_v14  ;;  %v16912_v23 = vld [vmem:[%s18080_s13 + $0x320] ss:$16 sps:$4 sm:$0xff]   ;;  %v16915_v14 = vld [vmem:[%s18080_s13 + $0x328] ss:$16 sps:$4 sm:$0xff]  }
0x18c9   : > { %13395 = vmatprep.subr.bf16.mxu1 %v16875_v18  ;;  %v16920_v18 = vld [vmem:[%s18080_s13 + $0x344] ss:$16 sps:$4 sm:$0xff]  }
0x18cb   : > { %13052 = vmatpush1.bf16.msra.mxu0 %v16870_v39  ;;  %v16923_v39 = vld [vmem:[%s18080_s13 + $0x34c] ss:$16 sps:$4 sm:$0xff]  }
0x18cc   : > { %13396 = vmatpush1.bf16.msra.mxu1 %v16873_v57  ;;  %13053 = vmatprep.subr.bf16.mxu0 %v16878_v15  ;;  %v16918_v57 = vld [vmem:[%s18080_s13 + $0x340] ss:$16 sps:$4 sm:$0xff]   ;;  %v16921_v15 = vld [vmem:[%s18080_s13 + $0x348] ss:$16 sps:$4 sm:$0xff]  }
0x18cd   : > { %13397 = vmatprep.subr.bf16.mxu1 %v16881_v51  ;;  %v16926_v51 = vld [vmem:[%s18080_s13 + $0x364] ss:$16 sps:$4 sm:$0xff]  }
0x18cf   : > { %13054 = vmatpush1.bf16.msra.mxu0 %v16876_v45  ;;  %v16929_v45 = vld [vmem:[%s18080_s13 + $0x36c] ss:$16 sps:$4 sm:$0xff]  }
0x18d0   : > { %13398 = vmatpush1.bf16.msra.mxu1 %v16879_v8  ;;  %13055 = vmatprep.subr.bf16.mxu0 %v16884_v54  ;;  %v16924_v8 = vld [vmem:[%s18080_s13 + $0x360] ss:$16 sps:$4 sm:$0xff]   ;;  %v16927_v54 = vld [vmem:[%s18080_s13 + $0x368] ss:$16 sps:$4 sm:$0xff]  }
0x18d1   : > { %13399 = vmatprep.subr.bf16.mxu1 %v16887_v63  ;;  %v16932_v63 = vld [vmem:[%s18080_s13 + $0x384] ss:$16 sps:$4 sm:$0xff]  }
0x18d3   : > { %13056 = vmatpush1.bf16.msra.mxu0 %v16882_v61  ;;  %v16935_v61 = vld [vmem:[%s18080_s13 + $0x38c] ss:$16 sps:$4 sm:$0xff]  }
0x18d4   : > { %13400 = vmatpush1.bf16.msra.mxu1 %v16885_v28  ;;  %13057 = vmatprep.subr.bf16.mxu0 %v16890_v32  ;;  %v16930_v28 = vld [vmem:[%s18080_s13 + $0x380] ss:$16 sps:$4 sm:$0xff]   ;;  %v16933_v32 = vld [vmem:[%s18080_s13 + $0x388] ss:$16 sps:$4 sm:$0xff]  }
0x18d5   : > { %v9617_v53 = vpop.f32.mrb[88].mxu0  ;;  %13401 = vmatprep.subr.bf16.mxu1 %v16893_v21  ;;  %v16938_v21 = vld [vmem:[%s18080_s13 + $0x3a4] ss:$16 sps:$4 sm:$0xff]  }
0x18d6   : > { %v9703_v1 = vpop.f32.mrb[88].mxu1  ;;  %v9619_v2 = vpop.f32.mrb[89].mxu0  ;;  %v9892_v36 = vmax.f32 %v9617_v53, 0.0  ;;  %v16944_v53 = vld [vmem:[%s18080_s13 + $0x3c4] ss:$16 sps:$4 sm:$0xff]  }
0x18d7   : > { %v9705_v24 = vpop.f32.mrb[89].mxu1  ;;  %v9621_v31 = vpop.f32.mrb[90].mxu0  ;;  %13058 = vmatpush1.bf16.msra.mxu0 %v16888_v13  ;;  %v9894_v34 = vmax.f32 %v9703_v1, 0.0  ;;  %v9893_v3 = vmax.f32 %v9619_v2, 0.0  ;;  %v16941_v13 = vld [vmem:[%s18080_s13 + $0x3ac] ss:$16 sps:$4 sm:$0xff]  }
0x18d8   : > { %v9908_v5 = vmax.f32 %v9621_v31, 0.0  ;;  %v9707_v7 = vpop.f32.mrb[90].mxu1  ;;  %13402 = vmatpush1.bf16.msra.mxu1 %v16891_v4  ;;  %v9623_v37 = vpop.f32.mrb[91].mxu0  ;;  %13059 = vmatprep.subr.bf16.mxu0 %v16896_v62  ;;  %v9895_v11 = vmax.f32 %v9705_v24, 0.0  ;;  %v16936_v4 = vld [vmem:[%s18080_s13 + $0x3a0] ss:$16 sps:$4 sm:$0xff]  }
0x18d9   : > { %v9910_v6 = vmax.f32 %v9707_v7, 0.0  ;;  %v9909_v47 = vmax.f32 %v9623_v37, 0.0  ;;  %v9709_v48 = vpop.f32.mrb[91].mxu1  ;;  %13403 = vmatprep.subr.bf16.mxu1 %v16899_v29  ;;  %v16939_v62 = vld [vmem:[%s18080_s13 + $0x3a8] ss:$16 sps:$4 sm:$0xff]  }
0x18da   : > { %v19925_v52 = vpack.c.bf16 %v9908_v5, %v9892_v36  ;;  %v9911_v44 = vmax.f32 %v9709_v48, 0.0  ;;  %v16947_v29 = vld [vmem:[%s18080_s13 + $0x3cc] ss:$16 sps:$4 sm:$0xff]   ;;  %v16942_v1 = vld [vmem:[%s18080_s13 + $0x3c0] ss:$16 sps:$4 sm:$0xff]  }
0x18db   : > { %v19927_v55 = vpack.c.bf16 %v9910_v6, %v9894_v34  ;;  %v19929_v20 = vpack.c.bf16 %v9909_v47, %v9893_v3  ;;  %13060 = vmatpush1.bf16.msra.mxu0 %v16894_v59  ;;  %v16945_v2 = vld [vmem:[%s18080_s13 + $0x3c8] ss:$16 sps:$4 sm:$0xff]   ;;  %v16950_v59 = vld [vmem:[%s18080_s13 + $0x3e4] ss:$16 sps:$4 sm:$0xff]   ;;  %v16953_v24 = vld [vmem:[%s18080_s13 + $0x3ec] ss:$16 sps:$4 sm:$0xff]  }
0x18dc   : > { %v19932_v41 = vpack.c.bf16 %v9911_v44, %v9895_v11  ;;  %13404 = vmatpush1.bf16.msra.mxu1 %v16897_v49  ;;  %13061 = vmatprep.subr.bf16.mxu0 %v16902_v35  ;;  %v16948_v31 = vld [vmem:[%s18080_s13 + $0x3e0] ss:$16 sps:$4 sm:$0xff]   ;;  %v16951_v49 = vld [vmem:[%s18080_s13 + $0x3e8] ss:$16 sps:$4 sm:$0xff]   ;;  %v16956_v35 = vld [vmem:[%s18080_s13 + $0x404] ss:$16 sps:$4 sm:$0xff]  }
0x18dd   : > { %13405 = vmatprep.subr.bf16.mxu1 %v16905_v17  ;;  %v16959_v36 = vld [vmem:[%s18080_s13 + $0x40c] ss:$16 sps:$4 sm:$0xff]   ;;  %v16954_v5 = vld [vmem:[%s18080_s13 + $0x400] ss:$16 sps:$4 sm:$0xff]   ;;  %v16957_v7 = vld [vmem:[%s18080_s13 + $0x408] ss:$16 sps:$4 sm:$0xff]  }
0x18de   : > { %v16962_v37 = vld [vmem:[%s18080_s13 + $0x424] ss:$16 sps:$4 sm:$0xff]   ;;  %v16965_v17 = vld [vmem:[%s18080_s13 + $0x42c] ss:$16 sps:$4 sm:$0xff]   ;;  %v16960_v34 = vld [vmem:[%s18080_s13 + $0x420] ss:$16 sps:$4 sm:$0xff]  }
0x18df   : > { %13062 = vmatpush1.bf16.msra.mxu0 %v16900_v60  ;;  %v16963_v3 = vld [vmem:[%s18080_s13 + $0x428] ss:$16 sps:$4 sm:$0xff]   ;;  %v16968_v6 = vld [vmem:[%s18080_s13 + $0x444] ss:$16 sps:$4 sm:$0xff]   ;;  %v16971_v47 = vld [vmem:[%s18080_s13 + $0x44c] ss:$16 sps:$4 sm:$0xff]  }
0x18e0   : > { %13406 = vmatpush1.bf16.msra.mxu1 %v16903_v0  ;;  %13063 = vmatprep.subr.bf16.mxu0 %v16908_v12  ;;  %v16969_v48 = vld [vmem:[%s18080_s13 + $0x448] ss:$16 sps:$4 sm:$0xff]   ;;  %v16974_v11 = vld [vmem:[%s18080_s13 + $0x464] ss:$16 sps:$4 sm:$0xff]   ;;  %v16977_v44 = vld [vmem:[%s18080_s13 + $0x46c] ss:$16 sps:$4 sm:$0xff]  }
0x18e1   : > { %13407 = vmatprep.subr.bf16.mxu1 %v16911_v19  ;;  %v16975_v60 = vld [vmem:[%s18080_s13 + $0x468] ss:$16 sps:$4 sm:$0xff]   ;;  %v16980_v0 = vld [vmem:[%s18080_s13 + $0x484] ss:$16 sps:$4 sm:$0xff]   ;;  %v16983_v12 = vld [vmem:[%s18080_s13 + $0x48c] ss:$16 sps:$4 sm:$0xff]  }
0x18e2   : > { %v16978_v19 = vld [vmem:[%s18080_s13 + $0x480] ss:$16 sps:$4 sm:$0xff]  }
0x18e3   : > { %13064 = vmatpush1.bf16.msra.mxu0 %v16906_v16  ;;  %v16981_v16 = vld [vmem:[%s18080_s13 + $0x488] ss:$16 sps:$4 sm:$0xff]  }
0x18e4   : > { %13408 = vmatpush1.bf16.msra.mxu1 %v16909_v43  ;;  %13065 = vmatprep.subr.bf16.mxu0 %v16914_v46  ;;  %v16986_v43 = vld [vmem:[%s18080_s13 + $0x4a4] ss:$16 sps:$4 sm:$0xff]   ;;  %v16989_v46 = vld [vmem:[%s18080_s13 + $0x4ac] ss:$16 sps:$4 sm:$0xff]  }
0x18e5   : > { %13409 = vmatprep.subr.bf16.mxu1 %v16917_v38  ;;  %v16984_v38 = vld [vmem:[%s18080_s13 + $0x4a0] ss:$16 sps:$4 sm:$0xff]  }
0x18e7   : > { %13066 = vmatpush1.bf16.msra.mxu0 %v16912_v23  ;;  %v16987_v23 = vld [vmem:[%s18080_s13 + $0x4a8] ss:$16 sps:$4 sm:$0xff]  }
0x18e8   : > { %13410 = vmatpush1.bf16.msra.mxu1 %v16915_v14  ;;  %13067 = vmatprep.subr.bf16.mxu0 %v16920_v18  ;;  %v16992_v14 = vld [vmem:[%s18080_s13 + $0x4c4] ss:$16 sps:$4 sm:$0xff]   ;;  %v16995_v18 = vld [vmem:[%s18080_s13 + $0x4cc] ss:$16 sps:$4 sm:$0xff]  }
0x18e9   : > { %13411 = vmatprep.subr.bf16.mxu1 %v16923_v39  ;;  %v16990_v39 = vld [vmem:[%s18080_s13 + $0x4c0] ss:$16 sps:$4 sm:$0xff]  }
0x18eb   : > { %13068 = vmatpush1.bf16.msra.mxu0 %v16918_v57  ;;  %v16993_v57 = vld [vmem:[%s18080_s13 + $0x4c8] ss:$16 sps:$4 sm:$0xff]  }
0x18ec   : > { %13412 = vmatpush1.bf16.msra.mxu1 %v16921_v15  ;;  %13069 = vmatprep.subr.bf16.mxu0 %v16926_v51  ;;  %v16998_v15 = vld [vmem:[%s18080_s13 + $0x4e4] ss:$16 sps:$4 sm:$0xff]   ;;  %v17001_v51 = vld [vmem:[%s18080_s13 + $0x4ec] ss:$16 sps:$4 sm:$0xff]  }
0x18ed   : > { %13413 = vmatprep.subr.bf16.mxu1 %v16929_v45  ;;  %v16996_v45 = vld [vmem:[%s18080_s13 + $0x4e0] ss:$16 sps:$4 sm:$0xff]  }
0x18ef   : > { %13070 = vmatpush1.bf16.msra.mxu0 %v16924_v8  ;;  %v16999_v8 = vld [vmem:[%s18080_s13 + $0x4e8] ss:$16 sps:$4 sm:$0xff]  }
0x18f0   : > { %13414 = vmatpush1.bf16.msra.mxu1 %v16927_v54  ;;  %13071 = vmatprep.subr.bf16.mxu0 %v16932_v63  ;;  %v17004_v54 = vld [vmem:[%s18080_s13 + $0x504] ss:$16 sps:$4 sm:$0xff]   ;;  %v17007_v63 = vld [vmem:[%s18080_s13 + $0x50c] ss:$16 sps:$4 sm:$0xff]  }
0x18f1   : > { %13415 = vmatprep.subr.bf16.mxu1 %v16935_v61  ;;  %v17002_v61 = vld [vmem:[%s18080_s13 + $0x500] ss:$16 sps:$4 sm:$0xff]  }
0x18f3   : > { %13072 = vmatpush1.bf16.msra.mxu0 %v16930_v28  ;;  %v17005_v28 = vld [vmem:[%s18080_s13 + $0x508] ss:$16 sps:$4 sm:$0xff]  }
0x18f4   : > { %13416 = vmatpush1.bf16.msra.mxu1 %v16933_v32  ;;  %13073 = vmatprep.subr.bf16.mxu0 %v16938_v21  ;;  %v17010_v32 = vld [vmem:[%s18080_s13 + $0x524] ss:$16 sps:$4 sm:$0xff]   ;;  %v17013_v21 = vld [vmem:[%s18080_s13 + $0x52c] ss:$16 sps:$4 sm:$0xff]  }
0x18f5   : > { %13417 = vmatprep.subr.bf16.mxu1 %v16941_v13  ;;  %v17008_v13 = vld [vmem:[%s18080_s13 + $0x520] ss:$16 sps:$4 sm:$0xff]  }
0x18f7   : > { %13074 = vmatpush1.bf16.msra.mxu0 %v16936_v4  ;;  %v17011_v4 = vld [vmem:[%s18080_s13 + $0x528] ss:$16 sps:$4 sm:$0xff]  }
0x18f8   : > { %13418 = vmatpush1.bf16.msra.mxu1 %v16939_v62  ;;  %13075 = vmatprep.subr.bf16.mxu0 %v16944_v53  ;;  %v17016_v62 = vld [vmem:[%s18080_s13 + $0x544] ss:$16 sps:$4 sm:$0xff]   ;;  %v17019_v53 = vld [vmem:[%s18080_s13 + $0x54c] ss:$16 sps:$4 sm:$0xff]  }
0x18f9   : > { %13419 = vmatprep.subr.bf16.mxu1 %v16947_v29  ;;  %v17014_v29 = vld [vmem:[%s18080_s13 + $0x540] ss:$16 sps:$4 sm:$0xff]  }
0x18fb   : > { %13076 = vmatpush1.bf16.msra.mxu0 %v16942_v1  ;;  %v17017_v1 = vld [vmem:[%s18080_s13 + $0x548] ss:$16 sps:$4 sm:$0xff]  }
0x18fc   : > { %13420 = vmatpush1.bf16.msra.mxu1 %v16945_v2  ;;  %13077 = vmatprep.subr.bf16.mxu0 %v16950_v59  ;;  %v17022_v2 = vld [vmem:[%s18080_s13 + $0x564] ss:$16 sps:$4 sm:$0xff]   ;;  %v17025_v59 = vld [vmem:[%s18080_s13 + $0x56c] ss:$16 sps:$4 sm:$0xff]  }
0x18fd   : > { %13421 = vmatprep.subr.bf16.mxu1 %v16953_v24  ;;  %v17020_v24 = vld [vmem:[%s18080_s13 + $0x560] ss:$16 sps:$4 sm:$0xff]  }
0x18ff   : > { %13078 = vmatpush1.bf16.msra.mxu0 %v16948_v31  ;;  %v17023_v31 = vld [vmem:[%s18080_s13 + $0x568] ss:$16 sps:$4 sm:$0xff]  }
0x1900   : > { %13422 = vmatpush1.bf16.msra.mxu1 %v16951_v49  ;;  %13090 = vmatprep.subr.bf16.mxu0 %v16956_v35  ;;  %v17028_v49 = vld [vmem:[%s18080_s13 + $0x584] ss:$16 sps:$4 sm:$0xff]   ;;  %v17031_v35 = vld [vmem:[%s18080_s13 + $0x58c] ss:$16 sps:$4 sm:$0xff]  }
0x1901   : > { %13434 = vmatprep.subr.bf16.mxu1 %v16959_v36  ;;  %v17026_v36 = vld [vmem:[%s18080_s13 + $0x580] ss:$16 sps:$4 sm:$0xff]  }
0x1902   : > { %13080 = vmatmul.mubr.bf16.vlgmr.msra.gmra.mrb[96].mxu0 %v19643_v40 }
0x1903   : > { %13424 = vmatmul.mubr.bf16.vlgmr.msra.gmra.mrb[96].mxu1 %v19643_v40  ;;  %13091 = vmatpush1.bf16.msra.mxu0 %v16954_v5  ;;  %v16966_v40 = vld [vmem:[%s18080_s13 + $0x440] ss:$16 sps:$4 sm:$0xff]   ;;  %v17029_v5 = vld [vmem:[%s18080_s13 + $0x588] ss:$16 sps:$4 sm:$0xff]  }
0x1904   : > { %13122 = vmatprep.mubr.bf16.mxu0 %v19791_v58  ;;  %13435 = vmatpush1.bf16.msra.mxu1 %v16957_v7  ;;  %v17034_v7 = vld [vmem:[%s18080_s13 + $0x5a4] ss:$16 sps:$4 sm:$0xff]  }
0x1905   : > { %13466 = vmatprep.mubr.bf16.mxu1 %v19791_v58  ;;  %13092 = vmatprep.subr.bf16.mxu0 %v16962_v37  ;;  %v16972_v58 = vld [vmem:[%s18080_s13 + $0x460] ss:$16 sps:$4 sm:$0xff]   ;;  %v17037_v37 = vld [vmem:[%s18080_s13 + $0x5ac] ss:$16 sps:$4 sm:$0xff]  }
0x1906   : > { %13436 = vmatprep.subr.bf16.mxu1 %v16965_v17  ;;  %v17032_v17 = vld [vmem:[%s18080_s13 + $0x5a0] ss:$16 sps:$4 sm:$0xff]  }
0x1907   : > { %13093 = vmatpush1.bf16.msra.mxu0 %v16960_v34  ;;  %v17035_v34 = vld [vmem:[%s18080_s13 + $0x5a8] ss:$16 sps:$4 sm:$0xff]  }
0x1908   : > { %13437 = vmatpush1.bf16.msra.mxu1 %v16963_v3  ;;  %13094 = vmatprep.subr.bf16.mxu0 %v16968_v6  ;;  %v17040_v3 = vld [vmem:[%s18080_s13 + $0x5c4] ss:$16 sps:$4 sm:$0xff]   ;;  %v17043_v6 = vld [vmem:[%s18080_s13 + $0x5cc] ss:$16 sps:$4 sm:$0xff]  }
0x1909   : > { %13438 = vmatprep.subr.bf16.mxu1 %v16971_v47  ;;  %v17038_v47 = vld [vmem:[%s18080_s13 + $0x5c0] ss:$16 sps:$4 sm:$0xff]  }
0x190b   : > { %13095 = vmatpush1.bf16.msra.mxu0 %v16966_v40  ;;  %v17041_v40 = vld [vmem:[%s18080_s13 + $0x5c8] ss:$16 sps:$4 sm:$0xff]  }
0x190c   : > { %13439 = vmatpush1.bf16.msra.mxu1 %v16969_v48  ;;  %13096 = vmatprep.subr.bf16.mxu0 %v16974_v11  ;;  %v17046_v48 = vld [vmem:[%s18080_s13 + $0x5e4] ss:$16 sps:$4 sm:$0xff]   ;;  %v17049_v11 = vld [vmem:[%s18080_s13 + $0x5ec] ss:$16 sps:$4 sm:$0xff]  }
0x190d   : > { %13440 = vmatprep.subr.bf16.mxu1 %v16977_v44  ;;  %v17044_v44 = vld [vmem:[%s18080_s13 + $0x5e0] ss:$16 sps:$4 sm:$0xff]  }
0x190f   : > { %13097 = vmatpush1.bf16.msra.mxu0 %v16972_v58  ;;  %v17047_v58 = vld [vmem:[%s18080_s13 + $0x5e8] ss:$16 sps:$4 sm:$0xff]  }
0x1910   : > { %13441 = vmatpush1.bf16.msra.mxu1 %v16975_v60  ;;  %13098 = vmatprep.subr.bf16.mxu0 %v16980_v0  ;;  %v17052_v60 = vld [vmem:[%s18080_s13 + $0x604] ss:$16 sps:$4 sm:$0xff]   ;;  %v17055_v0 = vld [vmem:[%s18080_s13 + $0x60c] ss:$16 sps:$4 sm:$0xff]  }
0x1911   : > { %13442 = vmatprep.subr.bf16.mxu1 %v16983_v12  ;;  %v17050_v12 = vld [vmem:[%s18080_s13 + $0x600] ss:$16 sps:$4 sm:$0xff]  }
0x1913   : > { %13099 = vmatpush1.bf16.msra.mxu0 %v16978_v19  ;;  %v17053_v19 = vld [vmem:[%s18080_s13 + $0x608] ss:$16 sps:$4 sm:$0xff]  }
0x1914   : > { %13443 = vmatpush1.bf16.msra.mxu1 %v16981_v16  ;;  %13100 = vmatprep.subr.bf16.mxu0 %v16986_v43  ;;  %v17058_v16 = vld [vmem:[%s18080_s13 + $0x624] ss:$16 sps:$4 sm:$0xff]   ;;  %v17061_v43 = vld [vmem:[%s18080_s13 + $0x62c] ss:$16 sps:$4 sm:$0xff]  }
0x1915   : > { %13444 = vmatprep.subr.bf16.mxu1 %v16989_v46  ;;  %v17056_v46 = vld [vmem:[%s18080_s13 + $0x620] ss:$16 sps:$4 sm:$0xff]  }
0x1917   : > { %13101 = vmatpush1.bf16.msra.mxu0 %v16984_v38  ;;  %v17059_v38 = vld [vmem:[%s18080_s13 + $0x628] ss:$16 sps:$4 sm:$0xff]  }
0x1918   : > { %13445 = vmatpush1.bf16.msra.mxu1 %v16987_v23  ;;  %13102 = vmatprep.subr.bf16.mxu0 %v16992_v14  ;;  %v17064_v23 = vld [vmem:[%s18080_s13 + $0x644] ss:$16 sps:$4 sm:$0xff]   ;;  %v17067_v14 = vld [vmem:[%s18080_s13 + $0x64c] ss:$16 sps:$4 sm:$0xff]  }
0x1919   : > { %13446 = vmatprep.subr.bf16.mxu1 %v16995_v18  ;;  %v17065_v18 = vld [vmem:[%s18080_s13 + $0x648] ss:$16 sps:$4 sm:$0xff]  }
0x191b   : > { %13103 = vmatpush1.bf16.msra.mxu0 %v16990_v39  ;;  %v17070_v39 = vld [vmem:[%s18080_s13 + $0x664] ss:$16 sps:$4 sm:$0xff]  }
0x191c   : > { %13447 = vmatpush1.bf16.msra.mxu1 %v16993_v57  ;;  %13104 = vmatprep.subr.bf16.mxu0 %v16998_v15  ;;  %v17073_v57 = vld [vmem:[%s18080_s13 + $0x66c] ss:$16 sps:$4 sm:$0xff]   ;;  %v17071_v15 = vld [vmem:[%s18080_s13 + $0x668] ss:$16 sps:$4 sm:$0xff]  }
0x191d   : > { %13448 = vmatprep.subr.bf16.mxu1 %v17001_v51  ;;  %v17076_v51 = vld [vmem:[%s18080_s13 + $0x684] ss:$16 sps:$4 sm:$0xff]  }
0x191f   : > { %13105 = vmatpush1.bf16.msra.mxu0 %v16996_v45  ;;  %v17079_v45 = vld [vmem:[%s18080_s13 + $0x68c] ss:$16 sps:$4 sm:$0xff]  }
0x1920   : > { %13449 = vmatpush1.bf16.msra.mxu1 %v16999_v8  ;;  %13106 = vmatprep.subr.bf16.mxu0 %v17004_v54  ;;  %v17074_v8 = vld [vmem:[%s18080_s13 + $0x680] ss:$16 sps:$4 sm:$0xff]   ;;  %v17077_v54 = vld [vmem:[%s18080_s13 + $0x688] ss:$16 sps:$4 sm:$0xff]  }
0x1921   : > { %13450 = vmatprep.subr.bf16.mxu1 %v17007_v63  ;;  %v17082_v63 = vld [vmem:[%s18080_s13 + $0x6a4] ss:$16 sps:$4 sm:$0xff]  }
0x1923   : > { %13107 = vmatpush1.bf16.msra.mxu0 %v17002_v61  ;;  %v17085_v61 = vld [vmem:[%s18080_s13 + $0x6ac] ss:$16 sps:$4 sm:$0xff]  }
0x1924   : > { %13451 = vmatpush1.bf16.msra.mxu1 %v17005_v28  ;;  %13108 = vmatprep.subr.bf16.mxu0 %v17010_v32  ;;  %v17080_v28 = vld [vmem:[%s18080_s13 + $0x6a0] ss:$16 sps:$4 sm:$0xff]   ;;  %v17083_v32 = vld [vmem:[%s18080_s13 + $0x6a8] ss:$16 sps:$4 sm:$0xff]  }
0x1925   : > { %13452 = vmatprep.subr.bf16.mxu1 %v17013_v21  ;;  %v17088_v21 = vld [vmem:[%s18080_s13 + $0x6c4] ss:$16 sps:$4 sm:$0xff]  }
0x1927   : > { %13109 = vmatpush1.bf16.msra.mxu0 %v17008_v13 }
0x1928   : > { %13453 = vmatpush1.bf16.msra.mxu1 %v17011_v4  ;;  %13110 = vmatprep.subr.bf16.mxu0 %v17016_v62  ;;  %v17091_v4 = vld [vmem:[%s18080_s13 + $0x6cc] ss:$16 sps:$4 sm:$0xff]  }
0x1929   : > { %13454 = vmatprep.subr.bf16.mxu1 %v17019_v53 }
0x192b   : > { %13111 = vmatpush1.bf16.msra.mxu0 %v17014_v29  ;;  %v17086_v29 = vld [vmem:[%s18080_s13 + $0x6c0] ss:$16 sps:$4 sm:$0xff]  }
0x192c   : > { %13455 = vmatpush1.bf16.msra.mxu1 %v17017_v1  ;;  %13112 = vmatprep.subr.bf16.mxu0 %v17022_v2 }
0x192d   : > { %13456 = vmatprep.subr.bf16.mxu1 %v17025_v59  ;;  %v17089_v59 = vld [vmem:[%s18080_s13 + $0x6c8] ss:$16 sps:$4 sm:$0xff]  }
0x192f   : > { %13113 = vmatpush1.bf16.msra.mxu0 %v17020_v24  ;;  %v17094_v24 = vld [vmem:[%s18080_s13 + $0x6e4] ss:$16 sps:$4 sm:$0xff]  }
0x1930   : > { %13457 = vmatpush1.bf16.msra.mxu1 %v17023_v31  ;;  %13114 = vmatprep.subr.bf16.mxu0 %v17028_v49 }
0x1931   : > { %13458 = vmatprep.subr.bf16.mxu1 %v17031_v35 }
0x1933   : > { %13115 = vmatpush1.bf16.msra.mxu0 %v17026_v36 }
0x1934   : > { %13459 = vmatpush1.bf16.msra.mxu1 %v17029_v5  ;;  %13116 = vmatprep.subr.bf16.mxu0 %v17034_v7  ;;  %v17097_v5 = vld [vmem:[%s18080_s13 + $0x6ec] ss:$16 sps:$4 sm:$0xff]  }
0x1935   : > { %13460 = vmatprep.subr.bf16.mxu1 %v17037_v37 }
0x1937   : > { %13117 = vmatpush1.bf16.msra.mxu0 %v17032_v17 }
0x1938   : > { %13461 = vmatpush1.bf16.msra.mxu1 %v17035_v34  ;;  %13118 = vmatprep.subr.bf16.mxu0 %v17040_v3 }
0x1939   : > { %13462 = vmatprep.subr.bf16.mxu1 %v17043_v6 }
0x193b   : > { %13119 = vmatpush1.bf16.msra.mxu0 %v17038_v47 }
0x193c   : > { %13463 = vmatpush1.bf16.msra.mxu1 %v17041_v40  ;;  %13120 = vmatprep.subr.bf16.mxu0 %v17046_v48 }
0x193d   : > { %13464 = vmatprep.subr.bf16.mxu1 %v17049_v11 }
0x193f   : > { %13121 = vmatpush1.bf16.msra.mxu0 %v17044_v44  ;;  %v17092_v44 = vld [vmem:[%s18080_s13 + $0x6e0] ss:$16 sps:$4 sm:$0xff]  }
0x1940   : > { %13465 = vmatpush1.bf16.msra.mxu1 %v17047_v58  ;;  %13133 = vmatprep.subr.bf16.mxu0 %v17052_v60  ;;  %v17095_v60 = vld [vmem:[%s18080_s13 + $0x6e8] ss:$16 sps:$4 sm:$0xff]  }
0x1941   : > { %13477 = vmatprep.subr.bf16.mxu1 %v17055_v0  ;;  %v17100_v0 = vld [vmem:[%s18080_s13 + $0x704] ss:$16 sps:$4 sm:$0xff]  }
0x1942   : > { %13123 = vmatmul.mubr.bf16.vlgmr.msra.gmra.mrb[96].mxu0 %v19785_v33 }
0x1943   : > { %13467 = vmatmul.mubr.bf16.vlgmr.msra.gmra.mrb[96].mxu1 %v19785_v33  ;;  %13134 = vmatpush1.bf16.msra.mxu0 %v17050_v12  ;;  %v17062_v33 = vld [vmem:[%s18080_s13 + $0x640] ss:$16 sps:$4 sm:$0xff]   ;;  %v17103_v12 = vld [vmem:[%s18080_s13 + $0x70c] ss:$16 sps:$4 sm:$0xff]  }
0x1944   : > { %13165 = vmatprep.mubr.bf16.mxu0 %v19793_v22  ;;  %13478 = vmatpush1.bf16.msra.mxu1 %v17053_v19  ;;  %v17098_v19 = vld [vmem:[%s18080_s13 + $0x700] ss:$16 sps:$4 sm:$0xff]  }
0x1945   : > { %13509 = vmatprep.mubr.bf16.mxu1 %v19793_v22  ;;  %13135 = vmatprep.subr.bf16.mxu0 %v17058_v16  ;;  %v17068_v22 = vld [vmem:[%s18080_s13 + $0x660] ss:$16 sps:$4 sm:$0xff]   ;;  %v17101_v16 = vld [vmem:[%s18080_s13 + $0x708] ss:$16 sps:$4 sm:$0xff]  }
0x1946   : > { %13479 = vmatprep.subr.bf16.mxu1 %v17061_v43  ;;  %v17106_v43 = vld [vmem:[%s18080_s13 + $0x724] ss:$16 sps:$4 sm:$0xff]  }
0x1947   : > { %13136 = vmatpush1.bf16.msra.mxu0 %v17056_v46  ;;  %v17109_v46 = vld [vmem:[%s18080_s13 + $0x72c] ss:$16 sps:$4 sm:$0xff]  }
0x1948   : > { %13480 = vmatpush1.bf16.msra.mxu1 %v17059_v38  ;;  %13137 = vmatprep.subr.bf16.mxu0 %v17064_v23  ;;  %v17104_v38 = vld [vmem:[%s18080_s13 + $0x720] ss:$16 sps:$4 sm:$0xff]   ;;  %v17107_v23 = vld [vmem:[%s18080_s13 + $0x728] ss:$16 sps:$4 sm:$0xff]  }
0x1949   : > { %13481 = vmatprep.subr.bf16.mxu1 %v17067_v14  ;;  %v17112_v14 = vld [vmem:[%s18080_s13 + $0x744] ss:$16 sps:$4 sm:$0xff]  }
0x194b   : > { %13138 = vmatpush1.bf16.msra.mxu0 %v17062_v33  ;;  %v17115_v33 = vld [vmem:[%s18080_s13 + $0x74c] ss:$16 sps:$4 sm:$0xff]  }
0x194c   : > { %13482 = vmatpush1.bf16.msra.mxu1 %v17065_v18  ;;  %13139 = vmatprep.subr.bf16.mxu0 %v17070_v39  ;;  %v17110_v18 = vld [vmem:[%s18080_s13 + $0x740] ss:$16 sps:$4 sm:$0xff]   ;;  %v17113_v39 = vld [vmem:[%s18080_s13 + $0x748] ss:$16 sps:$4 sm:$0xff]  }
0x194d   : > { %13483 = vmatprep.subr.bf16.mxu1 %v17073_v57  ;;  %v17118_v57 = vld [vmem:[%s18080_s13 + $0x764] ss:$16 sps:$4 sm:$0xff]  }
0x194f   : > { %13140 = vmatpush1.bf16.msra.mxu0 %v17068_v22  ;;  %v17121_v22 = vld [vmem:[%s18080_s13 + $0x76c] ss:$16 sps:$4 sm:$0xff]  }
0x1950   : > { %13484 = vmatpush1.bf16.msra.mxu1 %v17071_v15  ;;  %13141 = vmatprep.subr.bf16.mxu0 %v17076_v51  ;;  %v17116_v15 = vld [vmem:[%s18080_s13 + $0x760] ss:$16 sps:$4 sm:$0xff]   ;;  %v17119_v51 = vld [vmem:[%s18080_s13 + $0x768] ss:$16 sps:$4 sm:$0xff]  }
0x1951   : > { %13485 = vmatprep.subr.bf16.mxu1 %v17079_v45  ;;  %v17124_v45 = vld [vmem:[%s18080_s13 + $0x784] ss:$16 sps:$4 sm:$0xff]  }
0x1953   : > { %13142 = vmatpush1.bf16.msra.mxu0 %v17074_v8  ;;  %v17127_v8 = vld [vmem:[%s18080_s13 + $0x78c] ss:$16 sps:$4 sm:$0xff]  }
0x1954   : > { %13486 = vmatpush1.bf16.msra.mxu1 %v17077_v54  ;;  %13143 = vmatprep.subr.bf16.mxu0 %v17082_v63  ;;  %v17122_v54 = vld [vmem:[%s18080_s13 + $0x780] ss:$16 sps:$4 sm:$0xff]   ;;  %v17125_v63 = vld [vmem:[%s18080_s13 + $0x788] ss:$16 sps:$4 sm:$0xff]  }
0x1955   : > { %v9789_v13 = vpop.f32.mrb[92].mxu0  ;;  %13487 = vmatprep.subr.bf16.mxu1 %v17085_v61  ;;  %v17130_v61 = vld [vmem:[%s18080_s13 + $0x7a4] ss:$16 sps:$4 sm:$0xff]  }
0x1956   : > { %v9875_v62 = vpop.f32.mrb[92].mxu1  ;;  %v9791_v53 = vpop.f32.mrb[93].mxu0  ;;  %v9896_v31 = vmax.f32 %v9789_v13, 0.0  ;;  %v17136_v13 = vld [vmem:[%s18080_s13 + $0x7c4] ss:$16 sps:$4 sm:$0xff]  }
0x1957   : > { %v9877_v1 = vpop.f32.mrb[93].mxu1  ;;  %v9793_v2 = vpop.f32.mrb[94].mxu0  ;;  %13144 = vmatpush1.bf16.msra.mxu0 %v17080_v28  ;;  %v9898_v7 = vmax.f32 %v9875_v62, 0.0  ;;  %v9897_v37 = vmax.f32 %v9791_v53, 0.0  ;;  %v17133_v28 = vld [vmem:[%s18080_s13 + $0x7ac] ss:$16 sps:$4 sm:$0xff]  }
0x1958   : > { %v9912_v49 = vmax.f32 %v9793_v2, 0.0  ;;  %v9879_v35 = vpop.f32.mrb[94].mxu1  ;;  %13488 = vmatpush1.bf16.msra.mxu1 %v17083_v32  ;;  %v9795_v36 = vpop.f32.mrb[95].mxu0  ;;  %13145 = vmatprep.subr.bf16.mxu0 %v17088_v21  ;;  %v9899_v6 = vmax.f32 %v9877_v1, 0.0  ;;  %v17128_v32 = vld [vmem:[%s18080_s13 + $0x7a0] ss:$16 sps:$4 sm:$0xff]  }
0x1959   : > { %v9914_v17 = vmax.f32 %v9879_v35, 0.0  ;;  %v9913_v34 = vmax.f32 %v9795_v36, 0.0  ;;  %v9881_v3 = vpop.f32.mrb[95].mxu1  ;;  %13489 = vmatprep.subr.bf16.mxu1 %v17091_v4  ;;  %v17131_v21 = vld [vmem:[%s18080_s13 + $0x7a8] ss:$16 sps:$4 sm:$0xff]  }
0x195a   : > { %v20069_v47 = vpack.c.bf16 %v9912_v49, %v9896_v31  ;;  %v9915_v40 = vmax.f32 %v9881_v3, 0.0  ;;  %v17139_v4 = vld [vmem:[%s18080_s13 + $0x7cc] ss:$16 sps:$4 sm:$0xff]   ;;  %v17134_v62 = vld [vmem:[%s18080_s13 + $0x7c0] ss:$16 sps:$4 sm:$0xff]  }
0x195b   : > { %v20071_v48 = vpack.c.bf16 %v9914_v17, %v9898_v7  ;;  %v20073_v11 = vpack.c.bf16 %v9913_v34, %v9897_v37  ;;  %13146 = vmatpush1.bf16.msra.mxu0 %v17086_v29  ;;  %v17137_v53 = vld [vmem:[%s18080_s13 + $0x7c8] ss:$16 sps:$4 sm:$0xff]   ;;  %v17142_v29 = vld [vmem:[%s18080_s13 + $0x7e4] ss:$16 sps:$4 sm:$0xff]   ;;  %v17145_v1 = vld [vmem:[%s18080_s13 + $0x7ec] ss:$16 sps:$4 sm:$0xff]  }
0x195c   : > { %v20076_v58 = vpack.c.bf16 %v9915_v40, %v9899_v6  ;;  %13490 = vmatpush1.bf16.msra.mxu1 %v17089_v59  ;;  %13147 = vmatprep.subr.bf16.mxu0 %v17094_v24  ;;  %v17140_v2 = vld [vmem:[%s18080_s13 + $0x7e0] ss:$16 sps:$4 sm:$0xff]   ;;  %v17143_v59 = vld [vmem:[%s18080_s13 + $0x7e8] ss:$16 sps:$4 sm:$0xff]   ;;  %v17148_v24 = vld [vmem:[%s18080_s13 + $0x804] ss:$16 sps:$4 sm:$0xff]  }
0x195d   : > { %13491 = vmatprep.subr.bf16.mxu1 %v17097_v5  ;;  %v17151_v31 = vld [vmem:[%s18080_s13 + $0x80c] ss:$16 sps:$4 sm:$0xff]   ;;  %v17146_v49 = vld [vmem:[%s18080_s13 + $0x800] ss:$16 sps:$4 sm:$0xff]   ;;  %v17149_v35 = vld [vmem:[%s18080_s13 + $0x808] ss:$16 sps:$4 sm:$0xff]  }
0x195e   : > { %v17154_v36 = vld [vmem:[%s18080_s13 + $0x824] ss:$16 sps:$4 sm:$0xff]   ;;  %v17157_v5 = vld [vmem:[%s18080_s13 + $0x82c] ss:$16 sps:$4 sm:$0xff]   ;;  %v17152_v7 = vld [vmem:[%s18080_s13 + $0x820] ss:$16 sps:$4 sm:$0xff]  }
0x195f   : > { %13148 = vmatpush1.bf16.msra.mxu0 %v17092_v44  ;;  %v17155_v37 = vld [vmem:[%s18080_s13 + $0x828] ss:$16 sps:$4 sm:$0xff]   ;;  %v17160_v17 = vld [vmem:[%s18080_s13 + $0x844] ss:$16 sps:$4 sm:$0xff]   ;;  %v17163_v34 = vld [vmem:[%s18080_s13 + $0x84c] ss:$16 sps:$4 sm:$0xff]  }
0x1960   : > { %13492 = vmatpush1.bf16.msra.mxu1 %v17095_v60  ;;  %13149 = vmatprep.subr.bf16.mxu0 %v17100_v0  ;;  %v17161_v3 = vld [vmem:[%s18080_s13 + $0x848] ss:$16 sps:$4 sm:$0xff]   ;;  %v17166_v6 = vld [vmem:[%s18080_s13 + $0x864] ss:$16 sps:$4 sm:$0xff]   ;;  %v17169_v40 = vld [vmem:[%s18080_s13 + $0x86c] ss:$16 sps:$4 sm:$0xff]  }
0x1961   : > { %13493 = vmatprep.subr.bf16.mxu1 %v17103_v12  ;;  %v17167_v44 = vld [vmem:[%s18080_s13 + $0x868] ss:$16 sps:$4 sm:$0xff]   ;;  %v17172_v60 = vld [vmem:[%s18080_s13 + $0x884] ss:$16 sps:$4 sm:$0xff]   ;;  %v17175_v0 = vld [vmem:[%s18080_s13 + $0x88c] ss:$16 sps:$4 sm:$0xff]  }
0x1962   : > { %v17170_v12 = vld [vmem:[%s18080_s13 + $0x880] ss:$16 sps:$4 sm:$0xff]  }
0x1963   : > { %13150 = vmatpush1.bf16.msra.mxu0 %v17098_v19  ;;  %v17173_v19 = vld [vmem:[%s18080_s13 + $0x888] ss:$16 sps:$4 sm:$0xff]  }
0x1964   : > { %13494 = vmatpush1.bf16.msra.mxu1 %v17101_v16  ;;  %13151 = vmatprep.subr.bf16.mxu0 %v17106_v43  ;;  %v17178_v16 = vld [vmem:[%s18080_s13 + $0x8a4] ss:$16 sps:$4 sm:$0xff]   ;;  %v17181_v43 = vld [vmem:[%s18080_s13 + $0x8ac] ss:$16 sps:$4 sm:$0xff]  }
0x1965   : > { %13495 = vmatprep.subr.bf16.mxu1 %v17109_v46  ;;  %v17176_v46 = vld [vmem:[%s18080_s13 + $0x8a0] ss:$16 sps:$4 sm:$0xff]  }
0x1967   : > { %13152 = vmatpush1.bf16.msra.mxu0 %v17104_v38  ;;  %v17179_v38 = vld [vmem:[%s18080_s13 + $0x8a8] ss:$16 sps:$4 sm:$0xff]  }
0x1968   : > { %13496 = vmatpush1.bf16.msra.mxu1 %v17107_v23  ;;  %13153 = vmatprep.subr.bf16.mxu0 %v17112_v14  ;;  %v17184_v23 = vld [vmem:[%s18080_s13 + $0x8c4] ss:$16 sps:$4 sm:$0xff]   ;;  %v17187_v14 = vld [vmem:[%s18080_s13 + $0x8cc] ss:$16 sps:$4 sm:$0xff]  }
0x1969   : > { %13497 = vmatprep.subr.bf16.mxu1 %v17115_v33  ;;  %v17182_v33 = vld [vmem:[%s18080_s13 + $0x8c0] ss:$16 sps:$4 sm:$0xff]  }
0x196b   : > { %13154 = vmatpush1.bf16.msra.mxu0 %v17110_v18  ;;  %v17185_v18 = vld [vmem:[%s18080_s13 + $0x8c8] ss:$16 sps:$4 sm:$0xff]  }
0x196c   : > { %13498 = vmatpush1.bf16.msra.mxu1 %v17113_v39  ;;  %13155 = vmatprep.subr.bf16.mxu0 %v17118_v57  ;;  %v17190_v39 = vld [vmem:[%s18080_s13 + $0x8e4] ss:$16 sps:$4 sm:$0xff]   ;;  %v17193_v57 = vld [vmem:[%s18080_s13 + $0x8ec] ss:$16 sps:$4 sm:$0xff]  }
0x196d   : > { %13499 = vmatprep.subr.bf16.mxu1 %v17121_v22  ;;  %v17188_v22 = vld [vmem:[%s18080_s13 + $0x8e0] ss:$16 sps:$4 sm:$0xff]  }
0x196f   : > { %13156 = vmatpush1.bf16.msra.mxu0 %v17116_v15  ;;  %v17191_v15 = vld [vmem:[%s18080_s13 + $0x8e8] ss:$16 sps:$4 sm:$0xff]  }
0x1970   : > { %13500 = vmatpush1.bf16.msra.mxu1 %v17119_v51  ;;  %13157 = vmatprep.subr.bf16.mxu0 %v17124_v45  ;;  %v17196_v51 = vld [vmem:[%s18080_s13 + $0x904] ss:$16 sps:$4 sm:$0xff]   ;;  %v17199_v45 = vld [vmem:[%s18080_s13 + $0x90c] ss:$16 sps:$4 sm:$0xff]  }
0x1971   : > { %13501 = vmatprep.subr.bf16.mxu1 %v17127_v8  ;;  %v17194_v8 = vld [vmem:[%s18080_s13 + $0x900] ss:$16 sps:$4 sm:$0xff]  }
0x1973   : > { %13158 = vmatpush1.bf16.msra.mxu0 %v17122_v54  ;;  %v17197_v54 = vld [vmem:[%s18080_s13 + $0x908] ss:$16 sps:$4 sm:$0xff]  }
0x1974   : > { %13502 = vmatpush1.bf16.msra.mxu1 %v17125_v63  ;;  %13159 = vmatprep.subr.bf16.mxu0 %v17130_v61  ;;  %v17202_v63 = vld [vmem:[%s18080_s13 + $0x924] ss:$16 sps:$4 sm:$0xff]   ;;  %v17205_v61 = vld [vmem:[%s18080_s13 + $0x92c] ss:$16 sps:$4 sm:$0xff]  }
0x1975   : > { %13503 = vmatprep.subr.bf16.mxu1 %v17133_v28  ;;  %v17200_v28 = vld [vmem:[%s18080_s13 + $0x920] ss:$16 sps:$4 sm:$0xff]  }
0x1977   : > { %13160 = vmatpush1.bf16.msra.mxu0 %v17128_v32  ;;  %v17203_v32 = vld [vmem:[%s18080_s13 + $0x928] ss:$16 sps:$4 sm:$0xff]  }
0x1978   : > { %13504 = vmatpush1.bf16.msra.mxu1 %v17131_v21  ;;  %13161 = vmatprep.subr.bf16.mxu0 %v17136_v13  ;;  %v17208_v21 = vld [vmem:[%s18080_s13 + $0x944] ss:$16 sps:$4 sm:$0xff]   ;;  %v17211_v13 = vld [vmem:[%s18080_s13 + $0x94c] ss:$16 sps:$4 sm:$0xff]  }
0x1979   : > { %13505 = vmatprep.subr.bf16.mxu1 %v17139_v4  ;;  %v17206_v4 = vld [vmem:[%s18080_s13 + $0x940] ss:$16 sps:$4 sm:$0xff]  }
0x197b   : > { %13162 = vmatpush1.bf16.msra.mxu0 %v17134_v62  ;;  %v17209_v62 = vld [vmem:[%s18080_s13 + $0x948] ss:$16 sps:$4 sm:$0xff]  }
0x197c   : > { %13506 = vmatpush1.bf16.msra.mxu1 %v17137_v53  ;;  %13163 = vmatprep.subr.bf16.mxu0 %v17142_v29  ;;  %v17214_v53 = vld [vmem:[%s18080_s13 + $0x964] ss:$16 sps:$4 sm:$0xff]   ;;  %v17217_v29 = vld [vmem:[%s18080_s13 + $0x96c] ss:$16 sps:$4 sm:$0xff]  }
0x197d   : > { %13507 = vmatprep.subr.bf16.mxu1 %v17145_v1  ;;  %v17212_v1 = vld [vmem:[%s18080_s13 + $0x960] ss:$16 sps:$4 sm:$0xff]  }
0x197f   : > { %13164 = vmatpush1.bf16.msra.mxu0 %v17140_v2  ;;  %v17215_v2 = vld [vmem:[%s18080_s13 + $0x968] ss:$16 sps:$4 sm:$0xff]  }
0x1980   : > { %13508 = vmatpush1.bf16.msra.mxu1 %v17143_v59  ;;  %13176 = vmatprep.subr.bf16.mxu0 %v17148_v24  ;;  %v17220_v59 = vld [vmem:[%s18080_s13 + $0x984] ss:$16 sps:$4 sm:$0xff]   ;;  %v17223_v24 = vld [vmem:[%s18080_s13 + $0x98c] ss:$16 sps:$4 sm:$0xff]  }
0x1981   : > { %13520 = vmatprep.subr.bf16.mxu1 %v17151_v31  ;;  %v17218_v31 = vld [vmem:[%s18080_s13 + $0x980] ss:$16 sps:$4 sm:$0xff]  }
0x1982   : > { %13166 = vmatmul.mubr.bf16.vlgmr.msra.gmra.mrb[96].mxu0 %v19789_v42 }
0x1983   : > { %13510 = vmatmul.mubr.bf16.vlgmr.msra.gmra.mrb[96].mxu1 %v19789_v42  ;;  %13177 = vmatpush1.bf16.msra.mxu0 %v17146_v49  ;;  %v17158_v42 = vld [vmem:[%s18080_s13 + $0x840] ss:$16 sps:$4 sm:$0xff]   ;;  %v17221_v49 = vld [vmem:[%s18080_s13 + $0x988] ss:$16 sps:$4 sm:$0xff]  }
0x1984   : > { %13208 = vmatprep.mubr.bf16.mxu0 %v19929_v20  ;;  %13521 = vmatpush1.bf16.msra.mxu1 %v17149_v35  ;;  %v17226_v35 = vld [vmem:[%s18080_s13 + $0x9a4] ss:$16 sps:$4 sm:$0xff]  }
0x1985   : > { %13552 = vmatprep.mubr.bf16.mxu1 %v19929_v20  ;;  %13178 = vmatprep.subr.bf16.mxu0 %v17154_v36  ;;  %v17164_v20 = vld [vmem:[%s18080_s13 + $0x860] ss:$16 sps:$4 sm:$0xff]   ;;  %v17229_v36 = vld [vmem:[%s18080_s13 + $0x9ac] ss:$16 sps:$4 sm:$0xff]  }
0x1986   : > { %13522 = vmatprep.subr.bf16.mxu1 %v17157_v5  ;;  %v17224_v5 = vld [vmem:[%s18080_s13 + $0x9a0] ss:$16 sps:$4 sm:$0xff]  }
0x1987   : > { %13179 = vmatpush1.bf16.msra.mxu0 %v17152_v7  ;;  %v17227_v7 = vld [vmem:[%s18080_s13 + $0x9a8] ss:$16 sps:$4 sm:$0xff]  }
0x1988   : > { %13523 = vmatpush1.bf16.msra.mxu1 %v17155_v37  ;;  %13180 = vmatprep.subr.bf16.mxu0 %v17160_v17  ;;  %v17232_v37 = vld [vmem:[%s18080_s13 + $0x9c4] ss:$16 sps:$4 sm:$0xff]   ;;  %v17235_v17 = vld [vmem:[%s18080_s13 + $0x9cc] ss:$16 sps:$4 sm:$0xff]  }
0x1989   : > { %13524 = vmatprep.subr.bf16.mxu1 %v17163_v34  ;;  %v17230_v34 = vld [vmem:[%s18080_s13 + $0x9c0] ss:$16 sps:$4 sm:$0xff]  }
0x198b   : > { %13181 = vmatpush1.bf16.msra.mxu0 %v17158_v42  ;;  %v17233_v42 = vld [vmem:[%s18080_s13 + $0x9c8] ss:$16 sps:$4 sm:$0xff]  }
0x198c   : > { %13525 = vmatpush1.bf16.msra.mxu1 %v17161_v3  ;;  %13182 = vmatprep.subr.bf16.mxu0 %v17166_v6  ;;  %v17238_v3 = vld [vmem:[%s18080_s13 + $0x9e4] ss:$16 sps:$4 sm:$0xff]   ;;  %v17241_v6 = vld [vmem:[%s18080_s13 + $0x9ec] ss:$16 sps:$4 sm:$0xff]  }
0x198d   : > { %13526 = vmatprep.subr.bf16.mxu1 %v17169_v40  ;;  %v17236_v40 = vld [vmem:[%s18080_s13 + $0x9e0] ss:$16 sps:$4 sm:$0xff]  }
0x198f   : > { %13183 = vmatpush1.bf16.msra.mxu0 %v17164_v20  ;;  %v17239_v20 = vld [vmem:[%s18080_s13 + $0x9e8] ss:$16 sps:$4 sm:$0xff]  }
0x1990   : > { %13527 = vmatpush1.bf16.msra.mxu1 %v17167_v44  ;;  %13184 = vmatprep.subr.bf16.mxu0 %v17172_v60  ;;  %v17244_v44 = vld [vmem:[%s18080_s13 + $0xa04] ss:$16 sps:$4 sm:$0xff]   ;;  %v17247_v60 = vld [vmem:[%s18080_s13 + $0xa0c] ss:$16 sps:$4 sm:$0xff]  }
0x1991   : > { %13528 = vmatprep.subr.bf16.mxu1 %v17175_v0  ;;  %v17242_v0 = vld [vmem:[%s18080_s13 + $0xa00] ss:$16 sps:$4 sm:$0xff]  }
0x1993   : > { %13185 = vmatpush1.bf16.msra.mxu0 %v17170_v12  ;;  %v17245_v12 = vld [vmem:[%s18080_s13 + $0xa08] ss:$16 sps:$4 sm:$0xff]  }
0x1994   : > { %13529 = vmatpush1.bf16.msra.mxu1 %v17173_v19  ;;  %13186 = vmatprep.subr.bf16.mxu0 %v17178_v16  ;;  %v17250_v19 = vld [vmem:[%s18080_s13 + $0xa24] ss:$16 sps:$4 sm:$0xff]   ;;  %v17253_v16 = vld [vmem:[%s18080_s13 + $0xa2c] ss:$16 sps:$4 sm:$0xff]  }
0x1995   : > { %13530 = vmatprep.subr.bf16.mxu1 %v17181_v43  ;;  %v17248_v43 = vld [vmem:[%s18080_s13 + $0xa20] ss:$16 sps:$4 sm:$0xff]  }
0x1997   : > { %13187 = vmatpush1.bf16.msra.mxu0 %v17176_v46  ;;  %v17251_v46 = vld [vmem:[%s18080_s13 + $0xa28] ss:$16 sps:$4 sm:$0xff]  }
0x1998   : > { %13531 = vmatpush1.bf16.msra.mxu1 %v17179_v38  ;;  %13188 = vmatprep.subr.bf16.mxu0 %v17184_v23  ;;  %v17256_v38 = vld [vmem:[%s18080_s13 + $0xa44] ss:$16 sps:$4 sm:$0xff]   ;;  %v17259_v23 = vld [vmem:[%s18080_s13 + $0xa4c] ss:$16 sps:$4 sm:$0xff]  }
0x1999   : > { %13532 = vmatprep.subr.bf16.mxu1 %v17187_v14  ;;  %v17257_v14 = vld [vmem:[%s18080_s13 + $0xa48] ss:$16 sps:$4 sm:$0xff]  }
0x199b   : > { %13189 = vmatpush1.bf16.msra.mxu0 %v17182_v33  ;;  %v17262_v33 = vld [vmem:[%s18080_s13 + $0xa64] ss:$16 sps:$4 sm:$0xff]  }
0x199c   : > { %13533 = vmatpush1.bf16.msra.mxu1 %v17185_v18  ;;  %13190 = vmatprep.subr.bf16.mxu0 %v17190_v39  ;;  %v17265_v18 = vld [vmem:[%s18080_s13 + $0xa6c] ss:$16 sps:$4 sm:$0xff]   ;;  %v17263_v39 = vld [vmem:[%s18080_s13 + $0xa68] ss:$16 sps:$4 sm:$0xff]  }
0x199d   : > { %13534 = vmatprep.subr.bf16.mxu1 %v17193_v57  ;;  %v17268_v57 = vld [vmem:[%s18080_s13 + $0xa84] ss:$16 sps:$4 sm:$0xff]  }
0x199f   : > { %13191 = vmatpush1.bf16.msra.mxu0 %v17188_v22  ;;  %v17271_v22 = vld [vmem:[%s18080_s13 + $0xa8c] ss:$16 sps:$4 sm:$0xff]  }
0x19a0   : > { %13535 = vmatpush1.bf16.msra.mxu1 %v17191_v15  ;;  %13192 = vmatprep.subr.bf16.mxu0 %v17196_v51  ;;  %v17266_v15 = vld [vmem:[%s18080_s13 + $0xa80] ss:$16 sps:$4 sm:$0xff]   ;;  %v17269_v51 = vld [vmem:[%s18080_s13 + $0xa88] ss:$16 sps:$4 sm:$0xff]  }
0x19a1   : > { %13536 = vmatprep.subr.bf16.mxu1 %v17199_v45  ;;  %v17274_v45 = vld [vmem:[%s18080_s13 + $0xaa4] ss:$16 sps:$4 sm:$0xff]  }
0x19a3   : > { %13193 = vmatpush1.bf16.msra.mxu0 %v17194_v8  ;;  %v17277_v8 = vld [vmem:[%s18080_s13 + $0xaac] ss:$16 sps:$4 sm:$0xff]  }
0x19a4   : > { %13537 = vmatpush1.bf16.msra.mxu1 %v17197_v54  ;;  %13194 = vmatprep.subr.bf16.mxu0 %v17202_v63  ;;  %v17272_v54 = vld [vmem:[%s18080_s13 + $0xaa0] ss:$16 sps:$4 sm:$0xff]   ;;  %v17275_v63 = vld [vmem:[%s18080_s13 + $0xaa8] ss:$16 sps:$4 sm:$0xff]  }
0x19a5   : > { %13538 = vmatprep.subr.bf16.mxu1 %v17205_v61  ;;  %v17280_v61 = vld [vmem:[%s18080_s13 + $0xac4] ss:$16 sps:$4 sm:$0xff]  }
0x19a7   : > { %13195 = vmatpush1.bf16.msra.mxu0 %v17200_v28  ;;  %v17283_v28 = vld [vmem:[%s18080_s13 + $0xacc] ss:$16 sps:$4 sm:$0xff]  }
0x19a8   : > { %13539 = vmatpush1.bf16.msra.mxu1 %v17203_v32  ;;  %13196 = vmatprep.subr.bf16.mxu0 %v17208_v21  ;;  %v17278_v32 = vld [vmem:[%s18080_s13 + $0xac0] ss:$16 sps:$4 sm:$0xff]   ;;  %v17281_v21 = vld [vmem:[%s18080_s13 + $0xac8] ss:$16 sps:$4 sm:$0xff]  }
0x19a9   : > { %13540 = vmatprep.subr.bf16.mxu1 %v17211_v13  ;;  %v17286_v13 = vld [vmem:[%s18080_s13 + $0xae4] ss:$16 sps:$4 sm:$0xff]  }
0x19ab   : > { %13197 = vmatpush1.bf16.msra.mxu0 %v17206_v4  ;;  %v17289_v4 = vld [vmem:[%s18080_s13 + $0xaec] ss:$16 sps:$4 sm:$0xff]  }
0x19ac   : > { %13541 = vmatpush1.bf16.msra.mxu1 %v17209_v62  ;;  %13198 = vmatprep.subr.bf16.mxu0 %v17214_v53  ;;  %v17284_v62 = vld [vmem:[%s18080_s13 + $0xae0] ss:$16 sps:$4 sm:$0xff]   ;;  %v17287_v53 = vld [vmem:[%s18080_s13 + $0xae8] ss:$16 sps:$4 sm:$0xff]  }
0x19ad   : > { %13542 = vmatprep.subr.bf16.mxu1 %v17217_v29  ;;  %v17292_v29 = vld [vmem:[%s18080_s13 + $0xb04] ss:$16 sps:$4 sm:$0xff]  }
0x19af   : > { %13199 = vmatpush1.bf16.msra.mxu0 %v17212_v1  ;;  %v17295_v1 = vld [vmem:[%s18080_s13 + $0xb0c] ss:$16 sps:$4 sm:$0xff]  }
0x19b0   : > { %13543 = vmatpush1.bf16.msra.mxu1 %v17215_v2  ;;  %13200 = vmatprep.subr.bf16.mxu0 %v17220_v59  ;;  %v17290_v2 = vld [vmem:[%s18080_s13 + $0xb00] ss:$16 sps:$4 sm:$0xff]   ;;  %v17293_v59 = vld [vmem:[%s18080_s13 + $0xb08] ss:$16 sps:$4 sm:$0xff]  }
0x19b1   : > { %13544 = vmatprep.subr.bf16.mxu1 %v17223_v24  ;;  %v17298_v24 = vld [vmem:[%s18080_s13 + $0xb24] ss:$16 sps:$4 sm:$0xff]  }
0x19b3   : > { %13201 = vmatpush1.bf16.msra.mxu0 %v17218_v31  ;;  %v17301_v31 = vld [vmem:[%s18080_s13 + $0xb2c] ss:$16 sps:$4 sm:$0xff]  }
0x19b4   : > { %13545 = vmatpush1.bf16.msra.mxu1 %v17221_v49  ;;  %13202 = vmatprep.subr.bf16.mxu0 %v17226_v35  ;;  %v17296_v49 = vld [vmem:[%s18080_s13 + $0xb20] ss:$16 sps:$4 sm:$0xff]   ;;  %v17299_v35 = vld [vmem:[%s18080_s13 + $0xb28] ss:$16 sps:$4 sm:$0xff]  }
0x19b5   : > { %13546 = vmatprep.subr.bf16.mxu1 %v17229_v36  ;;  %v17304_v36 = vld [vmem:[%s18080_s13 + $0xb44] ss:$16 sps:$4 sm:$0xff]  }
0x19b7   : > { %13203 = vmatpush1.bf16.msra.mxu0 %v17224_v5  ;;  %v17307_v5 = vld [vmem:[%s18080_s13 + $0xb4c] ss:$16 sps:$4 sm:$0xff]  }
0x19b8   : > { %13547 = vmatpush1.bf16.msra.mxu1 %v17227_v7  ;;  %13204 = vmatprep.subr.bf16.mxu0 %v17232_v37  ;;  %v17302_v7 = vld [vmem:[%s18080_s13 + $0xb40] ss:$16 sps:$4 sm:$0xff]   ;;  %v17305_v37 = vld [vmem:[%s18080_s13 + $0xb48] ss:$16 sps:$4 sm:$0xff]  }
0x19b9   : > { %13548 = vmatprep.subr.bf16.mxu1 %v17235_v17  ;;  %v17310_v17 = vld [vmem:[%s18080_s13 + $0xb64] ss:$16 sps:$4 sm:$0xff]  }
0x19bb   : > { %13205 = vmatpush1.bf16.msra.mxu0 %v17230_v34  ;;  %v17313_v34 = vld [vmem:[%s18080_s13 + $0xb6c] ss:$16 sps:$4 sm:$0xff]  }
0x19bc   : > { %13549 = vmatpush1.bf16.msra.mxu1 %v17233_v42  ;;  %13206 = vmatprep.subr.bf16.mxu0 %v17238_v3  ;;  %v17308_v42 = vld [vmem:[%s18080_s13 + $0xb60] ss:$16 sps:$4 sm:$0xff]   ;;  %v17311_v3 = vld [vmem:[%s18080_s13 + $0xb68] ss:$16 sps:$4 sm:$0xff]  }
0x19bd   : > { %13550 = vmatprep.subr.bf16.mxu1 %v17241_v6  ;;  %v17316_v6 = vld [vmem:[%s18080_s13 + $0xb84] ss:$16 sps:$4 sm:$0xff]  }
0x19bf   : > { %13207 = vmatpush1.bf16.msra.mxu0 %v17236_v40  ;;  %v17319_v40 = vld [vmem:[%s18080_s13 + $0xb8c] ss:$16 sps:$4 sm:$0xff]  }
0x19c0   : > { %13551 = vmatpush1.bf16.msra.mxu1 %v17239_v20  ;;  %13219 = vmatprep.subr.bf16.mxu0 %v17244_v44  ;;  %v17314_v20 = vld [vmem:[%s18080_s13 + $0xb80] ss:$16 sps:$4 sm:$0xff]   ;;  %v17317_v44 = vld [vmem:[%s18080_s13 + $0xb88] ss:$16 sps:$4 sm:$0xff]  }
0x19c1   : > { %13563 = vmatprep.subr.bf16.mxu1 %v17247_v60  ;;  %v17322_v60 = vld [vmem:[%s18080_s13 + $0xba4] ss:$16 sps:$4 sm:$0xff]  }
0x19c2   : > { %13209 = vmatmul.mubr.bf16.vlgmr.msra.gmra.mrb[96].mxu0 %v19925_v52 }
0x19c3   : > { %13553 = vmatmul.mubr.bf16.vlgmr.msra.gmra.mrb[96].mxu1 %v19925_v52  ;;  %13220 = vmatpush1.bf16.msra.mxu0 %v17242_v0  ;;  %v17254_v52 = vld [vmem:[%s18080_s13 + $0xa40] ss:$16 sps:$4 sm:$0xff]   ;;  %v17325_v0 = vld [vmem:[%s18080_s13 + $0xbac] ss:$16 sps:$4 sm:$0xff]  }
0x19c4   : > { %13251 = vmatprep.mubr.bf16.mxu0 %v19932_v41  ;;  %13564 = vmatpush1.bf16.msra.mxu1 %v17245_v12  ;;  %v17320_v12 = vld [vmem:[%s18080_s13 + $0xba0] ss:$16 sps:$4 sm:$0xff]  }
0x19c5   : > { %13595 = vmatprep.mubr.bf16.mxu1 %v19932_v41  ;;  %13221 = vmatprep.subr.bf16.mxu0 %v17250_v19  ;;  %v17260_v41 = vld [vmem:[%s18080_s13 + $0xa60] ss:$16 sps:$4 sm:$0xff]   ;;  %v17323_v19 = vld [vmem:[%s18080_s13 + $0xba8] ss:$16 sps:$4 sm:$0xff]  }
0x19c6   : > { %13565 = vmatprep.subr.bf16.mxu1 %v17253_v16  ;;  %v17328_v16 = vld [vmem:[%s18080_s13 + $0xbc4] ss:$16 sps:$4 sm:$0xff]  }
0x19c7   : > { %13222 = vmatpush1.bf16.msra.mxu0 %v17248_v43  ;;  %v17331_v43 = vld [vmem:[%s18080_s13 + $0xbcc] ss:$16 sps:$4 sm:$0xff]  }
0x19c8   : > { %13566 = vmatpush1.bf16.msra.mxu1 %v17251_v46  ;;  %13223 = vmatprep.subr.bf16.mxu0 %v17256_v38  ;;  %v17326_v46 = vld [vmem:[%s18080_s13 + $0xbc0] ss:$16 sps:$4 sm:$0xff]   ;;  %v17329_v38 = vld [vmem:[%s18080_s13 + $0xbc8] ss:$16 sps:$4 sm:$0xff]  }
0x19c9   : > { %13567 = vmatprep.subr.bf16.mxu1 %v17259_v23  ;;  %v17334_v23 = vld [vmem:[%s18080_s13 + $0xbe4] ss:$16 sps:$4 sm:$0xff]  }
0x19cb   : > { %13224 = vmatpush1.bf16.msra.mxu0 %v17254_v52  ;;  %v17337_v52 = vld [vmem:[%s18080_s13 + $0xbec] ss:$16 sps:$4 sm:$0xff]  }
0x19cc   : > { %13568 = vmatpush1.bf16.msra.mxu1 %v17257_v14  ;;  %13225 = vmatprep.subr.bf16.mxu0 %v17262_v33  ;;  %v17332_v14 = vld [vmem:[%s18080_s13 + $0xbe0] ss:$16 sps:$4 sm:$0xff]   ;;  %v17335_v33 = vld [vmem:[%s18080_s13 + $0xbe8] ss:$16 sps:$4 sm:$0xff]  }
0x19cd   : > { %13569 = vmatprep.subr.bf16.mxu1 %v17265_v18  ;;  %v17340_v18 = vld [vmem:[%s18080_s13 + $0xc04] ss:$16 sps:$4 sm:$0xff]  }
0x19cf   : > { %13226 = vmatpush1.bf16.msra.mxu0 %v17260_v41  ;;  %v17343_v41 = vld [vmem:[%s18080_s13 + $0xc0c] ss:$16 sps:$4 sm:$0xff]  }
0x19d0   : > { %13570 = vmatpush1.bf16.msra.mxu1 %v17263_v39  ;;  %13227 = vmatprep.subr.bf16.mxu0 %v17268_v57  ;;  %v17338_v39 = vld [vmem:[%s18080_s13 + $0xc00] ss:$16 sps:$4 sm:$0xff]   ;;  %v17341_v57 = vld [vmem:[%s18080_s13 + $0xc08] ss:$16 sps:$4 sm:$0xff]  }
0x19d1   : > { %13571 = vmatprep.subr.bf16.mxu1 %v17271_v22  ;;  %v17346_v22 = vld [vmem:[%s18080_s13 + $0xc24] ss:$16 sps:$4 sm:$0xff]  }
0x19d3   : > { %13228 = vmatpush1.bf16.msra.mxu0 %v17266_v15  ;;  %v17349_v15 = vld [vmem:[%s18080_s13 + $0xc2c] ss:$16 sps:$4 sm:$0xff]  }
0x19d4   : > { %13572 = vmatpush1.bf16.msra.mxu1 %v17269_v51  ;;  %13229 = vmatprep.subr.bf16.mxu0 %v17274_v45  ;;  %v17344_v51 = vld [vmem:[%s18080_s13 + $0xc20] ss:$16 sps:$4 sm:$0xff]   ;;  %v17347_v45 = vld [vmem:[%s18080_s13 + $0xc28] ss:$16 sps:$4 sm:$0xff]  }
0x19d5   : > { %13573 = vmatprep.subr.bf16.mxu1 %v17277_v8  ;;  %v17352_v8 = vld [vmem:[%s18080_s13 + $0xc44] ss:$16 sps:$4 sm:$0xff]  }
0x19d7   : > { %13230 = vmatpush1.bf16.msra.mxu0 %v17272_v54  ;;  %v17355_v54 = vld [vmem:[%s18080_s13 + $0xc4c] ss:$16 sps:$4 sm:$0xff]  }
0x19d8   : > { %13574 = vmatpush1.bf16.msra.mxu1 %v17275_v63  ;;  %13231 = vmatprep.subr.bf16.mxu0 %v17280_v61  ;;  %v17353_v63 = vld [vmem:[%s18080_s13 + $0xc48] ss:$16 sps:$4 sm:$0xff]   ;;  %v17358_v61 = vld [vmem:[%s18080_s13 + $0xc64] ss:$16 sps:$4 sm:$0xff]  }
0x19d9   : > { %13575 = vmatprep.subr.bf16.mxu1 %v17283_v28  ;;  %v17361_v28 = vld [vmem:[%s18080_s13 + $0xc6c] ss:$16 sps:$4 sm:$0xff]  }
0x19db   : > { %13232 = vmatpush1.bf16.msra.mxu0 %v17278_v32  ;;  %v17359_v32 = vld [vmem:[%s18080_s13 + $0xc68] ss:$16 sps:$4 sm:$0xff]  }
0x19dc   : > { %13576 = vmatpush1.bf16.msra.mxu1 %v17281_v21  ;;  %13233 = vmatprep.subr.bf16.mxu0 %v17286_v13  ;;  %v17364_v21 = vld [vmem:[%s18080_s13 + $0xc84] ss:$16 sps:$4 sm:$0xff]   ;;  %v17367_v13 = vld [vmem:[%s18080_s13 + $0xc8c] ss:$16 sps:$4 sm:$0xff]  }
0x19dd   : > { %13577 = vmatprep.subr.bf16.mxu1 %v17289_v4  ;;  %v17362_v4 = vld [vmem:[%s18080_s13 + $0xc80] ss:$16 sps:$4 sm:$0xff]  }
0x19df   : > { %13234 = vmatpush1.bf16.msra.mxu0 %v17284_v62  ;;  %v17365_v62 = vld [vmem:[%s18080_s13 + $0xc88] ss:$16 sps:$4 sm:$0xff]  }
0x19e0   : > { %13578 = vmatpush1.bf16.msra.mxu1 %v17287_v53  ;;  %13235 = vmatprep.subr.bf16.mxu0 %v17292_v29  ;;  %v17370_v53 = vld [vmem:[%s18080_s13 + $0xca4] ss:$16 sps:$4 sm:$0xff]   ;;  %v17373_v29 = vld [vmem:[%s18080_s13 + $0xcac] ss:$16 sps:$4 sm:$0xff]  }
0x19e1   : > { %13579 = vmatprep.subr.bf16.mxu1 %v17295_v1  ;;  %v17368_v1 = vld [vmem:[%s18080_s13 + $0xca0] ss:$16 sps:$4 sm:$0xff]  }
0x19e3   : > { %13236 = vmatpush1.bf16.msra.mxu0 %v17290_v2  ;;  %v17371_v2 = vld [vmem:[%s18080_s13 + $0xca8] ss:$16 sps:$4 sm:$0xff]  }
0x19e4   : > { %13580 = vmatpush1.bf16.msra.mxu1 %v17293_v59  ;;  %13237 = vmatprep.subr.bf16.mxu0 %v17298_v24  ;;  %v17376_v59 = vld [vmem:[%s18080_s13 + $0xcc4] ss:$16 sps:$4 sm:$0xff]   ;;  %v17379_v24 = vld [vmem:[%s18080_s13 + $0xccc] ss:$16 sps:$4 sm:$0xff]  }
0x19e5   : > { %13581 = vmatprep.subr.bf16.mxu1 %v17301_v31  ;;  %v17374_v31 = vld [vmem:[%s18080_s13 + $0xcc0] ss:$16 sps:$4 sm:$0xff]  }
0x19e7   : > { %13238 = vmatpush1.bf16.msra.mxu0 %v17296_v49  ;;  %v17377_v49 = vld [vmem:[%s18080_s13 + $0xcc8] ss:$16 sps:$4 sm:$0xff]  }
0x19e8   : > { %13582 = vmatpush1.bf16.msra.mxu1 %v17299_v35  ;;  %13239 = vmatprep.subr.bf16.mxu0 %v17304_v36  ;;  %v17382_v35 = vld [vmem:[%s18080_s13 + $0xce4] ss:$16 sps:$4 sm:$0xff]   ;;  %v17385_v36 = vld [vmem:[%s18080_s13 + $0xcec] ss:$16 sps:$4 sm:$0xff]  }
0x19e9   : > { %13583 = vmatprep.subr.bf16.mxu1 %v17307_v5  ;;  %v17380_v5 = vld [vmem:[%s18080_s13 + $0xce0] ss:$16 sps:$4 sm:$0xff]  }
0x19eb   : > { %13240 = vmatpush1.bf16.msra.mxu0 %v17302_v7  ;;  %v17383_v7 = vld [vmem:[%s18080_s13 + $0xce8] ss:$16 sps:$4 sm:$0xff]  }
0x19ec   : > { %13584 = vmatpush1.bf16.msra.mxu1 %v17305_v37  ;;  %13241 = vmatprep.subr.bf16.mxu0 %v17310_v17  ;;  %v17388_v37 = vld [vmem:[%s18080_s13 + $0xd04] ss:$16 sps:$4 sm:$0xff]   ;;  %v17391_v17 = vld [vmem:[%s18080_s13 + $0xd0c] ss:$16 sps:$4 sm:$0xff]  }
0x19ed   : > { %13585 = vmatprep.subr.bf16.mxu1 %v17313_v34  ;;  %v17386_v34 = vld [vmem:[%s18080_s13 + $0xd00] ss:$16 sps:$4 sm:$0xff]  }
0x19ef   : > { %13242 = vmatpush1.bf16.msra.mxu0 %v17308_v42  ;;  %v17389_v42 = vld [vmem:[%s18080_s13 + $0xd08] ss:$16 sps:$4 sm:$0xff]  }
0x19f0   : > { %13586 = vmatpush1.bf16.msra.mxu1 %v17311_v3  ;;  %13243 = vmatprep.subr.bf16.mxu0 %v17316_v6  ;;  %v17394_v3 = vld [vmem:[%s18080_s13 + $0xd24] ss:$16 sps:$4 sm:$0xff]   ;;  %v17397_v6 = vld [vmem:[%s18080_s13 + $0xd2c] ss:$16 sps:$4 sm:$0xff]  }
0x19f1   : > { %13587 = vmatprep.subr.bf16.mxu1 %v17319_v40  ;;  %v17392_v40 = vld [vmem:[%s18080_s13 + $0xd20] ss:$16 sps:$4 sm:$0xff]  }
0x19f3   : > { %13244 = vmatpush1.bf16.msra.mxu0 %v17314_v20  ;;  %v17395_v20 = vld [vmem:[%s18080_s13 + $0xd28] ss:$16 sps:$4 sm:$0xff]  }
0x19f4   : > { %13588 = vmatpush1.bf16.msra.mxu1 %v17317_v44  ;;  %13245 = vmatprep.subr.bf16.mxu0 %v17322_v60  ;;  %v17400_v44 = vld [vmem:[%s18080_s13 + $0xd44] ss:$16 sps:$4 sm:$0xff]   ;;  %v17403_v60 = vld [vmem:[%s18080_s13 + $0xd4c] ss:$16 sps:$4 sm:$0xff]  }
0x19f5   : > { %13589 = vmatprep.subr.bf16.mxu1 %v17325_v0  ;;  %v17398_v0 = vld [vmem:[%s18080_s13 + $0xd40] ss:$16 sps:$4 sm:$0xff]  }
0x19f7   : > { %13246 = vmatpush1.bf16.msra.mxu0 %v17320_v12  ;;  %v17401_v12 = vld [vmem:[%s18080_s13 + $0xd48] ss:$16 sps:$4 sm:$0xff]  }
0x19f8   : > { %13590 = vmatpush1.bf16.msra.mxu1 %v17323_v19  ;;  %13247 = vmatprep.subr.bf16.mxu0 %v17328_v16  ;;  %v17406_v19 = vld [vmem:[%s18080_s13 + $0xd64] ss:$16 sps:$4 sm:$0xff]   ;;  %v17409_v16 = vld [vmem:[%s18080_s13 + $0xd6c] ss:$16 sps:$4 sm:$0xff]  }
0x19f9   : > { %13591 = vmatprep.subr.bf16.mxu1 %v17331_v43  ;;  %v17404_v43 = vld [vmem:[%s18080_s13 + $0xd60] ss:$16 sps:$4 sm:$0xff]  }
0x19fb   : > { %13248 = vmatpush1.bf16.msra.mxu0 %v17326_v46  ;;  %v17407_v46 = vld [vmem:[%s18080_s13 + $0xd68] ss:$16 sps:$4 sm:$0xff]  }
0x19fc   : > { %13592 = vmatpush1.bf16.msra.mxu1 %v17329_v38  ;;  %13249 = vmatprep.subr.bf16.mxu0 %v17334_v23  ;;  %v17412_v38 = vld [vmem:[%s18080_s13 + $0xd84] ss:$16 sps:$4 sm:$0xff]   ;;  %v17415_v23 = vld [vmem:[%s18080_s13 + $0xd8c] ss:$16 sps:$4 sm:$0xff]  }
0x19fd   : > { %13593 = vmatprep.subr.bf16.mxu1 %v17337_v52  ;;  %v17410_v52 = vld [vmem:[%s18080_s13 + $0xd80] ss:$16 sps:$4 sm:$0xff]  }
0x19ff   : > { %13250 = vmatpush1.bf16.msra.mxu0 %v17332_v14  ;;  %v17413_v14 = vld [vmem:[%s18080_s13 + $0xd88] ss:$16 sps:$4 sm:$0xff]  }
0x1a00   : > { %13594 = vmatpush1.bf16.msra.mxu1 %v17335_v33  ;;  %13262 = vmatprep.subr.bf16.mxu0 %v17340_v18  ;;  %v17418_v33 = vld [vmem:[%s18080_s13 + $0xda4] ss:$16 sps:$4 sm:$0xff]   ;;  %v17421_v18 = vld [vmem:[%s18080_s13 + $0xdac] ss:$16 sps:$4 sm:$0xff]  }
0x1a01   : > { %13606 = vmatprep.subr.bf16.mxu1 %v17343_v41  ;;  %v17416_v41 = vld [vmem:[%s18080_s13 + $0xda0] ss:$16 sps:$4 sm:$0xff]  }
0x1a02   : > { %13252 = vmatmul.mubr.bf16.vlgmr.msra.gmra.mrb[96].mxu0 %v19927_v55 }
0x1a03   : > { %13596 = vmatmul.mubr.bf16.vlgmr.msra.gmra.mrb[96].mxu1 %v19927_v55  ;;  %13263 = vmatpush1.bf16.msra.mxu0 %v17338_v39  ;;  %v17350_v55 = vld [vmem:[%s18080_s13 + $0xc40] ss:$16 sps:$4 sm:$0xff]   ;;  %v17419_v39 = vld [vmem:[%s18080_s13 + $0xda8] ss:$16 sps:$4 sm:$0xff]  }
0x1a04   : > { %13294 = vmatprep.mubr.bf16.mxu0 %v20073_v11  ;;  %13607 = vmatpush1.bf16.msra.mxu1 %v17341_v57  ;;  %v17424_v57 = vld [vmem:[%s18080_s13 + $0xdc4] ss:$16 sps:$4 sm:$0xff]  }
0x1a05   : > { %13638 = vmatprep.mubr.bf16.mxu1 %v20073_v11  ;;  %13264 = vmatprep.subr.bf16.mxu0 %v17346_v22  ;;  %v17356_v11 = vld [vmem:[%s18080_s13 + $0xc60] ss:$16 sps:$4 sm:$0xff]   ;;  %v17427_v22 = vld [vmem:[%s18080_s13 + $0xdcc] ss:$16 sps:$4 sm:$0xff]  }
0x1a06   : > { %13608 = vmatprep.subr.bf16.mxu1 %v17349_v15  ;;  %v17422_v15 = vld [vmem:[%s18080_s13 + $0xdc0] ss:$16 sps:$4 sm:$0xff]  }
0x1a07   : > { %13265 = vmatpush1.bf16.msra.mxu0 %v17344_v51  ;;  %v17425_v51 = vld [vmem:[%s18080_s13 + $0xdc8] ss:$16 sps:$4 sm:$0xff]  }
0x1a08   : > { %13609 = vmatpush1.bf16.msra.mxu1 %v17347_v45  ;;  %13266 = vmatprep.subr.bf16.mxu0 %v17352_v8  ;;  %v17430_v45 = vld [vmem:[%s18080_s13 + $0xde4] ss:$16 sps:$4 sm:$0xff]   ;;  %v17433_v8 = vld [vmem:[%s18080_s13 + $0xdec] ss:$16 sps:$4 sm:$0xff]  }
0x1a09   : > { %13610 = vmatprep.subr.bf16.mxu1 %v17355_v54  ;;  %v17428_v54 = vld [vmem:[%s18080_s13 + $0xde0] ss:$16 sps:$4 sm:$0xff]  }
0x1a0b   : > { %13267 = vmatpush1.bf16.msra.mxu0 %v17350_v55  ;;  %v17431_v55 = vld [vmem:[%s18080_s13 + $0xde8] ss:$16 sps:$4 sm:$0xff]  }
0x1a0c   : > { %13611 = vmatpush1.bf16.msra.mxu1 %v17353_v63  ;;  %13268 = vmatprep.subr.bf16.mxu0 %v17358_v61  ;;  %v17436_v63 = vld [vmem:[%s18080_s13 + $0xe04] ss:$16 sps:$4 sm:$0xff]   ;;  %v17439_v61 = vld [vmem:[%s18080_s13 + $0xe0c] ss:$16 sps:$4 sm:$0xff]  }
0x1a0d   : > { %13612 = vmatprep.subr.bf16.mxu1 %v17361_v28  ;;  %v17434_v28 = vld [vmem:[%s18080_s13 + $0xe00] ss:$16 sps:$4 sm:$0xff]  }
0x1a0f   : > { %13269 = vmatpush1.bf16.msra.mxu0 %v17356_v11  ;;  %v17437_v11 = vld [vmem:[%s18080_s13 + $0xe08] ss:$16 sps:$4 sm:$0xff]  }
0x1a10   : > { %13613 = vmatpush1.bf16.msra.mxu1 %v17359_v32  ;;  %13270 = vmatprep.subr.bf16.mxu0 %v17364_v21  ;;  %v17442_v32 = vld [vmem:[%s18080_s13 + $0xe24] ss:$16 sps:$4 sm:$0xff]   ;;  %v17445_v21 = vld [vmem:[%s18080_s13 + $0xe2c] ss:$16 sps:$4 sm:$0xff]  }
0x1a11   : > { %13614 = vmatprep.subr.bf16.mxu1 %v17367_v13  ;;  %v17440_v13 = vld [vmem:[%s18080_s13 + $0xe20] ss:$16 sps:$4 sm:$0xff]  }
0x1a13   : > { %13271 = vmatpush1.bf16.msra.mxu0 %v17362_v4  ;;  %v17443_v4 = vld [vmem:[%s18080_s13 + $0xe28] ss:$16 sps:$4 sm:$0xff]  }
0x1a14   : > { %13615 = vmatpush1.bf16.msra.mxu1 %v17365_v62  ;;  %13272 = vmatprep.subr.bf16.mxu0 %v17370_v53  ;;  %v17448_v62 = vld [vmem:[%s18080_s13 + $0xe44] ss:$16 sps:$4 sm:$0xff]   ;;  %v17451_v53 = vld [vmem:[%s18080_s13 + $0xe4c] ss:$16 sps:$4 sm:$0xff]  }
0x1a15   : > { %13616 = vmatprep.subr.bf16.mxu1 %v17373_v29  ;;  %v17449_v29 = vld [vmem:[%s18080_s13 + $0xe48] ss:$16 sps:$4 sm:$0xff]  }
0x1a17   : > { %13273 = vmatpush1.bf16.msra.mxu0 %v17368_v1  ;;  %v17454_v1 = vld [vmem:[%s18080_s13 + $0xe64] ss:$16 sps:$4 sm:$0xff]  }
0x1a18   : > { %13617 = vmatpush1.bf16.msra.mxu1 %v17371_v2  ;;  %13274 = vmatprep.subr.bf16.mxu0 %v17376_v59  ;;  %v17457_v2 = vld [vmem:[%s18080_s13 + $0xe6c] ss:$16 sps:$4 sm:$0xff]   ;;  %v17455_v59 = vld [vmem:[%s18080_s13 + $0xe68] ss:$16 sps:$4 sm:$0xff]  }
0x1a19   : > { %13618 = vmatprep.subr.bf16.mxu1 %v17379_v24  ;;  %v17460_v24 = vld [vmem:[%s18080_s13 + $0xe84] ss:$16 sps:$4 sm:$0xff]  }
0x1a1b   : > { %13275 = vmatpush1.bf16.msra.mxu0 %v17374_v31  ;;  %v17463_v31 = vld [vmem:[%s18080_s13 + $0xe8c] ss:$16 sps:$4 sm:$0xff]  }
0x1a1c   : > { %13619 = vmatpush1.bf16.msra.mxu1 %v17377_v49  ;;  %13276 = vmatprep.subr.bf16.mxu0 %v17382_v35  ;;  %v17458_v49 = vld [vmem:[%s18080_s13 + $0xe80] ss:$16 sps:$4 sm:$0xff]   ;;  %v17461_v35 = vld [vmem:[%s18080_s13 + $0xe88] ss:$16 sps:$4 sm:$0xff]  }
0x1a1d   : > { %13620 = vmatprep.subr.bf16.mxu1 %v17385_v36  ;;  %v17466_v36 = vld [vmem:[%s18080_s13 + $0xea4] ss:$16 sps:$4 sm:$0xff]  }
0x1a1f   : > { %13277 = vmatpush1.bf16.msra.mxu0 %v17380_v5  ;;  %v17469_v5 = vld [vmem:[%s18080_s13 + $0xeac] ss:$16 sps:$4 sm:$0xff]  }
0x1a20   : > { %13621 = vmatpush1.bf16.msra.mxu1 %v17383_v7  ;;  %13278 = vmatprep.subr.bf16.mxu0 %v17388_v37  ;;  %v17464_v7 = vld [vmem:[%s18080_s13 + $0xea0] ss:$16 sps:$4 sm:$0xff]   ;;  %v17467_v37 = vld [vmem:[%s18080_s13 + $0xea8] ss:$16 sps:$4 sm:$0xff]  }
0x1a21   : > { %13622 = vmatprep.subr.bf16.mxu1 %v17391_v17  ;;  %v17472_v17 = vld [vmem:[%s18080_s13 + $0xec4] ss:$16 sps:$4 sm:$0xff]  }
0x1a23   : > { %13279 = vmatpush1.bf16.msra.mxu0 %v17386_v34  ;;  %v17475_v34 = vld [vmem:[%s18080_s13 + $0xecc] ss:$16 sps:$4 sm:$0xff]  }
0x1a24   : > { %13623 = vmatpush1.bf16.msra.mxu1 %v17389_v42  ;;  %13280 = vmatprep.subr.bf16.mxu0 %v17394_v3  ;;  %v17470_v42 = vld [vmem:[%s18080_s13 + $0xec0] ss:$16 sps:$4 sm:$0xff]   ;;  %v17473_v3 = vld [vmem:[%s18080_s13 + $0xec8] ss:$16 sps:$4 sm:$0xff]  }
0x1a25   : > { %13624 = vmatprep.subr.bf16.mxu1 %v17397_v6  ;;  %v17478_v6 = vld [vmem:[%s18080_s13 + $0xee4] ss:$16 sps:$4 sm:$0xff]  }
0x1a27   : > { %13281 = vmatpush1.bf16.msra.mxu0 %v17392_v40  ;;  %v17481_v40 = vld [vmem:[%s18080_s13 + $0xeec] ss:$16 sps:$4 sm:$0xff]  }
0x1a28   : > { %13625 = vmatpush1.bf16.msra.mxu1 %v17395_v20  ;;  %13282 = vmatprep.subr.bf16.mxu0 %v17400_v44  ;;  %v17476_v20 = vld [vmem:[%s18080_s13 + $0xee0] ss:$16 sps:$4 sm:$0xff]   ;;  %v17479_v44 = vld [vmem:[%s18080_s13 + $0xee8] ss:$16 sps:$4 sm:$0xff]  }
0x1a29   : > { %13626 = vmatprep.subr.bf16.mxu1 %v17403_v60  ;;  %v17484_v60 = vld [vmem:[%s18080_s13 + $0xf04] ss:$16 sps:$4 sm:$0xff]  }
0x1a2b   : > { %13283 = vmatpush1.bf16.msra.mxu0 %v17398_v0  ;;  %v17487_v0 = vld [vmem:[%s18080_s13 + $0xf0c] ss:$16 sps:$4 sm:$0xff]  }
0x1a2c   : > { %13627 = vmatpush1.bf16.msra.mxu1 %v17401_v12  ;;  %13284 = vmatprep.subr.bf16.mxu0 %v17406_v19  ;;  %v17482_v12 = vld [vmem:[%s18080_s13 + $0xf00] ss:$16 sps:$4 sm:$0xff]   ;;  %v17485_v19 = vld [vmem:[%s18080_s13 + $0xf08] ss:$16 sps:$4 sm:$0xff]  }
0x1a2d   : > { %13628 = vmatprep.subr.bf16.mxu1 %v17409_v16  ;;  %v17490_v16 = vld [vmem:[%s18080_s13 + $0xf24] ss:$16 sps:$4 sm:$0xff]  }
0x1a2f   : > { %13285 = vmatpush1.bf16.msra.mxu0 %v17404_v43  ;;  %v17493_v43 = vld [vmem:[%s18080_s13 + $0xf2c] ss:$16 sps:$4 sm:$0xff]  }
0x1a30   : > { %13629 = vmatpush1.bf16.msra.mxu1 %v17407_v46  ;;  %13286 = vmatprep.subr.bf16.mxu0 %v17412_v38  ;;  %v17488_v46 = vld [vmem:[%s18080_s13 + $0xf20] ss:$16 sps:$4 sm:$0xff]   ;;  %v17491_v38 = vld [vmem:[%s18080_s13 + $0xf28] ss:$16 sps:$4 sm:$0xff]  }
0x1a31   : > { %13630 = vmatprep.subr.bf16.mxu1 %v17415_v23  ;;  %v17496_v23 = vld [vmem:[%s18080_s13 + $0xf44] ss:$16 sps:$4 sm:$0xff]  }
0x1a33   : > { %13287 = vmatpush1.bf16.msra.mxu0 %v17410_v52  ;;  %v17499_v52 = vld [vmem:[%s18080_s13 + $0xf4c] ss:$16 sps:$4 sm:$0xff]  }
0x1a34   : > { %13631 = vmatpush1.bf16.msra.mxu1 %v17413_v14  ;;  %13288 = vmatprep.subr.bf16.mxu0 %v17418_v33  ;;  %v17494_v14 = vld [vmem:[%s18080_s13 + $0xf40] ss:$16 sps:$4 sm:$0xff]   ;;  %v17497_v33 = vld [vmem:[%s18080_s13 + $0xf48] ss:$16 sps:$4 sm:$0xff]  }
0x1a35   : > { %13632 = vmatprep.subr.bf16.mxu1 %v17421_v18  ;;  %v17502_v18 = vld [vmem:[%s18080_s13 + $0xf64] ss:$16 sps:$4 sm:$0xff]  }
0x1a37   : > { %13289 = vmatpush1.bf16.msra.mxu0 %v17416_v41  ;;  %v17505_v41 = vld [vmem:[%s18080_s13 + $0xf6c] ss:$16 sps:$4 sm:$0xff]  }
0x1a38   : > { %13633 = vmatpush1.bf16.msra.mxu1 %v17419_v39  ;;  %13290 = vmatprep.subr.bf16.mxu0 %v17424_v57  ;;  %v17500_v39 = vld [vmem:[%s18080_s13 + $0xf60] ss:$16 sps:$4 sm:$0xff]   ;;  %v17503_v57 = vld [vmem:[%s18080_s13 + $0xf68] ss:$16 sps:$4 sm:$0xff]  }
0x1a39   : > { %13634 = vmatprep.subr.bf16.mxu1 %v17427_v22  ;;  %v17508_v22 = vld [vmem:[%s18080_s13 + $0xf84] ss:$16 sps:$4 sm:$0xff]  }
0x1a3b   : > { %13291 = vmatpush1.bf16.msra.mxu0 %v17422_v15  ;;  %v17511_v15 = vld [vmem:[%s18080_s13 + $0xf8c] ss:$16 sps:$4 sm:$0xff]  }
0x1a3c   : > { %13635 = vmatpush1.bf16.msra.mxu1 %v17425_v51  ;;  %13292 = vmatprep.subr.bf16.mxu0 %v17430_v45  ;;  %v17506_v51 = vld [vmem:[%s18080_s13 + $0xf80] ss:$16 sps:$4 sm:$0xff]   ;;  %v17509_v45 = vld [vmem:[%s18080_s13 + $0xf88] ss:$16 sps:$4 sm:$0xff]  }
0x1a3d   : > { %13636 = vmatprep.subr.bf16.mxu1 %v17433_v8  ;;  %v17514_v8 = vld [vmem:[%s18080_s13 + $0xfa4] ss:$16 sps:$4 sm:$0xff]  }
0x1a3f   : > { %13293 = vmatpush1.bf16.msra.mxu0 %v17428_v54  ;;  %v17517_v54 = vld [vmem:[%s18080_s13 + $0xfac] ss:$16 sps:$4 sm:$0xff]  }
0x1a40   : > { %13637 = vmatpush1.bf16.msra.mxu1 %v17431_v55  ;;  %13305 = vmatprep.subr.bf16.mxu0 %v17436_v63  ;;  %v17512_v55 = vld [vmem:[%s18080_s13 + $0xfa0] ss:$16 sps:$4 sm:$0xff]   ;;  %v17515_v63 = vld [vmem:[%s18080_s13 + $0xfa8] ss:$16 sps:$4 sm:$0xff]  }
0x1a41   : > { %13649 = vmatprep.subr.bf16.mxu1 %v17439_v61  ;;  %v17520_v61 = vld [vmem:[%s18080_s13 + $0xfc4] ss:$16 sps:$4 sm:$0xff]  }
0x1a42   : > { %13295 = vmatmul.mubr.bf16.vlgmr.msra.gmra.mrb[96].mxu0 %v20069_v47 }
0x1a43   : > { %13639 = vmatmul.mubr.bf16.vlgmr.msra.gmra.mrb[96].mxu1 %v20069_v47  ;;  %13306 = vmatpush1.bf16.msra.mxu0 %v17434_v28  ;;  %v17446_v47 = vld [vmem:[%s18080_s13 + $0xe40] ss:$16 sps:$4 sm:$0xff]   ;;  %v17523_v28 = vld [vmem:[%s18080_s13 + $0xfcc] ss:$16 sps:$4 sm:$0xff]  }
0x1a44   : > { %13337 = vmatprep.mubr.bf16.mxu0 %v20076_v58  ;;  %13650 = vmatpush1.bf16.msra.mxu1 %v17437_v11  ;;  %v17518_v11 = vld [vmem:[%s18080_s13 + $0xfc0] ss:$16 sps:$4 sm:$0xff]  }
0x1a45   : > { %13681 = vmatprep.mubr.bf16.mxu1 %v20076_v58  ;;  %13307 = vmatprep.subr.bf16.mxu0 %v17442_v32  ;;  %v17452_v58 = vld [vmem:[%s18080_s13 + $0xe60] ss:$16 sps:$4 sm:$0xff]   ;;  %v17521_v32 = vld [vmem:[%s18080_s13 + $0xfc8] ss:$16 sps:$4 sm:$0xff]  }
0x1a46   : > { %13651 = vmatprep.subr.bf16.mxu1 %v17445_v21  ;;  %v17526_v21 = vld [vmem:[%s18080_s13 + $0xfe4] ss:$16 sps:$4 sm:$0xff]  }
0x1a47   : > { %13308 = vmatpush1.bf16.msra.mxu0 %v17440_v13  ;;  %v17529_v13 = vld [vmem:[%s18080_s13 + $0xfec] ss:$16 sps:$4 sm:$0xff]  }
0x1a48   : > { %13652 = vmatpush1.bf16.msra.mxu1 %v17443_v4  ;;  %13309 = vmatprep.subr.bf16.mxu0 %v17448_v62  ;;  %v17524_v4 = vld [vmem:[%s18080_s13 + $0xfe0] ss:$16 sps:$4 sm:$0xff]   ;;  %v17527_v62 = vld [vmem:[%s18080_s13 + $0xfe8] ss:$16 sps:$4 sm:$0xff]   ;;  %s17730_s13 = scalar_lea.vmem %s13764_s18, 1024 }
0x1a49   : > { %13653 = vmatprep.subr.bf16.mxu1 %v17451_v53  ;;  %p17731_p6 = scmp.ne.s32.totalorder %s13764_s18, %s17730_s13  ;;  %p17738_p13 = scmp.lt.s32.totalorder %s17730_s13, %s17730_s13 }
0x1a4b   : > { %13310 = vmatpush1.bf16.msra.mxu0 %v17446_v47  ;;  %p17732_p1 = pnand %p17731_p6, %p15928_p5  ;;  %p17739_p9 = por %p17738_p13, %p17737_p11 }
0x1a4c   : > { %13654 = vmatpush1.bf16.msra.mxu1 %v17449_v29  ;;  %13311 = vmatprep.subr.bf16.mxu0 %v17454_v1 }
0x1a4d   : > { %13655 = vmatprep.subr.bf16.mxu1 %v17457_v2  ;;  %p17733_p4 = pneg %p17732_p1 }
0x1a4f   : > { %13312 = vmatpush1.bf16.msra.mxu0 %v17452_v58  ;;  %p17740_p0 = pnand %p17739_p9, %p17733_p4 }
0x1a50   : > { %13656 = vmatpush1.bf16.msra.mxu1 %v17455_v59  ;;  %13313 = vmatprep.subr.bf16.mxu0 %v17460_v24 }
0x1a51   : > { %13657 = vmatprep.subr.bf16.mxu1 %v17463_v31 }
0x1a53   : > { %13314 = vmatpush1.bf16.msra.mxu0 %v17458_v49 }
0x1a54   : > { %13658 = vmatpush1.bf16.msra.mxu1 %v17461_v35  ;;  %13315 = vmatprep.subr.bf16.mxu0 %v17466_v36 }
0x1a55   : > { %13659 = vmatprep.subr.bf16.mxu1 %v17469_v5 }
0x1a57   : > { %13316 = vmatpush1.bf16.msra.mxu0 %v17464_v7 }
0x1a58   : > { %13660 = vmatpush1.bf16.msra.mxu1 %v17467_v37  ;;  %13317 = vmatprep.subr.bf16.mxu0 %v17472_v17 }
0x1a59   : > { %13661 = vmatprep.subr.bf16.mxu1 %v17475_v34 }
0x1a5b   : > { %13318 = vmatpush1.bf16.msra.mxu0 %v17470_v42 }
0x1a5c   : > { %13662 = vmatpush1.bf16.msra.mxu1 %v17473_v3  ;;  %13319 = vmatprep.subr.bf16.mxu0 %v17478_v6 }
0x1a5d   : > { %13663 = vmatprep.subr.bf16.mxu1 %v17481_v40 }
0x1a5f   : > { %13320 = vmatpush1.bf16.msra.mxu0 %v17476_v20 }
0x1a60   : > { %13664 = vmatpush1.bf16.msra.mxu1 %v17479_v44  ;;  %13321 = vmatprep.subr.bf16.mxu0 %v17484_v60 }
0x1a61   : > { %13665 = vmatprep.subr.bf16.mxu1 %v17487_v0 }
0x1a63   : > { %13322 = vmatpush1.bf16.msra.mxu0 %v17482_v12 }
0x1a64   : > { %13666 = vmatpush1.bf16.msra.mxu1 %v17485_v19  ;;  %13323 = vmatprep.subr.bf16.mxu0 %v17490_v16 }
0x1a65   : > { %13667 = vmatprep.subr.bf16.mxu1 %v17493_v43 }
0x1a67   : > { %13324 = vmatpush1.bf16.msra.mxu0 %v17488_v46 }
0x1a68   : > { %13668 = vmatpush1.bf16.msra.mxu1 %v17491_v38  ;;  %13325 = vmatprep.subr.bf16.mxu0 %v17496_v23 }
0x1a69   : > { %13669 = vmatprep.subr.bf16.mxu1 %v17499_v52 }
0x1a6b   : > { %13326 = vmatpush1.bf16.msra.mxu0 %v17494_v14 }
0x1a6c   : > { %13670 = vmatpush1.bf16.msra.mxu1 %v17497_v33  ;;  %13327 = vmatprep.subr.bf16.mxu0 %v17502_v18 }
0x1a6d   : > { %13671 = vmatprep.subr.bf16.mxu1 %v17505_v41 }
0x1a6f   : > { %13328 = vmatpush1.bf16.msra.mxu0 %v17500_v39 }
0x1a70   : > { %13672 = vmatpush1.bf16.msra.mxu1 %v17503_v57  ;;  %13329 = vmatprep.subr.bf16.mxu0 %v17508_v22 }
0x1a71   : > { %13673 = vmatprep.subr.bf16.mxu1 %v17511_v15 }
0x1a73   : > { %13330 = vmatpush1.bf16.msra.mxu0 %v17506_v51 }
0x1a74   : > { %13674 = vmatpush1.bf16.msra.mxu1 %v17509_v45  ;;  %13331 = vmatprep.subr.bf16.mxu0 %v17514_v8 }
0x1a75   : > { %13675 = vmatprep.subr.bf16.mxu1 %v17517_v54 }
0x1a77   : > { %13332 = vmatpush1.bf16.msra.mxu0 %v17512_v55 }
0x1a78   : > { %13676 = vmatpush1.bf16.msra.mxu1 %v17515_v63  ;;  %13333 = vmatprep.subr.bf16.mxu0 %v17520_v61 }
0x1a79   : > { %13677 = vmatprep.subr.bf16.mxu1 %v17523_v28 }
0x1a7b   : > { %13334 = vmatpush1.bf16.msra.mxu0 %v17518_v11 }
0x1a7c   : > { %13678 = vmatpush1.bf16.msra.mxu1 %v17521_v32  ;;  %13335 = vmatprep.subr.bf16.mxu0 %v17526_v21 }
0x1a7d   : > { %13679 = vmatprep.subr.bf16.mxu1 %v17529_v13 }
0x1a7f   : > { %13336 = vmatpush1.bf16.msra.mxu0 %v17524_v4 }
0x1a80   : > { %13680 = vmatpush1.bf16.msra.mxu1 %v17527_v62 }
0x1a82   : > { %13338 = vmatmul.mubr.bf16.vlgmr.msra.gmra.mrb[96].mxu0 %v20071_v48 }
0x1a83   : > { %13682 = vmatmul.mubr.bf16.vlgmr.msra.gmra.mrb[96].mxu1 %v20071_v48 }
0x1b55   : > { %v13339_v53 = vpop.f32.mrb[96].mxu0 }
0x1b56   : > { %v15771_v47 = vadd.f32 %v13339_v53, %v19295_v25  ;;  %v13683_v29 = vpop.f32.mrb[96].mxu1  ;;  %v13341_v1 = vpop.f32.mrb[97].mxu0 }
0x1b57   : > { %v15772_v2 = vadd.f32 %v13341_v1, %v19287_v26  ;;  %v13685_v58 = vpop.f32.mrb[97].mxu1  ;;  %v13343_v59 = vpop.f32.mrb[98].mxu0  ;;  %v15775_v35 = vadd.f32 %v13683_v29, %v19398_v56 }
0x1b58   : > { %v15773_v24 = vadd.f32 %v13343_v59, %v19299_v27  ;;  %v13687_v31 = vpop.f32.mrb[98].mxu1  ;;  %v13345_v49 = vpop.f32.mrb[99].mxu0  ;;  %v15776_v48 = vadd.f32 %v13685_v58, %v19319_v9 }
0x1b59   : > { %v13692_v36 = vadd.f32 %v15772_v2, %v15771_v47  ;;  %v15774_v5 = vadd.f32 %v13345_v49, %v19291_v30  ;;  %v13689_v7 = vpop.f32.mrb[99].mxu1  ;;  %v15777_v25 = vadd.f32 %v13687_v31, %v19393_v50 }
0x1b5a   : > { %v15778_v26 = vadd.f32 %v13689_v7, %v19304_v10 }
0x1b5b   : > { %v13697_v37 = vadd.f32 %v15774_v5, %v15773_v24  ;;  %v13693_v17 = vadd.f32 %v15775_v35, %v13692_v36 }
0x1b5d   : > { %v13694_v34 = vadd.f32 %v15776_v48, %v13693_v17  ;;  %v13698_v42 = vadd.f32 %v15777_v25, %v13697_v37 }
0x1b5f   : > { %13695 = vadd.xlane.f32.xlu0 %v13694_v34  ;;  %v13699_v27 = vadd.f32 %v15778_v26, %v13698_v42 }
0x1b61   : > { %13700 = vadd.xlane.f32.xlu1 %v13699_v27 }
0x1bec   : > { %v13696_v3 = vpop.xlane.xlu0 %13695 }
0x1bed   : > { %v13702_v6 = vmul.f32 0.001953125, %v13696_v3 }
0x1bee   : > { %v13701_v56 = vpop.xlane.xlu1 %13700 }
0x1bef   : > { %v13704_v40 = vsub.f32 %v15771_v47, %v13702_v6  ;;  %v13705_v20 = vsub.f32 %v15772_v2, %v13702_v6  ;;  %v13703_v30 = vmul.f32 0.001953125, %v13701_v56  ;;  %v13706_v44 = vsub.f32 %v15775_v35, %v13702_v6 }
0x1bf0   : > { %v13707_v60 = vsub.f32 %v15776_v48, %v13702_v6 }
0x1bf1   : > { %v13708_v9 = vsub.f32 %v15773_v24, %v13703_v30  ;;  %v13709_v0 = vsub.f32 %v15774_v5, %v13703_v30  ;;  %v13712_v50 = vmul.f32 %v13704_v40, %v13704_v40  ;;  %v13713_v12 = vmul.f32 %v13705_v20, %v13705_v20 }
0x1bf2   : > { %v13714_v19 = vmul.f32 %v13706_v44, %v13706_v44  ;;  %v13710_v16 = vsub.f32 %v15777_v25, %v13703_v30  ;;  %v13711_v43 = vsub.f32 %v15778_v26, %v13703_v30  ;;  %v13715_v23 = vmul.f32 %v13707_v60, %v13707_v60 }
0x1bf3   : > { %v13720_v10 = vadd.f32 %v13713_v12, %v13712_v50  ;;  %v13716_v46 = vmul.f32 %v13708_v9, %v13708_v9  ;;  %v13717_v38 = vmul.f32 %v13709_v0, %v13709_v0 }
0x1bf4   : > { %v13718_v14 = vmul.f32 %v13710_v16, %v13710_v16  ;;  %v13719_v41 = vmul.f32 %v13711_v43, %v13711_v43 }
0x1bf5   : > { %v13721_v52 = vadd.f32 %v13720_v10, %v13714_v19  ;;  %v13725_v33 = vadd.f32 %v13717_v38, %v13716_v46 }
0x1bf7   : > { %v13722_v18 = vadd.f32 %v13721_v52, %v13715_v23  ;;  %v13726_v39 = vadd.f32 %v13725_v33, %v13718_v14 }
0x1bf9   : > { %13723 = vadd.xlane.f32.xlu0 %v13722_v18  ;;  %v13727_v57 = vadd.f32 %v13726_v39, %v13719_v41 }
0x1bfb   : > { %13728 = vadd.xlane.f32.xlu1 %v13727_v57 }
0x1c86   : > { %v13724_v22 = vpop.xlane.xlu0 %13723 }
0x1c87   : > { %v13730_v15 = vmul.f32 0.001953125, %v13724_v22 }
0x1c88   : > { %v13729_v51 = vpop.xlane.xlu1 %13728 }
0x1c89   : > { %v13732_v45 = vadd.f32 1e-05, %v13730_v15  ;;  %v13731_v8 = vmul.f32 0.001953125, %v13729_v51 }
0x1c8b   : > { %17598 = vrsqrt.f32 %v13732_v45  ;;  %v13733_v54 = vadd.f32 1e-05, %v13731_v8 }
0x1c8d   : > { %17600 = vrsqrt.f32 %v13733_v54 }
0x1c95   : > { %v17599_v55 = vpop.eup %17598 }
0x1c96   : > { %v13736_v63 = vmul.f32 %v17599_v55, %v13704_v40  ;;  %v13737_v61 = vmul.f32 %v17599_v55, %v13705_v20  ;;  %v13738_v28 = vmul.f32 %v17599_v55, %v13706_v44  ;;  %v13739_v11 = vmul.f32 %v17599_v55, %v13707_v60 }
0x1c97   : > { %v17601_v32 = vpop.eup %17600 }
0x1c98   : > { %v13740_v21 = vmul.f32 %v17601_v32, %v13708_v9  ;;  %v13741_v13 = vmul.f32 %v17601_v32, %v13709_v0  ;;  %v13742_v4 = vmul.f32 %v17601_v32, %v13710_v16  ;;  %v13743_v62 = vmul.f32 %v17601_v32, %v13711_v43  ;;  %13744 = vst [vmem:[#allocation10] sm:$0xff] %v13736_v63 }
0x1c99   : > { %13745 = vst [vmem:[#allocation10 + $0x8] sm:$0xff] %v13737_v61  ;;  %13746 = vst [vmem:[#allocation10 + $0x10] sm:$0xff] %v13738_v28 }
0x1c9a   : > { %13747 = vst [vmem:[#allocation10 + $0x18] sm:$0xff] %v13739_v11  ;;  %13748 = vst [vmem:[#allocation10 + $0x20] sm:$0xff] %v13740_v21 }
0x1c9b   : > { %13749 = vst [vmem:[#allocation10 + $0x28] sm:$0xff] %v13741_v13  ;;  %13750 = vst [vmem:[#allocation10 + $0x30] sm:$0xff] %v13742_v4 }
0x1c9c   : > { %13751 = vst [vmem:[#allocation10 + $0x38] sm:$0xff] %v13743_v62 }
0x1c9d   : > { %17743 = shalt.err (!%p17740_p0)
}
0x1c9e   : > { %s17744_s11 = scalar_lea.hbm %s20435_s6, 1024 }
0x1c9f   : > { %p17745_p12 = scmp.ne.s32.totalorder %s20435_s6, %s17744_s11  ;;  %p17750_p7 = scmp.lt.u32.totalorder %s17744_s11, %s20435_s6 }
0x1ca1   : > { %p17746_p2 = pnand %p17745_p12, %p15928_p5 }
0x1ca3   : > { %p17747_p10 = pneg %p17746_p2 }
0x1ca5   : > { %p17752_p8 = pnand %p17750_p7, %p17747_p10 }
0x1ca7   : > { %17755 = shalt.err (!%p17752_p8)
}
0x1ca8   : > { %s17818_s24 = smov 512   ;;  %s17819_s14 = smov 32  }
0x1ca9   : > { %15911 = dma.vmem_to_hbm [thread:$0]  (%p15928_p5), %s13764_s18, 1024, %s20435_s6, [#allocation4], %s17818_s24, %s17818_s24, %s17819_s14  }
0x1caa   : > { %17785 = dma.done.wait (%p15928_p5), [#allocation4], 1024  }
0x1cab   : > { %17787 = vsyncadd (%p15928_p5), [#allocation4], 4294966272 }
0x1cac PF: > { %p25_p3 = scmp.ge.s32.totalorder %s17882_s29, 8   ;;  %s20452_s24 = smov %s17794_s25 }
0x1cad   : > { %s20453_s25 = smov %s17798_s26  ;;  %s20454_s26 = smov %s17892_s9 }
0x1cae   : > { %s20455_s27 = smov %s17882_s29  ;;  %27 = sbr.rel (!%p25_p3) target bundleno = 11 (0xb), region = 134 }
0x1cb5   :  { %13790 = vsyncpa [#allocation3], 1 }
0x1cb6   :  { %13792 = vsyncpa [#allocation3 + $0x1], 1 }
0x1cb7   :  { %13793 = vsyncpa [#allocation6], 1 }
0x1cb8   :  { %13795 = vsyncpa [#allocation6 + $0x1], 1 }
0x1cb9   :  { %13796 = vsyncpa [#allocation9], 1 }
0x1cba   :  { %13798 = vsyncpa [#allocation9 + $0x1], 1 }
0x1cbb   :  { %13799 = vsyncpa [#allocation4], 1 }
0x1cbc   :  { %13801 = vsyncpa [#allocation4 + $0x1], 1 }

</bundles_post_ra>
